<compile_context>
chip_gen: v5e
topology: v5e:2x2
jax: 0.10.0
libtpu: 0.0.40
codegen_flags: <defaults>
</compile_context>

<pallas_src>
import numpy as np
import jax
import jax.numpy as jnp
from jax.experimental import pallas as pl
from jax.experimental.pallas import tpu as pltpu


# ----------------------------------------------------------------------------
# Pallas kernel
# ----------------------------------------------------------------------------
def _mm(a, b):
    return jnp.dot(a, b, preferred_element_type=jnp.float32)


def at2dcnn_kernel(xr_ref, xi_ref,
                   wrr_ref, wri_ref, ar_ref, ai_ref,
                   m1_ref, b1_ref, m2_ref, b2_ref, m3_ref, b3_ref,
                   w1_ref, fb1_ref, w2_ref, fb2_ref, w3_ref, fb3_ref,
                   out_ref):
    # ---- radar front end ----------------------------------------------------
    xr = xr_ref[0]                              # (80, 256) bf16, rows = frame*8 + antenna
    xi = xi_ref[0]
    wrr = wrr_ref[...]                          # (256, 256) bf16, Wr[j, h] (symmetric DFT)
    wri = wri_ref[...]
    # range DFT (complex), lane-dense N=256:  Y[f*8+a, h] = sum_j X[f*8+a, j] * Wr[j, h]
    yr = _mm(xr, wrr) - _mm(xi, wri)            # (80, 256) f32
    yi = _mm(xr, wri) + _mm(xi, wrr)
    yr16 = yr.astype(jnp.bfloat16)
    yi16 = yi.astype(jnp.bfloat16)

    # AoA DFT over antennas: ONE block-diagonal complex matmul (all 10 frames at once)
    ar = ar_ref[...]                            # (640, 80) bf16, A[f*64+e, f*8+a] = Wa[e, a]
    ai = ai_ref[...]
    zr = _mm(ar, yr16) - _mm(ai, yi16)          # (640, 256) f32, rows = f*64 + e
    zi = _mm(ar, yi16) + _mm(ai, yr16)
    mag = jnp.sqrt(zr * zr + zi * zi)           # CplxModulus, f32 elementwise
    # sum over range bins -> (frame, angle) = (10, 64)
    feat = jnp.sum(mag.reshape(10, 64, 256), axis=-1)

    # ---- conv / BN(eval) / relu / ceil-mode maxpool(1,2), all in VMEM -------
    # Activations stay (H, C*W).  Per layer: 3 banded matmuls (one per kernel
    # row kh); the maxpool even/odd selection is folded into the weight columns.
    def conv_block(x, ho, halfc, m_ref, b_ref):
        y = _mm(x[0:ho].astype(jnp.bfloat16), m_ref[0])
        y = y + _mm(x[1:1 + ho].astype(jnp.bfloat16), m_ref[1])
        y = y + _mm(x[2:2 + ho].astype(jnp.bfloat16), m_ref[2])
        y = jnp.maximum(y + b_ref[...], 0.0)             # bias + folded BN + relu
        return jnp.maximum(y[:, :halfc], y[:, halfc:])   # MaxPool2d((1,2), ceil_mode=True)

    a1 = conv_block(feat, 8, 4 * 31, m1_ref, b1_ref)     # (8, 124)
    a2 = conv_block(a1, 6, 8 * 15, m2_ref, b2_ref)       # (6, 120)
    a3 = conv_block(a2, 4, 16 * 7, m3_ref, b3_ref)       # (4, 112), cols = c*7 + w

    # ---- fused FC head ------------------------------------------------------
    # fc_1 contracts over (h, c, w); the PyTorch (c,h,w) flatten reorder is folded
    # into w1 host-side (one (112, 512) slab per conv-output row h), so the flatten
    # is 4 accumulated row matmuls with no in-kernel reshape.
    h = _mm(a3[0:1].astype(jnp.bfloat16), w1_ref[0])
    h = h + _mm(a3[1:2].astype(jnp.bfloat16), w1_ref[1])
    h = h + _mm(a3[2:3].astype(jnp.bfloat16), w1_ref[2])
    h = h + _mm(a3[3:4].astype(jnp.bfloat16), w1_ref[3])
    h = jnp.maximum(h + fb1_ref[...], 0.0)                                       # (1, 512)
    h = jnp.maximum(_mm(h.astype(jnp.bfloat16), w2_ref[...]) + fb2_ref[...], 0.0)  # (1, 128)
    out_ref[0] = _mm(h.astype(jnp.bfloat16), w3_ref[...]) + fb3_ref[...]           # (1, 12)


# ----------------------------------------------------------------------------
# pallas_call wrapper
# ----------------------------------------------------------------------------
def _const_spec(a):
    nd = a.ndim
    return pl.BlockSpec(a.shape, lambda *_, nd=nd: (0,) * nd)


def at2dcnn_call(xr, xi, p):
    bsz = xr.shape[0]
    xspec = pl.BlockSpec((1, 80, 256), lambda b: (b, 0, 0))
    consts = [p["wr_r"], p["wr_i"], p["aoa_r"], p["aoa_i"],
              p["m1"], p["bias1"], p["m2"], p["bias2"], p["m3"], p["bias3"],
              p["fc1_wT"], p["fc1_b"], p["fc2_wT"], p["fc2_b"],
              p["fc3_wT"], p["fc3_b"]]
    return pl.pallas_call(
        at2dcnn_kernel,
        out_shape=jax.ShapeDtypeStruct((bsz, 1, 12), jnp.float32),
        grid=(bsz,),
        in_specs=[xspec, xspec] + [_const_spec(a) for a in consts],
        out_specs=pl.BlockSpec((1, 1, 12), lambda b: (b, 0, 0)),
        compiler_params=pltpu.CompilerParams(
            dimension_semantics=("parallel",),
            vmem_limit_bytes=32 * 1024 * 1024),
    )(xr, xi, *consts)


# ----------------------------------------------------------------------------
# parameter construction / preprocessing (wrapper side, done once)
# ----------------------------------------------------------------------------
def make_params(key):
    def u(k, shape, fan_in):
        bound = 1.0 / np.sqrt(fan_in)
        return jax.random.uniform(k, shape, jnp.float32, -bound, bound)

    ks = jax.random.split(key, 12)
    return {
        "conv1_w": u(ks[0], (4, 1, 3, 3), 9), "conv1_b": u(ks[1], (4,), 9),
        "conv2_w": u(ks[2], (8, 4, 3, 3), 36), "conv2_b": u(ks[3], (8,), 36),
        "conv3_w": u(ks[4], (16, 8, 3, 3), 72), "conv3_b": u(ks[5], (16,), 72),
        "fc1_w": u(ks[6], (512, 448), 448), "fc1_b": u(ks[7], (512,), 448),
        "fc2_w": u(ks[8], (128, 512), 512), "fc2_b": u(ks[9], (128,), 512),
        "fc3_w": u(ks[10], (12, 128), 128), "fc3_b": u(ks[11], (12,), 128),
    }


def _fold_bn(w, b, eps=1e-5):
    # eval-mode BatchNorm2d with identity statistics folded into conv weight/bias.
    scale = 1.0 / np.sqrt(1.0 + eps)
    return np.asarray(w) * scale, np.asarray(b) * scale


def prepare_operands(params):
    prep = {}
    # Fourier weights (exact DFT matrices from the PyTorch module)
    n = np.arange(256)
    wr = np.exp(-2j * np.pi * np.outer(n, n) / 256.0)             # Wr[j, h] (symmetric)
    prep["wr_r"] = jnp.asarray(wr.real, jnp.bfloat16)
    prep["wr_i"] = jnp.asarray(wr.imag, jnp.bfloat16)

    ee = (np.arange(64) + 32) % 64
    wa = np.exp(-2j * np.pi * np.outer(ee, np.arange(8)) / 64.0)  # Wa[e, a]
    abd = np.zeros((640, 80), np.complex128)                      # 10-frame block diagonal
    for f in range(10):
        abd[f * 64:(f + 1) * 64, f * 8:(f + 1) * 8] = wa
    prep["aoa_r"] = jnp.asarray(abd.real, jnp.bfloat16)
    prep["aoa_i"] = jnp.asarray(abd.imag, jnp.bfloat16)

    # conv layers: fold eval-mode BN, build banded per-kh weights (cin*w_in, 2*cout*wp)
    # with the ceil-mode maxpool even/odd column selection folded into the columns.
    for name, cin, cout, w_in in (("1", 1, 4, 64), ("2", 4, 8, 31), ("3", 8, 16, 15)):
        w, b = _fold_bn(params[f"conv{name}_w"], params[f"conv{name}_b"])
        wo = w_in - 2
        wp = -(-wo // 2)                                           # ceil(wo / 2)
        m = np.zeros((3, cin * w_in, 2 * cout * wp), np.float32)
        bias = np.zeros((1, 2 * cout * wp), np.float32)
        for half in range(2):
            for j in range(wp):
                wo_idx = 2 * j if half == 0 else min(2 * j + 1, wo - 1)
                for co in range(cout):
                    col = half * cout * wp + co * wp + j
                    bias[0, col] = b[co]
                    for ci in range(cin):
                        for kh in range(3):
                            for kw in range(3):
                                m[kh, ci * w_in + wo_idx + kw, col] = w[co, ci, kh, kw]
        prep[f"m{name}"] = jnp.asarray(m, jnp.bfloat16)
        prep[f"bias{name}"] = jnp.asarray(bias)

    # FC head: fold the PyTorch (c,h,w) flatten order into fc1, one slab per row h.
    w1 = np.asarray(params["fc1_w"]).reshape(512, 16, 4, 7).transpose(2, 1, 3, 0)
    prep["fc1_wT"] = jnp.asarray(w1.reshape(4, 112, 512), jnp.bfloat16)
    prep["fc1_b"] = jnp.asarray(params["fc1_b"]).reshape(1, -1)
    prep["fc2_wT"] = jnp.asarray(params["fc2_w"]).T.astype(jnp.bfloat16)
    prep["fc2_b"] = jnp.asarray(params["fc2_b"]).reshape(1, -1)
    prep["fc3_wT"] = jnp.asarray(params["fc3_w"]).T.astype(jnp.bfloat16)
    prep["fc3_b"] = jnp.asarray(params["fc3_b"]).reshape(1, -1)
    return prep


# ----------------------------------------------------------------------------
# forward (glue: slicing / layout / dtype only — no transpose needed)
# ----------------------------------------------------------------------------
def forward_fn(xr, xi, prep):
    bsz = xr.shape[0]
    # x = x[:, :, 0, 0:8, :]  -> (B, 10, 8, 256) complex, flattened to (B, 80, 256)
    xr = xr[:, :, 0, 0:8, :].reshape(bsz, 80, 256).astype(jnp.bfloat16)
    xi = xi[:, :, 0, 0:8, :].reshape(bsz, 80, 256).astype(jnp.bfloat16)
    logits = at2dcnn_call(xr, xi, prep)                  # (B, 1, 12)
    return logits.reshape(bsz, 12)


forward = jax.jit(forward_fn)


if __name__ == "__main__":
    key = jax.random.PRNGKey(0)
    k_xr, k_xi, k_p = jax.random.split(key, 3)
    # complex radar cube: (batch=2, frames=10, chirps=2, antennas=8, samples=256)
    x_real = jax.random.normal(k_xr, (2, 10, 2, 8, 256), jnp.float32)
    x_imag = jax.random.normal(k_xi, (2, 10, 2, 8, 256), jnp.float32)

    params = make_params(k_p)
    prep = prepare_operands(params)

    out = forward(x_real, x_imag, prep)
    out = jax.block_until_ready(out)

    assert out.shape == (2, 12), out.shape
    assert bool(jnp.all(jnp.isfinite(out)))
    print("KERNEL_OK")
</pallas_src>

<mosaic_0001>
module attributes {stable_mosaic.version = 11 : i64} {
  func.func @at2dcnn_kernel(%arg0: i32, %arg1: memref<1x80x256xbf16, #tpu.memory_space<vmem>>, %arg2: memref<1x80x256xbf16, #tpu.memory_space<vmem>>, %arg3: memref<256x256xbf16, #tpu.memory_space<vmem>>, %arg4: memref<256x256xbf16, #tpu.memory_space<vmem>>, %arg5: memref<640x80xbf16, #tpu.memory_space<vmem>>, %arg6: memref<640x80xbf16, #tpu.memory_space<vmem>>, %arg7: memref<3x64x248xbf16, #tpu.memory_space<vmem>>, %arg8: memref<1x248xf32, #tpu.memory_space<vmem>>, %arg9: memref<3x124x240xbf16, #tpu.memory_space<vmem>>, %arg10: memref<1x240xf32, #tpu.memory_space<vmem>>, %arg11: memref<3x120x224xbf16, #tpu.memory_space<vmem>>, %arg12: memref<1x224xf32, #tpu.memory_space<vmem>>, %arg13: memref<4x112x512xbf16, #tpu.memory_space<vmem>>, %arg14: memref<1x512xf32, #tpu.memory_space<vmem>>, %arg15: memref<512x128xbf16, #tpu.memory_space<vmem>>, %arg16: memref<1x128xf32, #tpu.memory_space<vmem>>, %arg17: memref<128x12xbf16, #tpu.memory_space<vmem>>, %arg18: memref<1x12xf32, #tpu.memory_space<vmem>>, %arg19: memref<1x1x12xf32, #tpu.memory_space<vmem>>) attributes {dimension_semantics = [#tpu.dimension_semantics<parallel>], iteration_bounds = array<i64: 2>, scalar_prefetch = 0 : i64, scratch_operands = 0 : i64, tpu.core_type = #tpu.core_type<tc>, window_params = [{transform_indices = @transform_0, window_bounds = array<i64: 1, 80, 256>}, {transform_indices = @transform_1, window_bounds = array<i64: 1, 80, 256>}, {pipeline_mode = #tpu.pipeline_mode<synchronous>, transform_indices = @transform_2, window_bounds = array<i64: 256, 256>}, {pipeline_mode = #tpu.pipeline_mode<synchronous>, transform_indices = @transform_3, window_bounds = array<i64: 256, 256>}, {pipeline_mode = #tpu.pipeline_mode<synchronous>, transform_indices = @transform_4, window_bounds = array<i64: 640, 80>}, {pipeline_mode = #tpu.pipeline_mode<synchronous>, transform_indices = @transform_5, window_bounds = array<i64: 640, 80>}, {pipeline_mode = #tpu.pipeline_mode<synchronous>, transform_indices = @transform_6, window_bounds = array<i64: 3, 64, 248>}, {pipeline_mode = #tpu.pipeline_mode<synchronous>, transform_indices = @transform_7, window_bounds = array<i64: 1, 248>}, {pipeline_mode = #tpu.pipeline_mode<synchronous>, transform_indices = @transform_8, window_bounds = array<i64: 3, 124, 240>}, {pipeline_mode = #tpu.pipeline_mode<synchronous>, transform_indices = @transform_9, window_bounds = array<i64: 1, 240>}, {pipeline_mode = #tpu.pipeline_mode<synchronous>, transform_indices = @transform_10, window_bounds = array<i64: 3, 120, 224>}, {pipeline_mode = #tpu.pipeline_mode<synchronous>, transform_indices = @transform_11, window_bounds = array<i64: 1, 224>}, {pipeline_mode = #tpu.pipeline_mode<synchronous>, transform_indices = @transform_12, window_bounds = array<i64: 4, 112, 512>}, {pipeline_mode = #tpu.pipeline_mode<synchronous>, transform_indices = @transform_13, window_bounds = array<i64: 1, 512>}, {pipeline_mode = #tpu.pipeline_mode<synchronous>, transform_indices = @transform_14, window_bounds = array<i64: 512, 128>}, {pipeline_mode = #tpu.pipeline_mode<synchronous>, transform_indices = @transform_15, window_bounds = array<i64: 1, 128>}, {pipeline_mode = #tpu.pipeline_mode<synchronous>, transform_indices = @transform_16, window_bounds = array<i64: 128, 12>}, {pipeline_mode = #tpu.pipeline_mode<synchronous>, transform_indices = @transform_17, window_bounds = array<i64: 1, 12>}, {transform_indices = @transform_18, window_bounds = array<i64: 1, 1, 12>}]} {
    %c0 = arith.constant 0 : index
    %c0_0 = arith.constant 0 : index
    %c0_1 = arith.constant 0 : index
    %0 = vector.load %arg1[%c0, %c0_0, %c0_1] : memref<1x80x256xbf16, #tpu.memory_space<vmem>>, vector<1x80x256xbf16>
    %1 = vector.shape_cast %0 : vector<1x80x256xbf16> to vector<80x256xbf16>
    %c0_2 = arith.constant 0 : index
    %c0_3 = arith.constant 0 : index
    %c0_4 = arith.constant 0 : index
    %2 = vector.load %arg2[%c0_2, %c0_3, %c0_4] : memref<1x80x256xbf16, #tpu.memory_space<vmem>>, vector<1x80x256xbf16>
    %3 = vector.shape_cast %2 : vector<1x80x256xbf16> to vector<80x256xbf16>
    %c0_5 = arith.constant 0 : index
    %c0_6 = arith.constant 0 : index
    %4 = vector.load %arg3[%c0_5, %c0_6] : memref<256x256xbf16, #tpu.memory_space<vmem>>, vector<256x256xbf16>
    %c0_7 = arith.constant 0 : index
    %c0_8 = arith.constant 0 : index
    %5 = vector.load %arg4[%c0_7, %c0_8] : memref<256x256xbf16, #tpu.memory_space<vmem>>, vector<256x256xbf16>
    %cst = arith.constant dense<0.000000e+00> : vector<80x256xf32>
    %6 = tpu.matmul %1, %4, %cst {dimension_numbers = #tpu.dot_dimension_numbers<[1], [0], [0], [1], [0, 0, 1, 1], [], []>} : vector<80x256xbf16>, vector<256x256xbf16>, vector<80x256xf32> -> vector<80x256xf32>
    %cst_9 = arith.constant dense<0.000000e+00> : vector<80x256xf32>
    %7 = tpu.matmul %3, %5, %cst_9 {dimension_numbers = #tpu.dot_dimension_numbers<[1], [0], [0], [1], [0, 0, 1, 1], [], []>} : vector<80x256xbf16>, vector<256x256xbf16>, vector<80x256xf32> -> vector<80x256xf32>
    %8 = arith.subf %6, %7 : vector<80x256xf32>
    %cst_10 = arith.constant dense<0.000000e+00> : vector<80x256xf32>
    %9 = tpu.matmul %1, %5, %cst_10 {dimension_numbers = #tpu.dot_dimension_numbers<[1], [0], [0], [1], [0, 0, 1, 1], [], []>} : vector<80x256xbf16>, vector<256x256xbf16>, vector<80x256xf32> -> vector<80x256xf32>
    %cst_11 = arith.constant dense<0.000000e+00> : vector<80x256xf32>
    %10 = tpu.matmul %3, %4, %cst_11 {dimension_numbers = #tpu.dot_dimension_numbers<[1], [0], [0], [1], [0, 0, 1, 1], [], []>} : vector<80x256xbf16>, vector<256x256xbf16>, vector<80x256xf32> -> vector<80x256xf32>
    %11 = arith.addf %9, %10 : vector<80x256xf32>
    %12 = arith.truncf %8 : vector<80x256xf32> to vector<80x256xbf16>
    %13 = arith.truncf %11 : vector<80x256xf32> to vector<80x256xbf16>
    %c0_12 = arith.constant 0 : index
    %c0_13 = arith.constant 0 : index
    %14 = vector.load %arg5[%c0_12, %c0_13] : memref<640x80xbf16, #tpu.memory_space<vmem>>, vector<640x80xbf16>
    %c0_14 = arith.constant 0 : index
    %c0_15 = arith.constant 0 : index
    %15 = vector.load %arg6[%c0_14, %c0_15] : memref<640x80xbf16, #tpu.memory_space<vmem>>, vector<640x80xbf16>
    %cst_16 = arith.constant dense<0.000000e+00> : vector<640x256xf32>
    %16 = tpu.matmul %14, %12, %cst_16 {dimension_numbers = #tpu.dot_dimension_numbers<[1], [0], [0], [1], [0, 0, 1, 1], [], []>} : vector<640x80xbf16>, vector<80x256xbf16>, vector<640x256xf32> -> vector<640x256xf32>
    %cst_17 = arith.constant dense<0.000000e+00> : vector<640x256xf32>
    %17 = tpu.matmul %15, %13, %cst_17 {dimension_numbers = #tpu.dot_dimension_numbers<[1], [0], [0], [1], [0, 0, 1, 1], [], []>} : vector<640x80xbf16>, vector<80x256xbf16>, vector<640x256xf32> -> vector<640x256xf32>
    %18 = arith.subf %16, %17 : vector<640x256xf32>
    %cst_18 = arith.constant dense<0.000000e+00> : vector<640x256xf32>
    %19 = tpu.matmul %14, %13, %cst_18 {dimension_numbers = #tpu.dot_dimension_numbers<[1], [0], [0], [1], [0, 0, 1, 1], [], []>} : vector<640x80xbf16>, vector<80x256xbf16>, vector<640x256xf32> -> vector<640x256xf32>
    %cst_19 = arith.constant dense<0.000000e+00> : vector<640x256xf32>
    %20 = tpu.matmul %15, %12, %cst_19 {dimension_numbers = #tpu.dot_dimension_numbers<[1], [0], [0], [1], [0, 0, 1, 1], [], []>} : vector<640x80xbf16>, vector<80x256xbf16>, vector<640x256xf32> -> vector<640x256xf32>
    %21 = arith.addf %19, %20 : vector<640x256xf32>
    %22 = arith.mulf %18, %18 : vector<640x256xf32>
    %23 = arith.mulf %21, %21 : vector<640x256xf32>
    %24 = arith.addf %22, %23 : vector<640x256xf32>
    %25 = math.sqrt %24 : vector<640x256xf32>
    %26 = vector.shape_cast %25 : vector<640x256xf32> to vector<10x64x256xf32>
    %cst_20 = arith.constant dense<0.000000e+00> : vector<10x64xf32>
    %27 = vector.multi_reduction <add>, %26, %cst_20 [2] : vector<10x64x256xf32> to vector<10x64xf32>
    %28 = vector.extract_strided_slice %27 {offsets = [0, 0], sizes = [8, 64], strides = [1, 1]} : vector<10x64xf32> to vector<8x64xf32>
    %29 = arith.truncf %28 : vector<8x64xf32> to vector<8x64xbf16>
    %c0_21 = arith.constant 0 : index
    %c0_22 = arith.constant 0 : index
    %c0_23 = arith.constant 0 : index
    %30 = vector.load %arg7[%c0_21, %c0_22, %c0_23] : memref<3x64x248xbf16, #tpu.memory_space<vmem>>, vector<1x64x248xbf16>
    %31 = vector.shape_cast %30 : vector<1x64x248xbf16> to vector<64x248xbf16>
    %cst_24 = arith.constant dense<0.000000e+00> : vector<8x248xf32>
    %32 = tpu.matmul %29, %31, %cst_24 {dimension_numbers = #tpu.dot_dimension_numbers<[1], [0], [0], [1], [0, 0, 1, 1], [], []>} : vector<8x64xbf16>, vector<64x248xbf16>, vector<8x248xf32> -> vector<8x248xf32>
    %33 = vector.extract_strided_slice %27 {offsets = [1, 0], sizes = [8, 64], strides = [1, 1]} : vector<10x64xf32> to vector<8x64xf32>
    %34 = arith.truncf %33 : vector<8x64xf32> to vector<8x64xbf16>
    %c1 = arith.constant 1 : index
    %c0_25 = arith.constant 0 : index
    %c0_26 = arith.constant 0 : index
    %35 = vector.load %arg7[%c1, %c0_25, %c0_26] : memref<3x64x248xbf16, #tpu.memory_space<vmem>>, vector<1x64x248xbf16>
    %36 = vector.shape_cast %35 : vector<1x64x248xbf16> to vector<64x248xbf16>
    %cst_27 = arith.constant dense<0.000000e+00> : vector<8x248xf32>
    %37 = tpu.matmul %34, %36, %cst_27 {dimension_numbers = #tpu.dot_dimension_numbers<[1], [0], [0], [1], [0, 0, 1, 1], [], []>} : vector<8x64xbf16>, vector<64x248xbf16>, vector<8x248xf32> -> vector<8x248xf32>
    %38 = arith.addf %32, %37 : vector<8x248xf32>
    %39 = vector.extract_strided_slice %27 {offsets = [2, 0], sizes = [8, 64], strides = [1, 1]} : vector<10x64xf32> to vector<8x64xf32>
    %40 = arith.truncf %39 : vector<8x64xf32> to vector<8x64xbf16>
    %c2 = arith.constant 2 : index
    %c0_28 = arith.constant 0 : index
    %c0_29 = arith.constant 0 : index
    %41 = vector.load %arg7[%c2, %c0_28, %c0_29] : memref<3x64x248xbf16, #tpu.memory_space<vmem>>, vector<1x64x248xbf16>
    %42 = vector.shape_cast %41 : vector<1x64x248xbf16> to vector<64x248xbf16>
    %cst_30 = arith.constant dense<0.000000e+00> : vector<8x248xf32>
    %43 = tpu.matmul %40, %42, %cst_30 {dimension_numbers = #tpu.dot_dimension_numbers<[1], [0], [0], [1], [0, 0, 1, 1], [], []>} : vector<8x64xbf16>, vector<64x248xbf16>, vector<8x248xf32> -> vector<8x248xf32>
    %44 = arith.addf %38, %43 : vector<8x248xf32>
    %c0_31 = arith.constant 0 : index
    %c0_32 = arith.constant 0 : index
    %45 = vector.load %arg8[%c0_31, %c0_32] : memref<1x248xf32, #tpu.memory_space<vmem>>, vector<1x248xf32>
    %46 = vector.broadcast %45 : vector<1x248xf32> to vector<8x248xf32>
    %47 = arith.addf %44, %46 : vector<8x248xf32>
    %cst_33 = arith.constant 0.000000e+00 : f32
    %48 = vector.broadcast %cst_33 : f32 to vector<8x248xf32>
    %49 = arith.maximumf %47, %48 : vector<8x248xf32>
    %50 = vector.extract_strided_slice %49 {offsets = [0, 0], sizes = [8, 124], strides = [1, 1]} : vector<8x248xf32> to vector<8x124xf32>
    %51 = vector.extract_strided_slice %49 {offsets = [0, 124], sizes = [8, 124], strides = [1, 1]} : vector<8x248xf32> to vector<8x124xf32>
    %52 = arith.maximumf %50, %51 : vector<8x124xf32>
    %53 = vector.extract_strided_slice %52 {offsets = [0, 0], sizes = [6, 124], strides = [1, 1]} : vector<8x124xf32> to vector<6x124xf32>
    %54 = arith.truncf %53 : vector<6x124xf32> to vector<6x124xbf16>
    %c0_34 = arith.constant 0 : index
    %c0_35 = arith.constant 0 : index
    %c0_36 = arith.constant 0 : index
    %55 = vector.load %arg9[%c0_34, %c0_35, %c0_36] : memref<3x124x240xbf16, #tpu.memory_space<vmem>>, vector<1x124x240xbf16>
    %56 = vector.shape_cast %55 : vector<1x124x240xbf16> to vector<124x240xbf16>
    %cst_37 = arith.constant dense<0.000000e+00> : vector<6x240xf32>
    %57 = tpu.matmul %54, %56, %cst_37 {dimension_numbers = #tpu.dot_dimension_numbers<[1], [0], [0], [1], [0, 0, 1, 1], [], []>} : vector<6x124xbf16>, vector<124x240xbf16>, vector<6x240xf32> -> vector<6x240xf32>
    %58 = vector.extract_strided_slice %52 {offsets = [1, 0], sizes = [6, 124], strides = [1, 1]} : vector<8x124xf32> to vector<6x124xf32>
    %59 = arith.truncf %58 : vector<6x124xf32> to vector<6x124xbf16>
    %c1_38 = arith.constant 1 : index
    %c0_39 = arith.constant 0 : index
    %c0_40 = arith.constant 0 : index
    %60 = vector.load %arg9[%c1_38, %c0_39, %c0_40] : memref<3x124x240xbf16, #tpu.memory_space<vmem>>, vector<1x124x240xbf16>
    %61 = vector.shape_cast %60 : vector<1x124x240xbf16> to vector<124x240xbf16>
    %cst_41 = arith.constant dense<0.000000e+00> : vector<6x240xf32>
    %62 = tpu.matmul %59, %61, %cst_41 {dimension_numbers = #tpu.dot_dimension_numbers<[1], [0], [0], [1], [0, 0, 1, 1], [], []>} : vector<6x124xbf16>, vector<124x240xbf16>, vector<6x240xf32> -> vector<6x240xf32>
    %63 = arith.addf %57, %62 : vector<6x240xf32>
    %64 = vector.extract_strided_slice %52 {offsets = [2, 0], sizes = [6, 124], strides = [1, 1]} : vector<8x124xf32> to vector<6x124xf32>
    %65 = arith.truncf %64 : vector<6x124xf32> to vector<6x124xbf16>
    %c2_42 = arith.constant 2 : index
    %c0_43 = arith.constant 0 : index
    %c0_44 = arith.constant 0 : index
    %66 = vector.load %arg9[%c2_42, %c0_43, %c0_44] : memref<3x124x240xbf16, #tpu.memory_space<vmem>>, vector<1x124x240xbf16>
    %67 = vector.shape_cast %66 : vector<1x124x240xbf16> to vector<124x240xbf16>
    %cst_45 = arith.constant dense<0.000000e+00> : vector<6x240xf32>
    %68 = tpu.matmul %65, %67, %cst_45 {dimension_numbers = #tpu.dot_dimension_numbers<[1], [0], [0], [1], [0, 0, 1, 1], [], []>} : vector<6x124xbf16>, vector<124x240xbf16>, vector<6x240xf32> -> vector<6x240xf32>
    %69 = arith.addf %63, %68 : vector<6x240xf32>
    %c0_46 = arith.constant 0 : index
    %c0_47 = arith.constant 0 : index
    %70 = vector.load %arg10[%c0_46, %c0_47] : memref<1x240xf32, #tpu.memory_space<vmem>>, vector<1x240xf32>
    %71 = vector.broadcast %70 : vector<1x240xf32> to vector<6x240xf32>
    %72 = arith.addf %69, %71 : vector<6x240xf32>
    %cst_48 = arith.constant 0.000000e+00 : f32
    %73 = vector.broadcast %cst_48 : f32 to vector<6x240xf32>
    %74 = arith.maximumf %72, %73 : vector<6x240xf32>
    %75 = vector.extract_strided_slice %74 {offsets = [0, 0], sizes = [6, 120], strides = [1, 1]} : vector<6x240xf32> to vector<6x120xf32>
    %76 = vector.extract_strided_slice %74 {offsets = [0, 120], sizes = [6, 120], strides = [1, 1]} : vector<6x240xf32> to vector<6x120xf32>
    %77 = arith.maximumf %75, %76 : vector<6x120xf32>
    %78 = vector.extract_strided_slice %77 {offsets = [0, 0], sizes = [4, 120], strides = [1, 1]} : vector<6x120xf32> to vector<4x120xf32>
    %79 = arith.truncf %78 : vector<4x120xf32> to vector<4x120xbf16>
    %c0_49 = arith.constant 0 : index
    %c0_50 = arith.constant 0 : index
    %c0_51 = arith.constant 0 : index
    %80 = vector.load %arg11[%c0_49, %c0_50, %c0_51] : memref<3x120x224xbf16, #tpu.memory_space<vmem>>, vector<1x120x224xbf16>
    %81 = vector.shape_cast %80 : vector<1x120x224xbf16> to vector<120x224xbf16>
    %cst_52 = arith.constant dense<0.000000e+00> : vector<4x224xf32>
    %82 = tpu.matmul %79, %81, %cst_52 {dimension_numbers = #tpu.dot_dimension_numbers<[1], [0], [0], [1], [0, 0, 1, 1], [], []>} : vector<4x120xbf16>, vector<120x224xbf16>, vector<4x224xf32> -> vector<4x224xf32>
    %83 = vector.extract_strided_slice %77 {offsets = [1, 0], sizes = [4, 120], strides = [1, 1]} : vector<6x120xf32> to vector<4x120xf32>
    %84 = arith.truncf %83 : vector<4x120xf32> to vector<4x120xbf16>
    %c1_53 = arith.constant 1 : index
    %c0_54 = arith.constant 0 : index
    %c0_55 = arith.constant 0 : index
    %85 = vector.load %arg11[%c1_53, %c0_54, %c0_55] : memref<3x120x224xbf16, #tpu.memory_space<vmem>>, vector<1x120x224xbf16>
    %86 = vector.shape_cast %85 : vector<1x120x224xbf16> to vector<120x224xbf16>
    %cst_56 = arith.constant dense<0.000000e+00> : vector<4x224xf32>
    %87 = tpu.matmul %84, %86, %cst_56 {dimension_numbers = #tpu.dot_dimension_numbers<[1], [0], [0], [1], [0, 0, 1, 1], [], []>} : vector<4x120xbf16>, vector<120x224xbf16>, vector<4x224xf32> -> vector<4x224xf32>
    %88 = arith.addf %82, %87 : vector<4x224xf32>
    %89 = vector.extract_strided_slice %77 {offsets = [2, 0], sizes = [4, 120], strides = [1, 1]} : vector<6x120xf32> to vector<4x120xf32>
    %90 = arith.truncf %89 : vector<4x120xf32> to vector<4x120xbf16>
    %c2_57 = arith.constant 2 : index
    %c0_58 = arith.constant 0 : index
    %c0_59 = arith.constant 0 : index
    %91 = vector.load %arg11[%c2_57, %c0_58, %c0_59] : memref<3x120x224xbf16, #tpu.memory_space<vmem>>, vector<1x120x224xbf16>
    %92 = vector.shape_cast %91 : vector<1x120x224xbf16> to vector<120x224xbf16>
    %cst_60 = arith.constant dense<0.000000e+00> : vector<4x224xf32>
    %93 = tpu.matmul %90, %92, %cst_60 {dimension_numbers = #tpu.dot_dimension_numbers<[1], [0], [0], [1], [0, 0, 1, 1], [], []>} : vector<4x120xbf16>, vector<120x224xbf16>, vector<4x224xf32> -> vector<4x224xf32>
    %94 = arith.addf %88, %93 : vector<4x224xf32>
    %c0_61 = arith.constant 0 : index
    %c0_62 = arith.constant 0 : index
    %95 = vector.load %arg12[%c0_61, %c0_62] : memref<1x224xf32, #tpu.memory_space<vmem>>, vector<1x224xf32>
    %96 = vector.broadcast %95 : vector<1x224xf32> to vector<4x224xf32>
    %97 = arith.addf %94, %96 : vector<4x224xf32>
    %cst_63 = arith.constant 0.000000e+00 : f32
    %98 = vector.broadcast %cst_63 : f32 to vector<4x224xf32>
    %99 = arith.maximumf %97, %98 : vector<4x224xf32>
    %100 = vector.extract_strided_slice %99 {offsets = [0, 0], sizes = [4, 112], strides = [1, 1]} : vector<4x224xf32> to vector<4x112xf32>
    %101 = vector.extract_strided_slice %99 {offsets = [0, 112], sizes = [4, 112], strides = [1, 1]} : vector<4x224xf32> to vector<4x112xf32>
    %102 = arith.maximumf %100, %101 : vector<4x112xf32>
    %103 = vector.extract_strided_slice %102 {offsets = [0, 0], sizes = [1, 112], strides = [1, 1]} : vector<4x112xf32> to vector<1x112xf32>
    %104 = arith.truncf %103 : vector<1x112xf32> to vector<1x112xbf16>
    %c0_64 = arith.constant 0 : index
    %c0_65 = arith.constant 0 : index
    %c0_66 = arith.constant 0 : index
    %105 = vector.load %arg13[%c0_64, %c0_65, %c0_66] : memref<4x112x512xbf16, #tpu.memory_space<vmem>>, vector<1x112x512xbf16>
    %106 = vector.shape_cast %105 : vector<1x112x512xbf16> to vector<112x512xbf16>
    %cst_67 = arith.constant dense<0.000000e+00> : vector<1x512xf32>
    %107 = tpu.matmul %104, %106, %cst_67 {dimension_numbers = #tpu.dot_dimension_numbers<[1], [0], [0], [1], [0, 0, 1, 1], [], []>} : vector<1x112xbf16>, vector<112x512xbf16>, vector<1x512xf32> -> vector<1x512xf32>
    %108 = vector.extract_strided_slice %102 {offsets = [1, 0], sizes = [1, 112], strides = [1, 1]} : vector<4x112xf32> to vector<1x112xf32>
    %109 = arith.truncf %108 : vector<1x112xf32> to vector<1x112xbf16>
    %c1_68 = arith.constant 1 : index
    %c0_69 = arith.constant 0 : index
    %c0_70 = arith.constant 0 : index
    %110 = vector.load %arg13[%c1_68, %c0_69, %c0_70] : memref<4x112x512xbf16, #tpu.memory_space<vmem>>, vector<1x112x512xbf16>
    %111 = vector.shape_cast %110 : vector<1x112x512xbf16> to vector<112x512xbf16>
    %cst_71 = arith.constant dense<0.000000e+00> : vector<1x512xf32>
    %112 = tpu.matmul %109, %111, %cst_71 {dimension_numbers = #tpu.dot_dimension_numbers<[1], [0], [0], [1], [0, 0, 1, 1], [], []>} : vector<1x112xbf16>, vector<112x512xbf16>, vector<1x512xf32> -> vector<1x512xf32>
    %113 = arith.addf %107, %112 : vector<1x512xf32>
    %114 = vector.extract_strided_slice %102 {offsets = [2, 0], sizes = [1, 112], strides = [1, 1]} : vector<4x112xf32> to vector<1x112xf32>
    %115 = arith.truncf %114 : vector<1x112xf32> to vector<1x112xbf16>
    %c2_72 = arith.constant 2 : index
    %c0_73 = arith.constant 0 : index
    %c0_74 = arith.constant 0 : index
    %116 = vector.load %arg13[%c2_72, %c0_73, %c0_74] : memref<4x112x512xbf16, #tpu.memory_space<vmem>>, vector<1x112x512xbf16>
    %117 = vector.shape_cast %116 : vector<1x112x512xbf16> to vector<112x512xbf16>
    %cst_75 = arith.constant dense<0.000000e+00> : vector<1x512xf32>
    %118 = tpu.matmul %115, %117, %cst_75 {dimension_numbers = #tpu.dot_dimension_numbers<[1], [0], [0], [1], [0, 0, 1, 1], [], []>} : vector<1x112xbf16>, vector<112x512xbf16>, vector<1x512xf32> -> vector<1x512xf32>
    %119 = arith.addf %113, %118 : vector<1x512xf32>
    %120 = vector.extract_strided_slice %102 {offsets = [3, 0], sizes = [1, 112], strides = [1, 1]} : vector<4x112xf32> to vector<1x112xf32>
    %121 = arith.truncf %120 : vector<1x112xf32> to vector<1x112xbf16>
    %c3 = arith.constant 3 : index
    %c0_76 = arith.constant 0 : index
    %c0_77 = arith.constant 0 : index
    %122 = vector.load %arg13[%c3, %c0_76, %c0_77] : memref<4x112x512xbf16, #tpu.memory_space<vmem>>, vector<1x112x512xbf16>
    %123 = vector.shape_cast %122 : vector<1x112x512xbf16> to vector<112x512xbf16>
    %cst_78 = arith.constant dense<0.000000e+00> : vector<1x512xf32>
    %124 = tpu.matmul %121, %123, %cst_78 {dimension_numbers = #tpu.dot_dimension_numbers<[1], [0], [0], [1], [0, 0, 1, 1], [], []>} : vector<1x112xbf16>, vector<112x512xbf16>, vector<1x512xf32> -> vector<1x512xf32>
    %125 = arith.addf %119, %124 : vector<1x512xf32>
    %c0_79 = arith.constant 0 : index
    %c0_80 = arith.constant 0 : index
    %126 = vector.load %arg14[%c0_79, %c0_80] : memref<1x512xf32, #tpu.memory_space<vmem>>, vector<1x512xf32>
    %127 = arith.addf %125, %126 : vector<1x512xf32>
    %cst_81 = arith.constant 0.000000e+00 : f32
    %128 = vector.broadcast %cst_81 : f32 to vector<1x512xf32>
    %129 = arith.maximumf %127, %128 : vector<1x512xf32>
    %130 = arith.truncf %129 : vector<1x512xf32> to vector<1x512xbf16>
    %c0_82 = arith.constant 0 : index
    %c0_83 = arith.constant 0 : index
    %131 = vector.load %arg15[%c0_82, %c0_83] : memref<512x128xbf16, #tpu.memory_space<vmem>>, vector<512x128xbf16>
    %cst_84 = arith.constant dense<0.000000e+00> : vector<1x128xf32>
    %132 = tpu.matmul %130, %131, %cst_84 {dimension_numbers = #tpu.dot_dimension_numbers<[1], [0], [0], [1], [0, 0, 1, 1], [], []>} : vector<1x512xbf16>, vector<512x128xbf16>, vector<1x128xf32> -> vector<1x128xf32>
    %c0_85 = arith.constant 0 : index
    %c0_86 = arith.constant 0 : index
    %133 = vector.load %arg16[%c0_85, %c0_86] : memref<1x128xf32, #tpu.memory_space<vmem>>, vector<1x128xf32>
    %134 = arith.addf %132, %133 : vector<1x128xf32>
    %cst_87 = arith.constant 0.000000e+00 : f32
    %135 = vector.broadcast %cst_87 : f32 to vector<1x128xf32>
    %136 = arith.maximumf %134, %135 : vector<1x128xf32>
    %137 = arith.truncf %136 : vector<1x128xf32> to vector<1x128xbf16>
    %c0_88 = arith.constant 0 : index
    %c0_89 = arith.constant 0 : index
    %138 = vector.load %arg17[%c0_88, %c0_89] : memref<128x12xbf16, #tpu.memory_space<vmem>>, vector<128x12xbf16>
    %cst_90 = arith.constant dense<0.000000e+00> : vector<1x12xf32>
    %139 = tpu.matmul %137, %138, %cst_90 {dimension_numbers = #tpu.dot_dimension_numbers<[1], [0], [0], [1], [0, 0, 1, 1], [], []>} : vector<1x128xbf16>, vector<128x12xbf16>, vector<1x12xf32> -> vector<1x12xf32>
    %c0_91 = arith.constant 0 : index
    %c0_92 = arith.constant 0 : index
    %140 = vector.load %arg18[%c0_91, %c0_92] : memref<1x12xf32, #tpu.memory_space<vmem>>, vector<1x12xf32>
    %141 = arith.addf %139, %140 : vector<1x12xf32>
    %c0_93 = arith.constant 0 : index
    %c0_94 = arith.constant 0 : index
    %c0_95 = arith.constant 0 : index
    %142 = vector.load %arg19[%c0_93, %c0_94, %c0_95] : memref<1x1x12xf32, #tpu.memory_space<vmem>>, vector<1x1x12xf32>
    %143 = vector.shape_cast %142 : vector<1x1x12xf32> to vector<1x12xf32>
    %144 = vector.shape_cast %141 : vector<1x12xf32> to vector<1x1x12xf32>
    tpu.vector_store %arg19[%c0_93, %c0_94, %c0_95], %144 {strides = array<i32>} : memref<1x1x12xf32, #tpu.memory_space<vmem>>, vector<1x1x12xf32>,
    return
  }
  func.func @transform_0(%arg0: i32) -> (i32, i32, i32) {
    %c0_i32 = arith.constant 0 : i32
    %c0_i32_0 = arith.constant 0 : i32
    %c0_i32_1 = arith.constant 0 : i32
    return %arg0, %c0_i32, %c0_i32_0 : i32, i32, i32
  }
  func.func @transform_1(%arg0: i32) -> (i32, i32, i32) {
    %c0_i32 = arith.constant 0 : i32
    %c0_i32_0 = arith.constant 0 : i32
    %c0_i32_1 = arith.constant 0 : i32
    return %arg0, %c0_i32, %c0_i32_0 : i32, i32, i32
  }
  func.func @transform_2(%arg0: i32) -> (i32, i32) {
    %c0_i32 = arith.constant 0 : i32
    %c0_i32_0 = arith.constant 0 : i32
    %c0_i32_1 = arith.constant 0 : i32
    return %c0_i32, %c0_i32_0 : i32, i32
  }
  func.func @transform_3(%arg0: i32) -> (i32, i32) {
    %c0_i32 = arith.constant 0 : i32
    %c0_i32_0 = arith.constant 0 : i32
    %c0_i32_1 = arith.constant 0 : i32
    return %c0_i32, %c0_i32_0 : i32, i32
  }
  func.func @transform_4(%arg0: i32) -> (i32, i32) {
    %c0_i32 = arith.constant 0 : i32
    %c0_i32_0 = arith.constant 0 : i32
    %c0_i32_1 = arith.constant 0 : i32
    return %c0_i32, %c0_i32_0 : i32, i32
  }
  func.func @transform_5(%arg0: i32) -> (i32, i32) {
    %c0_i32 = arith.constant 0 : i32
    %c0_i32_0 = arith.constant 0 : i32
    %c0_i32_1 = arith.constant 0 : i32
    return %c0_i32, %c0_i32_0 : i32, i32
  }
  func.func @transform_6(%arg0: i32) -> (i32, i32, i32) {
    %c0_i32 = arith.constant 0 : i32
    %c0_i32_0 = arith.constant 0 : i32
    %c0_i32_1 = arith.constant 0 : i32
    %c0_i32_2 = arith.constant 0 : i32
    return %c0_i32, %c0_i32_0, %c0_i32_1 : i32, i32, i32
  }
  func.func @transform_7(%arg0: i32) -> (i32, i32) {
    %c0_i32 = arith.constant 0 : i32
    %c0_i32_0 = arith.constant 0 : i32
    %c0_i32_1 = arith.constant 0 : i32
    return %c0_i32, %c0_i32_0 : i32, i32
  }
  func.func @transform_8(%arg0: i32) -> (i32, i32, i32) {
    %c0_i32 = arith.constant 0 : i32
    %c0_i32_0 = arith.constant 0 : i32
    %c0_i32_1 = arith.constant 0 : i32
    %c0_i32_2 = arith.constant 0 : i32
    return %c0_i32, %c0_i32_0, %c0_i32_1 : i32, i32, i32
  }
  func.func @transform_9(%arg0: i32) -> (i32, i32) {
    %c0_i32 = arith.constant 0 : i32
    %c0_i32_0 = arith.constant 0 : i32
    %c0_i32_1 = arith.constant 0 : i32
    return %c0_i32, %c0_i32_0 : i32, i32
  }
  func.func @transform_10(%arg0: i32) -> (i32, i32, i32) {
    %c0_i32 = arith.constant 0 : i32
    %c0_i32_0 = arith.constant 0 : i32
    %c0_i32_1 = arith.constant 0 : i32
    %c0_i32_2 = arith.constant 0 : i32
    return %c0_i32, %c0_i32_0, %c0_i32_1 : i32, i32, i32
  }
  func.func @transform_11(%arg0: i32) -> (i32, i32) {
    %c0_i32 = arith.constant 0 : i32
    %c0_i32_0 = arith.constant 0 : i32
    %c0_i32_1 = arith.constant 0 : i32
    return %c0_i32, %c0_i32_0 : i32, i32
  }
  func.func @transform_12(%arg0: i32) -> (i32, i32, i32) {
    %c0_i32 = arith.constant 0 : i32
    %c0_i32_0 = arith.constant 0 : i32
    %c0_i32_1 = arith.constant 0 : i32
    %c0_i32_2 = arith.constant 0 : i32
    return %c0_i32, %c0_i32_0, %c0_i32_1 : i32, i32, i32
  }
  func.func @transform_13(%arg0: i32) -> (i32, i32) {
    %c0_i32 = arith.constant 0 : i32
    %c0_i32_0 = arith.constant 0 : i32
    %c0_i32_1 = arith.constant 0 : i32
    return %c0_i32, %c0_i32_0 : i32, i32
  }
  func.func @transform_14(%arg0: i32) -> (i32, i32) {
    %c0_i32 = arith.constant 0 : i32
    %c0_i32_0 = arith.constant 0 : i32
    %c0_i32_1 = arith.constant 0 : i32
    return %c0_i32, %c0_i32_0 : i32, i32
  }
  func.func @transform_15(%arg0: i32) -> (i32, i32) {
    %c0_i32 = arith.constant 0 : i32
    %c0_i32_0 = arith.constant 0 : i32
    %c0_i32_1 = arith.constant 0 : i32
    return %c0_i32, %c0_i32_0 : i32, i32
  }
  func.func @transform_16(%arg0: i32) -> (i32, i32) {
    %c0_i32 = arith.constant 0 : i32
    %c0_i32_0 = arith.constant 0 : i32
    %c0_i32_1 = arith.constant 0 : i32
    return %c0_i32, %c0_i32_0 : i32, i32
  }
  func.func @transform_17(%arg0: i32) -> (i32, i32) {
    %c0_i32 = arith.constant 0 : i32
    %c0_i32_0 = arith.constant 0 : i32
    %c0_i32_1 = arith.constant 0 : i32
    return %c0_i32, %c0_i32_0 : i32, i32
  }
  func.func @transform_18(%arg0: i32) -> (i32, i32, i32) {
    %c0_i32 = arith.constant 0 : i32
    %c0_i32_0 = arith.constant 0 : i32
    %c0_i32_1 = arith.constant 0 : i32
    return %arg0, %c0_i32, %c0_i32_0 : i32, i32, i32
  }
}

</mosaic_0001>

<bundles_post_ra>
// kernel: forward_fn.1
= control target key start
LH: loop header
LB: loop body
LE: loop exit
PB: predicated region body
PF: predicated region fallthrough
CT: control target
= control target key end

     0   :  { %s20662_s0 = inlined_call_operand.vmem [shape: bf16[2,80,256], index: 0, kind: input, shape index: {}]   ;;  %s20663_s1 = inlined_call_operand.vmem [shape: bf16[2,80,256], index: 1, kind: input, shape index: {}]   ;;  %s20664_s2 = inlined_call_operand.vmem [shape: bf16[256,256], index: 2, kind: input, shape index: {}]   ;;  %s20665_s3 = inlined_call_operand.vmem [shape: bf16[256,256], index: 3, kind: input, shape index: {}]   ;;  %s20666_s4 = inlined_call_operand.vmem [shape: bf16[640,80], index: 4, kind: input, shape index: {}]   ;;  %s20667_s5 = inlined_call_operand.vmem [shape: bf16[640,80], index: 5, kind: input, shape index: {}]   ;;  %s20668_s6 = inlined_call_operand.vmem [shape: bf16[3,64,248], index: 6, kind: input, shape index: {}]   ;;  %s20669_s7 = inlined_call_operand.vmem [shape: f32[1,248], index: 7, kind: input, shape index: {}]   ;;  %s20670_s8 = inlined_call_operand.vmem [shape: bf16[3,124,240], index: 8, kind: input, shape index: {}]   ;;  %s20671_s9 = inlined_call_operand.vmem [shape: f32[1,240], index: 9, kind: input, shape index: {}]   ;;  %s20672_s10 = inlined_call_operand.vmem [shape: bf16[3,120,224], index: 10, kind: input, shape index: {}]   ;;  %s20673_s11 = inlined_call_operand.vmem [shape: f32[1,224], index: 11, kind: input, shape index: {}]   ;;  %s20674_s12 = inlined_call_operand.vmem [shape: bf16[4,112,512], index: 12, kind: input, shape index: {}]   ;;  %s20675_s13 = inlined_call_operand.vmem [shape: f32[1,512], index: 13, kind: input, shape index: {}]   ;;  %s20676_s14 = inlined_call_operand.vmem [shape: bf16[512,128], index: 14, kind: input, shape index: {}]   ;;  %s20677_s15 = inlined_call_operand.vmem [shape: f32[1,128], index: 15, kind: input, shape index: {}]   ;;  %s20678_s16 = inlined_call_operand.vmem [shape: bf16[128,12], index: 16, kind: input, shape index: {}]   ;;  %s20679_s17 = inlined_call_operand.vmem [shape: f32[1,12], index: 17, kind: input, shape index: {}]   ;;  %s20680_s18 = inlined_call_operand.hbm [shape: f32[2,1,12], index: 18, kind: output, shape index: {}]  }
   0x1   :  { %20721 = sst [smem:[#allocation142_spill]] %s20662_s0 }
   0x2   :  { %20722 = sst [smem:[#allocation143_spill]] %s20663_s1 }
   0x3   :  { %20723 = sst [smem:[#allocation144_spill]] %s20664_s2 }
   0x4   :  { %20724 = sst [smem:[#allocation145_spill]] %s20679_s17 }
   0x5   :  { %23 = vsyncpa [#allocation3], 0 }
   0x6   :  { %25 = vsyncpa [#allocation3 + $0x1], 0  ;;  %s13097_s27 = smov 0   ;;  %s13099_s28 = smov 0  }
   0x7   :  { %s13101_s29 = smov 0   ;;  %s13103_s30 = smov 0  }
   0x8 LB: > { %20725 = sst [smem:[#allocation5_spill]] %s12985_s27  ;;  %s13118_s0 = sadd.s32 4294967295, %s12997_s30   ;;  %s12997_s30 = sphi %s13103_s30, %s21268_s30   ;;  %s12993_s29 = sphi %s13101_s29, %s21270_s29   ;;  %s12989_s28 = sphi %s13099_s28, %s21272_s28   ;;  %s12985_s27 = sphi %s13097_s27, %s21271_s27  }
   0x9   : > { %20726 = sst [smem:[#allocation6_spill]] %s12993_s29  ;;  %s9803_s19 = sadd.s32 4294967294, %s12997_s30  }
   0xa   : > { %20727 = sst [smem:[#allocation7_spill]] %s12997_s30  ;;  %s13122_s1 = sadd.s32 1, %s12997_s30  }
   0xb   : > { %20728 = sst [smem:[#allocation8_spill]] %s13122_s1  ;;  %s426_s20 = sadd.s32 1, %s12993_s29 }
   0xc   : > { %s423_s21 = ssub.s32 %s12997_s30, %s13122_s1  ;;  %p436_p0 = scmp.ne.s32.totalorder %s12993_s29, %s12989_s28 }
   0xd   : > { %p424_p1 = scmp.eq.s32.totalorder %s423_s21, 0  ;;  %p437_p2 = scmp.eq.s32.totalorder %s13118_s0, 1 }
   0xe   : > { %p442_p3 = scmp.ne.s32.totalorder %s12989_s28, %s12985_s27  ;;  %p443_p4 = scmp.eq.s32.totalorder %s9803_s19, 1 }
   0xf   : > { %s13133_s22 = scalar_select %p424_p1, %s12993_s29, %s426_s20  }
  0x10   : > { %p13135_p5 = por %p437_p2, %p436_p0  ;;  %p13139_p6 = por %p443_p4, %p442_p3 }
  0x11   : > { %20729 = sst [smem:[#allocation9_spill]] %s13133_s22  ;;  %p9806_p7 = scmp.ge.s32.totalorder %s12997_s30, 1 }
  0x12   : > { %s20730_s2 = scalar_select %p13135_p5, 1, 0 }
  0x13   : > { %s20732_s23 = scalar_select %p13139_p6, 1, 0 }
  0x14   : > { %20731 = sst [smem:[#allocation10_spill]] %s20730_s2  ;;  %p525_p8 = scmp.lt.s32.totalorder %s12997_s30, 3 }
  0x15   : > { %20733 = sst [smem:[#allocation11_spill]] %s20732_s23 }
  0x16   : > { %p526_p9 = pnand %p9806_p7, %p525_p8 }
  0x18   : > { %529 = sbr.rel (%p526_p9) target bundleno = 3472 (0xd90), region = 92 }
  0x1d   : > { %s20734_s26 = sld [smem:[#allocation144_spill]]  ;;  %p583_p10 = scmp.lt.s32.totalorder %s13118_s0, 1  ;;  %vm2042_vm0 = vcmask 654336  }
  0x1e   : > { %s20735_s22 = sld [smem:[#allocation142_spill]]  ;;  %s12999_s30 = smov 4  }
  0x1f   : > { %s13389_s19 = scalar_select %p583_p10, %s13118_s0, 1 }
  0x20   : > { %s20755_s1 = sld [smem:[#allocation143_spill]]  ;;  %s13000_s23 = smov 8  }
  0x21   : > { %s20690_s20 = smul.u32 80, %s13389_s19  ;;  %s13001_s29 = smov 16  }
  0x22   : > { %s581_s21 = sand.u32 1, %s12989_s28   ;;  %s9732_s17 = scalar_lea.hbm %s20680_s18, %s13118_s0 }
  0x23   : > { %v9907_v0 = vld [vmem:[%s20734_s26 + $0x70] sm:$0xf]  ;;  %v12082_v1 = vld [vmem:[%s20734_s26 + $0x74] sm:$0xf0]  ;;  %v12081_v5 = vld [vmem:[%s20734_s26 + $0x74] sm:$0xf] }
  0x24   : > { %v9971_v2 = vld [vmem:[%s20734_s26 + $0xf0] sm:$0xf]  ;;  %v13154_v3 = vor.u32 %v12082_v1, %v9907_v0  ;;  %v12098_v4 = vld [vmem:[%s20734_s26 + $0xf4] sm:$0xf0]  ;;  %v9909_v6 = vld [vmem:[%s20734_s26 + $0x78] sm:$0xf0]  ;;  %s13430_s2 = scalar_lea.vmem %s20735_s22, %s20690_s20 }
  0x25   : > { %v13165_v7 = vor.u32 %v12098_v4, %v9971_v2  ;;  %v13167_v8 = vor.u32 %v12081_v5, %v9909_v6  ;;  %v12097_v9 = vld [vmem:[%s20734_s26 + $0xf4] sm:$0xf]  ;;  %v9973_v10 = vld [vmem:[%s20734_s26 + $0xf8] sm:$0xf0]  ;;  %v9899_v11 = vld [vmem:[%s20734_s26 + $0x60] sm:$0xf] }
  0x26   : > { %888 = vmatpush.bf16.msra.mxu0 %v13154_v3  ;;  %v13179_v12 = vor.u32 %v12097_v9, %v9973_v10  ;;  %v12080_v13 = vld [vmem:[%s20734_s26 + $0x64] sm:$0xf0]  ;;  %v9963_v14 = vld [vmem:[%s20734_s26 + $0xe0] sm:$0xf]  ;;  %v12079_v18 = vld [vmem:[%s20734_s26 + $0x64] sm:$0xf] }
  0x27   : > { %v12096_v15 = vld [vmem:[%s20734_s26 + $0xe4] sm:$0xf0]  ;;  %922 = vmatpush.bf16.msra.mxu1 %v13165_v7  ;;  %956 = vmatpush.bf16.msra.mxu2 %v13167_v8  ;;  %v13192_v16 = vor.u32 %v12080_v13, %v9899_v11  ;;  %v9901_v19 = vld [vmem:[%s20734_s26 + $0x68] sm:$0xf0]  ;;  %v12095_v20 = vld [vmem:[%s20734_s26 + $0xe4] sm:$0xf] }
  0x28   : > { %v13194_v17 = vor.u32 %v12096_v15, %v9963_v14  ;;  %990 = vmatpush.bf16.msra.mxu3 %v13179_v12  ;;  %v13206_v21 = vor.u32 %v12079_v18, %v9901_v19  ;;  %v9965_v22 = vld [vmem:[%s20734_s26 + $0xe8] sm:$0xf0]  ;;  %v9891_v23 = vld [vmem:[%s20734_s26 + $0x50] sm:$0xf]  ;;  %v12078_v24 = vld [vmem:[%s20734_s26 + $0x54] sm:$0xf0] }
  0x29   : > { %v13217_v25 = vor.u32 %v12095_v20, %v9965_v22  ;;  %v9955_v26 = vld [vmem:[%s20734_s26 + $0xd0] sm:$0xf]  ;;  %v12094_v27 = vld [vmem:[%s20734_s26 + $0xd4] sm:$0xf0]  ;;  %v12077_v28 = vld [vmem:[%s20734_s26 + $0x54] sm:$0xf]  ;;  %v13229_v29 = vor.u32 %v12078_v24, %v9891_v23 }
  0x2a   : > { %889 = vmatpush.bf16.msra.mxu0 %v13192_v16  ;;  %v9893_v30 = vld [vmem:[%s20734_s26 + $0x58] sm:$0xf0]  ;;  %v12093_v31 = vld [vmem:[%s20734_s26 + $0xd4] sm:$0xf]  ;;  %v13242_v33 = vor.u32 %v12094_v27, %v9955_v26  ;;  %v9883_v35 = vld [vmem:[%s20734_s26 + $0x40] sm:$0xf] }
  0x2b   : > { %v9957_v32 = vld [vmem:[%s20734_s26 + $0xd8] sm:$0xf0]  ;;  %923 = vmatpush.bf16.msra.mxu1 %v13194_v17  ;;  %957 = vmatpush.bf16.msra.mxu2 %v13206_v21  ;;  %v13244_v34 = vor.u32 %v12077_v28, %v9893_v30  ;;  %v12076_v36 = vld [vmem:[%s20734_s26 + $0x44] sm:$0xf0]  ;;  %v9947_v37 = vld [vmem:[%s20734_s26 + $0xc0] sm:$0xf] }
  0x2c   : > { %991 = vmatpush.bf16.msra.mxu3 %v13217_v25  ;;  %v13256_v38 = vor.u32 %v12093_v31, %v9957_v32  ;;  %v12092_v39 = vld [vmem:[%s20734_s26 + $0xc4] sm:$0xf0]  ;;  %v12075_v40 = vld [vmem:[%s20734_s26 + $0x44] sm:$0xf]  ;;  %v9885_v41 = vld [vmem:[%s20734_s26 + $0x48] sm:$0xf0]  ;;  %v13274_v44 = vor.u32 %v12076_v36, %v9883_v35 }
  0x2d   : > { %v12091_v42 = vld [vmem:[%s20734_s26 + $0xc4] sm:$0xf]  ;;  %v9949_v43 = vld [vmem:[%s20734_s26 + $0xc8] sm:$0xf0]  ;;  %v13278_v45 = vor.u32 %v12092_v39, %v9947_v37  ;;  %v13280_v46 = vor.u32 %v12075_v40, %v9885_v41  ;;  %v9875_v47 = vld [vmem:[%s20734_s26 + $0x30] sm:$0xf] }
  0x2e   : > { %890 = vmatpush.bf16.msra.mxu0 %v13229_v29  ;;  %v12074_v48 = vld [vmem:[%s20734_s26 + $0x34] sm:$0xf0]  ;;  %v9939_v49 = vld [vmem:[%s20734_s26 + $0xb0] sm:$0xf]  ;;  %v13292_v50 = vor.u32 %v12091_v42, %v9949_v43  ;;  %v12073_v52 = vld [vmem:[%s20734_s26 + $0x34] sm:$0xf] }
  0x2f   : > { %924 = vmatpush.bf16.msra.mxu1 %v13242_v33  ;;  %958 = vmatpush.bf16.msra.mxu2 %v13244_v34  ;;  %v12090_v51 = vld [vmem:[%s20734_s26 + $0xb4] sm:$0xf0]  ;;  %v9877_v53 = vld [vmem:[%s20734_s26 + $0x38] sm:$0xf0]  ;;  %v12089_v54 = vld [vmem:[%s20734_s26 + $0xb4] sm:$0xf]  ;;  %v13310_v56 = vor.u32 %v12074_v48, %v9875_v47 }
  0x30   : > { %992 = vmatpush.bf16.msra.mxu3 %v13256_v38  ;;  %v9941_v55 = vld [vmem:[%s20734_s26 + $0xb8] sm:$0xf0]  ;;  %v13314_v57 = vor.u32 %v12090_v51, %v9939_v49  ;;  %v13316_v58 = vor.u32 %v12073_v52, %v9877_v53  ;;  %v9867_v59 = vld [vmem:[%s20734_s26 + $0x20] sm:$0xf]  ;;  %v12072_v60 = vld [vmem:[%s20734_s26 + $0x24] sm:$0xf0] }
  0x31   : > { %v9931_v61 = vld [vmem:[%s20734_s26 + $0xa0] sm:$0xf]  ;;  %v13328_v62 = vor.u32 %v12089_v54, %v9941_v55  ;;  %v12088_v63 = vld [vmem:[%s20734_s26 + $0xa4] sm:$0xf0]  ;;  %v12071_v0 = vld [vmem:[%s20734_s26 + $0x24] sm:$0xf]  ;;  %v13346_v5 = vor.u32 %v12072_v60, %v9867_v59 }
  0x32   : > { %891 = vmatpush.bf16.msra.mxu0 %v13274_v44  ;;  %v9869_v1 = vld [vmem:[%s20734_s26 + $0x28] sm:$0xf0]  ;;  %v12087_v2 = vld [vmem:[%s20734_s26 + $0xa4] sm:$0xf]  ;;  %v9859_v6 = vld [vmem:[%s20734_s26 + $0x10] sm:$0xf]  ;;  %v13353_v9 = vor.u32 %v12088_v63, %v9931_v61 }
  0x33   : > { %925 = vmatpush.bf16.msra.mxu1 %v13278_v45  ;;  %959 = vmatpush.bf16.msra.mxu2 %v13280_v46  ;;  %v9933_v4 = vld [vmem:[%s20734_s26 + $0xa8] sm:$0xf0]  ;;  %v13355_v10 = vor.u32 %v12071_v0, %v9869_v1  ;;  %v12070_v11 = vld [vmem:[%s20734_s26 + $0x14] sm:$0xf0]  ;;  %v9923_v13 = vld [vmem:[%s20734_s26 + $0x90] sm:$0xf] }
  0x34   : > { %993 = vmatpush.bf16.msra.mxu3 %v13292_v50  ;;  %v12086_v14 = vld [vmem:[%s20734_s26 + $0x94] sm:$0xf0]  ;;  %v13367_v15 = vor.u32 %v12087_v2, %v9933_v4  ;;  %v12069_v18 = vld [vmem:[%s20734_s26 + $0x14] sm:$0xf]  ;;  %v9861_v19 = vld [vmem:[%s20734_s26 + $0x18] sm:$0xf0]  ;;  %v13383_v23 = vor.u32 %v12070_v11, %v9859_v6 }
  0x35   : > { %v12085_v20 = vld [vmem:[%s20734_s26 + $0x94] sm:$0xf]  ;;  %v9925_v22 = vld [vmem:[%s20734_s26 + $0x98] sm:$0xf0]  ;;  %v9851_v24 = vld [vmem:[%s20734_s26] sm:$0xf]  ;;  %v13393_v26 = vor.u32 %v12086_v14, %v9923_v13  ;;  %v13395_v27 = vor.u32 %v12069_v18, %v9861_v19 }
  0x36   : > { %892 = vmatpush.bf16.msra.mxu0 %v13310_v56  ;;  %v12068_v28 = vld [vmem:[%s20734_s26 + $0x4] sm:$0xf0]  ;;  %v9915_v30 = vld [vmem:[%s20734_s26 + $0x80] sm:$0xf]  ;;  %v13407_v32 = vor.u32 %v12085_v20, %v9925_v22  ;;  %v12067_v35 = vld [vmem:[%s20734_s26 + $0x4] sm:$0xf] }
  0x37   : > { %926 = vmatpush.bf16.msra.mxu1 %v13314_v57  ;;  %960 = vmatpush.bf16.msra.mxu2 %v13316_v58  ;;  %v12084_v31 = vld [vmem:[%s20734_s26 + $0x84] sm:$0xf0]  ;;  %v9853_v36 = vld [vmem:[%s20734_s26 + $0x8] sm:$0xf0]  ;;  %v12083_v37 = vld [vmem:[%s20734_s26 + $0x84] sm:$0xf]  ;;  %v13423_v40 = vor.u32 %v12068_v28, %v9851_v24 }
  0x38   : > { %994 = vmatpush.bf16.msra.mxu3 %v13328_v62  ;;  %v9917_v39 = vld [vmem:[%s20734_s26 + $0x88] sm:$0xf0]  ;;  %v13434_v41 = vor.u32 %v12084_v31, %v9915_v30  ;;  %v13436_v42 = vor.u32 %v12067_v35, %v9853_v36  ;;  %v9811_v43 = vld [vmem:[%s13430_s2] sm:$0xf]  ;;  %v12048_v47 = vld [vmem:[%s13430_s2 + $0x4] sm:$0xf0] }
  0x39   : > { %v12047_v48 = vld [vmem:[%s13430_s2 + $0x4] sm:$0xf]  ;;  %v13442_v49 = vor.u32 %v12083_v37, %v9917_v39  ;;  %v9813_v51 = vld [vmem:[%s13430_s2 + $0x8] sm:$0xf0]  ;;  %v13445_v52 = vor.u32 %v12048_v47, %v9811_v43  ;;  %v9819_v54 = vld [vmem:[%s13430_s2 + $0x10] sm:$0xf] }
  0x3a   : > { %893 = vmatpush.bf16.msra.mxu0 %v13346_v5  ;;  %v13448_v53 = vor.u32 %v12047_v48, %v9813_v51  ;;  %v12050_v55 = vld [vmem:[%s13430_s2 + $0x14] sm:$0xf0]  ;;  %v12049_v59 = vld [vmem:[%s13430_s2 + $0x14] sm:$0xf]  ;;  %v9821_v60 = vld [vmem:[%s13430_s2 + $0x18] sm:$0xf0] }
  0x3b   : > { %927 = vmatpush.bf16.msra.mxu1 %v13353_v9  ;;  %961 = vmatpush.bf16.msra.mxu2 %v13355_v10  ;;  %20736 = vst [vmem:[#allocation12_spill] sm:$0xff] %v13445_v52  ;;  %v13461_v61 = vor.u32 %v12050_v55, %v9819_v54  ;;  %v13463_v63 = vor.u32 %v12049_v59, %v9821_v60  ;;  %v10075_v0 = vld [vmem:[%s20665_s3 + $0x70] sm:$0xf]  ;;  %v12114_v1 = vld [vmem:[%s20665_s3 + $0x74] sm:$0xf0]  ;;  %s9736_s25 = sshll.u32 %s9732_s17, 4  ;;  %s9737_s25 = int_to_ptr.hbm [resolvable:$true] %s9736_s25 }
  0x3c   : > { %995 = vmatpush.bf16.msra.mxu3 %v13367_v15  ;;  %20737 = vst [vmem:[#allocation13_spill] sm:$0xff] %v13448_v53  ;;  %v10139_v2 = vld [vmem:[%s20665_s3 + $0xf0] sm:$0xf]  ;;  %v13477_v4 = vor.u32 %v12114_v1, %v10075_v0  ;;  %v12130_v6 = vld [vmem:[%s20665_s3 + $0xf4] sm:$0xf0]  ;;  %s9724_s22 = scalar_lea.sflag [#allocation3], %s581_s21 }
  0x3d   : > { %20738 = vst [vmem:[#allocation14_spill] sm:$0xff] %v13461_v61  ;;  %v12113_v11 = vld [vmem:[%s20665_s3 + $0x74] sm:$0xf]  ;;  %v10077_v13 = vld [vmem:[%s20665_s3 + $0x78] sm:$0xf0]  ;;  %v13489_v14 = vor.u32 %v12130_v6, %v10139_v2  ;;  %s12949_s20 = sshra.s32 %s9737_s25, 4  ;;  %s12950_s20 = int_to_ptr.hbm [resolvable:$true] %s12949_s20 }
  0x3e   : > { %894 = vmatpush.bf16.msra.mxu0 %v13383_v23  ;;  %20739 = vst [vmem:[#allocation15_spill] sm:$0xff] %v13463_v63  ;;  %v13491_v18 = vor.u32 %v12113_v11, %v10077_v13  ;;  %v12129_v19 = vld [vmem:[%s20665_s3 + $0xf4] sm:$0xf]  ;;  %v10141_v20 = vld [vmem:[%s20665_s3 + $0xf8] sm:$0xf0]  ;;  %p12956_p0 = scmp.lt.s32.totalorder %s12950_s20, %s20680_s18 }
  0x3f   : > { %928 = vmatpush.bf16.msra.mxu1 %v13393_v26  ;;  %962 = vmatpush.bf16.msra.mxu2 %v13395_v27  ;;  %v10067_v22 = vld [vmem:[%s20665_s3 + $0x60] sm:$0xf]  ;;  %v13503_v24 = vor.u32 %v12129_v19, %v10141_v20  ;;  %v12112_v28 = vld [vmem:[%s20665_s3 + $0x64] sm:$0xf0]  ;;  %v12111_v37 = vld [vmem:[%s20665_s3 + $0x64] sm:$0xf] }
  0x40   : > { %996 = vmatpush.bf16.msra.mxu3 %v13407_v32  ;;  %v10131_v30 = vld [vmem:[%s20665_s3 + $0xe0] sm:$0xf]  ;;  %v12128_v31 = vld [vmem:[%s20665_s3 + $0xe4] sm:$0xf0]  ;;  %v13516_v35 = vor.u32 %v12112_v28, %v10067_v22  ;;  %v10069_v39 = vld [vmem:[%s20665_s3 + $0x68] sm:$0xf0] }
  0x41   : > { %v13518_v36 = vor.u32 %v12128_v31, %v10131_v30  ;;  %v12127_v43 = vld [vmem:[%s20665_s3 + $0xe4] sm:$0xf]  ;;  %v13530_v47 = vor.u32 %v12111_v37, %v10069_v39  ;;  %v10133_v48 = vld [vmem:[%s20665_s3 + $0xe8] sm:$0xf0]  ;;  %v10059_v51 = vld [vmem:[%s20665_s3 + $0x50] sm:$0xf] }
  0x42   : > { %895 = vmatpush.bf16.msra.mxu0 %v13423_v40  ;;  %v12110_v54 = vld [vmem:[%s20665_s3 + $0x54] sm:$0xf0]  ;;  %v13541_v55 = vor.u32 %v12127_v43, %v10133_v48  ;;  %v10123_v59 = vld [vmem:[%s20665_s3 + $0xd0] sm:$0xf]  ;;  %v12109_v0 = vld [vmem:[%s20665_s3 + $0x54] sm:$0xf] }
  0x43   : > { %929 = vmatpush.bf16.msra.mxu1 %v13434_v41  ;;  %963 = vmatpush.bf16.msra.mxu2 %v13436_v42  ;;  %v12126_v60 = vld [vmem:[%s20665_s3 + $0xd4] sm:$0xf0]  ;;  %v13553_v1 = vor.u32 %v12110_v54, %v10059_v51  ;;  %v10061_v2 = vld [vmem:[%s20665_s3 + $0x58] sm:$0xf0]  ;;  %v12125_v6 = vld [vmem:[%s20665_s3 + $0xd4] sm:$0xf] }
  0x44   : > { %997 = vmatpush.bf16.msra.mxu3 %v13442_v49  ;;  %v10125_v11 = vld [vmem:[%s20665_s3 + $0xd8] sm:$0xf0]  ;;  %v9827_v13 = vld [vmem:[%s13430_s2 + $0x20] sm:$0xf]  ;;  %v13567_v19 = vor.u32 %v12126_v60, %v10123_v59  ;;  %v13569_v20 = vor.u32 %v12109_v0, %v10061_v2  ;;  %v12108_v28 = vld [vmem:[%s20665_s3 + $0x44] sm:$0xf0] }
  0x45   : > { %896 = vmatmul.bf16.vlgmr.msra.gmra.mxu0 %v13445_v52  ;;  %v10051_v22 = vld [vmem:[%s20665_s3 + $0x40] sm:$0xf]  ;;  %v12052_v30 = vld [vmem:[%s13430_s2 + $0x24] sm:$0xf0]  ;;  %v13579_v31 = vor.u32 %v12125_v6, %v10125_v11  ;;  %v12051_v43 = vld [vmem:[%s13430_s2 + $0x24] sm:$0xf] }
  0x46   : > { %930 = vmatmul.bf16.vlgmr.msra.gmra.mxu1 %v13448_v53  ;;  %964 = vmatmul.bf16.vlgmr.msra.gmra.mxu2 %v13445_v52  ;;  %20740 = vst [vmem:[#allocation16_spill] sm:$0xff] %v13569_v20  ;;  %v10115_v37 = vld [vmem:[%s20665_s3 + $0xc0] sm:$0xf]  ;;  %v12124_v39 = vld [vmem:[%s20665_s3 + $0xc4] sm:$0xf0]  ;;  %v13590_v51 = vor.u32 %v12108_v28, %v10051_v22  ;;  %v13598_v60 = vor.u32 %v12052_v30, %v9827_v13 }
  0x47   : > { %998 = vmatmul.bf16.vlgmr.msra.gmra.mxu3 %v13448_v53  ;;  %1234 = vmatpush.bf16.msrb.mxu0 %v13477_v4  ;;  %20741 = vst [vmem:[#allocation17_spill] sm:$0xff] %v13579_v31  ;;  %v9829_v48 = vld [vmem:[%s13430_s2 + $0x28] sm:$0xf0]  ;;  %v12107_v54 = vld [vmem:[%s20665_s3 + $0x44] sm:$0xf]  ;;  %v13602_v0 = vor.u32 %v12124_v39, %v10115_v37 }
  0x48   : > { %1268 = vmatpush.bf16.msrb.mxu1 %v13489_v14  ;;  %1302 = vmatpush.bf16.msrb.mxu2 %v13491_v18  ;;  %20742 = vst [vmem:[#allocation18_spill] sm:$0xff] %v13590_v51  ;;  %v10053_v59 = vld [vmem:[%s20665_s3 + $0x48] sm:$0xf0]  ;;  %v12123_v2 = vld [vmem:[%s20665_s3 + $0xc4] sm:$0xf]  ;;  %v13610_v11 = vor.u32 %v12051_v43, %v9829_v48 }
  0x49   : > { %1336 = vmatpush.bf16.msrb.mxu3 %v13503_v24  ;;  %20743 = vst [vmem:[#allocation19_spill] sm:$0xff] %v13598_v60  ;;  %v10117_v6 = vld [vmem:[%s20665_s3 + $0xc8] sm:$0xf0]  ;;  %v13613_v13 = vor.u32 %v12107_v54, %v10053_v59  ;;  %v10043_v28 = vld [vmem:[%s20665_s3 + $0x30] sm:$0xf] }
  0x4a   : > { %20744 = vst [vmem:[#allocation20_spill] sm:$0xff] %v13602_v0  ;;  %v13616_v22 = vor.u32 %v12123_v2, %v10117_v6  ;;  %v12106_v30 = vld [vmem:[%s20665_s3 + $0x34] sm:$0xf0]  ;;  %v10107_v37 = vld [vmem:[%s20665_s3 + $0xb0] sm:$0xf] }
  0x4b   : > { %1235 = vmatpush.bf16.msrb.mxu0 %v13516_v35  ;;  %20745 = vst [vmem:[#allocation21_spill] sm:$0xff] %v13610_v11  ;;  %v13631_v39 = vor.u32 %v12106_v30, %v10043_v28  ;;  %v12122_v43 = vld [vmem:[%s20665_s3 + $0xb4] sm:$0xf0]  ;;  %v12105_v48 = vld [vmem:[%s20665_s3 + $0x34] sm:$0xf] }
  0x4c   : > { %1269 = vmatpush.bf16.msrb.mxu1 %v13518_v36  ;;  %1303 = vmatpush.bf16.msrb.mxu2 %v13530_v47  ;;  %20746 = vst [vmem:[#allocation22_spill] sm:$0xff] %v13613_v13  ;;  %v10045_v54 = vld [vmem:[%s20665_s3 + $0x38] sm:$0xf0]  ;;  %v13644_v59 = vor.u32 %v12122_v43, %v10107_v37  ;;  %v12121_v6 = vld [vmem:[%s20665_s3 + $0xb4] sm:$0xf] }
  0x4d   : > { %1337 = vmatpush.bf16.msrb.mxu3 %v13541_v55  ;;  %20747 = vst [vmem:[#allocation23_spill] sm:$0xff] %v13616_v22  ;;  %v13646_v2 = vor.u32 %v12105_v48, %v10045_v54  ;;  %v10109_v28 = vld [vmem:[%s20665_s3 + $0xb8] sm:$0xf0]  ;;  %v10035_v30 = vld [vmem:[%s20665_s3 + $0x20] sm:$0xf] }
  0x4e   : > { %20748 = vst [vmem:[#allocation24_spill] sm:$0xff] %v13631_v39  ;;  %v13659_v37 = vor.u32 %v12121_v6, %v10109_v28  ;;  %v12104_v43 = vld [vmem:[%s20665_s3 + $0x24] sm:$0xf0]  ;;  %v10099_v48 = vld [vmem:[%s20665_s3 + $0xa0] sm:$0xf] }
  0x4f   : > { %1236 = vmatpush.bf16.msrb.mxu0 %v13553_v1  ;;  %20749 = vst [vmem:[#allocation25_spill] sm:$0xff] %v13644_v59  ;;  %v12120_v54 = vld [vmem:[%s20665_s3 + $0xa4] sm:$0xf0]  ;;  %v12103_v6 = vld [vmem:[%s20665_s3 + $0x24] sm:$0xf] }
  0x50   : > { %1270 = vmatpush.bf16.msrb.mxu1 %v13567_v19  ;;  %1304 = vmatpush.bf16.msrb.mxu2 %v13569_v20  ;;  %20750 = vst [vmem:[#allocation26_spill] sm:$0xff] %v13646_v2  ;;  %v10037_v28 = vld [vmem:[%s20665_s3 + $0x28] sm:$0xf0]  ;;  %v12118_v53 = vld [vmem:[%s20665_s3 + $0x94] sm:$0xf0] }
  0x51   : > { %1338 = vmatpush.bf16.msrb.mxu3 %v13579_v31  ;;  %20751 = vst [vmem:[#allocation27_spill] sm:$0xff] %v13659_v37  ;;  %v9835_v52 = vld [vmem:[%s13430_s2 + $0x30] sm:$0xf]  ;;  %v10021_v31 = vld [vmem:[%s20665_s3 + $0x8] sm:$0xf0] }
  0x53   : > { %1237 = vmatpush.bf16.msrb.mxu0 %v13590_v51  ;;  %v12099_v51 = vld [vmem:[%s20665_s3 + $0x4] sm:$0xf] }
  0x54   : > { %1271 = vmatpush.bf16.msrb.mxu1 %v13602_v0  ;;  %1305 = vmatpush.bf16.msrb.mxu2 %v13613_v13 }
  0x55   : > { %901 = vmatmul.bf16.gmra.mxu0 %v13461_v61  ;;  %1339 = vmatpush.bf16.msrb.mxu3 %v13616_v22 }
  0x56   : > { %935 = vmatmul.bf16.gmra.mxu1 %v13463_v63  ;;  %969 = vmatmul.bf16.gmra.mxu2 %v13461_v61  ;;  %v10101_v61 = vld [vmem:[%s20665_s3 + $0xa8] sm:$0xf0] }
  0x57   : > { %1003 = vmatmul.bf16.gmra.mxu3 %v13463_v63  ;;  %1238 = vmatpush.bf16.msrb.mxu0 %v13631_v39  ;;  %v12119_v63 = vld [vmem:[%s20665_s3 + $0xa4] sm:$0xf]  ;;  %v12117_v39 = vld [vmem:[%s20665_s3 + $0x94] sm:$0xf] }
  0x58   : > { %1272 = vmatpush.bf16.msrb.mxu1 %v13644_v59  ;;  %1306 = vmatpush.bf16.msrb.mxu2 %v13646_v2  ;;  %v13705_v59 = vor.u32 %v12119_v63, %v10101_v61  ;;  %v10029_v2 = vld [vmem:[%s20665_s3 + $0x18] sm:$0xf0]  ;;  %v10019_v63 = vld [vmem:[%s20665_s3] sm:$0xf] }
  0x59   : > { %1340 = vmatpush.bf16.msrb.mxu3 %v13659_v37  ;;  %v10093_v61 = vld [vmem:[%s20665_s3 + $0x98] sm:$0xf0] }
  0x5a   : > { %v13744_v13 = vor.u32 %v12117_v39, %v10093_v61  ;;  %v12115_v39 = vld [vmem:[%s20665_s3 + $0x84] sm:$0xf] }
  0x5d   : > { %1341 = vmatpush.bf16.msrb.mxu3 %v13705_v59 }
  0x61   : > { %1342 = vmatpush.bf16.msrb.mxu3 %v13744_v13 }
  0x65   : > { %906 = vmatmul.bf16.gmra.mxu0 %v13598_v60 }
  0x66   : > { %940 = vmatmul.bf16.gmra.mxu1 %v13610_v11  ;;  %974 = vmatmul.bf16.gmra.mxu2 %v13598_v60  ;;  %v13673_v60 = vor.u32 %v12120_v54, %v10099_v48  ;;  %v13694_v48 = vor.u32 %v12103_v6, %v10037_v28  ;;  %v10091_v54 = vld [vmem:[%s20665_s3 + $0x90] sm:$0xf]  ;;  %v12101_v28 = vld [vmem:[%s20665_s3 + $0x14] sm:$0xf] }
  0x67   : > { %1008 = vmatmul.bf16.gmra.mxu3 %v13610_v11  ;;  %v13671_v11 = vor.u32 %v12104_v43, %v10035_v30  ;;  %v10027_v30 = vld [vmem:[%s20665_s3 + $0x10] sm:$0xf]  ;;  %v12102_v43 = vld [vmem:[%s20665_s3 + $0x14] sm:$0xf0]  ;;  %v13719_v37 = vor.u32 %v12118_v53, %v10091_v54  ;;  %v12116_v53 = vld [vmem:[%s20665_s3 + $0x84] sm:$0xf0]  ;;  %v13740_v22 = vor.u32 %v12101_v28, %v10029_v2 }
  0x68   : > { %20753 = vst [vmem:[#allocation29_spill] sm:$0xff] %v13673_v60  ;;  %v13707_v6 = vor.u32 %v12102_v43, %v10027_v30  ;;  %1273 = vmatpush.bf16.msrb.mxu1 %v13673_v60  ;;  %v12100_v30 = vld [vmem:[%s20665_s3 + $0x4] sm:$0xf0]  ;;  %v12054_v43 = vld [vmem:[%s13430_s2 + $0x34] sm:$0xf0]  ;;  %1307 = vmatpush.bf16.msrb.mxu2 %v13694_v48 }
  0x69   : > { %20752 = vst [vmem:[#allocation28_spill] sm:$0xff] %v13671_v11  ;;  %1239 = vmatpush.bf16.msrb.mxu0 %v13671_v11  ;;  %v10083_v11 = vld [vmem:[%s20665_s3 + $0x80] sm:$0xf]  ;;  %v12053_v54 = vld [vmem:[%s13430_s2 + $0x34] sm:$0xf]  ;;  %v13746_v0 = vor.u32 %v12100_v30, %v10019_v63  ;;  %v13754_v20 = vor.u32 %v12054_v43, %v9835_v52  ;;  %v13768_v63 = vor.u32 %v12099_v51, %v10021_v31 }
  0x6a   : > { %v9837_v60 = vld [vmem:[%s13430_s2 + $0x38] sm:$0xf0]  ;;  %v13757_v2 = vor.u32 %v12116_v53, %v10083_v11  ;;  %v10085_v28 = vld [vmem:[%s20665_s3 + $0x88] sm:$0xf0]  ;;  %v9843_v31 = vld [vmem:[%s13430_s2 + $0x40] sm:$0xf] }
  0x6b   : > { %v13765_v61 = vor.u32 %v12053_v54, %v9837_v60  ;;  %v13772_v52 = vor.u32 %v12115_v39, %v10085_v28  ;;  %v12056_v51 = vld [vmem:[%s13430_s2 + $0x44] sm:$0xf0]  ;;  %v12055_v60 = vld [vmem:[%s13430_s2 + $0x44] sm:$0xf]  ;;  %v9845_v11 = vld [vmem:[%s13430_s2 + $0x48] sm:$0xf0] }
  0x6c   : > { %1274 = vmatpush.bf16.msrb.mxu1 %v13719_v37  ;;  %1308 = vmatpush.bf16.msrb.mxu2 %v13740_v22  ;;  %s20754_s2 = smul.u32 80, %s13389_s19 }
  0x6d   : > { %1240 = vmatpush.bf16.msrb.mxu0 %v13707_v6  ;;  %1343 = vmatpush.bf16.msrb.mxu3 %v13772_v52 }
  0x6e   : > { %s13816_s27 = scalar_lea.vmem %s20755_s1, %s20754_s2  ;;  %s12955_s2 = scalar_lea.hbm %s20680_s18, 2 }
  0x6f   : > { %v12065_v30 = vld [vmem:[%s13816_s27 + $0x44] sm:$0xf]  ;;  %v10013_v43 = vld [vmem:[%s13816_s27 + $0x48] sm:$0xf0] }
  0x70   : > { %1275 = vmatpush.bf16.msrb.mxu1 %v13757_v2  ;;  %1309 = vmatpush.bf16.msrb.mxu2 %v13768_v63  ;;  %v13924_v28 = vor.u32 %v12065_v30, %v10013_v43 }
  0x71   : > { %1241 = vmatpush.bf16.msrb.mxu0 %v13746_v0  ;;  %1492 = vmatpush.bf16.msra.mxu3 %v13179_v12  ;;  %v12058_v12 = vld [vmem:[%s13816_s27 + $0x4] sm:$0xf0] }
  0x74   : > { %1424 = vmatpush.bf16.msra.mxu1 %v13165_v7  ;;  %1458 = vmatpush.bf16.msra.mxu2 %v13167_v8  ;;  %v13798_v7 = vor.u32 %v12055_v60, %v9845_v11  ;;  %v9979_v8 = vld [vmem:[%s13816_s27] sm:$0xf] }
  0x75   : > { %911 = vmatmul.bf16.gmra.mxu0 %v13754_v20  ;;  %1493 = vmatpush.bf16.msra.mxu3 %v13217_v25 }
  0x76   : > { %945 = vmatmul.bf16.gmra.mxu1 %v13765_v61  ;;  %979 = vmatmul.bf16.gmra.mxu2 %v13754_v20 }
  0x77   : > { %1013 = vmatmul.bf16.gmra.mxu3 %v13765_v61  ;;  %1390 = vmatpush.bf16.msra.mxu0 %v13154_v3  ;;  %v13794_v3 = vor.u32 %v12056_v51, %v9843_v31 }
  0x78   : > { %1425 = vmatpush.bf16.msra.mxu1 %v13194_v17  ;;  %1459 = vmatpush.bf16.msra.mxu2 %v13206_v21  ;;  %v9981_v17 = vld [vmem:[%s13816_s27 + $0x8] sm:$0xf0]  ;;  %v13829_v21 = vor.u32 %v12058_v12, %v9979_v8 }
  0x79   : > { %1494 = vmatpush.bf16.msra.mxu3 %v13256_v38  ;;  %v9989_v38 = vld [vmem:[%s13816_s27 + $0x18] sm:$0xf0] }
  0x7b   : > { %1391 = vmatpush.bf16.msra.mxu0 %v13192_v16  ;;  %v12057_v16 = vld [vmem:[%s13816_s27 + $0x4] sm:$0xf] }
  0x7c   : > { %1426 = vmatpush.bf16.msra.mxu1 %v13242_v33  ;;  %1460 = vmatpush.bf16.msra.mxu2 %v13244_v34  ;;  %v13832_v25 = vor.u32 %v12057_v16, %v9981_v17  ;;  %v12060_v33 = vld [vmem:[%s13816_s27 + $0x14] sm:$0xf0]  ;;  %v12059_v34 = vld [vmem:[%s13816_s27 + $0x14] sm:$0xf] }
  0x7d   : > { %1495 = vmatpush.bf16.msra.mxu3 %v13292_v50  ;;  %v20757_v50 = vld [vmem:[#allocation17_spill] sm:$0xff] }
  0x7f   : > { %1392 = vmatpush.bf16.msra.mxu0 %v13229_v29  ;;  %v9987_v29 = vld [vmem:[%s13816_s27 + $0x10] sm:$0xf] }
  0x80   : > { %1427 = vmatpush.bf16.msra.mxu1 %v13278_v45  ;;  %1461 = vmatpush.bf16.msra.mxu2 %v13280_v46  ;;  %v20756_v45 = vld [vmem:[#allocation16_spill] sm:$0xff]  ;;  %v13861_v46 = vor.u32 %v12059_v34, %v9989_v38 }
  0x81   : > { %1496 = vmatpush.bf16.msra.mxu3 %v13328_v62  ;;  %v20761_v62 = vld [vmem:[#allocation23_spill] sm:$0xff] }
  0x83   : > { %1393 = vmatpush.bf16.msra.mxu0 %v13274_v44  ;;  %v13857_v44 = vor.u32 %v12060_v33, %v9987_v29 }
  0x84   : > { %1428 = vmatpush.bf16.msra.mxu1 %v13314_v57  ;;  %1462 = vmatpush.bf16.msra.mxu2 %v13316_v58  ;;  %v20759_v57 = vld [vmem:[#allocation20_spill] sm:$0xff]  ;;  %v20760_v58 = vld [vmem:[#allocation22_spill] sm:$0xff] }
  0x85   : > { %916 = vmatmul.bf16.gmra.mxu0 %v13794_v3  ;;  %1497 = vmatpush.bf16.msra.mxu3 %v13367_v15  ;;  %v20765_v15 = vld [vmem:[#allocation27_spill] sm:$0xff] }
  0x86   : > { %950 = vmatmul.bf16.gmra.mxu1 %v13798_v7  ;;  %984 = vmatmul.bf16.gmra.mxu2 %v13794_v3 }
  0x87   : > { %1018 = vmatmul.bf16.gmra.mxu3 %v13798_v7  ;;  %1394 = vmatpush.bf16.msra.mxu0 %v13310_v56  ;;  %v20758_v56 = vld [vmem:[#allocation18_spill] sm:$0xff] }
  0x88   : > { %1429 = vmatpush.bf16.msra.mxu1 %v13353_v9  ;;  %1463 = vmatpush.bf16.msra.mxu2 %v13355_v10  ;;  %v20763_v9 = vld [vmem:[#allocation25_spill] sm:$0xff]  ;;  %v20764_v10 = vld [vmem:[#allocation26_spill] sm:$0xff] }
  0x89   : > { %1498 = vmatpush.bf16.msra.mxu3 %v13407_v32  ;;  %v12062_v32 = vld [vmem:[%s13816_s27 + $0x24] sm:$0xf0] }
  0x8b   : > { %1395 = vmatpush.bf16.msra.mxu0 %v13346_v5  ;;  %v20762_v5 = vld [vmem:[#allocation24_spill] sm:$0xff] }
  0x8c   : > { %1430 = vmatpush.bf16.msra.mxu1 %v13393_v26  ;;  %1464 = vmatpush.bf16.msra.mxu2 %v13395_v27  ;;  %v20767_v26 = vld [vmem:[#allocation29_spill] sm:$0xff]  ;;  %v9995_v27 = vld [vmem:[%s13816_s27 + $0x20] sm:$0xf] }
  0x8d   : > { %1499 = vmatpush.bf16.msra.mxu3 %v13442_v49 }
  0x8f   : > { %1396 = vmatpush.bf16.msra.mxu0 %v13383_v23  ;;  %v20766_v23 = vld [vmem:[#allocation28_spill] sm:$0xff] }
  0x90   : > { %1431 = vmatpush.bf16.msra.mxu1 %v13434_v41  ;;  %1465 = vmatpush.bf16.msra.mxu2 %v13436_v42  ;;  %v9997_v41 = vld [vmem:[%s13816_s27 + $0x28] sm:$0xf0]  ;;  %v13885_v42 = vor.u32 %v12062_v32, %v9995_v27 }
  0x93   : > { %1397 = vmatpush.bf16.msra.mxu0 %v13423_v40  ;;  %v12061_v40 = vld [vmem:[%s13816_s27 + $0x24] sm:$0xf] }
  0x94   : > { %v13888_v49 = vor.u32 %v12061_v40, %v9997_v41 }
  0x95   : > { %1242 = vmatmul.bf16.vlgmr.msrb.gmra.mxu0 %v13829_v21 }
  0x96   : > { %1276 = vmatmul.bf16.vlgmr.msrb.gmra.mxu1 %v13832_v25  ;;  %1310 = vmatmul.bf16.vlgmr.msrb.gmra.mxu2 %v13829_v21 }
  0x97   : > { %1344 = vmatmul.bf16.vlgmr.msrb.gmra.mxu3 %v13832_v25  ;;  %1526 = vmatpush.bf16.msrb.mxu0 %v13477_v4  ;;  %v10003_v4 = vld [vmem:[%s13816_s27 + $0x30] sm:$0xf] }
  0x98   : > { %1560 = vmatpush.bf16.msrb.mxu1 %v13489_v14  ;;  %1594 = vmatpush.bf16.msrb.mxu2 %v13491_v18  ;;  %v12064_v14 = vld [vmem:[%s13816_s27 + $0x34] sm:$0xf0]  ;;  %v12063_v18 = vld [vmem:[%s13816_s27 + $0x34] sm:$0xf] }
  0x99   : > { %1628 = vmatpush.bf16.msrb.mxu3 %v13503_v24  ;;  %v10005_v24 = vld [vmem:[%s13816_s27 + $0x38] sm:$0xf0] }
  0x9b   : > { %1527 = vmatpush.bf16.msrb.mxu0 %v13516_v35  ;;  %v13904_v35 = vor.u32 %v12064_v14, %v10003_v4 }
  0x9c   : > { %1561 = vmatpush.bf16.msrb.mxu1 %v13518_v36  ;;  %1595 = vmatpush.bf16.msrb.mxu2 %v13530_v47  ;;  %v13906_v47 = vor.u32 %v12063_v18, %v10005_v24 }
  0x9d   : > { %1629 = vmatpush.bf16.msrb.mxu3 %v13541_v55 }
  0x9f   : > { %1528 = vmatpush.bf16.msrb.mxu0 %v13553_v1 }
  0xa0   : > { %1562 = vmatpush.bf16.msrb.mxu1 %v13567_v19  ;;  %1596 = vmatpush.bf16.msrb.mxu2 %v20756_v45 }
  0xa1   : > { %1630 = vmatpush.bf16.msrb.mxu3 %v20757_v50 }
  0xa3   : > { %1529 = vmatpush.bf16.msrb.mxu0 %v20758_v56 }
  0xa4   : > { %1563 = vmatpush.bf16.msrb.mxu1 %v20759_v57  ;;  %1597 = vmatpush.bf16.msrb.mxu2 %v20760_v58 }
  0xa5   : > { %1247 = vmatmul.bf16.gmra.mxu0 %v13857_v44  ;;  %1631 = vmatpush.bf16.msrb.mxu3 %v20761_v62 }
  0xa6   : > { %1281 = vmatmul.bf16.gmra.mxu1 %v13861_v46  ;;  %1315 = vmatmul.bf16.gmra.mxu2 %v13857_v44 }
  0xa7   : > { %1349 = vmatmul.bf16.gmra.mxu3 %v13861_v46  ;;  %1530 = vmatpush.bf16.msrb.mxu0 %v20762_v5 }
  0xa8   : > { %1564 = vmatpush.bf16.msrb.mxu1 %v20763_v9  ;;  %1598 = vmatpush.bf16.msrb.mxu2 %v20764_v10 }
  0xa9   : > { %1632 = vmatpush.bf16.msrb.mxu3 %v20765_v15 }
  0xab   : > { %1531 = vmatpush.bf16.msrb.mxu0 %v20766_v23 }
  0xac   : > { %1565 = vmatpush.bf16.msrb.mxu1 %v20767_v26  ;;  %1599 = vmatpush.bf16.msrb.mxu2 %v13694_v48  ;;  %v10011_v48 = vld [vmem:[%s13816_s27 + $0x40] sm:$0xf] }
  0xad   : > { %1633 = vmatpush.bf16.msrb.mxu3 %v13705_v59 }
  0xaf   : > { %1532 = vmatpush.bf16.msrb.mxu0 %v13707_v6  ;;  %v12066_v6 = vld [vmem:[%s13816_s27 + $0x44] sm:$0xf0]  ;;  %s21263_s27 = sld [smem:[#allocation145_spill]] }
  0xb0   : > { %1566 = vmatpush.bf16.msrb.mxu1 %v13719_v37  ;;  %1600 = vmatpush.bf16.msrb.mxu2 %v13740_v22  ;;  %v13922_v54 = vor.u32 %v12066_v6, %v10011_v48 }
  0xb1   : > { %1634 = vmatpush.bf16.msrb.mxu3 %v13744_v13 }
  0xb3   : > { %1533 = vmatpush.bf16.msrb.mxu0 %v13746_v0 }
  0xb4   : > { %1567 = vmatpush.bf16.msrb.mxu1 %v13757_v2  ;;  %1601 = vmatpush.bf16.msrb.mxu2 %v13768_v63 }
  0xb5   : > { %1252 = vmatmul.bf16.gmra.mxu0 %v13885_v42  ;;  %1635 = vmatpush.bf16.msrb.mxu3 %v13772_v52 }
  0xb6   : > { %1286 = vmatmul.bf16.gmra.mxu1 %v13888_v49  ;;  %1320 = vmatmul.bf16.gmra.mxu2 %v13885_v42 }
  0xb7   : > { %1354 = vmatmul.bf16.gmra.mxu3 %v13888_v49 }
  0xc2   : > { %v897_v36 = vpop.f32.mrf.mxu0 }
  0xc3   : > { %v931_v55 = vpop.f32.mrf.mxu1 }
  0xc4   : > { %v13908_v1 = vadd.f32 %v931_v55, %v897_v36 }
  0xc5   : > { %1257 = vmatmul.bf16.gmra.mxu0 %v13904_v35 }
  0xc6   : > { %1291 = vmatmul.bf16.gmra.mxu1 %v13906_v47  ;;  %1325 = vmatmul.bf16.gmra.mxu2 %v13904_v35 }
  0xc7   : > { %1359 = vmatmul.bf16.gmra.mxu3 %v13906_v47 }
  0xc9   : > { %v965_v19 = vpop.f32.mrf.mxu2 }
  0xca   : > { %v999_v0 = vpop.f32.mrf.mxu3  ;;  %v899_v13 = vpop.f32.mrf.mxu0 }
  0xcb   : > { %v13914_v22 = vadd.f32 %v999_v0, %v965_v19  ;;  %v933_v59 = vpop.f32.mrf.mxu1 }
  0xcc   : > { %v13916_v37 = vadd.f32 %v933_v59, %v899_v13 }
  0xd1   : > { %v967_v53 = vpop.f32.mrf.mxu2 }
  0xd2   : > { %v1001_v2 = vpop.f32.mrf.mxu3  ;;  %v902_v39 = vpop.f32.mrf.mxu0 }
  0xd3   : > { %v13926_v63 = vadd.f32 %v1001_v2, %v967_v53  ;;  %v936_v52 = vpop.f32.mrf.mxu1 }
  0xd4   : > { %v13928_v31 = vadd.f32 %v936_v52, %v902_v39 }
  0xd5   : > { %1262 = vmatmul.bf16.gmra.mxu0 %v13922_v54 }
  0xd6   : > { %1296 = vmatmul.bf16.gmra.mxu1 %v13924_v28  ;;  %1330 = vmatmul.bf16.gmra.mxu2 %v13922_v54 }
  0xd7   : > { %1364 = vmatmul.bf16.gmra.mxu3 %v13924_v28 }
  0xd9   : > { %v970_v51 = vpop.f32.mrf.mxu2 }
  0xda   : > { %v1004_v60 = vpop.f32.mrf.mxu3  ;;  %v904_v11 = vpop.f32.mrf.mxu0 }
  0xdb   : > { %v13934_v8 = vadd.f32 %v1004_v60, %v970_v51  ;;  %v938_v12 = vpop.f32.mrf.mxu1 }
  0xdc   : > { %v13936_v16 = vadd.f32 %v938_v12, %v904_v11 }
  0xe1   : > { %v972_v17 = vpop.f32.mrf.mxu2 }
  0xe2   : > { %v1006_v29 = vpop.f32.mrf.mxu3  ;;  %v907_v33 = vpop.f32.mrf.mxu0 }
  0xe3   : > { %v13938_v34 = vadd.f32 %v1006_v29, %v972_v17  ;;  %v941_v38 = vpop.f32.mrf.mxu1 }
  0xe4   : > { %v13940_v45 = vadd.f32 %v941_v38, %v907_v33 }
  0xe5   : > { %1398 = vmatmul.bf16.vlgmr.msra.gmra.mxu0 %v13829_v21 }
  0xe6   : > { %1432 = vmatmul.bf16.vlgmr.msra.gmra.mxu1 %v13832_v25  ;;  %1466 = vmatmul.bf16.vlgmr.msra.gmra.mxu2 %v13829_v21 }
  0xe7   : > { %1500 = vmatmul.bf16.vlgmr.msra.gmra.mxu3 %v13832_v25 }
  0xe9   : > { %v975_v50 = vpop.f32.mrf.mxu2 }
  0xea   : > { %v1009_v56 = vpop.f32.mrf.mxu3  ;;  %v909_v57 = vpop.f32.mrf.mxu0 }
  0xeb   : > { %v13946_v58 = vadd.f32 %v1009_v56, %v975_v50  ;;  %v943_v62 = vpop.f32.mrf.mxu1 }
  0xec   : > { %v13948_v5 = vadd.f32 %v943_v62, %v909_v57 }
  0xf1   : > { %v977_v9 = vpop.f32.mrf.mxu2 }
  0xf2   : > { %v1011_v10 = vpop.f32.mrf.mxu3  ;;  %v912_v15 = vpop.f32.mrf.mxu0 }
  0xf3   : > { %v13950_v23 = vadd.f32 %v1011_v10, %v977_v9  ;;  %v946_v26 = vpop.f32.mrf.mxu1 }
  0xf4   : > { %v13952_v27 = vadd.f32 %v946_v26, %v912_v15 }
  0xf5   : > { %1403 = vmatmul.bf16.gmra.mxu0 %v13857_v44 }
  0xf6   : > { %1437 = vmatmul.bf16.gmra.mxu1 %v13861_v46  ;;  %1471 = vmatmul.bf16.gmra.mxu2 %v13857_v44 }
  0xf7   : > { %1505 = vmatmul.bf16.gmra.mxu3 %v13861_v46 }
  0xf9   : > { %v980_v21 = vpop.f32.mrf.mxu2 }
  0xfa   : > { %v1014_v25 = vpop.f32.mrf.mxu3  ;;  %v914_v32 = vpop.f32.mrf.mxu0 }
  0xfb   : > { %v13958_v40 = vadd.f32 %v1014_v25, %v980_v21  ;;  %v948_v41 = vpop.f32.mrf.mxu1 }
  0xfc   : > { %v13960_v4 = vadd.f32 %v948_v41, %v914_v32 }
 0x101   : > { %v982_v14 = vpop.f32.mrf.mxu2 }
 0x102   : > { %v1016_v18 = vpop.f32.mrf.mxu3  ;;  %v917_v24 = vpop.f32.mrf.mxu0 }
 0x103   : > { %v13962_v36 = vadd.f32 %v1016_v18, %v982_v14  ;;  %v951_v55 = vpop.f32.mrf.mxu1 }
 0x104   : > { %v13964_v19 = vadd.f32 %v951_v55, %v917_v24  ;;  %v20768_v24 = vld [vmem:[#allocation12_spill] sm:$0xff]  ;;  %v20769_v55 = vld [vmem:[#allocation13_spill] sm:$0xff] }
 0x105   : > { %1408 = vmatmul.bf16.gmra.mxu0 %v13885_v42 }
 0x106   : > { %1442 = vmatmul.bf16.gmra.mxu1 %v13888_v49  ;;  %1476 = vmatmul.bf16.gmra.mxu2 %v13885_v42 }
 0x107   : > { %1510 = vmatmul.bf16.gmra.mxu3 %v13888_v49 }
 0x109   : > { %v985_v44 = vpop.f32.mrf.mxu2 }
 0x10a   : > { %v1019_v46 = vpop.f32.mrf.mxu3  ;;  %v919_v0 = vpop.f32.mrf.mxu0 }
 0x10b   : > { %v13970_v13 = vadd.f32 %v1019_v46, %v985_v44  ;;  %v953_v59 = vpop.f32.mrf.mxu1 }
 0x10c   : > { %v13972_v48 = vadd.f32 %v953_v59, %v919_v0 }
 0x111   : > { %v987_v6 = vpop.f32.mrf.mxu2 }
 0x112   : > { %v1021_v30 = vpop.f32.mrf.mxu3  ;;  %v1243_v43 = vpop.f32.mrf.mxu0 }
 0x113   : > { %v13974_v53 = vadd.f32 %v1021_v30, %v987_v6  ;;  %v1277_v2 = vpop.f32.mrf.mxu1 }
 0x114   : > { %v1278_v39 = vadd.f32 %v1277_v2, %v1243_v43 }
 0x115   : > { %1413 = vmatmul.bf16.gmra.mxu0 %v13904_v35 }
 0x116   : > { %v1370_v42 = vsub.f32 %v13908_v1, %v1278_v39  ;;  %1447 = vmatmul.bf16.gmra.mxu1 %v13906_v47  ;;  %1481 = vmatmul.bf16.gmra.mxu2 %v13904_v35 }
 0x117   : > { %1515 = vmatmul.bf16.gmra.mxu3 %v13906_v47 }
 0x119   : > { %v1311_v49 = vpop.f32.mrf.mxu2 }
 0x11a   : > { %v1345_v52 = vpop.f32.mrf.mxu3  ;;  %v1245_v51 = vpop.f32.mrf.mxu0 }
 0x11b   : > { %v1346_v60 = vadd.f32 %v1345_v52, %v1311_v49  ;;  %v1279_v11 = vpop.f32.mrf.mxu1 }
 0x11c   : > { %v1280_v12 = vadd.f32 %v1279_v11, %v1245_v51 }
 0x11d   : > { %v1371_v17 = vsub.f32 %v13914_v22, %v1346_v60 }
 0x11e   : > { %v1372_v29 = vsub.f32 %v13916_v37, %v1280_v12  ;;  %v20770_v12 = vld [vmem:[#allocation14_spill] sm:$0xff] }
 0x120   : > { %v13983_v33 = vpack.c.bf16 %v1372_v29, %v1370_v42 }
 0x121   : > { %v1313_v38 = vpop.f32.mrf.mxu2 }
 0x122   : > { %v1347_v1 = vpop.f32.mrf.mxu3  ;;  %v1248_v50 = vpop.f32.mrf.mxu0 }
 0x123   : > { %v1348_v56 = vadd.f32 %v1347_v1, %v1313_v38  ;;  %v1282_v57 = vpop.f32.mrf.mxu1 }
 0x124   : > { %v1283_v35 = vadd.f32 %v1282_v57, %v1248_v50 }
 0x125   : > { %v1373_v47 = vsub.f32 %v13926_v63, %v1348_v56  ;;  %1418 = vmatmul.bf16.gmra.mxu0 %v13922_v54 }
 0x126   : > { %v1374_v62 = vsub.f32 %v13928_v31, %v1283_v35  ;;  %1452 = vmatmul.bf16.gmra.mxu1 %v13924_v28  ;;  %1486 = vmatmul.bf16.gmra.mxu2 %v13922_v54 }
 0x127   : > { %1520 = vmatmul.bf16.gmra.mxu3 %v13924_v28  ;;  %v13991_v22 = vpack.c.bf16 %v1373_v47, %v1371_v17  ;;  %v20771_v17 = vld [vmem:[#allocation15_spill] sm:$0xff] }
 0x129   : > { %v1316_v37 = vpop.f32.mrf.mxu2 }
 0x12a   : > { %v1350_v9 = vpop.f32.mrf.mxu3  ;;  %v1250_v10 = vpop.f32.mrf.mxu0 }
 0x12b   : > { %v1351_v15 = vadd.f32 %v1350_v9, %v1316_v37  ;;  %v1284_v26 = vpop.f32.mrf.mxu1 }
 0x12c   : > { %v1285_v21 = vadd.f32 %v1284_v26, %v1250_v10 }
 0x12d   : > { %v1375_v63 = vsub.f32 %v13934_v8, %v1351_v15 }
 0x12e   : > { %v1376_v25 = vsub.f32 %v13936_v16, %v1285_v21  ;;  %v20772_v21 = vld [vmem:[#allocation19_spill] sm:$0xff] }
 0x130   : > { %v13995_v32 = vpack.c.bf16 %v1376_v25, %v1374_v62 }
 0x131   : > { %v1318_v31 = vpop.f32.mrf.mxu2 }
 0x132   : > { %v1352_v41 = vpop.f32.mrf.mxu3  ;;  %v1253_v14 = vpop.f32.mrf.mxu0 }
 0x133   : > { %v1353_v54 = vadd.f32 %v1352_v41, %v1318_v31  ;;  %v1287_v18 = vpop.f32.mrf.mxu1 }
 0x134   : > { %v1288_v44 = vadd.f32 %v1287_v18, %v1253_v14 }
 0x135   : > { %v1377_v28 = vsub.f32 %v13938_v34, %v1353_v54  ;;  %1534 = vmatmul.bf16.vlgmr.msrb.gmra.mxu0 %v20768_v24 }
 0x136   : > { %1568 = vmatmul.bf16.vlgmr.msrb.gmra.mxu1 %v20769_v55  ;;  %1602 = vmatmul.bf16.vlgmr.msrb.gmra.mxu2 %v20768_v24  ;;  %v1378_v30 = vsub.f32 %v13940_v45, %v1288_v44 }
 0x137   : > { %1636 = vmatmul.bf16.vlgmr.msrb.gmra.mxu3 %v20769_v55  ;;  %v14002_v8 = vpack.c.bf16 %v1377_v28, %v1375_v63  ;;  %v20773_v63 = vld [vmem:[#allocation21_spill] sm:$0xff] }
 0x139   : > { %v1321_v16 = vpop.f32.mrf.mxu2 }
 0x13a   : > { %v1355_v46 = vpop.f32.mrf.mxu3  ;;  %v1255_v0 = vpop.f32.mrf.mxu0 }
 0x13b   : > { %v1289_v59 = vpop.f32.mrf.mxu1  ;;  %v1356_v2 = vadd.f32 %v1355_v46, %v1321_v16 }
 0x13c   : > { %v1290_v6 = vadd.f32 %v1289_v59, %v1255_v0 }
 0x13d   : > { %v1379_v60 = vsub.f32 %v13946_v58, %v1356_v2 }
 0x13e   : > { %v1380_v34 = vsub.f32 %v13948_v5, %v1290_v6 }
 0x140   : > { %v14006_v43 = vpack.c.bf16 %v1380_v34, %v1378_v30 }
 0x141   : > { %v1323_v39 = vpop.f32.mrf.mxu2 }
 0x142   : > { %v1357_v42 = vpop.f32.mrf.mxu3  ;;  %v1258_v49 = vpop.f32.mrf.mxu0 }
 0x143   : > { %v1358_v52 = vadd.f32 %v1357_v42, %v1323_v39  ;;  %v1292_v51 = vpop.f32.mrf.mxu1 }
 0x144   : > { %v1293_v29 = vadd.f32 %v1292_v51, %v1258_v49 }
 0x145   : > { %v1381_v11 = vsub.f32 %v13950_v23, %v1358_v52  ;;  %1539 = vmatmul.bf16.gmra.mxu0 %v20770_v12 }
 0x146   : > { %1573 = vmatmul.bf16.gmra.mxu1 %v20771_v17  ;;  %1607 = vmatmul.bf16.gmra.mxu2 %v20770_v12  ;;  %v1382_v58 = vsub.f32 %v13952_v27, %v1293_v29 }
 0x147   : > { %1641 = vmatmul.bf16.gmra.mxu3 %v20771_v17  ;;  %v14014_v45 = vpack.c.bf16 %v1381_v11, %v1379_v60 }
 0x149   : > { %v1326_v5 = vpop.f32.mrf.mxu2 }
 0x14a   : > { %v1360_v38 = vpop.f32.mrf.mxu3  ;;  %v1260_v1 = vpop.f32.mrf.mxu0 }
 0x14b   : > { %v1294_v50 = vpop.f32.mrf.mxu1  ;;  %v1361_v35 = vadd.f32 %v1360_v38, %v1326_v5 }
 0x14c   : > { %v1295_v56 = vadd.f32 %v1294_v50, %v1260_v1 }
 0x14d   : > { %v1383_v15 = vsub.f32 %v13958_v40, %v1361_v35 }
 0x14e   : > { %v1384_v23 = vsub.f32 %v13960_v4, %v1295_v56 }
 0x150   : > { %v1668_v57 = vpack.c.bf16 %v1384_v23, %v1382_v58 }
 0x151   : > { %v1328_v47 = vpop.f32.mrf.mxu2 }
 0x152   : > { %v1362_v62 = vpop.f32.mrf.mxu3  ;;  %v1263_v37 = vpop.f32.mrf.mxu0 }
 0x153   : > { %v1363_v9 = vadd.f32 %v1362_v62, %v1328_v47  ;;  %v1297_v10 = vpop.f32.mrf.mxu1 }
 0x154   : > { %v1298_v25 = vadd.f32 %v1297_v10, %v1263_v37 }
 0x155   : > { %v1385_v26 = vsub.f32 %v13962_v36, %v1363_v9  ;;  %1544 = vmatmul.bf16.gmra.mxu0 %v20772_v21 }
 0x156   : > { %1578 = vmatmul.bf16.gmra.mxu1 %v20773_v63  ;;  %1612 = vmatmul.bf16.gmra.mxu2 %v20772_v21  ;;  %v1386_v18 = vsub.f32 %v13964_v19, %v1298_v25 }
 0x157   : > { %1646 = vmatmul.bf16.gmra.mxu3 %v20773_v63  ;;  %v1669_v27 = vpack.c.bf16 %v1385_v26, %v1383_v15 }
 0x159   : > { %v1331_v4 = vpop.f32.mrf.mxu2 }
 0x15a   : > { %v1365_v31 = vpop.f32.mrf.mxu3  ;;  %v1265_v41 = vpop.f32.mrf.mxu0 }
 0x15b   : > { %v1299_v14 = vpop.f32.mrf.mxu1  ;;  %v1366_v28 = vadd.f32 %v1365_v31, %v1331_v4 }
 0x15c   : > { %v1300_v54 = vadd.f32 %v1299_v14, %v1265_v41 }
 0x15d   : > { %v1387_v59 = vsub.f32 %v13970_v13, %v1366_v28 }
 0x15e   : > { %v1388_v40 = vsub.f32 %v13972_v48, %v1300_v54 }
 0x160   : > { %v1670_v36 = vpack.c.bf16 %v1388_v40, %v1386_v18 }
 0x161   : > { %v1333_v24 = vpop.f32.mrf.mxu2 }
 0x162   : > { %v1367_v55 = vpop.f32.mrf.mxu3  ;;  %2166 = vmatpush.bf16.msra.mxu0 %v1670_v36  ;;  %v1399_v16 = vpop.f32.mrf.mxu0 }
 0x163   : > { %v1368_v44 = vadd.f32 %v1367_v55, %v1333_v24  ;;  %v1433_v46 = vpop.f32.mrf.mxu1 }
 0x164   : > { %v14026_v0 = vadd.f32 %v1433_v46, %v1399_v16 }
 0x165   : > { %v1389_v6 = vsub.f32 %v13974_v53, %v1368_v44  ;;  %1549 = vmatmul.bf16.gmra.mxu0 %v13754_v20 }
 0x166   : > { %1583 = vmatmul.bf16.gmra.mxu1 %v13765_v61  ;;  %1617 = vmatmul.bf16.gmra.mxu2 %v13754_v20 }
 0x167   : > { %v1671_v19 = vpack.c.bf16 %v1389_v6, %v1387_v59  ;;  %1651 = vmatmul.bf16.gmra.mxu3 %v13765_v61  ;;  %2167 = vmatpush.bf16.msra.mxu0 %v1668_v57 }
 0x169   : > { %2375 = vmatpush.bf16.msra.mxu1 %v1671_v19  ;;  %v1467_v48 = vpop.f32.mrf.mxu2 }
 0x16a   : > { %v1501_v30 = vpop.f32.mrf.mxu3  ;;  %v14034_v34 = vpop.f32.mrf.mxu0 }
 0x16b   : > { %v14036_v2 = vadd.f32 %v1501_v30, %v1467_v48  ;;  %2168 = vmatpush.bf16.msra.mxu0 %v14006_v43  ;;  %v14039_v13 = vpop.f32.mrf.mxu1 }
 0x16d   : > { %2376 = vmatpush.bf16.msra.mxu1 %v1669_v27 }
 0x16f   : > { %2169 = vmatpush.bf16.msra.mxu0 %v13995_v32 }
 0x171   : > { %2377 = vmatpush.bf16.msra.mxu1 %v14014_v45  ;;  %v14043_v20 = vpop.f32.mrf.mxu2 }
 0x172   : > { %v14045_v61 = vpop.f32.mrf.mxu3  ;;  %v1404_v53 = vpop.f32.mrf.mxu0 }
 0x173   : > { %2170 = vmatpush.bf16.msra.mxu0 %v13983_v33  ;;  %v1438_v39 = vpop.f32.mrf.mxu1 }
 0x174   : > { %v14048_v42 = vadd.f32 %v1438_v39, %v1404_v53 }
 0x175   : > { %2378 = vmatpush.bf16.msra.mxu1 %v14002_v8  ;;  %1554 = vmatmul.bf16.gmra.mxu0 %v13794_v3 }
 0x176   : > { %1588 = vmatmul.bf16.gmra.mxu1 %v13798_v7  ;;  %1622 = vmatmul.bf16.gmra.mxu2 %v13794_v3 }
 0x177   : > { %3482 = vmatpush.bf16.msrb.mxu0 %v1670_v36  ;;  %1656 = vmatmul.bf16.gmra.mxu3 %v13798_v7 }
 0x179   : > { %2379 = vmatpush.bf16.msra.mxu1 %v13991_v22  ;;  %v1472_v49 = vpop.f32.mrf.mxu2 }
 0x17a   : > { %v1506_v52 = vpop.f32.mrf.mxu3  ;;  %v14056_v51 = vpop.f32.mrf.mxu0 }
 0x17b   : > { %3483 = vmatpush.bf16.msrb.mxu0 %v1668_v57  ;;  %v1507_v60 = vadd.f32 %v1506_v52, %v1472_v49  ;;  %v14058_v11 = vpop.f32.mrf.mxu1 }
 0x17d   : > { %3691 = vmatpush.bf16.msrb.mxu1 %v1671_v19 }
 0x17f   : > { %3484 = vmatpush.bf16.msrb.mxu0 %v14006_v43 }
 0x181   : > { %3692 = vmatpush.bf16.msrb.mxu1 %v1669_v27  ;;  %v14062_v12 = vpop.f32.mrf.mxu2 }
 0x182   : > { %v14064_v3 = vpop.f32.mrf.mxu3  ;;  %v1409_v7 = vpop.f32.mrf.mxu0 }
 0x183   : > { %3485 = vmatpush.bf16.msrb.mxu0 %v13995_v32  ;;  %v1443_v17 = vpop.f32.mrf.mxu1 }
 0x184   : > { %v14067_v5 = vadd.f32 %v1443_v17, %v1409_v7 }
 0x185   : > { %3693 = vmatpush.bf16.msrb.mxu1 %v14014_v45 }
 0x187   : > { %3486 = vmatpush.bf16.msrb.mxu0 %v13983_v33 }
 0x189   : > { %3694 = vmatpush.bf16.msrb.mxu1 %v14002_v8  ;;  %v1477_v29 = vpop.f32.mrf.mxu2 }
 0x18a   : > { %v1511_v38 = vpop.f32.mrf.mxu3  ;;  %v14072_v43 = vpop.f32.mrf.mxu0 }
 0x18b   : > { %v14074_v32 = vadd.f32 %v1511_v38, %v1477_v29  ;;  %v14076_v1 = vpop.f32.mrf.mxu1 }
 0x18d   : > { %3695 = vmatpush.bf16.msrb.mxu1 %v13991_v22 }
 0x191   : > { %v14078_v50 = vpop.f32.mrf.mxu2 }
 0x192   : > { %v14080_v45 = vpop.f32.mrf.mxu3  ;;  %v1414_v56 = vpop.f32.mrf.mxu0 }
 0x193   : > { %v1448_v58 = vpop.f32.mrf.mxu1 }
 0x194   : > { %v14082_v23 = vadd.f32 %v1448_v58, %v1414_v56 }
 0x199   : > { %v1482_v33 = vpop.f32.mrf.mxu2 }
 0x19a   : > { %v1516_v8 = vpop.f32.mrf.mxu3  ;;  %v1416_v57 = vpop.f32.mrf.mxu0 }
 0x19b   : > { %v14084_v35 = vadd.f32 %v1516_v8, %v1482_v33  ;;  %v1450_v22 = vpop.f32.mrf.mxu1 }
 0x1a1   : > { %v14086_v47 = vpop.f32.mrf.mxu2 }
 0x1a2   : > { %v14088_v62 = vpop.f32.mrf.mxu3  ;;  %v1419_v37 = vpop.f32.mrf.mxu0 }
 0x1a3   : > { %v1453_v9 = vpop.f32.mrf.mxu1 }
 0x1a4   : > { %v1454_v10 = vadd.f32 %v1453_v9, %v1419_v37 }
 0x1a9   : > { %v1487_v15 = vpop.f32.mrf.mxu2 }
 0x1aa   : > { %v1521_v26 = vpop.f32.mrf.mxu3  ;;  %v1421_v21 = vpop.f32.mrf.mxu0 }
 0x1ab   : > { %v14090_v63 = vadd.f32 %v1521_v26, %v1487_v15  ;;  %v1455_v27 = vpop.f32.mrf.mxu1 }
 0x1b1   : > { %v14092_v4 = vpop.f32.mrf.mxu2 }
 0x1b2   : > { %v14094_v25 = vpop.f32.mrf.mxu3  ;;  %v1535_v31 = vpop.f32.mrf.mxu0 }
 0x1b3   : > { %v1536_v41 = vadd.f32 %v1535_v31, %v14026_v0  ;;  %v1569_v14 = vpop.f32.mrf.mxu1 }
 0x1b5   : > { %v14097_v54 = vadd.f32 %v1569_v14, %v1536_v41 }
 0x1b7   : > { %20774 = vst [vmem:[#allocation16_spill] sm:$0xff] %v14097_v54 }
 0x1b9   : > { %v1603_v18 = vpop.f32.mrf.mxu2 }
 0x1ba   : > { %v1604_v40 = vadd.f32 %v1603_v18, %v14036_v2  ;;  %v1637_v36 = vpop.f32.mrf.mxu3  ;;  %v14100_v28 = vpop.f32.mrf.mxu0 }
 0x1bb   : > { %v14102_v24 = vpop.f32.mrf.mxu1 }
 0x1bc   : > { %v14104_v55 = vadd.f32 %v1637_v36, %v1604_v40  ;;  %v12131_v40 = vld [vmem:[%s20666_s4] sm:$0xff]  ;;  %v1451_v36 = vadd.f32 %v1450_v22, %v1416_v57 }
 0x1bd   : > { %10305 = vmatmul.msk.bf16.vlgmr.msra.gmra.mxu0 %vm2042_vm0, %v12131_v40  ;;  %10345 = vmatmul.msk.bf16.vlgmr.msra.gmra.mxu1 %vm2042_vm0, %v12131_v40  ;;  %v1441_v40 = vadd.f32 %v14058_v11, %v14056_v51  ;;  %v1436_v51 = vadd.f32 %v14039_v13, %v14034_v34  ;;  %v12132_v34 = vld [vmem:[%s20666_s4 + $0x8] sm:$0xff] }
 0x1be   : > { %20775 = vst [vmem:[#allocation17_spill] sm:$0xff] %v14104_v55 }
 0x1c1   : > { %v14106_v16 = vpop.f32.mrf.mxu2 }
 0x1c2   : > { %v14108_v44 = vpop.f32.mrf.mxu3  ;;  %v1540_v46 = vpop.f32.mrf.mxu0 }
 0x1c3   : > { %20776 = vst [vmem:[#allocation18_spill] sm:$0xff] %v14108_v44  ;;  %v1541_v0 = vadd.f32 %v1540_v46, %v14048_v42  ;;  %v1574_v59 = vpop.f32.mrf.mxu1  ;;  %v1456_v46 = vadd.f32 %v1455_v27, %v1421_v21  ;;  %v1446_v44 = vadd.f32 %v14076_v1, %v14072_v43  ;;  %v1519_v27 = vadd.f32 %v14088_v62, %v14086_v47 }
 0x1c4   : > { %v1514_v47 = vadd.f32 %v14080_v45, %v14078_v50  ;;  %v1509_v50 = vadd.f32 %v14064_v3, %v14062_v12 }
 0x1c5   : > { %v14111_v6 = vadd.f32 %v1574_v59, %v1541_v0 }
 0x1c9   : > { %v1608_v19 = vpop.f32.mrf.mxu2 }
 0x1ca   : > { %v1609_v48 = vadd.f32 %v1608_v19, %v1507_v60  ;;  %v1642_v30 = vpop.f32.mrf.mxu3  ;;  %v1542_v2 = vpop.f32.mrf.mxu0 }
 0x1cb   : > { %v14113_v53 = vpop.f32.mrf.mxu1 }
 0x1cc   : > { %v14115_v39 = vadd.f32 %v1642_v30, %v1609_v48 }
 0x1cd   : > { %10306 = vmatmul.msk.bf16.gmra.mxu0 %vm2042_vm0, %v12132_v34  ;;  %10346 = vmatmul.msk.bf16.gmra.mxu1 %vm2042_vm0, %v12132_v34 }
 0x1ce   : > { %20777 = vst [vmem:[#allocation20_spill] sm:$0xff] %v14115_v39 }
 0x1d1   : > { %v14117_v49 = vpop.f32.mrf.mxu2 }
 0x1d2   : > { %v14119_v52 = vpop.f32.mrf.mxu3  ;;  %v1545_v7 = vpop.f32.mrf.mxu0  ;;  %v1611_v13 = vadd.f32 %v14117_v49, %v1509_v50 }
 0x1d3   : > { %20778 = vst [vmem:[#allocation22_spill] sm:$0xff] %v14119_v52  ;;  %v1579_v17 = vpop.f32.mrf.mxu1  ;;  %v1546_v43 = vadd.f32 %v1545_v7, %v14067_v5 }
 0x1d5   : > { %v1580_v11 = vadd.f32 %v1579_v17, %v1546_v43 }
 0x1d9   : > { %v14121_v29 = vpop.f32.mrf.mxu2 }
 0x1da   : > { %v14123_v42 = vpop.f32.mrf.mxu3  ;;  %v1547_v38 = vpop.f32.mrf.mxu0  ;;  %v1614_v45 = vadd.f32 %v14121_v29, %v14074_v32  ;;  %v1504_v32 = vadd.f32 %v14045_v61, %v14043_v20  ;;  %v20779_v29 = vld [vmem:[#allocation22_spill] sm:$0xff]  ;;  %v20782_v20 = vld [vmem:[#allocation20_spill] sm:$0xff] }
 0x1db   : > { %v1581_v56 = vpop.f32.mrf.mxu1  ;;  %v1548_v22 = vadd.f32 %v1547_v38, %v1446_v44 }
 0x1dc   : > { %v1606_v49 = vadd.f32 %v14106_v16, %v1504_v32  ;;  %v20783_v16 = vld [vmem:[#allocation17_spill] sm:$0xff] }
 0x1e1   : > { %v1615_v58 = vpop.f32.mrf.mxu2 }
 0x1e2   : > { %v14125_v60 = vpop.f32.mrf.mxu3  ;;  %v1550_v33 = vpop.f32.mrf.mxu0  ;;  %v1616_v5 = vadd.f32 %v1615_v58, %v1514_v47  ;;  %v1645_v58 = vadd.f32 %v20779_v29, %v1611_v13 }
 0x1e3   : > { %v1584_v8 = vpop.f32.mrf.mxu1  ;;  %v1551_v54 = vadd.f32 %v1550_v33, %v14082_v23 }
 0x1e4   : > { %v1675_v61 = vpack.c.bf16 %v1645_v58, %v20782_v20 }
 0x1e5   : > { %v1585_v1 = vadd.f32 %v1584_v8, %v1551_v54  ;;  %v20780_v8 = vld [vmem:[#allocation16_spill] sm:$0xff] }
 0x1e9   : > { %v1618_v37 = vpop.f32.mrf.mxu2 }
 0x1ea   : > { %v1652_v9 = vpop.f32.mrf.mxu3  ;;  %v1552_v15 = vpop.f32.mrf.mxu0  ;;  %v1619_v62 = vadd.f32 %v1618_v37, %v14084_v35 }
 0x1eb   : > { %v1586_v26 = vpop.f32.mrf.mxu1  ;;  %v1553_v30 = vadd.f32 %v1552_v15, %v1451_v36  ;;  %v12135_v36 = vld [vmem:[%s20666_s4 + $0x20] sm:$0xff] }
 0x1ec   : > { %v1653_v35 = vadd.f32 %v1652_v9, %v1619_v62 }
 0x1f1   : > { %v1620_v31 = vpop.f32.mrf.mxu2 }
 0x1f2   : > { %v1654_v41 = vpop.f32.mrf.mxu3  ;;  %v1555_v14 = vpop.f32.mrf.mxu0 }
 0x1f3   : > { %v1589_v18 = vpop.f32.mrf.mxu1  ;;  %v1556_v0 = vadd.f32 %v1555_v14, %v1454_v10  ;;  %v1587_v10 = vadd.f32 %v1586_v26, %v1553_v30  ;;  %v1524_v14 = vadd.f32 %v14094_v25, %v14092_v4  ;;  %v12133_v26 = vld [vmem:[%s20666_s4 + $0x10] sm:$0xff]  ;;  %v12138_v30 = vld [vmem:[%s20666_s4 + $0x38] sm:$0xff] }
 0x1f4   : > { %10307 = vmatmul.msk.bf16.gmra.mxu0 %vm2042_vm0, %v12133_v26  ;;  %10347 = vmatmul.msk.bf16.gmra.mxu1 %vm2042_vm0, %v12133_v26 }
 0x1f5   : > { %v1590_v52 = vadd.f32 %v1589_v18, %v1556_v0  ;;  %v1678_v38 = vpack.c.bf16 %v1587_v10, %v1585_v1  ;;  %v12173_v18 = vld [vmem:[%s20667_s5 + $0x10] sm:$0xff]  ;;  %v12136_v0 = vld [vmem:[%s20666_s4 + $0x28] sm:$0xff] }
 0x1f6   : > { %v12140_v1 = vld [vmem:[%s20666_s4 + $0x48] sm:$0xff] }
 0x1f9   : > { %v1623_v59 = vpop.f32.mrf.mxu2 }
 0x1fa   : > { %v1657_v19 = vpop.f32.mrf.mxu3  ;;  %v1557_v48 = vpop.f32.mrf.mxu0  ;;  %v1624_v15 = vadd.f32 %v1623_v59, %v14090_v63  ;;  %v12175_v59 = vld [vmem:[%s20667_s5 + $0x20] sm:$0xff] }
 0x1fb   : > { %v1558_v55 = vadd.f32 %v1557_v48, %v1456_v46  ;;  %v1591_v39 = vpop.f32.mrf.mxu1  ;;  %v12174_v46 = vld [vmem:[%s20667_s5 + $0x18] sm:$0xff]  ;;  %v12176_v48 = vld [vmem:[%s20667_s5 + $0x28] sm:$0xff] }
 0x1fc   : > { %v1658_v63 = vadd.f32 %v1657_v19, %v1624_v15  ;;  %v12137_v19 = vld [vmem:[%s20666_s4 + $0x30] sm:$0xff]  ;;  %v12178_v15 = vld [vmem:[%s20667_s5 + $0x38] sm:$0xff] }
 0x1fd   : > { %v1592_v57 = vadd.f32 %v1591_v39, %v1558_v55  ;;  %v1621_v55 = vadd.f32 %v1620_v31, %v1519_v27  ;;  %v1543_v39 = vadd.f32 %v1542_v2, %v1441_v40  ;;  %v1538_v2 = vadd.f32 %v14100_v28, %v1436_v51  ;;  %v12172_v31 = vld [vmem:[%s20667_s5 + $0x8] sm:$0xff] }
 0x1fe   : > { %v1650_v28 = vadd.f32 %v14125_v60, %v1616_v5  ;;  %v12180_v5 = vld [vmem:[%s20667_s5 + $0x48] sm:$0xff] }
 0x1ff   : > { %v1680_v21 = vpack.c.bf16 %v1592_v57, %v1590_v52  ;;  %v1582_v52 = vadd.f32 %v1581_v56, %v1548_v22  ;;  %v1655_v25 = vadd.f32 %v1654_v41, %v1621_v55  ;;  %v1577_v7 = vadd.f32 %v14113_v53, %v1543_v39  ;;  %v12134_v41 = vld [vmem:[%s20666_s4 + $0x18] sm:$0xff]  ;;  %v12177_v57 = vld [vmem:[%s20667_s5 + $0x30] sm:$0xff] }
 0x200   : > { %v1572_v12 = vadd.f32 %v14102_v24, %v1538_v2  ;;  %v1648_v53 = vadd.f32 %v14123_v42, %v1614_v45  ;;  %v12171_v24 = vld [vmem:[%s20667_s5] sm:$0xff]  ;;  %v12142_v45 = vld [vmem:[%s20666_s4 + $0x58] sm:$0xff] }
 0x201   : > { %v1625_v23 = vpop.f32.mrf.mxu2  ;;  %2904 = vmatpush.bf16.msra.mxu2 %v1680_v21  ;;  %v1676_v56 = vpack.c.bf16 %v1582_v52, %v1580_v11  ;;  %v1679_v17 = vpack.c.bf16 %v1655_v25, %v1653_v35  ;;  %v1674_v3 = vpack.c.bf16 %v1577_v7, %v14111_v6  ;;  %v20781_v6 = vld [vmem:[#allocation18_spill] sm:$0xff] }
 0x202   : > { %v1626_v44 = vadd.f32 %v1625_v23, %v1524_v14  ;;  %v1659_v33 = vpop.f32.mrf.mxu3  ;;  %v1677_v60 = vpack.c.bf16 %v1650_v28, %v1648_v53  ;;  %v1672_v37 = vpack.c.bf16 %v1572_v12, %v20780_v8  ;;  %v1640_v9 = vadd.f32 %v20781_v6, %v1606_v49  ;;  %v12143_v8 = vld [vmem:[%s20666_s4 + $0x60] sm:$0xff] }
 0x204   : > { %v1660_v4 = vadd.f32 %v1659_v33, %v1626_v44  ;;  %v1673_v42 = vpack.c.bf16 %v1640_v9, %v20783_v16  ;;  %10308 = vmatmul.msk.bf16.gmra.mxu0 %vm2042_vm0, %v12134_v41  ;;  %10348 = vmatmul.msk.bf16.gmra.mxu1 %vm2042_vm0, %v12134_v41  ;;  %v12179_v44 = vld [vmem:[%s20667_s5 + $0x40] sm:$0xff]  ;;  %v12141_v33 = vld [vmem:[%s20666_s4 + $0x50] sm:$0xff]  ;;  %v12182_v16 = vld [vmem:[%s20667_s5 + $0x58] sm:$0xff] }
 0x205   : > { %2905 = vmatpush.bf16.msra.mxu2 %v1678_v38 }
 0x206   : > { %v1681_v54 = vpack.c.bf16 %v1660_v4, %v1658_v63 }
 0x208   : > { %3113 = vmatpush.bf16.msra.mxu3 %v1681_v54 }
 0x209   : > { %2906 = vmatpush.bf16.msra.mxu2 %v1676_v56 }
 0x20c   : > { %3114 = vmatpush.bf16.msra.mxu3 %v1679_v17 }
 0x20d   : > { %2907 = vmatpush.bf16.msra.mxu2 %v1674_v3 }
 0x210   : > { %3115 = vmatpush.bf16.msra.mxu3 %v1677_v60 }
 0x211   : > { %2908 = vmatpush.bf16.msra.mxu2 %v1672_v37 }
 0x214   : > { %3116 = vmatpush.bf16.msra.mxu3 %v1675_v61  ;;  %10545 = vmatmul.msk.bf16.vlgmr.msra.gmra.mxu2 %vm2042_vm0, %v12171_v24 }
 0x215   : > { %3900 = vmatpush.bf16.msrb.mxu2 %v1680_v21  ;;  %10309 = vmatmul.msk.bf16.gmra.mxu0 %vm2042_vm0, %v12135_v36  ;;  %v12139_v21 = vld [vmem:[%s20666_s4 + $0x40] sm:$0xff] }
 0x216   : > { %10349 = vmatmul.msk.bf16.gmra.mxu1 %vm2042_vm0, %v12135_v36 }
 0x218   : > { %3117 = vmatpush.bf16.msra.mxu3 %v1673_v42 }
 0x219   : > { %3901 = vmatpush.bf16.msrb.mxu2 %v1678_v38 }
 0x21b   : > { %10585 = vmatmul.msk.bf16.vlgmr.msra.gmra.mxu3 %vm2042_vm0, %v12171_v24 }
 0x21c   : > { %4109 = vmatpush.bf16.msrb.mxu3 %v1681_v54 }
 0x21d   : > { %3902 = vmatpush.bf16.msrb.mxu2 %v1676_v56 }
 0x220   : > { %4110 = vmatpush.bf16.msrb.mxu3 %v1679_v17 }
 0x221   : > { %3903 = vmatpush.bf16.msrb.mxu2 %v1674_v3  ;;  %v12181_v3 = vld [vmem:[%s20667_s5 + $0x50] sm:$0xff] }
 0x224   : > { %4111 = vmatpush.bf16.msrb.mxu3 %v1677_v60  ;;  %10546 = vmatmul.msk.bf16.gmra.mxu2 %vm2042_vm0, %v12172_v31 }
 0x225   : > { %3904 = vmatpush.bf16.msrb.mxu2 %v1672_v37  ;;  %10310 = vmatmul.msk.bf16.gmra.mxu0 %vm2042_vm0, %v12136_v0 }
 0x226   : > { %10350 = vmatmul.msk.bf16.gmra.mxu1 %vm2042_vm0, %v12136_v0 }
 0x228   : > { %4112 = vmatpush.bf16.msrb.mxu3 %v1675_v61 }
 0x22b   : > { %10586 = vmatmul.msk.bf16.gmra.mxu3 %vm2042_vm0, %v12172_v31 }
 0x22c   : > { %4113 = vmatpush.bf16.msrb.mxu3 %v1673_v42 }
 0x234   : > { %10547 = vmatmul.msk.bf16.gmra.mxu2 %vm2042_vm0, %v12173_v18 }
 0x235   : > { %10311 = vmatmul.msk.bf16.gmra.mxu0 %vm2042_vm0, %v12137_v19 }
 0x236   : > { %10351 = vmatmul.msk.bf16.gmra.mxu1 %vm2042_vm0, %v12137_v19 }
 0x23a   : > { %v2172_v22 = vpop.f32.mrf.mxu0  ;;  %v2381_v10 = vpop.f32.mrf.mxu1 }
 0x23b   : > { %10587 = vmatmul.msk.bf16.gmra.mxu3 %vm2042_vm0, %v12173_v18 }
 0x242   : > { %v2174_v27 = vpop.f32.mrf.mxu0  ;;  %v2383_v14 = vpop.f32.mrf.mxu1 }
 0x244   : > { %10548 = vmatmul.msk.bf16.gmra.mxu2 %vm2042_vm0, %v12174_v46 }
 0x245   : > { %10312 = vmatmul.msk.bf16.gmra.mxu0 %vm2042_vm0, %v12138_v30 }
 0x246   : > { %10352 = vmatmul.msk.bf16.gmra.mxu1 %vm2042_vm0, %v12138_v30 }
 0x24a   : > { %v2177_v40 = vpop.f32.mrf.mxu0  ;;  %v2386_v43 = vpop.f32.mrf.mxu1 }
 0x24b   : > { %10588 = vmatmul.msk.bf16.gmra.mxu3 %vm2042_vm0, %v12174_v46  ;;  %v12144_v46 = vld [vmem:[%s20666_s4 + $0x68] sm:$0xff] }
 0x252   : > { %v2179_v23 = vpop.f32.mrf.mxu0  ;;  %v2388_v55 = vpop.f32.mrf.mxu1 }
 0x254   : > { %10549 = vmatmul.msk.bf16.gmra.mxu2 %vm2042_vm0, %v12175_v59 }
 0x255   : > { %10313 = vmatmul.msk.bf16.gmra.mxu0 %vm2042_vm0, %v12139_v21 }
 0x256   : > { %10353 = vmatmul.msk.bf16.gmra.mxu1 %vm2042_vm0, %v12139_v21 }
 0x25b   : > { %10589 = vmatmul.msk.bf16.gmra.mxu3 %vm2042_vm0, %v12175_v59 }
 0x264   : > { %10550 = vmatmul.msk.bf16.gmra.mxu2 %vm2042_vm0, %v12176_v48 }
 0x265   : > { %10314 = vmatmul.msk.bf16.gmra.mxu0 %vm2042_vm0, %v12140_v1 }
 0x266   : > { %10354 = vmatmul.msk.bf16.gmra.mxu1 %vm2042_vm0, %v12140_v1 }
 0x26b   : > { %10590 = vmatmul.msk.bf16.gmra.mxu3 %vm2042_vm0, %v12176_v48 }
 0x271   : > { %v2182_v52 = vpop.f32.mrf.mxu0  ;;  %v2391_v47 = vpop.f32.mrf.mxu1 }
 0x274   : > { %10551 = vmatmul.msk.bf16.gmra.mxu2 %vm2042_vm0, %v12177_v57 }
 0x275   : > { %10315 = vmatmul.msk.bf16.gmra.mxu0 %vm2042_vm0, %v12141_v33 }
 0x276   : > { %10355 = vmatmul.msk.bf16.gmra.mxu1 %vm2042_vm0, %v12141_v33  ;;  %v12184_v33 = vld [vmem:[%s20667_s5 + $0x68] sm:$0xff] }
 0x279   : > { %v2184_v51 = vpop.f32.mrf.mxu0  ;;  %v2393_v25 = vpop.f32.mrf.mxu1 }
 0x27b   : > { %10591 = vmatmul.msk.bf16.gmra.mxu3 %vm2042_vm0, %v12177_v57 }
 0x281   : > { %v2187_v56 = vpop.f32.mrf.mxu0  ;;  %v2396_v35 = vpop.f32.mrf.mxu1 }
 0x284   : > { %10552 = vmatmul.msk.bf16.gmra.mxu2 %vm2042_vm0, %v12178_v15 }
 0x285   : > { %10316 = vmatmul.msk.bf16.gmra.mxu0 %vm2042_vm0, %v12142_v45 }
 0x286   : > { %10356 = vmatmul.msk.bf16.gmra.mxu1 %vm2042_vm0, %v12142_v45 }
 0x289   : > { %v2189_v17 = vpop.f32.mrf.mxu0  ;;  %v2398_v32 = vpop.f32.mrf.mxu1 }
 0x28b   : > { %10592 = vmatmul.msk.bf16.gmra.mxu3 %vm2042_vm0, %v12178_v15 }
 0x292   : > { %v2192_v58 = vpop.f32.mrf.mxu0 }
 0x293   : > { %v2401_v37 = vpop.f32.mrf.mxu1 }
 0x294   : > { %10553 = vmatmul.msk.bf16.gmra.mxu2 %vm2042_vm0, %v12179_v44 }
 0x295   : > { %10317 = vmatmul.msk.bf16.gmra.mxu0 %vm2042_vm0, %v12143_v8 }
 0x296   : > { %10357 = vmatmul.msk.bf16.gmra.mxu1 %vm2042_vm0, %v12143_v8 }
 0x297   : > { %v2910_v39 = vpop.f32.mrf.mxu2 }
 0x298   : > { %v14256_v38 = vsub.f32 %v2172_v22, %v2910_v39  ;;  %v12183_v22 = vld [vmem:[%s20667_s5 + $0x60] sm:$0xff] }
 0x29a   : > { %v2194_v20 = vpop.f32.mrf.mxu0 }
 0x29b   : > { %10593 = vmatmul.msk.bf16.gmra.mxu3 %vm2042_vm0, %v12179_v44  ;;  %v2403_v42 = vpop.f32.mrf.mxu1 }
 0x29e   : > { %v3119_v62 = vpop.f32.mrf.mxu3 }
 0x29f   : > { %v14264_v63 = vsub.f32 %v2381_v10, %v3119_v62  ;;  %v2912_v4 = vpop.f32.mrf.mxu2 }
 0x2a0   : > { %v14266_v11 = vsub.f32 %v2174_v27, %v2912_v4 }
 0x2a2   : > { %v2197_v18 = vpop.f32.mrf.mxu0 }
 0x2a3   : > { %v2406_v0 = vpop.f32.mrf.mxu1 }
 0x2a4   : > { %10554 = vmatmul.msk.bf16.gmra.mxu2 %vm2042_vm0, %v12180_v5 }
 0x2a5   : > { %10318 = vmatmul.msk.bf16.gmra.mxu0 %vm2042_vm0, %v12144_v46 }
 0x2a6   : > { %v3121_v54 = vpop.f32.mrf.mxu3  ;;  %10358 = vmatmul.msk.bf16.gmra.mxu1 %vm2042_vm0, %v12144_v46 }
 0x2a7   : > { %v14272_v2 = vsub.f32 %v2383_v14, %v3121_v54  ;;  %v2915_v7 = vpop.f32.mrf.mxu2  ;;  %v12146_v54 = vld [vmem:[%s20666_s4 + $0x78] sm:$0xff] }
 0x2a8   : > { %v14274_v50 = vsub.f32 %v2177_v40, %v2915_v7 }
 0x2aa   : > { %v2199_v30 = vpop.f32.mrf.mxu0 }
 0x2ab   : > { %10594 = vmatmul.msk.bf16.gmra.mxu3 %vm2042_vm0, %v12180_v5  ;;  %v2408_v10 = vpop.f32.mrf.mxu1 }
 0x2ae   : > { %v3124_v34 = vpop.f32.mrf.mxu3 }
 0x2af   : > { %v14282_v13 = vsub.f32 %v2386_v43, %v3124_v34  ;;  %v2917_v28 = vpop.f32.mrf.mxu2  ;;  %v12145_v43 = vld [vmem:[%s20666_s4 + $0x70] sm:$0xff] }
 0x2b0   : > { %v14284_v12 = vsub.f32 %v2179_v23, %v2917_v28 }
 0x2b2   : > { %v2202_v15 = vpop.f32.mrf.mxu0 }
 0x2b3   : > { %v2411_v1 = vpop.f32.mrf.mxu1 }
 0x2b4   : > { %10555 = vmatmul.msk.bf16.gmra.mxu2 %vm2042_vm0, %v12181_v3 }
 0x2b5   : > { %10319 = vmatmul.msk.bf16.gmra.mxu0 %vm2042_vm0, %v12145_v43 }
 0x2b6   : > { %v3126_v53 = vpop.f32.mrf.mxu3  ;;  %10359 = vmatmul.msk.bf16.gmra.mxu1 %vm2042_vm0, %v12145_v43 }
 0x2b7   : > { %v14290_v49 = vsub.f32 %v2388_v55, %v3126_v53  ;;  %v2920_v29 = vpop.f32.mrf.mxu2 }
 0x2b8   : > { %v14292_v60 = vsub.f32 %v2182_v52, %v2920_v29 }
 0x2ba   : > { %v2204_v39 = vpop.f32.mrf.mxu0 }
 0x2bb   : > { %10595 = vmatmul.msk.bf16.gmra.mxu3 %vm2042_vm0, %v12181_v3 }
 0x2be   : > { %v3129_v24 = vpop.f32.mrf.mxu3 }
 0x2bf   : > { %v14300_v6 = vsub.f32 %v2391_v47, %v3129_v24  ;;  %v2922_v9 = vpop.f32.mrf.mxu2  ;;  %v2413_v47 = vpop.f32.mrf.mxu1 }
 0x2c0   : > { %v14302_v61 = vsub.f32 %v2184_v51, %v2922_v9 }
 0x2c2   : > { %v2207_v5 = vpop.f32.mrf.mxu0 }
 0x2c4   : > { %10556 = vmatmul.msk.bf16.gmra.mxu2 %vm2042_vm0, %v12182_v16 }
 0x2c5   : > { %10320 = vmatmul.msk.bf16.gmra.mxu0 %vm2042_vm0, %v12146_v54 }
 0x2c6   : > { %v3131_v26 = vpop.f32.mrf.mxu3  ;;  %10360 = vmatmul.msk.bf16.gmra.mxu1 %vm2042_vm0, %v12146_v54 }
 0x2c7   : > { %v14308_v31 = vsub.f32 %v2393_v25, %v3131_v26  ;;  %v2925_v41 = vpop.f32.mrf.mxu2  ;;  %v2416_v7 = vpop.f32.mrf.mxu1 }
 0x2c8   : > { %v14310_v36 = vsub.f32 %v2187_v56, %v2925_v41  ;;  %v12186_v41 = vld [vmem:[%s20667_s5 + $0x78] sm:$0xff] }
 0x2ca   : > { %v2209_v34 = vpop.f32.mrf.mxu0 }
 0x2cb   : > { %10596 = vmatmul.msk.bf16.gmra.mxu3 %vm2042_vm0, %v12182_v16 }
 0x2ce   : > { %v3134_v59 = vpop.f32.mrf.mxu3 }
 0x2cf   : > { %v14318_v19 = vsub.f32 %v2396_v35, %v3134_v59  ;;  %v2927_v48 = vpop.f32.mrf.mxu2  ;;  %v2418_v3 = vpop.f32.mrf.mxu1 }
 0x2d0   : > { %v14320_v57 = vsub.f32 %v2189_v17, %v2927_v48  ;;  %v12185_v17 = vld [vmem:[%s20667_s5 + $0x70] sm:$0xff] }
 0x2d4   : > { %10557 = vmatmul.msk.bf16.gmra.mxu2 %vm2042_vm0, %v12183_v22 }
 0x2d6   : > { %v3136_v21 = vpop.f32.mrf.mxu3 }
 0x2d7   : > { %v14326_v27 = vsub.f32 %v2398_v32, %v3136_v21  ;;  %v2930_v14 = vpop.f32.mrf.mxu2  ;;  %v2421_v24 = vpop.f32.mrf.mxu1 }
 0x2d8   : > { %v14328_v40 = vsub.f32 %v2192_v58, %v2930_v14  ;;  %v2212_v58 = vpop.f32.mrf.mxu0 }
 0x2db   : > { %10597 = vmatmul.msk.bf16.gmra.mxu3 %vm2042_vm0, %v12183_v22  ;;  %v12148_v22 = vld [vmem:[%s20666_s4 + $0x88] sm:$0xff] }
 0x2de   : > { %v3139_v23 = vpop.f32.mrf.mxu3 }
 0x2df   : > { %v14336_v55 = vsub.f32 %v2401_v37, %v3139_v23  ;;  %v2932_v44 = vpop.f32.mrf.mxu2  ;;  %v12147_v37 = vld [vmem:[%s20666_s4 + $0x80] sm:$0xff] }
 0x2e0   : > { %v14338_v52 = vsub.f32 %v2194_v20, %v2932_v44  ;;  %10321 = vmatmul.msk.bf16.gmra.mxu0 %vm2042_vm0, %v12147_v37  ;;  %10361 = vmatmul.msk.bf16.gmra.mxu1 %vm2042_vm0, %v12147_v37  ;;  %v12187_v23 = vld [vmem:[%s20667_s5 + $0x80] sm:$0xff] }
 0x2e4   : > { %10558 = vmatmul.msk.bf16.gmra.mxu2 %vm2042_vm0, %v12184_v33 }
 0x2e6   : > { %v3141_v62 = vpop.f32.mrf.mxu3 }
 0x2e7   : > { %v14344_v4 = vsub.f32 %v2403_v42, %v3141_v62  ;;  %v2935_v51 = vpop.f32.mrf.mxu2  ;;  %v2214_v42 = vpop.f32.mrf.mxu0 }
 0x2e8   : > { %v14346_v25 = vsub.f32 %v2197_v18, %v2935_v51  ;;  %v2423_v18 = vpop.f32.mrf.mxu1 }
 0x2eb   : > { %10598 = vmatmul.msk.bf16.gmra.mxu3 %vm2042_vm0, %v12184_v33 }
 0x2ee   : > { %v3144_v56 = vpop.f32.mrf.mxu3 }
 0x2ef   : > { %v14354_v45 = vsub.f32 %v2406_v0, %v3144_v56  ;;  %v2937_v35 = vpop.f32.mrf.mxu2  ;;  %v2217_v48 = vpop.f32.mrf.mxu0 }
 0x2f0   : > { %v14356_v28 = vsub.f32 %v2199_v30, %v2937_v35  ;;  %10322 = vmatmul.msk.bf16.gmra.mxu0 %vm2042_vm0, %v12148_v22  ;;  %10362 = vmatmul.msk.bf16.gmra.mxu1 %vm2042_vm0, %v12148_v22 }
 0x2f4   : > { %10559 = vmatmul.msk.bf16.gmra.mxu2 %vm2042_vm0, %v12185_v17 }
 0x2f6   : > { %v3146_v32 = vpop.f32.mrf.mxu3 }
 0x2f7   : > { %v14362_v53 = vsub.f32 %v2408_v10, %v3146_v32  ;;  %v2940_v29 = vpop.f32.mrf.mxu2  ;;  %v2426_v10 = vpop.f32.mrf.mxu1 }
 0x2f8   : > { %v14364_v8 = vsub.f32 %v2202_v15, %v2940_v29  ;;  %v2219_v43 = vpop.f32.mrf.mxu0 }
 0x2fb   : > { %10599 = vmatmul.msk.bf16.gmra.mxu3 %vm2042_vm0, %v12185_v17 }
 0x2fe   : > { %v3149_v9 = vpop.f32.mrf.mxu3 }
 0x2ff   : > { %v14372_v20 = vsub.f32 %v2411_v1, %v3149_v9  ;;  %v2942_v16 = vpop.f32.mrf.mxu2  ;;  %v2428_v44 = vpop.f32.mrf.mxu1 }
 0x300   : > { %v14374_v26 = vsub.f32 %v2204_v39, %v2942_v16  ;;  %v2222_v62 = vpop.f32.mrf.mxu0 }
 0x304   : > { %10560 = vmatmul.msk.bf16.gmra.mxu2 %vm2042_vm0, %v12186_v41 }
 0x306   : > { %v3151_v46 = vpop.f32.mrf.mxu3 }
 0x307   : > { %v14380_v0 = vsub.f32 %v2413_v47, %v3151_v46  ;;  %v2945_v59 = vpop.f32.mrf.mxu2  ;;  %v2431_v54 = vpop.f32.mrf.mxu1 }
 0x308   : > { %v14382_v30 = vsub.f32 %v2207_v5, %v2945_v59  ;;  %v12149_v5 = vld [vmem:[%s20666_s4 + $0x90] sm:$0xff] }
 0x309   : > { %10323 = vmatmul.msk.bf16.gmra.mxu0 %vm2042_vm0, %v12149_v5  ;;  %10363 = vmatmul.msk.bf16.gmra.mxu1 %vm2042_vm0, %v12149_v5 }
 0x30b   : > { %10600 = vmatmul.msk.bf16.gmra.mxu3 %vm2042_vm0, %v12186_v41 }
 0x30e   : > { %v3154_v21 = vpop.f32.mrf.mxu3 }
 0x30f   : > { %v14390_v14 = vsub.f32 %v2416_v7, %v3154_v21  ;;  %v2947_v15 = vpop.f32.mrf.mxu2  ;;  %v2433_v32 = vpop.f32.mrf.mxu1 }
 0x310   : > { %v14392_v1 = vsub.f32 %v2209_v34, %v2947_v15  ;;  %v2224_v34 = vpop.f32.mrf.mxu0 }
 0x314   : > { %10561 = vmatmul.msk.bf16.gmra.mxu2 %vm2042_vm0, %v12187_v23 }
 0x316   : > { %v3156_v39 = vpop.f32.mrf.mxu3 }
 0x317   : > { %v14398_v33 = vsub.f32 %v2418_v3, %v3156_v39  ;;  %v2950_v47 = vpop.f32.mrf.mxu2  ;;  %v12188_v3 = vld [vmem:[%s20667_s5 + $0x88] sm:$0xff] }
 0x318   : > { %v14400_v51 = vsub.f32 %v2212_v58, %v2950_v47  ;;  %v2227_v9 = vpop.f32.mrf.mxu0 }
 0x31b   : > { %10601 = vmatmul.msk.bf16.gmra.mxu3 %vm2042_vm0, %v12187_v23 }
 0x31e   : > { %v3159_v7 = vpop.f32.mrf.mxu3 }
 0x31f   : > { %v14408_v56 = vsub.f32 %v2421_v24, %v3159_v7  ;;  %v2952_v35 = vpop.f32.mrf.mxu2  ;;  %v12150_v24 = vld [vmem:[%s20666_s4 + $0x98] sm:$0xff] }
 0x320   : > { %v14410_v17 = vsub.f32 %v2214_v42, %v2952_v35  ;;  %v2436_v42 = vpop.f32.mrf.mxu1  ;;  %10324 = vmatmul.msk.bf16.gmra.mxu0 %vm2042_vm0, %v12150_v24  ;;  %10364 = vmatmul.msk.bf16.gmra.mxu1 %vm2042_vm0, %v12150_v24  ;;  %v2229_v59 = vpop.f32.mrf.mxu0 }
 0x324   : > { %10562 = vmatmul.msk.bf16.gmra.mxu2 %vm2042_vm0, %v12188_v3 }
 0x326   : > { %v3161_v29 = vpop.f32.mrf.mxu3 }
 0x327   : > { %v14416_v58 = vsub.f32 %v2423_v18, %v3161_v29  ;;  %v2955_v37 = vpop.f32.mrf.mxu2 }
 0x328   : > { %v14418_v16 = vsub.f32 %v2217_v48, %v2955_v37  ;;  %v12189_v48 = vld [vmem:[%s20667_s5 + $0x90] sm:$0xff]  ;;  %v2438_v21 = vpop.f32.mrf.mxu1  ;;  %v2232_v47 = vpop.f32.mrf.mxu0 }
 0x32b   : > { %10602 = vmatmul.msk.bf16.gmra.mxu3 %vm2042_vm0, %v12188_v3 }
 0x32e   : > { %v3164_v41 = vpop.f32.mrf.mxu3 }
 0x32f   : > { %v14426_v46 = vsub.f32 %v2426_v10, %v3164_v41  ;;  %v2957_v18 = vpop.f32.mrf.mxu2  ;;  %v12151_v10 = vld [vmem:[%s20666_s4 + $0xa0] sm:$0xff] }
 0x330   : > { %v14428_v22 = vsub.f32 %v2219_v43, %v2957_v18  ;;  %v2441_v43 = vpop.f32.mrf.mxu1  ;;  %10325 = vmatmul.msk.bf16.gmra.mxu0 %vm2042_vm0, %v12151_v10  ;;  %10365 = vmatmul.msk.bf16.gmra.mxu1 %vm2042_vm0, %v12151_v10  ;;  %v2234_v3 = vpop.f32.mrf.mxu0 }
 0x334   : > { %10563 = vmatmul.msk.bf16.gmra.mxu2 %vm2042_vm0, %v12189_v48 }
 0x336   : > { %v3166_v15 = vpop.f32.mrf.mxu3 }
 0x337   : > { %v14434_v23 = vsub.f32 %v2428_v44, %v3166_v15  ;;  %v2960_v39 = vpop.f32.mrf.mxu2 }
 0x338   : > { %v14436_v5 = vsub.f32 %v2222_v62, %v2960_v39  ;;  %v12190_v62 = vld [vmem:[%s20667_s5 + $0x98] sm:$0xff]  ;;  %v2443_v37 = vpop.f32.mrf.mxu1 }
 0x33b   : > { %10603 = vmatmul.msk.bf16.gmra.mxu3 %vm2042_vm0, %v12189_v48  ;;  %v2237_v48 = vpop.f32.mrf.mxu0 }
 0x33e   : > { %v3169_v7 = vpop.f32.mrf.mxu3 }
 0x33f   : > { %v14444_v35 = vsub.f32 %v2431_v54, %v3169_v7  ;;  %v2962_v44 = vpop.f32.mrf.mxu2  ;;  %v12152_v54 = vld [vmem:[%s20666_s4 + $0xa8] sm:$0xff] }
 0x340   : > { %v14446_v29 = vsub.f32 %v2224_v34, %v2962_v44  ;;  %v2446_v34 = vpop.f32.mrf.mxu1  ;;  %10326 = vmatmul.msk.bf16.gmra.mxu0 %vm2042_vm0, %v12152_v54  ;;  %10366 = vmatmul.msk.bf16.gmra.mxu1 %vm2042_vm0, %v12152_v54 }
 0x343   : > { %v2239_v7 = vpop.f32.mrf.mxu0 }
 0x344   : > { %10564 = vmatmul.msk.bf16.gmra.mxu2 %vm2042_vm0, %v12190_v62 }
 0x346   : > { %v3171_v24 = vpop.f32.mrf.mxu3 }
 0x347   : > { %v14452_v41 = vsub.f32 %v2433_v32, %v3171_v24  ;;  %v2965_v18 = vpop.f32.mrf.mxu2 }
 0x348   : > { %v14454_v15 = vsub.f32 %v2227_v9, %v2965_v18  ;;  %v12191_v9 = vld [vmem:[%s20667_s5 + $0xa0] sm:$0xff]  ;;  %v2448_v24 = vpop.f32.mrf.mxu1 }
 0x349   : > { %20784 = vst [vmem:[#allocation23_spill] sm:$0xff] %v14452_v41 }
 0x34a   : > { %20785 = vst [vmem:[#allocation24_spill] sm:$0xff] %v14454_v15 }
 0x34b   : > { %10604 = vmatmul.msk.bf16.gmra.mxu3 %vm2042_vm0, %v12190_v62  ;;  %v2242_v41 = vpop.f32.mrf.mxu0 }
 0x34e   : > { %v3174_v39 = vpop.f32.mrf.mxu3 }
 0x34f   : > { %v14462_v10 = vsub.f32 %v2436_v42, %v3174_v39  ;;  %v2967_v32 = vpop.f32.mrf.mxu2  ;;  %v12153_v42 = vld [vmem:[%s20666_s4 + $0xb0] sm:$0xff] }
 0x350   : > { %v14464_v44 = vsub.f32 %v2229_v59, %v2967_v32  ;;  %v2451_v59 = vpop.f32.mrf.mxu1  ;;  %10327 = vmatmul.msk.bf16.gmra.mxu0 %vm2042_vm0, %v12153_v42  ;;  %10367 = vmatmul.msk.bf16.gmra.mxu1 %vm2042_vm0, %v12153_v42 }
 0x351   : > { %20786 = vst [vmem:[#allocation25_spill] sm:$0xff] %v14462_v10 }
 0x352   : > { %20787 = vst [vmem:[#allocation26_spill] sm:$0xff] %v14464_v44 }
 0x354   : > { %10565 = vmatmul.msk.bf16.gmra.mxu2 %vm2042_vm0, %v12191_v9 }
 0x356   : > { %v3176_v18 = vpop.f32.mrf.mxu3 }
 0x357   : > { %v14470_v15 = vsub.f32 %v2438_v21, %v3176_v18  ;;  %v2970_v62 = vpop.f32.mrf.mxu2  ;;  %v2244_v18 = vpop.f32.mrf.mxu0 }
 0x358   : > { %v14472_v54 = vsub.f32 %v2232_v47, %v2970_v62  ;;  %v12192_v47 = vld [vmem:[%s20667_s5 + $0xa8] sm:$0xff]  ;;  %v2453_v62 = vpop.f32.mrf.mxu1 }
 0x359   : > { %20788 = vst [vmem:[#allocation27_spill] sm:$0xff] %v14470_v15 }
 0x35a   : > { %20789 = vst [vmem:[#allocation28_spill] sm:$0xff] %v14472_v54 }
 0x35b   : > { %10605 = vmatmul.msk.bf16.gmra.mxu3 %vm2042_vm0, %v12191_v9 }
 0x35e   : > { %v3179_v39 = vpop.f32.mrf.mxu3 }
 0x35f   : > { %v14480_v32 = vsub.f32 %v2441_v43, %v3179_v39  ;;  %v2972_v21 = vpop.f32.mrf.mxu2  ;;  %v2247_v10 = vpop.f32.mrf.mxu0  ;;  %v12154_v43 = vld [vmem:[%s20666_s4 + $0xb8] sm:$0xff] }
 0x360   : > { %v14482_v15 = vsub.f32 %v2234_v3, %v2972_v21  ;;  %v2456_v3 = vpop.f32.mrf.mxu1  ;;  %10328 = vmatmul.msk.bf16.gmra.mxu0 %vm2042_vm0, %v12154_v43  ;;  %10368 = vmatmul.msk.bf16.gmra.mxu1 %vm2042_vm0, %v12154_v43 }
 0x361   : > { %20790 = vst [vmem:[#allocation29_spill] sm:$0xff] %v14480_v32 }
 0x362   : > { %20791 = vst [vmem:[#allocation12_spill] sm:$0xff] %v14482_v15 }
 0x364   : > { %10566 = vmatmul.msk.bf16.gmra.mxu2 %vm2042_vm0, %v12192_v47 }
 0x366   : > { %v3181_v54 = vpop.f32.mrf.mxu3 }
 0x367   : > { %v14488_v44 = vsub.f32 %v2443_v37, %v3181_v54  ;;  %v2975_v9 = vpop.f32.mrf.mxu2  ;;  %v2249_v54 = vpop.f32.mrf.mxu0 }
 0x368   : > { %v14490_v42 = vsub.f32 %v2237_v48, %v2975_v9  ;;  %v12193_v48 = vld [vmem:[%s20667_s5 + $0xb0] sm:$0xff]  ;;  %v2458_v9 = vpop.f32.mrf.mxu1 }
 0x369   : > { %20792 = vst [vmem:[#allocation13_spill] sm:$0xff] %v14488_v44 }
 0x36a   : > { %20793 = vst [vmem:[#allocation14_spill] sm:$0xff] %v14490_v42 }
 0x36b   : > { %10606 = vmatmul.msk.bf16.gmra.mxu3 %vm2042_vm0, %v12192_v47 }
 0x36e   : > { %v3184_v39 = vpop.f32.mrf.mxu3 }
 0x36f   : > { %v14498_v21 = vsub.f32 %v2446_v34, %v3184_v39  ;;  %v2977_v37 = vpop.f32.mrf.mxu2  ;;  %v2252_v32 = vpop.f32.mrf.mxu0  ;;  %v12155_v34 = vld [vmem:[%s20666_s4 + $0xc0] sm:$0xff] }
 0x370   : > { %v14500_v44 = vsub.f32 %v2239_v7, %v2977_v37  ;;  %v2461_v7 = vpop.f32.mrf.mxu1  ;;  %10329 = vmatmul.msk.bf16.gmra.mxu0 %vm2042_vm0, %v12155_v34  ;;  %10369 = vmatmul.msk.bf16.gmra.mxu1 %vm2042_vm0, %v12155_v34 }
 0x371   : > { %20794 = vst [vmem:[#allocation15_spill] sm:$0xff] %v14498_v21 }
 0x372   : > { %20795 = vst [vmem:[#allocation19_spill] sm:$0xff] %v14500_v44 }
 0x374   : > { %10567 = vmatmul.msk.bf16.gmra.mxu2 %vm2042_vm0, %v12193_v48 }
 0x376   : > { %v3186_v42 = vpop.f32.mrf.mxu3 }
 0x377   : > { %v14506_v15 = vsub.f32 %v2448_v24, %v3186_v42  ;;  %v2980_v47 = vpop.f32.mrf.mxu2  ;;  %v2254_v42 = vpop.f32.mrf.mxu0 }
 0x378   : > { %v14508_v43 = vsub.f32 %v2242_v41, %v2980_v47  ;;  %v12194_v41 = vld [vmem:[%s20667_s5 + $0xb8] sm:$0xff]  ;;  %v2463_v47 = vpop.f32.mrf.mxu1 }
 0x379   : > { %20796 = vst [vmem:[#allocation21_spill] sm:$0xff] %v14506_v15 }
 0x37a   : > { %20797 = vst [vmem:[#allocation22_spill] sm:$0xff] %v14508_v43 }
 0x37b   : > { %10607 = vmatmul.msk.bf16.gmra.mxu3 %vm2042_vm0, %v12193_v48 }
 0x37e   : > { %v3189_v39 = vpop.f32.mrf.mxu3 }
 0x37f   : > { %v14516_v37 = vsub.f32 %v2451_v59, %v3189_v39  ;;  %v2982_v24 = vpop.f32.mrf.mxu2  ;;  %v2257_v21 = vpop.f32.mrf.mxu0  ;;  %v12156_v59 = vld [vmem:[%s20666_s4 + $0xc8] sm:$0xff] }
 0x380   : > { %v14518_v15 = vsub.f32 %v2244_v18, %v2982_v24  ;;  %v2466_v18 = vpop.f32.mrf.mxu1  ;;  %10330 = vmatmul.msk.bf16.gmra.mxu0 %vm2042_vm0, %v12156_v59  ;;  %10370 = vmatmul.msk.bf16.gmra.mxu1 %vm2042_vm0, %v12156_v59 }
 0x381   : > { %20798 = vst [vmem:[#allocation16_spill] sm:$0xff] %v14516_v37 }
 0x382   : > { %20799 = vst [vmem:[#allocation18_spill] sm:$0xff] %v14518_v15 }
 0x384   : > { %10568 = vmatmul.msk.bf16.gmra.mxu2 %vm2042_vm0, %v12194_v41 }
 0x386   : > { %v3191_v43 = vpop.f32.mrf.mxu3 }
 0x387   : > { %v14524_v44 = vsub.f32 %v2453_v62, %v3191_v43  ;;  %v2985_v48 = vpop.f32.mrf.mxu2  ;;  %v2259_v43 = vpop.f32.mrf.mxu0 }
 0x388   : > { %v14526_v34 = vsub.f32 %v2247_v10, %v2985_v48  ;;  %v12195_v10 = vld [vmem:[%s20667_s5 + $0xc0] sm:$0xff]  ;;  %v2468_v48 = vpop.f32.mrf.mxu1 }
 0x389   : > { %20800 = vst [vmem:[#allocation20_spill] sm:$0xff] %v14524_v44 }
 0x38a   : > { %20801 = vst [vmem:[#allocation17_spill] sm:$0xff] %v14526_v34 }
 0x38b   : > { %10608 = vmatmul.msk.bf16.gmra.mxu3 %vm2042_vm0, %v12194_v41 }
 0x38e   : > { %v3194_v39 = vpop.f32.mrf.mxu3 }
 0x38f   : > { %v14534_v24 = vsub.f32 %v2456_v3, %v3194_v39  ;;  %v2987_v62 = vpop.f32.mrf.mxu2  ;;  %v2262_v37 = vpop.f32.mrf.mxu0  ;;  %v12157_v3 = vld [vmem:[%s20666_s4 + $0xd0] sm:$0xff] }
 0x390   : > { %v14536_v44 = vsub.f32 %v2249_v54, %v2987_v62  ;;  %v2471_v54 = vpop.f32.mrf.mxu1  ;;  %10331 = vmatmul.msk.bf16.gmra.mxu0 %vm2042_vm0, %v12157_v3  ;;  %10371 = vmatmul.msk.bf16.gmra.mxu1 %vm2042_vm0, %v12157_v3 }
 0x391   : > { %20802 = vst [vmem:[#allocation30_spill] sm:$0xff] %v14534_v24 }
 0x392   : > { %20803 = vst [vmem:[#allocation31_spill] sm:$0xff] %v14536_v44 }
 0x394   : > { %10569 = vmatmul.msk.bf16.gmra.mxu2 %vm2042_vm0, %v12195_v10 }
 0x396   : > { %v3196_v34 = vpop.f32.mrf.mxu3 }
 0x397   : > { %v14542_v15 = vsub.f32 %v2458_v9, %v3196_v34  ;;  %v2990_v41 = vpop.f32.mrf.mxu2  ;;  %v2264_v34 = vpop.f32.mrf.mxu0 }
 0x398   : > { %v14544_v59 = vsub.f32 %v2252_v32, %v2990_v41  ;;  %v12196_v32 = vld [vmem:[%s20667_s5 + $0xc8] sm:$0xff]  ;;  %v2473_v41 = vpop.f32.mrf.mxu1 }
 0x399   : > { %20804 = vst [vmem:[#allocation32_spill] sm:$0xff] %v14542_v15 }
 0x39a   : > { %20805 = vst [vmem:[#allocation33_spill] sm:$0xff] %v14544_v59 }
 0x39b   : > { %10609 = vmatmul.msk.bf16.gmra.mxu3 %vm2042_vm0, %v12195_v10 }
 0x39e   : > { %v3199_v39 = vpop.f32.mrf.mxu3 }
 0x39f   : > { %v14552_v62 = vsub.f32 %v2461_v7, %v3199_v39  ;;  %v2992_v9 = vpop.f32.mrf.mxu2  ;;  %v2267_v24 = vpop.f32.mrf.mxu0  ;;  %v12158_v7 = vld [vmem:[%s20666_s4 + $0xd8] sm:$0xff] }
 0x3a0   : > { %v14554_v15 = vsub.f32 %v2254_v42, %v2992_v9  ;;  %v2476_v42 = vpop.f32.mrf.mxu1  ;;  %10332 = vmatmul.msk.bf16.gmra.mxu0 %vm2042_vm0, %v12158_v7  ;;  %10372 = vmatmul.msk.bf16.gmra.mxu1 %vm2042_vm0, %v12158_v7 }
 0x3a1   : > { %20806 = vst [vmem:[#allocation34_spill] sm:$0xff] %v14552_v62 }
 0x3a2   : > { %20807 = vst [vmem:[#allocation35_spill] sm:$0xff] %v14554_v15 }
 0x3a4   : > { %10570 = vmatmul.msk.bf16.gmra.mxu2 %vm2042_vm0, %v12196_v32 }
 0x3a6   : > { %v3201_v59 = vpop.f32.mrf.mxu3 }
 0x3a7   : > { %v14560_v44 = vsub.f32 %v2463_v47, %v3201_v59  ;;  %v2995_v10 = vpop.f32.mrf.mxu2  ;;  %v2269_v59 = vpop.f32.mrf.mxu0 }
 0x3a8   : > { %v14562_v3 = vsub.f32 %v2257_v21, %v2995_v10  ;;  %v12197_v21 = vld [vmem:[%s20667_s5 + $0xd0] sm:$0xff]  ;;  %v2478_v10 = vpop.f32.mrf.mxu1 }
 0x3a9   : > { %20808 = vst [vmem:[#allocation36_spill] sm:$0xff] %v14560_v44 }
 0x3aa   : > { %20809 = vst [vmem:[#allocation37_spill] sm:$0xff] %v14562_v3 }
 0x3ab   : > { %10610 = vmatmul.msk.bf16.gmra.mxu3 %vm2042_vm0, %v12196_v32 }
 0x3ae   : > { %v3204_v39 = vpop.f32.mrf.mxu3 }
 0x3af   : > { %v14570_v9 = vsub.f32 %v2466_v18, %v3204_v39  ;;  %v2997_v47 = vpop.f32.mrf.mxu2  ;;  %v2272_v62 = vpop.f32.mrf.mxu0  ;;  %v12159_v18 = vld [vmem:[%s20666_s4 + $0xe0] sm:$0xff] }
 0x3b0   : > { %v14572_v44 = vsub.f32 %v2259_v43, %v2997_v47  ;;  %v2481_v43 = vpop.f32.mrf.mxu1  ;;  %10333 = vmatmul.msk.bf16.gmra.mxu0 %vm2042_vm0, %v12159_v18  ;;  %10373 = vmatmul.msk.bf16.gmra.mxu1 %vm2042_vm0, %v12159_v18 }
 0x3b1   : > { %20810 = vst [vmem:[#allocation38_spill] sm:$0xff] %v14570_v9 }
 0x3b2   : > { %20811 = vst [vmem:[#allocation39_spill] sm:$0xff] %v14572_v44 }
 0x3b4   : > { %10571 = vmatmul.msk.bf16.gmra.mxu2 %vm2042_vm0, %v12197_v21 }
 0x3b6   : > { %v3206_v3 = vpop.f32.mrf.mxu3 }
 0x3b7   : > { %v14578_v15 = vsub.f32 %v2468_v48, %v3206_v3  ;;  %v3000_v32 = vpop.f32.mrf.mxu2  ;;  %v2274_v3 = vpop.f32.mrf.mxu0 }
 0x3b8   : > { %v14580_v7 = vsub.f32 %v2262_v37, %v3000_v32  ;;  %v12198_v37 = vld [vmem:[%s20667_s5 + $0xd8] sm:$0xff]  ;;  %v2483_v32 = vpop.f32.mrf.mxu1 }
 0x3b9   : > { %20812 = vst [vmem:[#allocation40_spill] sm:$0xff] %v14578_v15 }
 0x3ba   : > { %20813 = vst [vmem:[#allocation41_spill] sm:$0xff] %v14580_v7 }
 0x3bb   : > { %10611 = vmatmul.msk.bf16.gmra.mxu3 %vm2042_vm0, %v12197_v21 }
 0x3be   : > { %v3209_v39 = vpop.f32.mrf.mxu3 }
 0x3bf   : > { %v14588_v47 = vsub.f32 %v2471_v54, %v3209_v39  ;;  %v3002_v48 = vpop.f32.mrf.mxu2  ;;  %v2277_v9 = vpop.f32.mrf.mxu0  ;;  %v12160_v54 = vld [vmem:[%s20666_s4 + $0xe8] sm:$0xff] }
 0x3c0   : > { %v14590_v15 = vsub.f32 %v2264_v34, %v3002_v48  ;;  %v2486_v34 = vpop.f32.mrf.mxu1  ;;  %10334 = vmatmul.msk.bf16.gmra.mxu0 %vm2042_vm0, %v12160_v54  ;;  %10374 = vmatmul.msk.bf16.gmra.mxu1 %vm2042_vm0, %v12160_v54 }
 0x3c1   : > { %20814 = vst [vmem:[#allocation42_spill] sm:$0xff] %v14588_v47 }
 0x3c2   : > { %20815 = vst [vmem:[#allocation43_spill] sm:$0xff] %v14590_v15 }
 0x3c4   : > { %10572 = vmatmul.msk.bf16.gmra.mxu2 %vm2042_vm0, %v12198_v37 }
 0x3c6   : > { %v3211_v7 = vpop.f32.mrf.mxu3 }
 0x3c7   : > { %v14596_v44 = vsub.f32 %v2473_v41, %v3211_v7  ;;  %v3005_v21 = vpop.f32.mrf.mxu2  ;;  %v2279_v7 = vpop.f32.mrf.mxu0 }
 0x3c8   : > { %v14598_v18 = vsub.f32 %v2267_v24, %v3005_v21  ;;  %v12199_v24 = vld [vmem:[%s20667_s5 + $0xe0] sm:$0xff]  ;;  %v2488_v21 = vpop.f32.mrf.mxu1 }
 0x3c9   : > { %20816 = vst [vmem:[#allocation44_spill] sm:$0xff] %v14596_v44 }
 0x3ca   : > { %20817 = vst [vmem:[#allocation45_spill] sm:$0xff] %v14598_v18 }
 0x3cb   : > { %10612 = vmatmul.msk.bf16.gmra.mxu3 %vm2042_vm0, %v12198_v37 }
 0x3ce   : > { %v3214_v39 = vpop.f32.mrf.mxu3 }
 0x3cf   : > { %v14606_v48 = vsub.f32 %v2476_v42, %v3214_v39  ;;  %v3007_v41 = vpop.f32.mrf.mxu2  ;;  %v2282_v47 = vpop.f32.mrf.mxu0  ;;  %v12161_v42 = vld [vmem:[%s20666_s4 + $0xf0] sm:$0xff] }
 0x3d0   : > { %v14608_v44 = vsub.f32 %v2269_v59, %v3007_v41  ;;  %v2491_v59 = vpop.f32.mrf.mxu1  ;;  %10335 = vmatmul.msk.bf16.gmra.mxu0 %vm2042_vm0, %v12161_v42  ;;  %10375 = vmatmul.msk.bf16.gmra.mxu1 %vm2042_vm0, %v12161_v42 }
 0x3d1   : > { %20818 = vst [vmem:[#allocation46_spill] sm:$0xff] %v14606_v48 }
 0x3d2   : > { %20819 = vst [vmem:[#allocation47_spill] sm:$0xff] %v14608_v44 }
 0x3d4   : > { %10573 = vmatmul.msk.bf16.gmra.mxu2 %vm2042_vm0, %v12199_v24 }
 0x3d6   : > { %v3216_v18 = vpop.f32.mrf.mxu3 }
 0x3d7   : > { %v14614_v15 = vsub.f32 %v2478_v10, %v3216_v18  ;;  %v3010_v37 = vpop.f32.mrf.mxu2  ;;  %v2284_v18 = vpop.f32.mrf.mxu0 }
 0x3d8   : > { %v14616_v54 = vsub.f32 %v2272_v62, %v3010_v37  ;;  %v12200_v62 = vld [vmem:[%s20667_s5 + $0xe8] sm:$0xff]  ;;  %v2493_v37 = vpop.f32.mrf.mxu1 }
 0x3d9   : > { %20820 = vst [vmem:[#allocation48_spill] sm:$0xff] %v14614_v15 }
 0x3da   : > { %20821 = vst [vmem:[#allocation49_spill] sm:$0xff] %v14616_v54 }
 0x3db   : > { %10613 = vmatmul.msk.bf16.gmra.mxu3 %vm2042_vm0, %v12199_v24 }
 0x3de   : > { %v3219_v39 = vpop.f32.mrf.mxu3 }
 0x3df   : > { %v14624_v41 = vsub.f32 %v2481_v43, %v3219_v39  ;;  %v3012_v10 = vpop.f32.mrf.mxu2  ;;  %v2287_v48 = vpop.f32.mrf.mxu0  ;;  %v12162_v43 = vld [vmem:[%s20666_s4 + $0xf8] sm:$0xff] }
 0x3e0   : > { %v14626_v15 = vsub.f32 %v2274_v3, %v3012_v10  ;;  %v2496_v3 = vpop.f32.mrf.mxu1  ;;  %10336 = vmatmul.msk.bf16.gmra.mxu0 %vm2042_vm0, %v12162_v43  ;;  %10376 = vmatmul.msk.bf16.gmra.mxu1 %vm2042_vm0, %v12162_v43 }
 0x3e1   : > { %20822 = vst [vmem:[#allocation50_spill] sm:$0xff] %v14624_v41 }
 0x3e2   : > { %20823 = vst [vmem:[#allocation51_spill] sm:$0xff] %v14626_v15 }
 0x3e4   : > { %10574 = vmatmul.msk.bf16.gmra.mxu2 %vm2042_vm0, %v12200_v62 }
 0x3e6   : > { %v3221_v54 = vpop.f32.mrf.mxu3 }
 0x3e7   : > { %v14632_v44 = vsub.f32 %v2483_v32, %v3221_v54  ;;  %v3015_v24 = vpop.f32.mrf.mxu2  ;;  %v2289_v54 = vpop.f32.mrf.mxu0 }
 0x3e8   : > { %v14634_v42 = vsub.f32 %v2277_v9, %v3015_v24  ;;  %v12201_v9 = vld [vmem:[%s20667_s5 + $0xf0] sm:$0xff]  ;;  %v2498_v24 = vpop.f32.mrf.mxu1 }
 0x3e9   : > { %20824 = vst [vmem:[#allocation52_spill] sm:$0xff] %v14632_v44 }
 0x3ea   : > { %20825 = vst [vmem:[#allocation53_spill] sm:$0xff] %v14634_v42 }
 0x3eb   : > { %10614 = vmatmul.msk.bf16.gmra.mxu3 %vm2042_vm0, %v12200_v62 }
 0x3ee   : > { %v3224_v39 = vpop.f32.mrf.mxu3 }
 0x3ef   : > { %v14642_v10 = vsub.f32 %v2486_v34, %v3224_v39  ;;  %v3017_v32 = vpop.f32.mrf.mxu2  ;;  %v2292_v41 = vpop.f32.mrf.mxu0  ;;  %v12163_v34 = vld [vmem:[%s20666_s4 + $0x100] sm:$0xff] }
 0x3f0   : > { %v14644_v44 = vsub.f32 %v2279_v7, %v3017_v32  ;;  %v2501_v7 = vpop.f32.mrf.mxu1  ;;  %10337 = vmatmul.msk.bf16.gmra.mxu0 %vm2042_vm0, %v12163_v34  ;;  %10377 = vmatmul.msk.bf16.gmra.mxu1 %vm2042_vm0, %v12163_v34 }
 0x3f1   : > { %20826 = vst [vmem:[#allocation54_spill] sm:$0xff] %v14642_v10 }
 0x3f2   : > { %20827 = vst [vmem:[#allocation55_spill] sm:$0xff] %v14644_v44 }
 0x3f4   : > { %10575 = vmatmul.msk.bf16.gmra.mxu2 %vm2042_vm0, %v12201_v9 }
 0x3f6   : > { %v3226_v42 = vpop.f32.mrf.mxu3 }
 0x3f7   : > { %v14650_v15 = vsub.f32 %v2488_v21, %v3226_v42  ;;  %v3020_v62 = vpop.f32.mrf.mxu2  ;;  %v2294_v42 = vpop.f32.mrf.mxu0 }
 0x3f8   : > { %v14652_v43 = vsub.f32 %v2282_v47, %v3020_v62  ;;  %v12202_v47 = vld [vmem:[%s20667_s5 + $0xf8] sm:$0xff]  ;;  %v2503_v62 = vpop.f32.mrf.mxu1 }
 0x3f9   : > { %20828 = vst [vmem:[#allocation56_spill] sm:$0xff] %v14650_v15 }
 0x3fa   : > { %20829 = vst [vmem:[#allocation57_spill] sm:$0xff] %v14652_v43 }
 0x3fb   : > { %10615 = vmatmul.msk.bf16.gmra.mxu3 %vm2042_vm0, %v12201_v9 }
 0x3fe   : > { %v3229_v39 = vpop.f32.mrf.mxu3 }
 0x3ff   : > { %v14660_v32 = vsub.f32 %v2491_v59, %v3229_v39  ;;  %v3022_v21 = vpop.f32.mrf.mxu2  ;;  %v2297_v10 = vpop.f32.mrf.mxu0  ;;  %v12164_v59 = vld [vmem:[%s20666_s4 + $0x108] sm:$0xff] }
 0x400   : > { %v14662_v15 = vsub.f32 %v2284_v18, %v3022_v21  ;;  %v2506_v18 = vpop.f32.mrf.mxu1  ;;  %10338 = vmatmul.msk.bf16.gmra.mxu0 %vm2042_vm0, %v12164_v59  ;;  %10378 = vmatmul.msk.bf16.gmra.mxu1 %vm2042_vm0, %v12164_v59 }
 0x401   : > { %20830 = vst [vmem:[#allocation58_spill] sm:$0xff] %v14660_v32 }
 0x402   : > { %20831 = vst [vmem:[#allocation59_spill] sm:$0xff] %v14662_v15 }
 0x404   : > { %10576 = vmatmul.msk.bf16.gmra.mxu2 %vm2042_vm0, %v12202_v47 }
 0x406   : > { %v3231_v43 = vpop.f32.mrf.mxu3 }
 0x407   : > { %v14668_v44 = vsub.f32 %v2493_v37, %v3231_v43  ;;  %v3025_v9 = vpop.f32.mrf.mxu2  ;;  %v2299_v43 = vpop.f32.mrf.mxu0 }
 0x408   : > { %v14670_v34 = vsub.f32 %v2287_v48, %v3025_v9  ;;  %v12203_v48 = vld [vmem:[%s20667_s5 + $0x100] sm:$0xff]  ;;  %v2508_v9 = vpop.f32.mrf.mxu1 }
 0x409   : > { %20832 = vst [vmem:[#allocation60_spill] sm:$0xff] %v14668_v44 }
 0x40a   : > { %20833 = vst [vmem:[#allocation61_spill] sm:$0xff] %v14670_v34 }
 0x40b   : > { %10616 = vmatmul.msk.bf16.gmra.mxu3 %vm2042_vm0, %v12202_v47 }
 0x40e   : > { %v3234_v39 = vpop.f32.mrf.mxu3 }
 0x40f   : > { %v14678_v21 = vsub.f32 %v2496_v3, %v3234_v39  ;;  %v3027_v37 = vpop.f32.mrf.mxu2  ;;  %v2302_v32 = vpop.f32.mrf.mxu0  ;;  %v12165_v3 = vld [vmem:[%s20666_s4 + $0x110] sm:$0xff] }
 0x410   : > { %v14680_v44 = vsub.f32 %v2289_v54, %v3027_v37  ;;  %v2511_v54 = vpop.f32.mrf.mxu1  ;;  %10339 = vmatmul.msk.bf16.gmra.mxu0 %vm2042_vm0, %v12165_v3  ;;  %10379 = vmatmul.msk.bf16.gmra.mxu1 %vm2042_vm0, %v12165_v3 }
 0x411   : > { %20834 = vst [vmem:[#allocation62_spill] sm:$0xff] %v14678_v21 }
 0x412   : > { %20835 = vst [vmem:[#allocation63_spill] sm:$0xff] %v14680_v44 }
 0x414   : > { %10577 = vmatmul.msk.bf16.gmra.mxu2 %vm2042_vm0, %v12203_v48 }
 0x416   : > { %v3236_v34 = vpop.f32.mrf.mxu3 }
 0x417   : > { %v14686_v15 = vsub.f32 %v2498_v24, %v3236_v34  ;;  %v3030_v47 = vpop.f32.mrf.mxu2  ;;  %v2304_v34 = vpop.f32.mrf.mxu0 }
 0x418   : > { %v14688_v59 = vsub.f32 %v2292_v41, %v3030_v47  ;;  %v12204_v41 = vld [vmem:[%s20667_s5 + $0x108] sm:$0xff]  ;;  %v2513_v47 = vpop.f32.mrf.mxu1 }
 0x419   : > { %20836 = vst [vmem:[#allocation64_spill] sm:$0xff] %v14686_v15 }
 0x41a   : > { %20837 = vst [vmem:[#allocation65_spill] sm:$0xff] %v14688_v59 }
 0x41b   : > { %10617 = vmatmul.msk.bf16.gmra.mxu3 %vm2042_vm0, %v12203_v48 }
 0x41e   : > { %v3239_v39 = vpop.f32.mrf.mxu3 }
 0x41f   : > { %v14696_v37 = vsub.f32 %v2501_v7, %v3239_v39  ;;  %v3032_v24 = vpop.f32.mrf.mxu2  ;;  %v2307_v21 = vpop.f32.mrf.mxu0  ;;  %v12166_v7 = vld [vmem:[%s20666_s4 + $0x118] sm:$0xff] }
 0x420   : > { %v14698_v15 = vsub.f32 %v2294_v42, %v3032_v24  ;;  %v2516_v42 = vpop.f32.mrf.mxu1  ;;  %10340 = vmatmul.msk.bf16.gmra.mxu0 %vm2042_vm0, %v12166_v7  ;;  %10380 = vmatmul.msk.bf16.gmra.mxu1 %vm2042_vm0, %v12166_v7 }
 0x421   : > { %20838 = vst [vmem:[#allocation66_spill] sm:$0xff] %v14696_v37 }
 0x422   : > { %20839 = vst [vmem:[#allocation67_spill] sm:$0xff] %v14698_v15 }
 0x424   : > { %10578 = vmatmul.msk.bf16.gmra.mxu2 %vm2042_vm0, %v12204_v41 }
 0x426   : > { %v3241_v59 = vpop.f32.mrf.mxu3 }
 0x427   : > { %v14704_v44 = vsub.f32 %v2503_v62, %v3241_v59  ;;  %v3035_v48 = vpop.f32.mrf.mxu2  ;;  %v2309_v59 = vpop.f32.mrf.mxu0 }
 0x428   : > { %v14706_v3 = vsub.f32 %v2297_v10, %v3035_v48  ;;  %v12205_v10 = vld [vmem:[%s20667_s5 + $0x110] sm:$0xff]  ;;  %v2518_v48 = vpop.f32.mrf.mxu1 }
 0x429   : > { %20840 = vst [vmem:[#allocation68_spill] sm:$0xff] %v14704_v44 }
 0x42a   : > { %20841 = vst [vmem:[#allocation69_spill] sm:$0xff] %v14706_v3 }
 0x42b   : > { %10618 = vmatmul.msk.bf16.gmra.mxu3 %vm2042_vm0, %v12204_v41 }
 0x42e   : > { %v3244_v39 = vpop.f32.mrf.mxu3 }
 0x42f   : > { %v14714_v24 = vsub.f32 %v2506_v18, %v3244_v39  ;;  %v3037_v62 = vpop.f32.mrf.mxu2  ;;  %v2312_v37 = vpop.f32.mrf.mxu0  ;;  %v12167_v18 = vld [vmem:[%s20666_s4 + $0x120] sm:$0xff] }
 0x430   : > { %v14716_v44 = vsub.f32 %v2299_v43, %v3037_v62  ;;  %v2521_v43 = vpop.f32.mrf.mxu1  ;;  %10341 = vmatmul.msk.bf16.gmra.mxu0 %vm2042_vm0, %v12167_v18  ;;  %10381 = vmatmul.msk.bf16.gmra.mxu1 %vm2042_vm0, %v12167_v18 }
 0x431   : > { %20842 = vst [vmem:[#allocation70_spill] sm:$0xff] %v14714_v24 }
 0x432   : > { %20843 = vst [vmem:[#allocation71_spill] sm:$0xff] %v14716_v44 }
 0x434   : > { %10579 = vmatmul.msk.bf16.gmra.mxu2 %vm2042_vm0, %v12205_v10 }
 0x436   : > { %v3246_v3 = vpop.f32.mrf.mxu3 }
 0x437   : > { %v14722_v15 = vsub.f32 %v2508_v9, %v3246_v3  ;;  %v3040_v41 = vpop.f32.mrf.mxu2  ;;  %v2314_v3 = vpop.f32.mrf.mxu0 }
 0x438   : > { %v14724_v7 = vsub.f32 %v2302_v32, %v3040_v41  ;;  %v12206_v32 = vld [vmem:[%s20667_s5 + $0x118] sm:$0xff]  ;;  %v2523_v41 = vpop.f32.mrf.mxu1 }
 0x439   : > { %20844 = vst [vmem:[#allocation72_spill] sm:$0xff] %v14722_v15 }
 0x43a   : > { %20845 = vst [vmem:[#allocation73_spill] sm:$0xff] %v14724_v7 }
 0x43b   : > { %10619 = vmatmul.msk.bf16.gmra.mxu3 %vm2042_vm0, %v12205_v10 }
 0x43e   : > { %v3249_v39 = vpop.f32.mrf.mxu3 }
 0x43f   : > { %v14732_v62 = vsub.f32 %v2511_v54, %v3249_v39  ;;  %v3042_v9 = vpop.f32.mrf.mxu2  ;;  %v2317_v24 = vpop.f32.mrf.mxu0  ;;  %v12168_v54 = vld [vmem:[%s20666_s4 + $0x128] sm:$0xff] }
 0x440   : > { %v14734_v15 = vsub.f32 %v2304_v34, %v3042_v9  ;;  %v2526_v34 = vpop.f32.mrf.mxu1  ;;  %10342 = vmatmul.msk.bf16.gmra.mxu0 %vm2042_vm0, %v12168_v54  ;;  %10382 = vmatmul.msk.bf16.gmra.mxu1 %vm2042_vm0, %v12168_v54 }
 0x441   : > { %20846 = vst [vmem:[#allocation74_spill] sm:$0xff] %v14732_v62 }
 0x442   : > { %20847 = vst [vmem:[#allocation75_spill] sm:$0xff] %v14734_v15 }
 0x444   : > { %10580 = vmatmul.msk.bf16.gmra.mxu2 %vm2042_vm0, %v12206_v32 }
 0x446   : > { %v3251_v7 = vpop.f32.mrf.mxu3 }
 0x447   : > { %v14740_v44 = vsub.f32 %v2513_v47, %v3251_v7  ;;  %v3045_v10 = vpop.f32.mrf.mxu2  ;;  %v2319_v7 = vpop.f32.mrf.mxu0 }
 0x448   : > { %v14742_v18 = vsub.f32 %v2307_v21, %v3045_v10  ;;  %v12207_v21 = vld [vmem:[%s20667_s5 + $0x120] sm:$0xff]  ;;  %v2528_v10 = vpop.f32.mrf.mxu1 }
 0x449   : > { %20848 = vst [vmem:[#allocation76_spill] sm:$0xff] %v14740_v44 }
 0x44a   : > { %20849 = vst [vmem:[#allocation77_spill] sm:$0xff] %v14742_v18 }
 0x44b   : > { %10620 = vmatmul.msk.bf16.gmra.mxu3 %vm2042_vm0, %v12206_v32 }
 0x44e   : > { %v3254_v39 = vpop.f32.mrf.mxu3 }
 0x44f   : > { %v14750_v9 = vsub.f32 %v2516_v42, %v3254_v39  ;;  %v3047_v47 = vpop.f32.mrf.mxu2  ;;  %v2322_v62 = vpop.f32.mrf.mxu0  ;;  %v12169_v42 = vld [vmem:[%s20666_s4 + $0x130] sm:$0xff] }
 0x450   : > { %v14752_v44 = vsub.f32 %v2309_v59, %v3047_v47  ;;  %v2531_v59 = vpop.f32.mrf.mxu1  ;;  %10343 = vmatmul.msk.bf16.gmra.mxu0 %vm2042_vm0, %v12169_v42  ;;  %10383 = vmatmul.msk.bf16.gmra.mxu1 %vm2042_vm0, %v12169_v42 }
 0x451   : > { %20850 = vst [vmem:[#allocation78_spill] sm:$0xff] %v14750_v9 }
 0x452   : > { %20851 = vst [vmem:[#allocation79_spill] sm:$0xff] %v14752_v44 }
 0x454   : > { %10581 = vmatmul.msk.bf16.gmra.mxu2 %vm2042_vm0, %v12207_v21 }
 0x456   : > { %v3256_v18 = vpop.f32.mrf.mxu3 }
 0x457   : > { %v14758_v15 = vsub.f32 %v2518_v48, %v3256_v18  ;;  %v3050_v32 = vpop.f32.mrf.mxu2  ;;  %v2324_v18 = vpop.f32.mrf.mxu0 }
 0x458   : > { %v14760_v54 = vsub.f32 %v2312_v37, %v3050_v32  ;;  %v12208_v37 = vld [vmem:[%s20667_s5 + $0x128] sm:$0xff]  ;;  %v2533_v32 = vpop.f32.mrf.mxu1 }
 0x459   : > { %20852 = vst [vmem:[#allocation80_spill] sm:$0xff] %v14758_v15 }
 0x45a   : > { %20853 = vst [vmem:[#allocation81_spill] sm:$0xff] %v14760_v54 }
 0x45b   : > { %10621 = vmatmul.msk.bf16.gmra.mxu3 %vm2042_vm0, %v12207_v21 }
 0x45e   : > { %v3259_v39 = vpop.f32.mrf.mxu3 }
 0x45f   : > { %v14768_v47 = vsub.f32 %v2521_v43, %v3259_v39  ;;  %v3052_v48 = vpop.f32.mrf.mxu2  ;;  %v2327_v9 = vpop.f32.mrf.mxu0  ;;  %v12170_v43 = vld [vmem:[%s20666_s4 + $0x138] sm:$0xff] }
 0x460   : > { %v14770_v15 = vsub.f32 %v2314_v3, %v3052_v48  ;;  %v2536_v3 = vpop.f32.mrf.mxu1  ;;  %10344 = vmatmul.msk.bf16.gmra.mxu0 %vm2042_vm0, %v12170_v43  ;;  %10384 = vmatmul.msk.bf16.gmra.mxu1 %vm2042_vm0, %v12170_v43 }
 0x461   : > { %20854 = vst [vmem:[#allocation82_spill] sm:$0xff] %v14768_v47 }
 0x462   : > { %20855 = vst [vmem:[#allocation83_spill] sm:$0xff] %v14770_v15 }
 0x464   : > { %10582 = vmatmul.msk.bf16.gmra.mxu2 %vm2042_vm0, %v12208_v37 }
 0x466   : > { %v3261_v54 = vpop.f32.mrf.mxu3 }
 0x467   : > { %v14776_v44 = vsub.f32 %v2523_v41, %v3261_v54  ;;  %v3055_v21 = vpop.f32.mrf.mxu2  ;;  %v2329_v54 = vpop.f32.mrf.mxu0 }
 0x468   : > { %v14778_v42 = vsub.f32 %v2317_v24, %v3055_v21  ;;  %v12209_v24 = vld [vmem:[%s20667_s5 + $0x130] sm:$0xff]  ;;  %v2538_v21 = vpop.f32.mrf.mxu1 }
 0x469   : > { %20856 = vst [vmem:[#allocation84_spill] sm:$0xff] %v14776_v44 }
 0x46a   : > { %20857 = vst [vmem:[#allocation85_spill] sm:$0xff] %v14778_v42 }
 0x46b   : > { %10622 = vmatmul.msk.bf16.gmra.mxu3 %vm2042_vm0, %v12208_v37 }
 0x46e   : > { %v3264_v39 = vpop.f32.mrf.mxu3 }
 0x46f   : > { %v14786_v48 = vsub.f32 %v2526_v34, %v3264_v39  ;;  %v3057_v41 = vpop.f32.mrf.mxu2  ;;  %v2332_v47 = vpop.f32.mrf.mxu0 }
 0x470   : > { %v14788_v44 = vsub.f32 %v2319_v7, %v3057_v41  ;;  %v2541_v34 = vpop.f32.mrf.mxu1  ;;  %v12855_v7 = vld [vmem:[%s20667_s5] sm:$0xff] }
 0x471   : > { %20858 = vst [vmem:[#allocation86_spill] sm:$0xff] %v14786_v48  ;;  %10625 = vmatmul.msk.bf16.vlgmr.msrb.gmra.mxu0 %vm2042_vm0, %v12855_v7  ;;  %10665 = vmatmul.msk.bf16.vlgmr.msrb.gmra.mxu1 %vm2042_vm0, %v12855_v7 }
 0x472   : > { %20859 = vst [vmem:[#allocation87_spill] sm:$0xff] %v14788_v44 }
 0x474   : > { %10583 = vmatmul.msk.bf16.gmra.mxu2 %vm2042_vm0, %v12209_v24 }
 0x476   : > { %v3266_v42 = vpop.f32.mrf.mxu3 }
 0x477   : > { %v14794_v15 = vsub.f32 %v2528_v10, %v3266_v42  ;;  %v3060_v37 = vpop.f32.mrf.mxu2  ;;  %v2334_v42 = vpop.f32.mrf.mxu0 }
 0x478   : > { %v14796_v43 = vsub.f32 %v2322_v62, %v3060_v37  ;;  %v12210_v62 = vld [vmem:[%s20667_s5 + $0x138] sm:$0xff]  ;;  %v2543_v37 = vpop.f32.mrf.mxu1 }
 0x479   : > { %20860 = vst [vmem:[#allocation88_spill] sm:$0xff] %v14794_v15 }
 0x47a   : > { %20861 = vst [vmem:[#allocation89_spill] sm:$0xff] %v14796_v43 }
 0x47b   : > { %10623 = vmatmul.msk.bf16.gmra.mxu3 %vm2042_vm0, %v12209_v24 }
 0x47e   : > { %v3269_v39 = vpop.f32.mrf.mxu3 }
 0x47f   : > { %v14804_v41 = vsub.f32 %v2531_v59, %v3269_v39  ;;  %v3062_v10 = vpop.f32.mrf.mxu2  ;;  %v2337_v48 = vpop.f32.mrf.mxu0 }
 0x480   : > { %v14806_v15 = vsub.f32 %v2324_v18, %v3062_v10  ;;  %v2546_v59 = vpop.f32.mrf.mxu1  ;;  %v12856_v18 = vld [vmem:[%s20667_s5 + $0x8] sm:$0xff] }
 0x481   : > { %20862 = vst [vmem:[#allocation90_spill] sm:$0xff] %v14804_v41  ;;  %10626 = vmatmul.msk.bf16.gmra.mxu0 %vm2042_vm0, %v12856_v18  ;;  %10666 = vmatmul.msk.bf16.gmra.mxu1 %vm2042_vm0, %v12856_v18 }
 0x482   : > { %20863 = vst [vmem:[#allocation91_spill] sm:$0xff] %v14806_v15 }
 0x484   : > { %10584 = vmatmul.msk.bf16.gmra.mxu2 %vm2042_vm0, %v12210_v62 }
 0x486   : > { %v3271_v43 = vpop.f32.mrf.mxu3 }
 0x487   : > { %v14812_v44 = vsub.f32 %v2533_v32, %v3271_v43  ;;  %v3065_v24 = vpop.f32.mrf.mxu2  ;;  %v2339_v43 = vpop.f32.mrf.mxu0 }
 0x488   : > { %v14814_v7 = vsub.f32 %v2327_v9, %v3065_v24  ;;  %v2548_v9 = vpop.f32.mrf.mxu1  ;;  %v12857_v24 = vld [vmem:[%s20666_s4] sm:$0xff] }
 0x489   : > { %20864 = vst [vmem:[#allocation92_spill] sm:$0xff] %v14812_v44 }
 0x48a   : > { %20865 = vst [vmem:[#allocation93_spill] sm:$0xff] %v14814_v7 }
 0x48b   : > { %10624 = vmatmul.msk.bf16.gmra.mxu3 %vm2042_vm0, %v12210_v62 }
 0x48e   : > { %v3274_v39 = vpop.f32.mrf.mxu3 }
 0x48f   : > { %v14822_v10 = vsub.f32 %v2536_v3, %v3274_v39  ;;  %v3067_v32 = vpop.f32.mrf.mxu2  ;;  %v2342_v41 = vpop.f32.mrf.mxu0 }
 0x490   : > { %v14824_v44 = vsub.f32 %v2329_v54, %v3067_v32  ;;  %v2551_v3 = vpop.f32.mrf.mxu1  ;;  %v12858_v54 = vld [vmem:[%s20667_s5 + $0x10] sm:$0xff] }
 0x491   : > { %20866 = vst [vmem:[#allocation94_spill] sm:$0xff] %v14822_v10  ;;  %10627 = vmatmul.msk.bf16.gmra.mxu0 %vm2042_vm0, %v12858_v54  ;;  %10667 = vmatmul.msk.bf16.gmra.mxu1 %vm2042_vm0, %v12858_v54 }
 0x492   : > { %20867 = vst [vmem:[#allocation95_spill] sm:$0xff] %v14824_v44 }
 0x494   : > { %10705 = vmatmul.msk.bf16.vlgmr.msrb.gmra.mxu2 %vm2042_vm0, %v12857_v24 }
 0x496   : > { %v3276_v7 = vpop.f32.mrf.mxu3 }
 0x497   : > { %v14830_v15 = vsub.f32 %v2538_v21, %v3276_v7  ;;  %v3070_v62 = vpop.f32.mrf.mxu2  ;;  %v2344_v7 = vpop.f32.mrf.mxu0 }
 0x498   : > { %v14832_v18 = vsub.f32 %v2332_v47, %v3070_v62  ;;  %v2553_v47 = vpop.f32.mrf.mxu1  ;;  %v12859_v62 = vld [vmem:[%s20666_s4 + $0x8] sm:$0xff] }
 0x499   : > { %20868 = vst [vmem:[#allocation96_spill] sm:$0xff] %v14830_v15 }
 0x49a   : > { %20869 = vst [vmem:[#allocation97_spill] sm:$0xff] %v14832_v18 }
 0x49b   : > { %10745 = vmatmul.msk.bf16.vlgmr.msrb.gmra.mxu3 %vm2042_vm0, %v12857_v24 }
 0x49e   : > { %v3279_v39 = vpop.f32.mrf.mxu3 }
 0x49f   : > { %v14840_v32 = vsub.f32 %v2541_v34, %v3279_v39  ;;  %v3072_v21 = vpop.f32.mrf.mxu2  ;;  %v2347_v10 = vpop.f32.mrf.mxu0 }
 0x4a0   : > { %v14842_v15 = vsub.f32 %v2334_v42, %v3072_v21  ;;  %v2556_v34 = vpop.f32.mrf.mxu1  ;;  %v12860_v42 = vld [vmem:[%s20667_s5 + $0x18] sm:$0xff] }
 0x4a1   : > { %20870 = vst [vmem:[#allocation98_spill] sm:$0xff] %v14840_v32  ;;  %10628 = vmatmul.msk.bf16.gmra.mxu0 %vm2042_vm0, %v12860_v42  ;;  %10668 = vmatmul.msk.bf16.gmra.mxu1 %vm2042_vm0, %v12860_v42 }
 0x4a2   : > { %20871 = vst [vmem:[#allocation99_spill] sm:$0xff] %v14842_v15 }
 0x4a4   : > { %10706 = vmatmul.msk.bf16.gmra.mxu2 %vm2042_vm0, %v12859_v62 }
 0x4a6   : > { %v3281_v18 = vpop.f32.mrf.mxu3 }
 0x4a7   : > { %v14848_v44 = vsub.f32 %v2543_v37, %v3281_v18  ;;  %v3075_v24 = vpop.f32.mrf.mxu2  ;;  %v2349_v18 = vpop.f32.mrf.mxu0 }
 0x4a8   : > { %v14850_v54 = vsub.f32 %v2337_v48, %v3075_v24  ;;  %v2558_v48 = vpop.f32.mrf.mxu1  ;;  %v12861_v24 = vld [vmem:[%s20666_s4 + $0x10] sm:$0xff] }
 0x4a9   : > { %20872 = vst [vmem:[#allocation100_spill] sm:$0xff] %v14848_v44 }
 0x4aa   : > { %20873 = vst [vmem:[#allocation101_spill] sm:$0xff] %v14850_v54 }
 0x4ab   : > { %10746 = vmatmul.msk.bf16.gmra.mxu3 %vm2042_vm0, %v12859_v62 }
 0x4ae   : > { %v3284_v39 = vpop.f32.mrf.mxu3 }
 0x4af   : > { %v14858_v21 = vsub.f32 %v2546_v59, %v3284_v39  ;;  %v3077_v37 = vpop.f32.mrf.mxu2  ;;  %v2352_v32 = vpop.f32.mrf.mxu0 }
 0x4b0   : > { %v14860_v44 = vsub.f32 %v2339_v43, %v3077_v37  ;;  %v2561_v59 = vpop.f32.mrf.mxu1  ;;  %v12862_v43 = vld [vmem:[%s20667_s5 + $0x20] sm:$0xff] }
 0x4b1   : > { %20874 = vst [vmem:[#allocation102_spill] sm:$0xff] %v14858_v21  ;;  %10629 = vmatmul.msk.bf16.gmra.mxu0 %vm2042_vm0, %v12862_v43  ;;  %10669 = vmatmul.msk.bf16.gmra.mxu1 %vm2042_vm0, %v12862_v43 }
 0x4b2   : > { %20875 = vst [vmem:[#allocation103_spill] sm:$0xff] %v14860_v44 }
 0x4b4   : > { %10707 = vmatmul.msk.bf16.gmra.mxu2 %vm2042_vm0, %v12861_v24 }
 0x4b6   : > { %v3286_v54 = vpop.f32.mrf.mxu3 }
 0x4b7   : > { %v14866_v15 = vsub.f32 %v2548_v9, %v3286_v54  ;;  %v3080_v62 = vpop.f32.mrf.mxu2  ;;  %v2354_v54 = vpop.f32.mrf.mxu0 }
 0x4b8   : > { %v14868_v42 = vsub.f32 %v2342_v41, %v3080_v62  ;;  %v2563_v41 = vpop.f32.mrf.mxu1  ;;  %v12863_v62 = vld [vmem:[%s20666_s4 + $0x18] sm:$0xff] }
 0x4b9   : > { %20876 = vst [vmem:[#allocation104_spill] sm:$0xff] %v14866_v15 }
 0x4ba   : > { %20877 = vst [vmem:[#allocation105_spill] sm:$0xff] %v14868_v42 }
 0x4bb   : > { %10747 = vmatmul.msk.bf16.gmra.mxu3 %vm2042_vm0, %v12861_v24 }
 0x4be   : > { %v3289_v39 = vpop.f32.mrf.mxu3 }
 0x4bf   : > { %v14876_v37 = vsub.f32 %v2551_v3, %v3289_v39  ;;  %v3082_v9 = vpop.f32.mrf.mxu2  ;;  %v2357_v21 = vpop.f32.mrf.mxu0 }
 0x4c0   : > { %v14878_v15 = vsub.f32 %v2344_v7, %v3082_v9  ;;  %v2566_v3 = vpop.f32.mrf.mxu1  ;;  %v12864_v7 = vld [vmem:[%s20667_s5 + $0x28] sm:$0xff] }
 0x4c1   : > { %20878 = vst [vmem:[#allocation106_spill] sm:$0xff] %v14876_v37  ;;  %10630 = vmatmul.msk.bf16.gmra.mxu0 %vm2042_vm0, %v12864_v7  ;;  %10670 = vmatmul.msk.bf16.gmra.mxu1 %vm2042_vm0, %v12864_v7 }
 0x4c2   : > { %20879 = vst [vmem:[#allocation107_spill] sm:$0xff] %v14878_v15 }
 0x4c4   : > { %10708 = vmatmul.msk.bf16.gmra.mxu2 %vm2042_vm0, %v12863_v62 }
 0x4c6   : > { %v3291_v42 = vpop.f32.mrf.mxu3 }
 0x4c7   : > { %v14884_v44 = vsub.f32 %v2553_v47, %v3291_v42  ;;  %v3085_v24 = vpop.f32.mrf.mxu2  ;;  %v2359_v42 = vpop.f32.mrf.mxu0 }
 0x4c8   : > { %v14886_v43 = vsub.f32 %v2347_v10, %v3085_v24  ;;  %v2568_v10 = vpop.f32.mrf.mxu1  ;;  %v12865_v24 = vld [vmem:[%s20666_s4 + $0x20] sm:$0xff] }
 0x4c9   : > { %20880 = vst [vmem:[#allocation108_spill] sm:$0xff] %v14884_v44 }
 0x4ca   : > { %20881 = vst [vmem:[#allocation109_spill] sm:$0xff] %v14886_v43 }
 0x4cb   : > { %10748 = vmatmul.msk.bf16.gmra.mxu3 %vm2042_vm0, %v12863_v62 }
 0x4ce   : > { %v3294_v39 = vpop.f32.mrf.mxu3 }
 0x4cf   : > { %v14894_v9 = vsub.f32 %v2556_v34, %v3294_v39  ;;  %v3087_v47 = vpop.f32.mrf.mxu2  ;;  %v2362_v37 = vpop.f32.mrf.mxu0 }
 0x4d0   : > { %v14896_v44 = vsub.f32 %v2349_v18, %v3087_v47  ;;  %v2571_v34 = vpop.f32.mrf.mxu1  ;;  %v12866_v18 = vld [vmem:[%s20667_s5 + $0x30] sm:$0xff] }
 0x4d1   : > { %20882 = vst [vmem:[#allocation110_spill] sm:$0xff] %v14894_v9  ;;  %10631 = vmatmul.msk.bf16.gmra.mxu0 %vm2042_vm0, %v12866_v18  ;;  %10671 = vmatmul.msk.bf16.gmra.mxu1 %vm2042_vm0, %v12866_v18 }
 0x4d2   : > { %20883 = vst [vmem:[#allocation111_spill] sm:$0xff] %v14896_v44 }
 0x4d4   : > { %10709 = vmatmul.msk.bf16.gmra.mxu2 %vm2042_vm0, %v12865_v24 }
 0x4d6   : > { %v3296_v43 = vpop.f32.mrf.mxu3 }
 0x4d7   : > { %v14902_v15 = vsub.f32 %v2558_v48, %v3296_v43  ;;  %v3090_v62 = vpop.f32.mrf.mxu2  ;;  %v2364_v43 = vpop.f32.mrf.mxu0 }
 0x4d8   : > { %v14904_v7 = vsub.f32 %v2352_v32, %v3090_v62  ;;  %v2573_v32 = vpop.f32.mrf.mxu1  ;;  %v12867_v62 = vld [vmem:[%s20666_s4 + $0x28] sm:$0xff] }
 0x4d9   : > { %20884 = vst [vmem:[#allocation112_spill] sm:$0xff] %v14902_v15 }
 0x4da   : > { %20885 = vst [vmem:[#allocation113_spill] sm:$0xff] %v14904_v7 }
 0x4db   : > { %10749 = vmatmul.msk.bf16.gmra.mxu3 %vm2042_vm0, %v12865_v24 }
 0x4de   : > { %v3299_v39 = vpop.f32.mrf.mxu3 }
 0x4df   : > { %v14912_v47 = vsub.f32 %v2561_v59, %v3299_v39  ;;  %v3092_v48 = vpop.f32.mrf.mxu2  ;;  %v2367_v9 = vpop.f32.mrf.mxu0 }
 0x4e0   : > { %v14914_v15 = vsub.f32 %v2354_v54, %v3092_v48  ;;  %v2576_v59 = vpop.f32.mrf.mxu1  ;;  %v12868_v54 = vld [vmem:[%s20667_s5 + $0x38] sm:$0xff] }
 0x4e1   : > { %20886 = vst [vmem:[#allocation114_spill] sm:$0xff] %v14912_v47  ;;  %10632 = vmatmul.msk.bf16.gmra.mxu0 %vm2042_vm0, %v12868_v54  ;;  %10672 = vmatmul.msk.bf16.gmra.mxu1 %vm2042_vm0, %v12868_v54 }
 0x4e2   : > { %20887 = vst [vmem:[#allocation115_spill] sm:$0xff] %v14914_v15 }
 0x4e4   : > { %10710 = vmatmul.msk.bf16.gmra.mxu2 %vm2042_vm0, %v12867_v62 }
 0x4e6   : > { %v3301_v7 = vpop.f32.mrf.mxu3 }
 0x4e7   : > { %v14920_v44 = vsub.f32 %v2563_v41, %v3301_v7  ;;  %v3095_v24 = vpop.f32.mrf.mxu2  ;;  %v2369_v7 = vpop.f32.mrf.mxu0 }
 0x4e8   : > { %v14922_v18 = vsub.f32 %v2357_v21, %v3095_v24  ;;  %v14934_v21 = vpop.f32.mrf.mxu1  ;;  %v12869_v24 = vld [vmem:[%s20666_s4 + $0x30] sm:$0xff] }
 0x4e9   : > { %20888 = vst [vmem:[#allocation116_spill] sm:$0xff] %v14920_v44 }
 0x4ea   : > { %20889 = vst [vmem:[#allocation117_spill] sm:$0xff] %v14922_v18 }
 0x4eb   : > { %10750 = vmatmul.msk.bf16.gmra.mxu3 %vm2042_vm0, %v12867_v62 }
 0x4ee   : > { %v3304_v39 = vpop.f32.mrf.mxu3 }
 0x4ef   : > { %v14930_v48 = vsub.f32 %v2566_v3, %v3304_v39  ;;  %v3097_v41 = vpop.f32.mrf.mxu2  ;;  %v14942_v54 = vpop.f32.mrf.mxu0 }
 0x4f0   : > { %v14932_v44 = vsub.f32 %v2359_v42, %v3097_v41  ;;  %v14946_v39 = vpop.f32.mrf.mxu1  ;;  %v12870_v42 = vld [vmem:[%s20667_s5 + $0x40] sm:$0xff] }
 0x4f1   : > { %20890 = vst [vmem:[#allocation118_spill] sm:$0xff] %v14930_v48  ;;  %10633 = vmatmul.msk.bf16.gmra.mxu0 %vm2042_vm0, %v12870_v42  ;;  %10673 = vmatmul.msk.bf16.gmra.mxu1 %vm2042_vm0, %v12870_v42 }
 0x4f2   : > { %20891 = vst [vmem:[#allocation119_spill] sm:$0xff] %v14932_v44 }
 0x4f4   : > { %10711 = vmatmul.msk.bf16.gmra.mxu2 %vm2042_vm0, %v12869_v24 }
 0x4f6   : > { %v3306_v18 = vpop.f32.mrf.mxu3 }
 0x4f7   : > { %v14940_v15 = vsub.f32 %v2568_v10, %v3306_v18  ;;  %v3100_v62 = vpop.f32.mrf.mxu2 }
 0x4f8   : > { %v14944_v3 = vsub.f32 %v2362_v37, %v3100_v62  ;;  %v14960_v62 = vpop.f32.mrf.mxu1 }
 0x4f9   : > { %20892 = vst [vmem:[#allocation120_spill] sm:$0xff] %v14940_v15  ;;  %v14956_v15 = vpop.f32.mrf.mxu0 }
 0x4fa   : > { %20893 = vst [vmem:[#allocation121_spill] sm:$0xff] %v14944_v3  ;;  %v12871_v3 = vld [vmem:[%s20666_s4 + $0x38] sm:$0xff] }
 0x4fb   : > { %10751 = vmatmul.msk.bf16.gmra.mxu3 %vm2042_vm0, %v12869_v24 }
 0x4fe   : > { %v3309_v41 = vpop.f32.mrf.mxu3 }
 0x4ff   : > { %v14954_v10 = vsub.f32 %v2571_v34, %v3309_v41  ;;  %v3102_v18 = vpop.f32.mrf.mxu2 }
 0x500   : > { %v14958_v37 = vsub.f32 %v2364_v43, %v3102_v18  ;;  %v14972_v41 = vpop.f32.mrf.mxu1  ;;  %v12872_v43 = vld [vmem:[%s20667_s5 + $0x48] sm:$0xff]  ;;  %v14990_v18 = vmul.f32 %v14266_v11, %v14266_v11  ;;  %v15010_v11 = vmul.f32 %v14284_v12, %v14284_v12  ;;  %v15030_v12 = vmul.f32 %v14302_v61, %v14302_v61 }
 0x501   : > { %20894 = vst [vmem:[#allocation122_spill] sm:$0xff] %v14954_v10  ;;  %v14968_v48 = vpop.f32.mrf.mxu0  ;;  %10634 = vmatmul.msk.bf16.gmra.mxu0 %vm2042_vm0, %v12872_v43  ;;  %10674 = vmatmul.msk.bf16.gmra.mxu1 %vm2042_vm0, %v12872_v43  ;;  %v15050_v61 = vmul.f32 %v14326_v27, %v14326_v27  ;;  %v15070_v27 = vmul.f32 %v14346_v25, %v14346_v25 }
 0x502   : > { %20895 = vst [vmem:[#allocation123_spill] sm:$0xff] %v14958_v37  ;;  %v15090_v25 = vmul.f32 %v14364_v8, %v14364_v8  ;;  %v15110_v8 = vmul.f32 %v14390_v14, %v14390_v14  ;;  %v15130_v14 = vmul.f32 %v14410_v17, %v14410_v17 }
 0x504   : > { %10712 = vmatmul.msk.bf16.gmra.mxu2 %vm2042_vm0, %v12871_v3  ;;  %20904 = vst [vmem:[#allocation132_spill] sm:$0xff] %v15130_v14 }
 0x506   : > { %v3311_v44 = vpop.f32.mrf.mxu3 }
 0x507   : > { %v14966_v24 = vsub.f32 %v2573_v32, %v3311_v44  ;;  %v3105_v42 = vpop.f32.mrf.mxu2  ;;  %v14982_v44 = vmul.f32 %v14256_v38, %v14256_v38 }
 0x508   : > { %v14970_v34 = vsub.f32 %v2367_v9, %v3105_v42  ;;  %v14986_v9 = vmul.f32 %v14264_v63, %v14264_v63  ;;  %v14994_v42 = vmul.f32 %v14272_v2, %v14272_v2  ;;  %v15006_v63 = vmul.f32 %v14282_v13, %v14282_v13 }
 0x509   : > { %20896 = vst [vmem:[#allocation124_spill] sm:$0xff] %v14966_v24  ;;  %v15014_v2 = vmul.f32 %v14290_v49, %v14290_v49  ;;  %v15026_v13 = vmul.f32 %v14300_v6, %v14300_v6  ;;  %v15034_v49 = vmul.f32 %v14308_v31, %v14308_v31  ;;  %v15046_v6 = vmul.f32 %v14320_v57, %v14320_v57 }
 0x50a   : > { %20897 = vst [vmem:[#allocation125_spill] sm:$0xff] %v14970_v34  ;;  %v15002_v34 = vpop.f32.mrf.mxu0  ;;  %v15054_v31 = vmul.f32 %v14328_v40, %v14328_v40  ;;  %v15066_v57 = vmul.f32 %v14344_v4, %v14344_v4  ;;  %v15074_v40 = vmul.f32 %v14354_v45, %v14354_v45  ;;  %v12873_v4 = vld [vmem:[%s20666_s4 + $0x40] sm:$0xff]  ;;  %v15094_v45 = vmul.f32 %v14372_v20, %v14372_v20 }
 0x50b   : > { %10752 = vmatmul.msk.bf16.gmra.mxu3 %vm2042_vm0, %v12871_v3  ;;  %v14998_v3 = vmul.f32 %v14274_v50, %v14274_v50  ;;  %v15018_v50 = vpop.f32.mrf.mxu1  ;;  %v15114_v20 = vmul.f32 %v14392_v1, %v14392_v1 }
 0x50d   : > { %20900 = vst [vmem:[#allocation128_spill] sm:$0xff] %v15114_v20 }
 0x50e   : > { %v3314_v32 = vpop.f32.mrf.mxu3 }
 0x50f   : > { %v15000_v43 = vsub.f32 %v2576_v59, %v3314_v32  ;;  %v3107_v38 = vpop.f32.mrf.mxu2  ;;  %v15022_v59 = vmul.f32 %v14292_v60, %v14292_v60  ;;  %v15042_v60 = vmul.f32 %v14318_v19, %v14318_v19  ;;  %v15062_v19 = vmul.f32 %v14338_v52, %v14338_v52 }
 0x510   : > { %v15016_v24 = vsub.f32 %v2369_v7, %v3107_v38  ;;  %v15038_v7 = vmul.f32 %v14310_v36, %v14310_v36  ;;  %v15058_v36 = vmul.f32 %v14336_v55, %v14336_v55  ;;  %v15078_v55 = vmul.f32 %v14356_v28, %v14356_v28 }
 0x511   : > { %20898 = vst [vmem:[#allocation126_spill] sm:$0xff] %v15000_v43  ;;  %v15082_v52 = vmul.f32 %v14362_v53, %v14362_v53  ;;  %v15098_v28 = vmul.f32 %v14374_v26, %v14374_v26  ;;  %v15102_v53 = vmul.f32 %v14380_v0, %v14380_v0  ;;  %v15106_v32 = vmul.f32 %v14382_v30, %v14382_v30 }
 0x512   : > { %20899 = vst [vmem:[#allocation127_spill] sm:$0xff] %v15016_v24  ;;  %v15118_v26 = vmul.f32 %v14398_v33, %v14398_v33  ;;  %v15122_v0 = vmul.f32 %v14400_v51, %v14400_v51  ;;  %v15126_v30 = vmul.f32 %v14408_v56, %v14408_v56  ;;  %v15135_v43 = vpop.f32.mrf.mxu0  ;;  %v15139_v33 = vmul.f32 %v14416_v58, %v14416_v58 }
 0x513   : > { %v15143_v51 = vmul.f32 %v14418_v16, %v14418_v16  ;;  %v15147_v56 = vmul.f32 %v14426_v46, %v14426_v46  ;;  %v15150_v37 = vpop.f32.mrf.mxu1  ;;  %v15158_v58 = vmul.f32 %v14434_v23, %v14434_v23  ;;  %v15162_v16 = vmul.f32 %v14436_v5, %v14436_v5  ;;  %v12874_v5 = vld [vmem:[%s20667_s5 + $0x50] sm:$0xff] }
 0x514   : > { %10713 = vmatmul.msk.bf16.gmra.mxu2 %vm2042_vm0, %v12873_v4  ;;  %20901 = vst [vmem:[#allocation129_spill] sm:$0xff] %v15118_v26  ;;  %v15166_v46 = vmul.f32 %v14444_v35, %v14444_v35  ;;  %10635 = vmatmul.msk.bf16.gmra.mxu0 %vm2042_vm0, %v12874_v5  ;;  %v20918_v35 = vld [vmem:[#allocation25_spill] sm:$0xff] }
 0x515   : > { %20902 = vst [vmem:[#allocation130_spill] sm:$0xff] %v15122_v0  ;;  %v15186_v10 = vmul.f32 %v20918_v35, %v20918_v35  ;;  %10675 = vmatmul.msk.bf16.gmra.mxu1 %vm2042_vm0, %v12874_v5  ;;  %v20932_v5 = vld [vmem:[#allocation14_spill] sm:$0xff] }
 0x516   : > { %v3316_v38 = vpop.f32.mrf.mxu3  ;;  %20903 = vst [vmem:[#allocation131_spill] sm:$0xff] %v15126_v30 }
 0x517   : > { %v15133_v1 = vsub.f32 %v14934_v21, %v3316_v38  ;;  %v3906_v24 = vpop.f32.mrf.mxu2  ;;  %20906 = vst [vmem:[#allocation134_spill] sm:$0xff] %v15139_v33  ;;  %v15154_v21 = vmul.f32 %v14428_v22, %v14428_v22  ;;  %v20916_v38 = vld [vmem:[#allocation24_spill] sm:$0xff] }
 0x518   : > { %20907 = vst [vmem:[#allocation135_spill] sm:$0xff] %v15143_v51  ;;  %v3907_v17 = vadd.f32 %v3906_v24, %v14942_v54  ;;  %v15170_v54 = vmul.f32 %v14446_v29, %v14446_v29  ;;  %v20914_v24 = vld [vmem:[#allocation23_spill] sm:$0xff]  ;;  %v15178_v23 = vmul.f32 %v20916_v38, %v20916_v38  ;;  %v20920_v29 = vld [vmem:[#allocation26_spill] sm:$0xff] }
 0x519   : > { %20905 = vst [vmem:[#allocation133_spill] sm:$0xff] %v15133_v1  ;;  %v15174_v22 = vmul.f32 %v20914_v24, %v20914_v24  ;;  %v15190_v47 = vmul.f32 %v20920_v29, %v20920_v29  ;;  %v20922_v24 = vld [vmem:[#allocation27_spill] sm:$0xff] }
 0x51a   : > { %20908 = vst [vmem:[#allocation136_spill] sm:$0xff] %v15147_v56  ;;  %v4475_v1 = vmul.f32 %v3907_v17, %v3907_v17  ;;  %v20924_v17 = vld [vmem:[#allocation28_spill] sm:$0xff]  ;;  %v21032_v51 = vld [vmem:[#allocation71_spill] sm:$0xff] }
 0x51b   : > { %20909 = vst [vmem:[#allocation137_spill] sm:$0xff] %v15154_v21  ;;  %10753 = vmatmul.msk.bf16.gmra.mxu3 %vm2042_vm0, %v12873_v4  ;;  %v15200_v38 = vmul.f32 %v20924_v17, %v20924_v17  ;;  %v20934_v17 = vld [vmem:[#allocation15_spill] sm:$0xff] }
 0x51c   : > { %20910 = vst [vmem:[#allocation138_spill] sm:$0xff] %v15158_v58 }
 0x51d   : > { %20911 = vst [vmem:[#allocation139_spill] sm:$0xff] %v15162_v16  ;;  %v20994_v16 = vld [vmem:[#allocation52_spill] sm:$0xff] }
 0x51e   : > { %20912 = vst [vmem:[#allocation140_spill] sm:$0xff] %v15166_v46  ;;  %v20962_v46 = vld [vmem:[#allocation36_spill] sm:$0xff] }
 0x51f   : > { %20913 = vst [vmem:[#allocation141_spill] sm:$0xff] %v15170_v54  ;;  %v20952_v54 = vld [vmem:[#allocation31_spill] sm:$0xff] }
 0x520   : > { %20915 = vst [vmem:[#allocation23_spill] sm:$0xff] %v15174_v22  ;;  %v15194_v22 = vmul.f32 %v20922_v24, %v20922_v24  ;;  %v20930_v24 = vld [vmem:[#allocation13_spill] sm:$0xff] }
 0x521   : > { %20917 = vst [vmem:[#allocation24_spill] sm:$0xff] %v15178_v23  ;;  %v20926_v23 = vld [vmem:[#allocation29_spill] sm:$0xff]  ;;  %v15215_v4 = vmul.f32 %v20930_v24, %v20930_v24 }
 0x522   : > { %20919 = vst [vmem:[#allocation25_spill] sm:$0xff] %v15186_v10  ;;  %v15204_v35 = vmul.f32 %v20926_v23, %v20926_v23  ;;  %v20928_v10 = vld [vmem:[#allocation12_spill] sm:$0xff]  ;;  %v20936_v23 = vld [vmem:[#allocation19_spill] sm:$0xff] }
 0x523   : > { %20921 = vst [vmem:[#allocation26_spill] sm:$0xff] %v15190_v47  ;;  %v15208_v29 = vmul.f32 %v20928_v10, %v20928_v10  ;;  %v15211_v47 = vadd.f32 %v4475_v1, %v14982_v44  ;;  %v20938_v10 = vld [vmem:[#allocation21_spill] sm:$0xff]  ;;  %v20940_v1 = vld [vmem:[#allocation22_spill] sm:$0xff] }
 0x524   : > { %20923 = vst [vmem:[#allocation27_spill] sm:$0xff] %v15194_v22  ;;  %v15219_v22 = vmul.f32 %v20932_v5, %v20932_v5  ;;  %v15231_v44 = vmul.f32 %v20938_v10, %v20938_v10  ;;  %v15235_v24 = vmul.f32 %v20940_v1, %v20940_v1  ;;  %v20948_v10 = vld [vmem:[#allocation17_spill] sm:$0xff] }
 0x525   : > { %20925 = vst [vmem:[#allocation28_spill] sm:$0xff] %v15200_v38  ;;  %v15223_v38 = vmul.f32 %v20934_v17, %v20934_v17  ;;  %12535 = vrsqrt.f32 %v15211_v47  ;;  %v20944_v17 = vld [vmem:[#allocation18_spill] sm:$0xff]  ;;  %vm4802_vm1 = vcmp.eq.f32.partialorder %v15211_v47, inf  ;;  %vm4804_vm2 = vcmp.eq.f32.partialorder %v15211_v47, 0.0 }
 0x526   : > { %20927 = vst [vmem:[#allocation29_spill] sm:$0xff] %v15204_v35  ;;  %v15227_v35 = vmul.f32 %v20936_v23, %v20936_v23  ;;  %v20946_v23 = vld [vmem:[#allocation20_spill] sm:$0xff] }
 0x527   : > { %20929 = vst [vmem:[#allocation12_spill] sm:$0xff] %v15208_v29 }
 0x528   : > { %20931 = vst [vmem:[#allocation13_spill] sm:$0xff] %v15215_v4  ;;  %v20942_v4 = vld [vmem:[#allocation16_spill] sm:$0xff] }
 0x529   : > { %20933 = vst [vmem:[#allocation14_spill] sm:$0xff] %v15219_v22  ;;  %v15239_v5 = vmul.f32 %v20942_v4, %v20942_v4  ;;  %v4115_v22 = vpop.f32.mrf.mxu3  ;;  %v15255_v4 = vpop.f32.mrf.mxu0 }
 0x52a   : > { %20935 = vst [vmem:[#allocation15_spill] sm:$0xff] %v15223_v38  ;;  %v15244_v38 = vmul.f32 %v20944_v17, %v20944_v17  ;;  %v4116_v1 = vadd.f32 %v4115_v22, %v14946_v39  ;;  %v15263_v17 = vmul.f32 %v20952_v54, %v20952_v54  ;;  %v20956_v39 = vld [vmem:[#allocation33_spill] sm:$0xff] }
 0x52b   : > { %20937 = vst [vmem:[#allocation19_spill] sm:$0xff] %v15227_v35  ;;  %v15248_v35 = vmul.f32 %v20946_v23, %v20946_v23  ;;  %v15274_v22 = vmul.f32 %v20956_v39, %v20956_v39 }
 0x52c   : > { %20939 = vst [vmem:[#allocation21_spill] sm:$0xff] %v15231_v44  ;;  %v15252_v44 = vmul.f32 %v20948_v10, %v20948_v10 }
 0x52d   : > { %20941 = vst [vmem:[#allocation22_spill] sm:$0xff] %v15235_v24  ;;  %v3908_v24 = vpop.f32.mrf.mxu2 }
 0x52e   : > { %20943 = vst [vmem:[#allocation16_spill] sm:$0xff] %v15239_v5  ;;  %v20950_v5 = vld [vmem:[#allocation30_spill] sm:$0xff]  ;;  %v3909_v10 = vadd.f32 %v3908_v24, %v14956_v15  ;;  %v20964_v15 = vld [vmem:[#allocation37_spill] sm:$0xff] }
 0x52f   : > { %20945 = vst [vmem:[#allocation18_spill] sm:$0xff] %v15244_v38  ;;  %v15259_v29 = vmul.f32 %v20950_v5, %v20950_v5  ;;  %v20954_v38 = vld [vmem:[#allocation32_spill] sm:$0xff]  ;;  %v15290_v24 = vmul.f32 %v20964_v15, %v20964_v15 }
 0x530   : > { %20947 = vst [vmem:[#allocation20_spill] sm:$0xff] %v15248_v35  ;;  %v15267_v23 = vmul.f32 %v20954_v38, %v20954_v38  ;;  %v20958_v35 = vld [vmem:[#allocation34_spill] sm:$0xff]  ;;  %v15286_v38 = vmul.f32 %v20962_v46, %v20962_v46 }
 0x531   : > { %20949 = vst [vmem:[#allocation17_spill] sm:$0xff] %v15252_v44  ;;  %v15270_v44 = vpop.f32.mrf.mxu1  ;;  %v15278_v5 = vmul.f32 %v20958_v35, %v20958_v35  ;;  %v20968_v35 = vld [vmem:[#allocation39_spill] sm:$0xff] }
 0x532   : > { %20951 = vst [vmem:[#allocation30_spill] sm:$0xff] %v15259_v29  ;;  %v20960_v29 = vld [vmem:[#allocation35_spill] sm:$0xff] }
 0x533   : > { %20953 = vst [vmem:[#allocation31_spill] sm:$0xff] %v15263_v17  ;;  %v15282_v54 = vmul.f32 %v20960_v29, %v20960_v29  ;;  %v4476_v17 = vmul.f32 %v4116_v1, %v4116_v1  ;;  %v20970_v29 = vld [vmem:[#allocation40_spill] sm:$0xff] }
 0x534   : > { %20955 = vst [vmem:[#allocation32_spill] sm:$0xff] %v15267_v23  ;;  %v20966_v23 = vld [vmem:[#allocation38_spill] sm:$0xff]  ;;  %v15302_v1 = vmul.f32 %v20970_v29, %v20970_v29 }
 0x535   : > { %20957 = vst [vmem:[#allocation33_spill] sm:$0xff] %v15274_v22  ;;  %v15294_v39 = vmul.f32 %v20966_v23, %v20966_v23  ;;  %v4477_v22 = vmul.f32 %v3909_v10, %v3909_v10  ;;  %v15309_v15 = vadd.f32 %v4476_v17, %v14986_v9  ;;  %v20976_v10 = vld [vmem:[#allocation43_spill] sm:$0xff]  ;;  %v12875_v9 = vld [vmem:[%s20666_s4 + $0x48] sm:$0xff] }
 0x536   : > { %20959 = vst [vmem:[#allocation34_spill] sm:$0xff] %v15278_v5  ;;  %v15298_v5 = vmul.f32 %v20968_v35, %v20968_v35  ;;  %v15317_v35 = vmul.f32 %v20976_v10, %v20976_v10  ;;  %10714 = vmatmul.msk.bf16.gmra.mxu2 %vm2042_vm0, %v12875_v9  ;;  %v20980_v17 = vld [vmem:[#allocation45_spill] sm:$0xff]  ;;  %10754 = vmatmul.msk.bf16.gmra.mxu3 %vm2042_vm0, %v12875_v9 }
 0x537   : > { %20961 = vst [vmem:[#allocation35_spill] sm:$0xff] %v15282_v54  ;;  %v20972_v54 = vld [vmem:[#allocation41_spill] sm:$0xff]  ;;  %12537 = vrsqrt.f32 %v15309_v15  ;;  %vm4814_vm3 = vcmp.eq.f32.partialorder %v15309_v15, inf  ;;  %vm4816_vm4 = vcmp.eq.f32.partialorder %v15309_v15, 0.0 }
 0x538   : > { %20963 = vst [vmem:[#allocation36_spill] sm:$0xff] %v15286_v38  ;;  %v15306_v46 = vmul.f32 %v20972_v54, %v20972_v54  ;;  %v20974_v38 = vld [vmem:[#allocation42_spill] sm:$0xff]  ;;  %v15332_v54 = vmul.f32 %v20980_v17, %v20980_v17 }
 0x539   : > { %20965 = vst [vmem:[#allocation37_spill] sm:$0xff] %v15290_v24  ;;  %v12536_v24 = vpop.eup %12535  ;;  %v15313_v23 = vmul.f32 %v20974_v38, %v20974_v38  ;;  %v20982_v38 = vld [vmem:[#allocation46_spill] sm:$0xff] }
 0x53a   : > { %20967 = vst [vmem:[#allocation38_spill] sm:$0xff] %v15294_v39  ;;  %v15336_v10 = vmul.f32 %v20982_v38, %v20982_v38  ;;  %v20990_v38 = vld [vmem:[#allocation50_spill] sm:$0xff] }
 0x53b   : > { %20969 = vst [vmem:[#allocation39_spill] sm:$0xff] %v15298_v5  ;;  %v20978_v5 = vld [vmem:[#allocation44_spill] sm:$0xff] }
 0x53c   : > { %20971 = vst [vmem:[#allocation40_spill] sm:$0xff] %v15302_v1  ;;  %v15321_v29 = vmul.f32 %v20978_v5, %v20978_v5  ;;  %v15324_v1 = vadd.f32 %v4477_v22, %v14990_v18  ;;  %v4796_v5 = vmul.f32 %v12536_v24, %v15211_v47  ;;  %v20984_v18 = vld [vmem:[#allocation47_spill] sm:$0xff] }
 0x53d   : > { %20973 = vst [vmem:[#allocation41_spill] sm:$0xff] %v15306_v46  ;;  %v15342_v22 = vmul.f32 %v20984_v18, %v20984_v18  ;;  %v20992_v46 = vld [vmem:[#allocation51_spill] sm:$0xff] }
 0x53e   : > { %20975 = vst [vmem:[#allocation42_spill] sm:$0xff] %v15313_v23  ;;  %v20988_v23 = vld [vmem:[#allocation49_spill] sm:$0xff]  ;;  %12539 = vrsqrt.f32 %v15324_v1  ;;  %v15359_v39 = vmul.f32 %v20992_v46, %v20992_v46  ;;  %vm4826_vm5 = vcmp.eq.f32.partialorder %v15324_v1, inf  ;;  %vm4828_vm6 = vcmp.eq.f32.partialorder %v15324_v1, 0.0 }
 0x53f   : > { %20977 = vst [vmem:[#allocation43_spill] sm:$0xff] %v15317_v35  ;;  %v15350_v17 = vmul.f32 %v20988_v23, %v20988_v23  ;;  %v15366_v23 = vmul.f32 %v20994_v16, %v20994_v16 }
 0x540   : > { %20979 = vst [vmem:[#allocation44_spill] sm:$0xff] %v15321_v29  ;;  %v20986_v29 = vld [vmem:[#allocation48_spill] sm:$0xff] }
 0x541   : > { %20981 = vst [vmem:[#allocation45_spill] sm:$0xff] %v15332_v54  ;;  %v15346_v35 = vmul.f32 %v20986_v29, %v20986_v29  ;;  %v4117_v54 = vpop.f32.mrf.mxu3  ;;  %v4797_v29 = vmul.f32 %v12536_v24, %v4796_v5  ;;  %v21002_v5 = vld [vmem:[#allocation56_spill] sm:$0xff] }
 0x542   : > { %20983 = vst [vmem:[#allocation46_spill] sm:$0xff] %v15336_v10  ;;  %v15355_v10 = vmul.f32 %v20990_v38, %v20990_v38  ;;  %v4118_v18 = vadd.f32 %v4117_v54, %v14960_v62  ;;  %v20998_v38 = vld [vmem:[#allocation54_spill] sm:$0xff]  ;;  %v21000_v62 = vld [vmem:[#allocation55_spill] sm:$0xff]  ;;  %v15385_v16 = vmul.f32 %v21002_v5, %v21002_v5 }
 0x543   : > { %20985 = vst [vmem:[#allocation47_spill] sm:$0xff] %v15342_v22  ;;  %v3911_v22 = vpop.f32.mrf.mxu2  ;;  %v15381_v54 = vmul.f32 %v21000_v62, %v21000_v62  ;;  %v4798_v21 = vmul.f32 0.5, %v4797_v29  ;;  %v12876_v5 = vld [vmem:[%s20667_s5 + $0x58] sm:$0xff]  ;;  %v21010_v29 = vld [vmem:[#allocation60_spill] sm:$0xff] }
 0x544   : > { %20987 = vst [vmem:[#allocation48_spill] sm:$0xff] %v15346_v35  ;;  %v15362_v35 = vpop.f32.mrf.mxu0  ;;  %v3912_v46 = vadd.f32 %v3911_v22, %v14968_v48  ;;  %v21008_v48 = vld [vmem:[#allocation59_spill] sm:$0xff]  ;;  %10636 = vmatmul.msk.bf16.gmra.mxu0 %vm2042_vm0, %v12876_v5  ;;  %10676 = vmatmul.msk.bf16.gmra.mxu1 %vm2042_vm0, %v12876_v5 }
 0x545   : > { %20989 = vst [vmem:[#allocation49_spill] sm:$0xff] %v15350_v17  ;;  %v20996_v17 = vld [vmem:[#allocation53_spill] sm:$0xff]  ;;  %v15397_v22 = vmul.f32 %v21008_v48, %v21008_v48 }
 0x546   : > { %20991 = vst [vmem:[#allocation50_spill] sm:$0xff] %v15355_v10  ;;  %v15370_v58 = vmul.f32 %v20996_v17, %v20996_v17  ;;  %v15374_v10 = vmul.f32 %v20998_v38, %v20998_v38  ;;  %v21004_v17 = vld [vmem:[#allocation57_spill] sm:$0xff]  ;;  %v21006_v38 = vld [vmem:[#allocation58_spill] sm:$0xff]  ;;  %v4479_v62 = vmul.f32 %v3912_v46, %v3912_v46  ;;  %v4799_v46 = vsub.f32 1.5, %v4798_v21 }
 0x547   : > { %20993 = vst [vmem:[#allocation51_spill] sm:$0xff] %v15359_v39  ;;  %v15377_v39 = vpop.f32.mrf.mxu1 }
 0x548   : > { %20995 = vst [vmem:[#allocation52_spill] sm:$0xff] %v15366_v23  ;;  %v4478_v23 = vmul.f32 %v4118_v18, %v4118_v18  ;;  %v12538_v18 = vpop.eup %12537  ;;  %v4800_v21 = vmul.f32 %v12536_v24, %v4799_v46  ;;  %v21026_v24 = vld [vmem:[#allocation68_spill] sm:$0xff] }
 0x549   : > { %20997 = vst [vmem:[#allocation53_spill] sm:$0xff] %v15370_v58  ;;  %v15389_v58 = vmul.f32 %v21004_v17, %v21004_v17  ;;  %v15405_v17 = vmul.f32 %v21010_v29, %v21010_v29  ;;  %v12540_v48 = vpop.eup %12539  ;;  %v15449_v46 = vmul.f32 %v21026_v24, %v21026_v24  ;;  %v15465_v24 = vmul.f32 %v21032_v51, %v21032_v51 }
 0x54a   : > { %20999 = vst [vmem:[#allocation54_spill] sm:$0xff] %v15374_v10  ;;  %v15393_v10 = vmul.f32 %v21006_v38, %v21006_v38  ;;  %v4820_v5 = vmul.f32 %v12540_v48, %v15324_v1 }
 0x54b   : > { %21001 = vst [vmem:[#allocation55_spill] sm:$0xff] %v15381_v54  ;;  %v21016_v54 = vld [vmem:[#allocation63_spill] sm:$0xff] }
 0x54c   : > { %21003 = vst [vmem:[#allocation56_spill] sm:$0xff] %v15385_v16  ;;  %v15422_v29 = vmul.f32 %v21016_v54, %v21016_v54  ;;  %v21022_v54 = vld [vmem:[#allocation66_spill] sm:$0xff] }
 0x54d   : > { %21005 = vst [vmem:[#allocation57_spill] sm:$0xff] %v15389_v58  ;;  %v21012_v58 = vld [vmem:[#allocation61_spill] sm:$0xff] }
 0x54e   : > { %21007 = vst [vmem:[#allocation58_spill] sm:$0xff] %v15393_v10  ;;  %v15409_v38 = vmul.f32 %v21012_v58, %v21012_v58  ;;  %v15412_v10 = vadd.f32 %v4478_v23, %v14994_v42  ;;  %v15425_v58 = vadd.f32 %v4479_v62, %v14998_v3  ;;  %v4808_v42 = vmul.f32 %v12538_v18, %v15309_v15  ;;  %v21018_v23 = vld [vmem:[#allocation64_spill] sm:$0xff]  ;;  %v4120_v3 = vpop.f32.mrf.mxu3 }
 0x54f   : > { %21009 = vst [vmem:[#allocation59_spill] sm:$0xff] %v15397_v22  ;;  %v21014_v22 = vld [vmem:[#allocation62_spill] sm:$0xff]  ;;  %v15430_v9 = vmul.f32 %v21018_v23, %v21018_v23 }
 0x550   : > { %21011 = vst [vmem:[#allocation60_spill] sm:$0xff] %v15405_v17  ;;  %v15418_v16 = vmul.f32 %v21014_v22, %v21014_v22  ;;  %12541 = vrsqrt.f32 %v15412_v10  ;;  %v21020_v22 = vld [vmem:[#allocation65_spill] sm:$0xff]  ;;  %v4809_v62 = vmul.f32 %v12538_v18, %v4808_v42  ;;  %vm4838_vm7 = vcmp.eq.f32.partialorder %v15412_v10, inf }
 0x551   : > { %21013 = vst [vmem:[#allocation61_spill] sm:$0xff] %v15409_v38  ;;  %12543 = vrsqrt.f32 %v15425_v58  ;;  %v21024_v38 = vld [vmem:[#allocation67_spill] sm:$0xff]  ;;  %v21028_v17 = vld [vmem:[#allocation69_spill] sm:$0xff]  ;;  %vm4840_vm8 = vcmp.eq.f32.partialorder %v15412_v10, 0.0  ;;  %vm4850_vm9 = vcmp.eq.f32.partialorder %v15425_v58, inf  ;;  %vm4852_vm10 = vcmp.eq.f32.partialorder %v15425_v58, 0.0 }
 0x552   : > { %21015 = vst [vmem:[#allocation62_spill] sm:$0xff] %v15418_v16  ;;  %v15436_v16 = vmul.f32 %v21020_v22, %v21020_v22  ;;  %v15445_v23 = vmul.f32 %v21024_v38, %v21024_v38  ;;  %v3913_v22 = vpop.f32.mrf.mxu2  ;;  %v4810_v38 = vmul.f32 0.5, %v4809_v62 }
 0x553   : > { %21017 = vst [vmem:[#allocation63_spill] sm:$0xff] %v15422_v29  ;;  %v15440_v29 = vmul.f32 %v21022_v54, %v21022_v54  ;;  %v15454_v54 = vmul.f32 %v21028_v17, %v21028_v17  ;;  %v3914_v56 = vadd.f32 %v3913_v22, %v15002_v34  ;;  %v15476_v22 = vpop.f32.mrf.mxu1 }
 0x554   : > { %21019 = vst [vmem:[#allocation64_spill] sm:$0xff] %v15430_v9  ;;  %v4121_v9 = vadd.f32 %v4120_v3, %v14972_v41  ;;  %v4811_v62 = vsub.f32 1.5, %v4810_v38 }
 0x555   : > { %21021 = vst [vmem:[#allocation65_spill] sm:$0xff] %v15436_v16  ;;  %v4821_v16 = vmul.f32 %v12540_v48, %v4820_v5  ;;  %v4801_v5 = vmul.f32 %v4800_v21, %v15211_v47  ;;  %v4481_v34 = vmul.f32 %v3914_v56, %v3914_v56  ;;  %v12877_v56 = vld [vmem:[%s20666_s4 + $0x50] sm:$0xff] }
 0x556   : > { %21023 = vst [vmem:[#allocation66_spill] sm:$0xff] %v15440_v29  ;;  %v21030_v29 = vld [vmem:[#allocation70_spill] sm:$0xff]  ;;  %v4480_v41 = vmul.f32 %v4121_v9, %v4121_v9  ;;  %10715 = vmatmul.msk.bf16.gmra.mxu2 %vm2042_vm0, %v12877_v56  ;;  %10755 = vmatmul.msk.bf16.gmra.mxu3 %vm2042_vm0, %v12877_v56 }
 0x557   : > { %21025 = vst [vmem:[#allocation67_spill] sm:$0xff] %v15445_v23  ;;  %v15458_v42 = vmul.f32 %v21030_v29, %v21030_v29  ;;  %v15461_v23 = vpop.f32.mrf.mxu0  ;;  %v4822_v3 = vmul.f32 0.5, %v4821_v16  ;;  %v15484_v21 = vadd.f32 %v4481_v34, %v15010_v11  ;;  %v4803_v38 = vsel %vm4802_vm1, %v15211_v47, %v4801_v5  ;;  %v4122_v11 = vpop.f32.mrf.mxu3 }
 0x558   : > { %21027 = vst [vmem:[#allocation68_spill] sm:$0xff] %v15449_v46  ;;  %v21034_v46 = vld [vmem:[#allocation72_spill] sm:$0xff]  ;;  %v15479_v51 = vadd.f32 %v4480_v41, %v15006_v63 }
 0x559   : > { %21029 = vst [vmem:[#allocation69_spill] sm:$0xff] %v15454_v54  ;;  %v15470_v17 = vmul.f32 %v21034_v46, %v21034_v46  ;;  %v21036_v54 = vld [vmem:[#allocation73_spill] sm:$0xff]  ;;  %v4823_v16 = vsub.f32 1.5, %v4822_v3  ;;  %v4805_v46 = vand.u32 2147483648, %v15211_v47  ;;  %v12878_v47 = vld [vmem:[%s20667_s5 + $0x60] sm:$0xff]  ;;  %vm4874_vm13 = vcmp.eq.f32.partialorder %v15484_v21, inf }
 0x55a   : > { %21031 = vst [vmem:[#allocation70_spill] sm:$0xff] %v15458_v42  ;;  %v15474_v29 = vmul.f32 %v21036_v54, %v21036_v54  ;;  %v12542_v42 = vpop.eup %12541  ;;  %v4812_v54 = vmul.f32 %v12538_v18, %v4811_v62  ;;  %12545 = vrsqrt.f32 %v15479_v51  ;;  %v3916_v18 = vpop.f32.mrf.mxu2  ;;  %v4817_v62 = vand.u32 2147483648, %v15309_v15  ;;  %10637 = vmatmul.msk.bf16.gmra.mxu0 %vm2042_vm0, %v12878_v47  ;;  %10677 = vmatmul.msk.bf16.gmra.mxu1 %vm2042_vm0, %v12878_v47 }
 0x55b   : > { %21033 = vst [vmem:[#allocation71_spill] sm:$0xff] %v15465_v24  ;;  %v12544_v9 = vpop.eup %12543  ;;  %v4832_v63 = vmul.f32 %v12542_v42, %v15412_v10  ;;  %v4824_v41 = vmul.f32 %v12540_v48, %v4823_v16  ;;  %12547 = vrsqrt.f32 %v15484_v21  ;;  %v3917_v48 = vadd.f32 %v3916_v18, %v15135_v43  ;;  %v15516_v43 = vpop.f32.mrf.mxu1 }
 0x55c   : > { %21035 = vst [vmem:[#allocation72_spill] sm:$0xff] %v15470_v17  ;;  %v4844_v3 = vmul.f32 %v12544_v9, %v15425_v58  ;;  %v4813_v34 = vmul.f32 %v4812_v54, %v15309_v15  ;;  %v4123_v17 = vadd.f32 %v4122_v11, %v15018_v50  ;;  %v4806_v5 = vsel %vm4804_vm2, %v4805_v46, %v4803_v38  ;;  %v21038_v50 = vld [vmem:[#allocation74_spill] sm:$0xff] }
 0x55d   : > { %21037 = vst [vmem:[#allocation73_spill] sm:$0xff] %v15474_v29  ;;  %v4833_v29 = vmul.f32 %v12542_v42, %v4832_v63  ;;  %v4825_v63 = vmul.f32 %v4824_v41, %v15324_v1  ;;  %v15508_v11 = vmul.f32 %v21038_v50, %v21038_v50  ;;  %vm4862_vm11 = vcmp.eq.f32.partialorder %v15479_v51, inf }
 0x55e   : > { %v4845_v24 = vmul.f32 %v12544_v9, %v4844_v3  ;;  %v4815_v16 = vsel %vm4814_vm3, %v15309_v15, %v4813_v34  ;;  %v4482_v33 = vmul.f32 %v4123_v17, %v4123_v17  ;;  %v4483_v3 = vmul.f32 %v3917_v48, %v3917_v48  ;;  %v21039_v17 = vld [vmem:[#allocation75_spill] sm:$0xff] }
 0x55f   : > { %v4834_v54 = vmul.f32 0.5, %v4833_v29  ;;  %v4818_v14 = vsel %vm4816_vm4, %v4817_v62, %v4815_v16  ;;  %v15510_v20 = vpop.f32.mrf.mxu0  ;;  %v4841_v62 = vand.u32 2147483648, %v15412_v10  ;;  %vm4864_vm12 = vcmp.eq.f32.partialorder %v15479_v51, 0.0 }
 0x560   : > { %v4846_v30 = vmul.f32 0.5, %v4845_v24  ;;  %v6715_v0 = vadd.f32 %v4818_v14, %v4806_v5  ;;  %v12546_v15 = vpop.eup %12545  ;;  %v15520_v24 = vmul.f32 %v21039_v17, %v21039_v17  ;;  %v15523_v29 = vadd.f32 %v4482_v33, %v15014_v2 }
 0x561   : > { %v4835_v26 = vsub.f32 1.5, %v4834_v54  ;;  %v15529_v46 = vadd.f32 %v4483_v3, %v15022_v59  ;;  %v4856_v41 = vmul.f32 %v12546_v15, %v15479_v51  ;;  %v12548_v34 = vpop.eup %12547  ;;  %v4827_v2 = vsel %vm4826_vm5, %v15324_v1, %v4825_v63  ;;  %v21040_v63 = vld [vmem:[#allocation76_spill] sm:$0xff] }
 0x562   : > { %v4847_v14 = vsub.f32 1.5, %v4846_v30  ;;  %6716 = vadd.xlane.f32.xlu0 %v6715_v0  ;;  %v4829_v33 = vand.u32 2147483648, %v15324_v1  ;;  %12549 = vrsqrt.f32 %v15523_v29  ;;  %v4125_v30 = vpop.f32.mrf.mxu3  ;;  %v4868_v0 = vmul.f32 %v12548_v34, %v15484_v21 }
 0x563   : > { %v4836_v38 = vmul.f32 %v12542_v42, %v4835_v26  ;;  %v4857_v18 = vmul.f32 %v12546_v15, %v4856_v41  ;;  %v4126_v26 = vadd.f32 %v4125_v30, %v15150_v37  ;;  %v3918_v42 = vpop.f32.mrf.mxu2  ;;  %12551 = vrsqrt.f32 %v15529_v46 }
 0x564   : > { %v4848_v59 = vmul.f32 %v12544_v9, %v4847_v14  ;;  %v3919_v48 = vadd.f32 %v3918_v42, %v15255_v4  ;;  %v4869_v54 = vmul.f32 %v12548_v34, %v4868_v0  ;;  %v15547_v9 = vmul.f32 %v21040_v63, %v21040_v63  ;;  %v15554_v4 = vpop.f32.mrf.mxu1 }
 0x565   : > { %v4837_v56 = vmul.f32 %v4836_v38, %v15412_v10  ;;  %v4858_v16 = vmul.f32 0.5, %v4857_v18  ;;  %v4484_v50 = vmul.f32 %v4126_v26, %v4126_v26  ;;  %v4830_v37 = vsel %vm4828_vm6, %v4829_v33, %v4827_v2  ;;  %v12879_v33 = vld [vmem:[%s20666_s4 + $0x58] sm:$0xff] }
 0x566   : > { %v4485_v47 = vmul.f32 %v3919_v48, %v3919_v48  ;;  %v4849_v14 = vmul.f32 %v4848_v59, %v15425_v58  ;;  %v4870_v1 = vmul.f32 0.5, %v4869_v54  ;;  %10716 = vmatmul.msk.bf16.gmra.mxu2 %vm2042_vm0, %v12879_v33  ;;  %10756 = vmatmul.msk.bf16.gmra.mxu3 %vm2042_vm0, %v12879_v33  ;;  %vm4876_vm14 = vcmp.eq.f32.partialorder %v15484_v21, 0.0 }
 0x567   : > { %v4839_v5 = vsel %vm4838_vm7, %v15412_v10, %v4837_v56  ;;  %v4859_v38 = vsub.f32 1.5, %v4858_v16  ;;  %v15552_v41 = vpop.f32.mrf.mxu0  ;;  %v15557_v30 = vadd.f32 %v4484_v50, %v15026_v13  ;;  %v4853_v56 = vand.u32 2147483648, %v15425_v58 }
 0x568   : > { %v4842_v3 = vsel %vm4840_vm8, %v4841_v62, %v4839_v5  ;;  %v12550_v10 = vpop.eup %12549  ;;  %v15562_v2 = vadd.f32 %v4485_v47, %v15030_v12  ;;  %v4871_v0 = vsub.f32 1.5, %v4870_v1  ;;  %v4851_v26 = vsel %vm4850_vm9, %v15425_v58, %v4849_v14 }
 0x569   : > { %v6718_v17 = vadd.f32 %v4842_v3, %v4830_v37  ;;  %v4860_v59 = vmul.f32 %v12546_v15, %v4859_v38  ;;  %v4880_v13 = vmul.f32 %v12550_v10, %v15523_v29  ;;  %v12552_v18 = vpop.eup %12551  ;;  %12553 = vrsqrt.f32 %v15557_v30 }
 0x56a   : > { %v4127_v12 = vpop.f32.mrf.mxu3  ;;  %v4892_v15 = vmul.f32 %v12552_v18, %v15529_v46  ;;  %v4865_v16 = vand.u32 2147483648, %v15479_v51  ;;  %v4872_v54 = vmul.f32 %v12548_v34, %v4871_v0  ;;  %12555 = vrsqrt.f32 %v15562_v2 }
 0x56b   : > { %6719 = vadd.xlane.f32.xlu0 %v6718_v17  ;;  %v4861_v42 = vmul.f32 %v4860_v59, %v15479_v51  ;;  %v4881_v62 = vmul.f32 %v12550_v10, %v4880_v13  ;;  %v4128_v48 = vadd.f32 %v4127_v12, %v15270_v44  ;;  %v3921_v5 = vpop.f32.mrf.mxu2  ;;  %v4854_v17 = vsel %vm4852_vm10, %v4853_v56, %v4851_v26  ;;  %v21041_v56 = vld [vmem:[#allocation77_spill] sm:$0xff]  ;;  %v21042_v12 = vld [vmem:[#allocation78_spill] sm:$0xff] }
 0x56c   : > { %v3922_v63 = vadd.f32 %v3921_v5, %v15362_v35  ;;  %v4893_v3 = vmul.f32 %v12552_v18, %v4892_v15  ;;  %v4873_v44 = vmul.f32 %v4872_v54, %v15484_v21  ;;  %v12880_v35 = vld [vmem:[%s20667_s5 + $0x68] sm:$0xff]  ;;  %v15594_v0 = vpop.f32.mrf.mxu1  ;;  %v15602_v26 = vmul.f32 %v21042_v12, %v21042_v12 }
 0x56d   : > { %v4863_v50 = vsel %vm4862_vm11, %v15479_v51, %v4861_v42  ;;  %v4882_v37 = vmul.f32 0.5, %v4881_v62  ;;  %v4486_v47 = vmul.f32 %v4128_v48, %v4128_v48  ;;  %10638 = vmatmul.msk.bf16.gmra.mxu0 %vm2042_vm0, %v12880_v35  ;;  %v15598_v51 = vmul.f32 %v21041_v56, %v21041_v56  ;;  %10678 = vmatmul.msk.bf16.gmra.mxu1 %vm2042_vm0, %v12880_v35 }
 0x56e   : > { %v4866_v14 = vsel %vm4864_vm12, %v4865_v16, %v4863_v50  ;;  %v4487_v38 = vmul.f32 %v3922_v63, %v3922_v63  ;;  %v4894_v59 = vmul.f32 0.5, %v4893_v3  ;;  %v4877_v16 = vand.u32 2147483648, %v15484_v21 }
 0x56f   : > { %v6721_v1 = vadd.f32 %v4866_v14, %v4854_v17  ;;  %v4883_v34 = vsub.f32 1.5, %v4882_v37  ;;  %v15588_v13 = vpop.f32.mrf.mxu0  ;;  %v12554_v58 = vpop.eup %12553  ;;  %v15605_v42 = vadd.f32 %v4486_v47, %v15034_v49  ;;  %vm4886_vm15 = vcmp.eq.f32.partialorder %v15523_v29, inf }
 0x570   : > { %v15611_v62 = vadd.f32 %v4487_v38, %v15038_v7  ;;  %v4895_v48 = vsub.f32 1.5, %v4894_v59  ;;  %v12556_v5 = vpop.eup %12555  ;;  %v4904_v49 = vmul.f32 %v12554_v58, %v15557_v30  ;;  %v4875_v54 = vsel %vm4874_vm13, %v15484_v21, %v4873_v44 }
 0x571   : > { %6722 = vadd.xlane.f32.xlu2 %v6721_v1  ;;  %v4884_v15 = vmul.f32 %v12550_v10, %v4883_v34  ;;  %12557 = vrsqrt.f32 %v15605_v42  ;;  %v4916_v50 = vmul.f32 %v12556_v5, %v15562_v2  ;;  %v4889_v3 = vand.u32 2147483648, %v15523_v29 }
 0x572   : > { %v4130_v33 = vpop.f32.mrf.mxu3  ;;  %v4896_v63 = vmul.f32 %v12552_v18, %v4895_v48  ;;  %v4905_v47 = vmul.f32 %v12554_v58, %v4904_v49  ;;  %12559 = vrsqrt.f32 %v15611_v62  ;;  %vm4888_vm1 = vcmp.eq.f32.partialorder %v15523_v29, 0.0  ;;  %v21043_v48 = vld [vmem:[#allocation79_spill] sm:$0xff] }
 0x573   : > { %v4885_v7 = vmul.f32 %v4884_v15, %v15523_v29  ;;  %v4131_v10 = vadd.f32 %v4130_v33, %v15377_v39  ;;  %v3923_v37 = vpop.f32.mrf.mxu2  ;;  %v4917_v44 = vmul.f32 %v12556_v5, %v4916_v50  ;;  %v4878_v18 = vsel %vm4876_vm14, %v4877_v16, %v4875_v54  ;;  %v12881_v33 = vld [vmem:[%s20666_s4 + $0x60] sm:$0xff] }
 0x574   : > { %v3924_v17 = vadd.f32 %v3923_v37, %v15461_v23  ;;  %v4906_v34 = vmul.f32 0.5, %v4905_v47  ;;  %v4897_v35 = vmul.f32 %v4896_v63, %v15529_v46  ;;  %v15632_v15 = vpop.f32.mrf.mxu1  ;;  %vm4898_vm2 = vcmp.eq.f32.partialorder %v15529_v46, inf }
 0x575   : > { %v4887_v14 = vsel %vm4886_vm15, %v15523_v29, %v4885_v7  ;;  %v4488_v38 = vmul.f32 %v4131_v10, %v4131_v10  ;;  %v4918_v56 = vmul.f32 0.5, %v4917_v44  ;;  %v15636_v29 = vmul.f32 %v21043_v48, %v21043_v48  ;;  %v12882_v48 = vld [vmem:[%s20667_s5 + $0x70] sm:$0xff] }
 0x576   : > { %v4890_v1 = vsel %vm4888_vm1, %v4889_v3, %v4887_v14  ;;  %v4489_v39 = vmul.f32 %v3924_v17, %v3924_v17  ;;  %v4907_v21 = vsub.f32 1.5, %v4906_v34  ;;  %10717 = vmatmul.msk.bf16.gmra.mxu2 %vm2042_vm0, %v12881_v33  ;;  %vm4900_vm3 = vcmp.eq.f32.partialorder %v15529_v46, 0.0  ;;  %10757 = vmatmul.msk.bf16.gmra.mxu3 %vm2042_vm0, %v12881_v33 }
 0x577   : > { %v6724_v59 = vadd.f32 %v4890_v1, %v4878_v18  ;;  %v15630_v12 = vpop.f32.mrf.mxu0  ;;  %v12558_v23 = vpop.eup %12557  ;;  %v15639_v49 = vadd.f32 %v4488_v38, %v15042_v60  ;;  %v4919_v54 = vsub.f32 1.5, %v4918_v56  ;;  %v4901_v63 = vand.u32 2147483648, %v15529_v46 }
 0x578   : > { %v15643_v16 = vadd.f32 %v4489_v39, %v15046_v6  ;;  %v4928_v7 = vmul.f32 %v12558_v23, %v15605_v42  ;;  %v12560_v60 = vpop.eup %12559  ;;  %v4908_v50 = vmul.f32 %v12554_v58, %v4907_v21  ;;  %vm4910_vm4 = vcmp.eq.f32.partialorder %v15557_v30, inf }
 0x579   : > { %6725 = vadd.xlane.f32.xlu2 %v6724_v59  ;;  %12561 = vrsqrt.f32 %v15639_v49  ;;  %v4899_v10 = vsel %vm4898_vm2, %v15529_v46, %v4897_v35  ;;  %v4920_v37 = vmul.f32 %v12556_v5, %v4919_v54  ;;  %v4940_v47 = vmul.f32 %v12560_v60, %v15611_v62 }
 0x57a   : > { %v4132_v6 = vpop.f32.mrf.mxu3  ;;  %v4929_v3 = vmul.f32 %v12558_v23, %v4928_v7  ;;  %v4909_v44 = vmul.f32 %v4908_v50, %v15557_v30  ;;  %vm4912_vm5 = vcmp.eq.f32.partialorder %v15557_v30, 0.0  ;;  %12563 = vrsqrt.f32 %v15643_v16 }
 0x57b   : > { %v4133_v17 = vadd.f32 %v4132_v6, %v15476_v22  ;;  %v3926_v14 = vpop.f32.mrf.mxu2  ;;  %v4913_v38 = vand.u32 2147483648, %v15557_v30  ;;  %v4941_v1 = vmul.f32 %v12560_v60, %v4940_v47  ;;  %v4902_v5 = vsel %vm4900_vm3, %v4901_v63, %v4899_v10 }
 0x57c   : > { %v3927_v58 = vadd.f32 %v3926_v14, %v15510_v20  ;;  %v4930_v18 = vmul.f32 0.5, %v4929_v3  ;;  %v4911_v22 = vsel %vm4910_vm4, %v15557_v30, %v4909_v44  ;;  %vm4922_vm6 = vcmp.eq.f32.partialorder %v15562_v2, inf  ;;  %v15675_v46 = vpop.f32.mrf.mxu1 }
 0x57d   : > { %v4490_v34 = vmul.f32 %v4133_v17, %v4133_v17  ;;  %v4914_v59 = vsel %vm4912_vm5, %v4913_v38, %v4911_v22  ;;  %v4921_v35 = vmul.f32 %v4920_v37, %v15562_v2  ;;  %10639 = vmatmul.msk.bf16.gmra.mxu0 %vm2042_vm0, %v12882_v48  ;;  %vm4924_vm7 = vcmp.eq.f32.partialorder %v15562_v2, 0.0  ;;  %10679 = vmatmul.msk.bf16.gmra.mxu1 %vm2042_vm0, %v12882_v48 }
 0x57e   : > { %v4491_v39 = vmul.f32 %v3927_v58, %v3927_v58  ;;  %v4931_v56 = vsub.f32 1.5, %v4930_v18  ;;  %v6727_v54 = vadd.f32 %v4914_v59, %v4902_v5  ;;  %v4942_v7 = vmul.f32 0.5, %v4941_v1 }
 0x57f   : > { %v15669_v20 = vpop.f32.mrf.mxu0  ;;  %v12562_v21 = vpop.eup %12561  ;;  %v15678_v30 = vadd.f32 %v4490_v34, %v15050_v61  ;;  %v4925_v50 = vand.u32 2147483648, %v15562_v2  ;;  %vm4934_vm8 = vcmp.eq.f32.partialorder %v15605_v42, inf  ;;  %vm4936_vm9 = vcmp.eq.f32.partialorder %v15605_v42, 0.0 }
 0x580   : > { %v15684_v63 = vadd.f32 %v4491_v39, %v15054_v31  ;;  %v4932_v6 = vmul.f32 %v12558_v23, %v4931_v56  ;;  %v4952_v10 = vmul.f32 %v12562_v21, %v15639_v49  ;;  %v12564_v37 = vpop.eup %12563  ;;  %v4943_v61 = vsub.f32 1.5, %v4942_v7  ;;  %v21044_v7 = vld [vmem:[#allocation80_spill] sm:$0xff] }
 0x581   : > { %6728 = vadd.xlane.f32.xlu2 %v6727_v54  ;;  %12565 = vrsqrt.f32 %v15678_v30  ;;  %v4923_v31 = vsel %vm4922_vm6, %v15562_v2, %v4921_v35  ;;  %v4964_v23 = vmul.f32 %v12564_v37, %v15643_v16  ;;  %v4937_v44 = vand.u32 2147483648, %v15605_v42  ;;  %v21046_v2 = vld [vmem:[#allocation81_spill] sm:$0xff] }
 0x582   : > { %v4135_v33 = vpop.f32.mrf.mxu3  ;;  %v4933_v3 = vmul.f32 %v4932_v6, %v15605_v42  ;;  %v4953_v47 = vmul.f32 %v12562_v21, %v4952_v10  ;;  %v4944_v58 = vmul.f32 %v12560_v60, %v4943_v61  ;;  %12567 = vrsqrt.f32 %v15684_v63  ;;  %v12883_v61 = vld [vmem:[%s20666_s4 + $0x68] sm:$0xff] }
 0x583   : > { %v4136_v17 = vadd.f32 %v4135_v33, %v15516_v43  ;;  %v3928_v14 = vpop.f32.mrf.mxu2  ;;  %v4965_v34 = vmul.f32 %v12564_v37, %v4964_v23  ;;  %v4926_v22 = vsel %vm4924_vm7, %v4925_v50, %v4923_v31  ;;  %v15712_v6 = vmul.f32 %v21044_v7, %v21044_v7 }
 0x584   : > { %v3929_v38 = vadd.f32 %v3928_v14, %v15552_v41  ;;  %v4935_v18 = vsel %vm4934_vm8, %v15605_v42, %v4933_v3  ;;  %v4954_v1 = vmul.f32 0.5, %v4953_v47  ;;  %v4945_v43 = vmul.f32 %v4944_v58, %v15611_v62  ;;  %v15708_v41 = vpop.f32.mrf.mxu1 }
 0x585   : > { %v4492_v5 = vmul.f32 %v4136_v17, %v4136_v17  ;;  %v4938_v39 = vsel %vm4936_vm9, %v4937_v44, %v4935_v18  ;;  %v4966_v56 = vmul.f32 0.5, %v4965_v34  ;;  %21045 = vst [vmem:[#allocation74_spill] sm:$0xff] %v15712_v6  ;;  %v15716_v50 = vmul.f32 %v21046_v2, %v21046_v2 }
 0x586   : > { %v4493_v59 = vmul.f32 %v3929_v38, %v3929_v38  ;;  %v6730_v35 = vadd.f32 %v4938_v39, %v4926_v22  ;;  %v4955_v60 = vsub.f32 1.5, %v4954_v1  ;;  %vm4946_vm10 = vcmp.eq.f32.partialorder %v15611_v62, inf  ;;  %10718 = vmatmul.msk.bf16.gmra.mxu2 %vm2042_vm0, %v12883_v61  ;;  %10758 = vmatmul.msk.bf16.gmra.mxu3 %vm2042_vm0, %v12883_v61 }
 0x587   : > { %v15706_v48 = vpop.f32.mrf.mxu0  ;;  %v12566_v54 = vpop.eup %12565  ;;  %21047 = vst [vmem:[#allocation75_spill] sm:$0xff] %v15716_v50  ;;  %v15719_v42 = vadd.f32 %v4492_v5, %v15058_v36  ;;  %vm4948_vm11 = vcmp.eq.f32.partialorder %v15611_v62, 0.0  ;;  %v4967_v31 = vsub.f32 1.5, %v4966_v56  ;;  %v4949_v36 = vand.u32 2147483648, %v15611_v62  ;;  %v21184_v50 = vld [vmem:[#allocation60_spill] sm:$0xff] }
 0x588   : > { %v15723_v10 = vadd.f32 %v4493_v59, %v15062_v19  ;;  %6731 = vadd.xlane.f32.xlu0 %v6730_v35  ;;  %v4956_v33 = vmul.f32 %v12562_v21, %v4955_v60  ;;  %v12568_v3 = vpop.eup %12567  ;;  %vm4958_vm12 = vcmp.eq.f32.partialorder %v15639_v49, inf  ;;  %v4976_v47 = vmul.f32 %v12566_v54, %v15678_v30 }
 0x589   : > { %12569 = vrsqrt.f32 %v15719_v42  ;;  %v4947_v23 = vsel %vm4946_vm10, %v15611_v62, %v4945_v43  ;;  %v4968_v14 = vmul.f32 %v12564_v37, %v4967_v31  ;;  %v4988_v44 = vmul.f32 %v12568_v3, %v15684_v63  ;;  %v21048_v62 = vld [vmem:[#allocation82_spill] sm:$0xff] }
 0x58a   : > { %v4137_v19 = vpop.f32.mrf.mxu3  ;;  %v4957_v17 = vmul.f32 %v4956_v33, %v15639_v49  ;;  %v4961_v38 = vand.u32 2147483648, %v15639_v49  ;;  %v4977_v18 = vmul.f32 %v12566_v54, %v4976_v47  ;;  %12571 = vrsqrt.f32 %v15723_v10 }
 0x58b   : > { %v4138_v21 = vadd.f32 %v4137_v19, %v15554_v4  ;;  %v3931_v58 = vpop.f32.mrf.mxu2  ;;  %vm4960_vm13 = vcmp.eq.f32.partialorder %v15639_v49, 0.0  ;;  %v4989_v5 = vmul.f32 %v12568_v3, %v4988_v44  ;;  %v4950_v37 = vsel %vm4948_vm11, %v4949_v36, %v4947_v23 }
 0x58c   : > { %v3932_v1 = vadd.f32 %v3931_v58, %v15588_v13  ;;  %v4959_v34 = vsel %vm4958_vm12, %v15639_v49, %v4957_v17  ;;  %v4978_v43 = vmul.f32 0.5, %v4977_v18  ;;  %v4969_v35 = vmul.f32 %v4968_v14, %v15643_v16  ;;  %v12884_v13 = vld [vmem:[%s20667_s5 + $0x78] sm:$0xff]  ;;  %v15752_v49 = vpop.f32.mrf.mxu1 }
 0x58d   : > { %v4494_v22 = vmul.f32 %v4138_v21, %v4138_v21  ;;  %v4962_v39 = vsel %vm4960_vm13, %v4961_v38, %v4959_v34  ;;  %v4990_v60 = vmul.f32 0.5, %v4989_v5  ;;  %10640 = vmatmul.msk.bf16.gmra.mxu0 %vm2042_vm0, %v12884_v13  ;;  %v15756_v2 = vmul.f32 %v21048_v62, %v21048_v62  ;;  %10680 = vmatmul.msk.bf16.gmra.mxu1 %vm2042_vm0, %v12884_v13  ;;  %v12885_v62 = vld [vmem:[%s20666_s4 + $0x70] sm:$0xff] }
 0x58e   : > { %v4495_v4 = vmul.f32 %v3932_v1, %v3932_v1  ;;  %v6733_v59 = vadd.f32 %v4962_v39, %v4950_v37  ;;  %vm4970_vm14 = vcmp.eq.f32.partialorder %v15643_v16, inf  ;;  %v4979_v31 = vsub.f32 1.5, %v4978_v43 }
 0x58f   : > { %v15746_v56 = vpop.f32.mrf.mxu0  ;;  %v12570_v7 = vpop.eup %12569  ;;  %21049 = vst [vmem:[#allocation76_spill] sm:$0xff] %v15756_v2  ;;  %v15759_v33 = vadd.f32 %v4494_v22, %v15066_v57  ;;  %vm4972_vm15 = vcmp.eq.f32.partialorder %v15643_v16, 0.0  ;;  %v4991_v47 = vsub.f32 1.5, %v4990_v60  ;;  %v4973_v57 = vand.u32 2147483648, %v15643_v16 }
 0x590   : > { %v15765_v36 = vadd.f32 %v4495_v4, %v15070_v27  ;;  %6734 = vadd.xlane.f32.xlu1 %v6733_v59  ;;  %v5000_v19 = vmul.f32 %v12570_v7, %v15719_v42  ;;  %v12572_v23 = vpop.eup %12571  ;;  %v4980_v17 = vmul.f32 %v12566_v54, %v4979_v31  ;;  %vm4982_vm1 = vcmp.eq.f32.partialorder %v15678_v30, inf }
 0x591   : > { %12573 = vrsqrt.f32 %v15759_v33  ;;  %v4971_v14 = vsel %vm4970_vm14, %v15643_v16, %v4969_v35  ;;  %v4992_v44 = vmul.f32 %v12568_v3, %v4991_v47  ;;  %v5012_v21 = vmul.f32 %v12572_v23, %v15723_v10 }
 0x592   : > { %v4140_v61 = vpop.f32.mrf.mxu3  ;;  %v5001_v27 = vmul.f32 %v12570_v7, %v5000_v19  ;;  %v4981_v18 = vmul.f32 %v4980_v17, %v15678_v30  ;;  %vm4984_vm2 = vcmp.eq.f32.partialorder %v15678_v30, 0.0  ;;  %12575 = vrsqrt.f32 %v15765_v36 }
 0x593   : > { %v4141_v58 = vadd.f32 %v4140_v61, %v15594_v0  ;;  %v3933_v38 = vpop.f32.mrf.mxu2  ;;  %v4985_v1 = vand.u32 2147483648, %v15678_v30  ;;  %v5013_v5 = vmul.f32 %v12572_v23, %v5012_v21  ;;  %v4974_v3 = vsel %vm4972_vm15, %v4973_v57, %v4971_v14 }
 0x594   : > { %v3934_v54 = vadd.f32 %v3933_v38, %v15630_v12  ;;  %v5002_v34 = vmul.f32 0.5, %v5001_v27  ;;  %v4983_v0 = vsel %vm4982_vm1, %v15678_v30, %v4981_v18  ;;  %vm4994_vm3 = vcmp.eq.f32.partialorder %v15684_v63, inf  ;;  %v15789_v59 = vpop.f32.mrf.mxu1 }
 0x595   : > { %v4496_v22 = vmul.f32 %v4141_v58, %v4141_v58  ;;  %v4986_v39 = vsel %vm4984_vm2, %v4985_v1, %v4983_v0  ;;  %v4993_v43 = vmul.f32 %v4992_v44, %v15684_v63  ;;  %vm4996_vm4 = vcmp.eq.f32.partialorder %v15684_v63, 0.0 }
 0x596   : > { %v4497_v37 = vmul.f32 %v3934_v54, %v3934_v54  ;;  %v5003_v4 = vsub.f32 1.5, %v5002_v34  ;;  %v6736_v16 = vadd.f32 %v4986_v39, %v4974_v3  ;;  %v5014_v13 = vmul.f32 0.5, %v5013_v5  ;;  %10719 = vmatmul.msk.bf16.gmra.mxu2 %vm2042_vm0, %v12885_v62  ;;  %10759 = vmatmul.msk.bf16.gmra.mxu3 %vm2042_vm0, %v12885_v62 }
 0x597   : > { %v15787_v12 = vpop.f32.mrf.mxu0  ;;  %v12574_v35 = vpop.eup %12573  ;;  %v15792_v60 = vadd.f32 %v4496_v22, %v15074_v40  ;;  %v4997_v31 = vand.u32 2147483648, %v15684_v63  ;;  %vm5006_vm5 = vcmp.eq.f32.partialorder %v15719_v42, inf  ;;  %vm5008_vm6 = vcmp.eq.f32.partialorder %v15719_v42, 0.0 }
 0x598   : > { %v15796_v30 = vadd.f32 %v4497_v37, %v15078_v55  ;;  %v5004_v47 = vmul.f32 %v12570_v7, %v5003_v4  ;;  %v5024_v19 = vmul.f32 %v12574_v35, %v15759_v33  ;;  %v12576_v40 = vpop.eup %12575  ;;  %6737 = vadd.xlane.f32.xlu2 %v6736_v16  ;;  %v5015_v57 = vsub.f32 1.5, %v5014_v13  ;;  %v21050_v4 = vld [vmem:[#allocation83_spill] sm:$0xff]  ;;  %v21052_v16 = vld [vmem:[#allocation84_spill] sm:$0xff] }
 0x599   : > { %12577 = vrsqrt.f32 %v15792_v60  ;;  %v4995_v17 = vsel %vm4994_vm3, %v15684_v63, %v4993_v43  ;;  %v5036_v7 = vmul.f32 %v12576_v40, %v15765_v36  ;;  %v5009_v21 = vand.u32 2147483648, %v15719_v42 }
 0x59a   : > { %v4142_v55 = vpop.f32.mrf.mxu3  ;;  %v5005_v61 = vmul.f32 %v5004_v47, %v15719_v42  ;;  %v5025_v14 = vmul.f32 %v12574_v35, %v5024_v19  ;;  %v5016_v58 = vmul.f32 %v12572_v23, %v5015_v57  ;;  %12579 = vrsqrt.f32 %v15796_v30 }
 0x59b   : > { %v4143_v44 = vadd.f32 %v4142_v55, %v15632_v15  ;;  %v3936_v27 = vpop.f32.mrf.mxu2  ;;  %v5037_v1 = vmul.f32 %v12576_v40, %v5036_v7  ;;  %v4998_v5 = vsel %vm4996_vm4, %v4997_v31, %v4995_v17  ;;  %v15836_v13 = vmul.f32 %v21052_v16, %v21052_v16 }
 0x59c   : > { %v3937_v38 = vadd.f32 %v3936_v27, %v15669_v20  ;;  %v5007_v18 = vsel %vm5006_vm5, %v15719_v42, %v5005_v61  ;;  %v5026_v54 = vmul.f32 0.5, %v5025_v14  ;;  %v5017_v15 = vmul.f32 %v5016_v58, %v15723_v10  ;;  %v12886_v20 = vld [vmem:[%s20667_s5 + $0x80] sm:$0xff]  ;;  %v15828_v43 = vpop.f32.mrf.mxu1 }
 0x59d   : > { %v4498_v34 = vmul.f32 %v4143_v44, %v4143_v44  ;;  %v5010_v22 = vsel %vm5008_vm6, %v5009_v21, %v5007_v18  ;;  %v5038_v37 = vmul.f32 0.5, %v5037_v1  ;;  %10641 = vmatmul.msk.bf16.gmra.mxu0 %vm2042_vm0, %v12886_v20  ;;  %v15832_v42 = vmul.f32 %v21050_v4, %v21050_v4  ;;  %21053 = vst [vmem:[#allocation78_spill] sm:$0xff] %v15836_v13  ;;  %v12887_v4 = vld [vmem:[%s20666_s4 + $0x78] sm:$0xff] }
 0x59e   : > { %v4499_v3 = vmul.f32 %v3937_v38, %v3937_v38  ;;  %v6739_v0 = vadd.f32 %v5010_v22, %v4998_v5  ;;  %v5027_v23 = vsub.f32 1.5, %v5026_v54  ;;  %vm5018_vm7 = vcmp.eq.f32.partialorder %v15723_v10, inf  ;;  %10681 = vmatmul.msk.bf16.gmra.mxu1 %vm2042_vm0, %v12886_v20  ;;  %v21115_v13 = vld [vmem:[#allocation22_spill] sm:$0xff] }
 0x59f   : > { %v15822_v39 = vpop.f32.mrf.mxu0  ;;  %v12578_v63 = vpop.eup %12577  ;;  %21051 = vst [vmem:[#allocation77_spill] sm:$0xff] %v15832_v42  ;;  %v15839_v31 = vadd.f32 %v4498_v34, %v15082_v52  ;;  %vm5020_vm8 = vcmp.eq.f32.partialorder %v15723_v10, 0.0  ;;  %v5039_v57 = vsub.f32 1.5, %v5038_v37  ;;  %v5021_v17 = vand.u32 2147483648, %v15723_v10 }
 0x5a0   : > { %v15845_v47 = vadd.f32 %v4499_v3, %v15090_v25  ;;  %6740 = vadd.xlane.f32.xlu1 %v6739_v0  ;;  %v5028_v19 = vmul.f32 %v12574_v35, %v5027_v23  ;;  %v12580_v55 = vpop.eup %12579  ;;  %vm5030_vm9 = vcmp.eq.f32.partialorder %v15759_v33, inf  ;;  %v5048_v52 = vmul.f32 %v12578_v63, %v15792_v60  ;;  %v21054_v23 = vld [vmem:[#allocation85_spill] sm:$0xff] }
 0x5a1   : > { %12581 = vrsqrt.f32 %v15839_v31  ;;  %v5019_v61 = vsel %vm5018_vm7, %v15723_v10, %v5017_v15  ;;  %v5040_v14 = vmul.f32 %v12576_v40, %v5039_v57  ;;  %v5060_v7 = vmul.f32 %v12580_v55, %v15796_v30 }
 0x5a2   : > { %v4145_v62 = vpop.f32.mrf.mxu3  ;;  %v5029_v25 = vmul.f32 %v5028_v19, %v15759_v33  ;;  %v5033_v27 = vand.u32 2147483648, %v15759_v33  ;;  %v5049_v21 = vmul.f32 %v12578_v63, %v5048_v52  ;;  %12583 = vrsqrt.f32 %v15845_v47 }
 0x5a3   : > { %v4146_v35 = vadd.f32 %v4145_v62, %v15675_v46  ;;  %v3938_v44 = vpop.f32.mrf.mxu2  ;;  %vm5032_vm10 = vcmp.eq.f32.partialorder %v15759_v33, 0.0  ;;  %v5061_v18 = vmul.f32 %v12580_v55, %v5060_v7  ;;  %v5022_v40 = vsel %vm5020_vm8, %v5021_v17, %v5019_v61 }
 0x5a4   : > { %v3939_v58 = vadd.f32 %v3938_v44, %v15706_v48  ;;  %v5031_v38 = vsel %vm5030_vm9, %v15759_v33, %v5029_v25  ;;  %v5050_v34 = vmul.f32 0.5, %v5049_v21  ;;  %v5041_v22 = vmul.f32 %v5040_v14, %v15765_v36  ;;  %v15866_v0 = vpop.f32.mrf.mxu1 }
 0x5a5   : > { %v4500_v54 = vmul.f32 %v4146_v35, %v4146_v35  ;;  %v5034_v1 = vsel %vm5032_vm10, %v5033_v27, %v5031_v38  ;;  %v5062_v15 = vmul.f32 0.5, %v5061_v18  ;;  %v15870_v33 = vmul.f32 %v21054_v23, %v21054_v23 }
 0x5a6   : > { %v4501_v46 = vmul.f32 %v3939_v58, %v3939_v58  ;;  %v6742_v5 = vadd.f32 %v5034_v1, %v5022_v40  ;;  %vm5042_vm11 = vcmp.eq.f32.partialorder %v15765_v36, inf  ;;  %v5051_v10 = vsub.f32 1.5, %v5050_v34  ;;  %10720 = vmatmul.msk.bf16.gmra.mxu2 %vm2042_vm0, %v12887_v4  ;;  %v12888_v1 = vld [vmem:[%s20667_s5 + $0x88] sm:$0xff]  ;;  %10760 = vmatmul.msk.bf16.gmra.mxu3 %vm2042_vm0, %v12887_v4 }
 0x5a7   : > { %v15864_v3 = vpop.f32.mrf.mxu0  ;;  %v12582_v48 = vpop.eup %12581  ;;  %21055 = vst [vmem:[#allocation79_spill] sm:$0xff] %v15870_v33  ;;  %v15873_v37 = vadd.f32 %v4500_v54, %v15094_v45  ;;  %vm5044_vm12 = vcmp.eq.f32.partialorder %v15765_v36, 0.0  ;;  %v5063_v16 = vsub.f32 1.5, %v5062_v15  ;;  %v5045_v57 = vand.u32 2147483648, %v15765_v36 }
 0x5a8   : > { %v15877_v20 = vadd.f32 %v4501_v46, %v15098_v28  ;;  %6743 = vadd.xlane.f32.xlu1 %v6742_v5  ;;  %v5072_v19 = vmul.f32 %v12582_v48, %v15839_v31  ;;  %v12584_v45 = vpop.eup %12583  ;;  %v5052_v17 = vmul.f32 %v12578_v63, %v5051_v10  ;;  %vm5054_vm13 = vcmp.eq.f32.partialorder %v15792_v60, inf }
 0x5a9   : > { %12585 = vrsqrt.f32 %v15873_v37  ;;  %v5043_v52 = vsel %vm5042_vm11, %v15765_v36, %v5041_v22  ;;  %v5064_v62 = vmul.f32 %v12580_v55, %v5063_v16  ;;  %v5084_v25 = vmul.f32 %v12584_v45, %v15845_v47 }
 0x5aa   : > { %v4147_v28 = vpop.f32.mrf.mxu3  ;;  %v5073_v61 = vmul.f32 %v12582_v48, %v5072_v19  ;;  %v5053_v35 = vmul.f32 %v5052_v17, %v15792_v60  ;;  %vm5056_vm14 = vcmp.eq.f32.partialorder %v15792_v60, 0.0  ;;  %12587 = vrsqrt.f32 %v15877_v20 }
 0x5ab   : > { %v4148_v14 = vadd.f32 %v4147_v28, %v15708_v41  ;;  %v3941_v7 = vpop.f32.mrf.mxu2  ;;  %v5057_v44 = vand.u32 2147483648, %v15792_v60  ;;  %v5085_v21 = vmul.f32 %v12584_v45, %v5084_v25  ;;  %v5046_v55 = vsel %vm5044_vm12, %v5045_v57, %v5043_v52 }
 0x5ac   : > { %v3942_v63 = vadd.f32 %v3941_v7, %v15746_v56  ;;  %v5074_v27 = vmul.f32 0.5, %v5073_v61  ;;  %v5055_v41 = vsel %vm5054_vm13, %v15792_v60, %v5053_v35  ;;  %vm5066_vm15 = vcmp.eq.f32.partialorder %v15796_v30, inf  ;;  %v15909_v36 = vpop.f32.mrf.mxu1 }
 0x5ad   : > { %v4502_v58 = vmul.f32 %v4148_v14, %v4148_v14  ;;  %v5058_v18 = vsel %vm5056_vm14, %v5057_v44, %v5055_v41  ;;  %v5065_v54 = vmul.f32 %v5064_v62, %v15796_v30  ;;  %10642 = vmatmul.msk.bf16.gmra.mxu0 %vm2042_vm0, %v12888_v1  ;;  %vm5068_vm1 = vcmp.eq.f32.partialorder %v15796_v30, 0.0  ;;  %v21056_v41 = vld [vmem:[#allocation86_spill] sm:$0xff] }
 0x5ae   : > { %v4503_v38 = vmul.f32 %v3942_v63, %v3942_v63  ;;  %v5075_v40 = vsub.f32 1.5, %v5074_v27  ;;  %v6745_v46 = vadd.f32 %v5058_v18, %v5046_v55  ;;  %v5086_v5 = vmul.f32 0.5, %v5085_v21  ;;  %10682 = vmatmul.msk.bf16.gmra.mxu1 %vm2042_vm0, %v12888_v1  ;;  %v21058_v18 = vld [vmem:[#allocation87_spill] sm:$0xff] }
 0x5af   : > { %v15903_v56 = vpop.f32.mrf.mxu0  ;;  %v12586_v34 = vpop.eup %12585  ;;  %v15912_v60 = vadd.f32 %v4502_v58, %v15102_v53  ;;  %v5069_v15 = vand.u32 2147483648, %v15796_v30  ;;  %vm5078_vm2 = vcmp.eq.f32.partialorder %v15839_v31, inf  ;;  %vm5080_vm3 = vcmp.eq.f32.partialorder %v15839_v31, 0.0 }
 0x5b0   : > { %v15918_v22 = vadd.f32 %v4503_v38, %v15106_v32  ;;  %v5076_v23 = vmul.f32 %v12582_v48, %v5075_v40  ;;  %v5096_v10 = vmul.f32 %v12586_v34, %v15873_v37  ;;  %v12588_v16 = vpop.eup %12587  ;;  %6746 = vadd.xlane.f32.xlu0 %v6745_v46  ;;  %v5087_v53 = vsub.f32 1.5, %v5086_v5  ;;  %v21060_v40 = vld [vmem:[#allocation128_spill] sm:$0xff] }
 0x5b1   : > { %12589 = vrsqrt.f32 %v15912_v60  ;;  %v5067_v32 = vsel %vm5066_vm15, %v15796_v30, %v5065_v54  ;;  %v5108_v48 = vmul.f32 %v12588_v16, %v15877_v20  ;;  %v5081_v52 = vand.u32 2147483648, %v15839_v31  ;;  %v12889_v46 = vld [vmem:[%s20666_s4 + $0x80] sm:$0xff] }
 0x5b2   : > { %v4150_v4 = vpop.f32.mrf.mxu3  ;;  %v5077_v19 = vmul.f32 %v5076_v23, %v15839_v31  ;;  %v5097_v57 = vmul.f32 %v12586_v34, %v5096_v10  ;;  %v5088_v62 = vmul.f32 %v12584_v45, %v5087_v53  ;;  %12591 = vrsqrt.f32 %v15918_v22 }
 0x5b3   : > { %v4151_v17 = vadd.f32 %v4150_v4, %v15752_v49  ;;  %v3943_v28 = vpop.f32.mrf.mxu2  ;;  %v5109_v7 = vmul.f32 %v12588_v16, %v5108_v48  ;;  %v5070_v63 = vsel %vm5068_vm1, %v5069_v15, %v5067_v32  ;;  %v15944_v38 = vmul.f32 %v21056_v41, %v21056_v41 }
 0x5b4   : > { %v3944_v61 = vadd.f32 %v3943_v28, %v15787_v12  ;;  %v5079_v25 = vsel %vm5078_vm2, %v15839_v31, %v5077_v19  ;;  %v5098_v14 = vmul.f32 0.5, %v5097_v57  ;;  %v5089_v49 = vmul.f32 %v5088_v62, %v15845_v47  ;;  %v15954_v54 = vpop.f32.mrf.mxu1 }
 0x5b5   : > { %v4504_v35 = vmul.f32 %v4151_v17, %v4151_v17  ;;  %v5082_v44 = vsel %vm5080_vm3, %v5081_v52, %v5079_v25  ;;  %v5110_v58 = vmul.f32 0.5, %v5109_v7  ;;  %21057 = vst [vmem:[#allocation80_spill] sm:$0xff] %v15944_v38  ;;  %v15948_v30 = vmul.f32 %v21058_v18, %v21058_v18 }
 0x5b6   : > { %v4505_v27 = vmul.f32 %v3944_v61, %v3944_v61  ;;  %v6748_v21 = vadd.f32 %v5082_v44, %v5070_v63  ;;  %v5099_v45 = vsub.f32 1.5, %v5098_v14  ;;  %vm5090_vm4 = vcmp.eq.f32.partialorder %v15845_v47, inf  ;;  %10721 = vmatmul.msk.bf16.gmra.mxu2 %vm2042_vm0, %v12889_v46  ;;  %10761 = vmatmul.msk.bf16.gmra.mxu3 %vm2042_vm0, %v12889_v46 }
 0x5b7   : > { %v15940_v55 = vpop.f32.mrf.mxu0  ;;  %v12590_v12 = vpop.eup %12589  ;;  %21059 = vst [vmem:[#allocation81_spill] sm:$0xff] %v15948_v30  ;;  %v15951_v31 = vadd.f32 %v4504_v35, %v15110_v8  ;;  %vm5092_vm5 = vcmp.eq.f32.partialorder %v15845_v47, 0.0  ;;  %v5111_v15 = vsub.f32 1.5, %v5110_v58  ;;  %v5093_v23 = vand.u32 2147483648, %v15845_v47  ;;  %v21065_v58 = vld [vmem:[#allocation129_spill] sm:$0xff] }
 0x5b8   : > { %v15957_v1 = vadd.f32 %v4505_v27, %v21060_v40  ;;  %6749 = vadd.xlane.f32.xlu1 %v6748_v21  ;;  %v5100_v5 = vmul.f32 %v12586_v34, %v5099_v45  ;;  %v12592_v8 = vpop.eup %12591  ;;  %vm5102_vm6 = vcmp.eq.f32.partialorder %v15873_v37, inf  ;;  %v5120_v10 = vmul.f32 %v12590_v12, %v15912_v60  ;;  %v21061_v27 = vld [vmem:[#allocation88_spill] sm:$0xff]  ;;  %v21063_v21 = vld [vmem:[#allocation89_spill] sm:$0xff] }
 0x5b9   : > { %12593 = vrsqrt.f32 %v15951_v31  ;;  %v5091_v4 = vsel %vm5090_vm4, %v15845_v47, %v5089_v49  ;;  %v5112_v19 = vmul.f32 %v12588_v16, %v5111_v15  ;;  %v5132_v57 = vmul.f32 %v12592_v8, %v15918_v22 }
 0x5ba   : > { %v4152_v53 = vpop.f32.mrf.mxu3  ;;  %v5101_v32 = vmul.f32 %v5100_v5, %v15873_v37  ;;  %v5105_v17 = vand.u32 2147483648, %v15873_v37  ;;  %v5121_v28 = vmul.f32 %v12590_v12, %v5120_v10  ;;  %12595 = vrsqrt.f32 %v15957_v1 }
 0x5bb   : > { %v4153_v34 = vadd.f32 %v4152_v53, %v15789_v59  ;;  %v3946_v48 = vpop.f32.mrf.mxu2  ;;  %vm5104_vm7 = vcmp.eq.f32.partialorder %v15873_v37, 0.0  ;;  %v5133_v61 = vmul.f32 %v12592_v8, %v5132_v57  ;;  %v5094_v16 = vsel %vm5092_vm5, %v5093_v23, %v5091_v4  ;;  %v21066_v23 = vld [vmem:[#allocation130_spill] sm:$0xff] }
 0x5bc   : > { %v3947_v52 = vadd.f32 %v3946_v48, %v15822_v39  ;;  %v5103_v62 = vsel %vm5102_vm6, %v15873_v37, %v5101_v32  ;;  %v5122_v7 = vmul.f32 0.5, %v5121_v28  ;;  %v5113_v63 = vmul.f32 %v5112_v19, %v15877_v20  ;;  %v12890_v39 = vld [vmem:[%s20667_s5 + $0x90] sm:$0xff]  ;;  %v16007_v46 = vpop.f32.mrf.mxu1 }
 0x5bd   : > { %v4506_v25 = vmul.f32 %v4153_v34, %v4153_v34  ;;  %v5106_v14 = vsel %vm5104_vm7, %v5105_v17, %v5103_v62  ;;  %v5134_v44 = vmul.f32 0.5, %v5133_v61  ;;  %10643 = vmatmul.msk.bf16.gmra.mxu0 %vm2042_vm0, %v12890_v39  ;;  %v15988_v47 = vmul.f32 %v21061_v27, %v21061_v27 }
 0x5be   : > { %v4507_v59 = vmul.f32 %v3947_v52, %v3947_v52  ;;  %v6751_v35 = vadd.f32 %v5106_v14, %v5094_v16  ;;  %v15992_v45 = vmul.f32 %v21063_v21, %v21063_v21  ;;  %v5123_v18 = vsub.f32 1.5, %v5122_v7  ;;  %10683 = vmatmul.msk.bf16.gmra.mxu1 %vm2042_vm0, %v12890_v39 }
 0x5bf   : > { %v15980_v49 = vpop.f32.mrf.mxu0  ;;  %v12594_v37 = vpop.eup %12593  ;;  %21062 = vst [vmem:[#allocation82_spill] sm:$0xff] %v15988_v47  ;;  %v15995_v41 = vadd.f32 %v4506_v25, %v21065_v58  ;;  %vm5114_vm8 = vcmp.eq.f32.partialorder %v15877_v20, inf  ;;  %vm5116_vm9 = vcmp.eq.f32.partialorder %v15877_v20, 0.0  ;;  %v5135_v40 = vsub.f32 1.5, %v5134_v44  ;;  %v21067_v44 = vld [vmem:[#allocation131_spill] sm:$0xff] }
 0x5c0   : > { %21064 = vst [vmem:[#allocation83_spill] sm:$0xff] %v15992_v45  ;;  %6752 = vadd.xlane.f32.xlu1 %v6751_v35  ;;  %v5144_v5 = vmul.f32 %v12594_v37, %v15951_v31  ;;  %v12596_v15 = vpop.eup %12595  ;;  %v16003_v10 = vadd.f32 %v4507_v59, %v21066_v23  ;;  %v5117_v53 = vand.u32 2147483648, %v15877_v20  ;;  %v5124_v4 = vmul.f32 %v12590_v12, %v5123_v18 }
 0x5c1   : > { %12597 = vrsqrt.f32 %v15995_v41  ;;  %v5115_v19 = vsel %vm5114_vm8, %v15877_v20, %v5113_v63  ;;  %v5136_v57 = vmul.f32 %v12592_v8, %v5135_v40  ;;  %v5156_v48 = vmul.f32 %v12596_v15, %v15957_v1  ;;  %v21068_v20 = vld [vmem:[#allocation132_spill] sm:$0xff] }
 0x5c2   : > { %v4155_v32 = vpop.f32.mrf.mxu3  ;;  %v5145_v34 = vmul.f32 %v12594_v37, %v5144_v5  ;;  %v5125_v52 = vmul.f32 %v5124_v4, %v15912_v60  ;;  %vm5126_vm10 = vcmp.eq.f32.partialorder %v15912_v60, inf  ;;  %vm5128_vm11 = vcmp.eq.f32.partialorder %v15912_v60, 0.0 }
 0x5c3   : > { %v4156_v17 = vadd.f32 %v4155_v32, %v15828_v43  ;;  %v3948_v28 = vpop.f32.mrf.mxu2  ;;  %v5129_v62 = vand.u32 2147483648, %v15912_v60  ;;  %v5157_v25 = vmul.f32 %v12596_v15, %v5156_v48  ;;  %v5118_v8 = vsel %vm5116_vm9, %v5117_v53, %v5115_v19 }
 0x5c4   : > { %v3949_v12 = vadd.f32 %v3948_v28, %v15864_v3  ;;  %v5146_v61 = vmul.f32 0.5, %v5145_v34  ;;  %v5127_v14 = vsel %vm5126_vm10, %v15912_v60, %v5125_v52  ;;  %12599 = vrsqrt.f32 %v16003_v10  ;;  %v12891_v60 = vld [vmem:[%s20666_s4 + $0x88] sm:$0xff]  ;;  %v16046_v28 = vpop.f32.mrf.mxu1 }
 0x5c5   : > { %v4508_v16 = vmul.f32 %v4156_v17, %v4156_v17  ;;  %v5130_v7 = vsel %vm5128_vm11, %v5129_v62, %v5127_v14  ;;  %v5137_v59 = vmul.f32 %v5136_v57, %v15918_v22  ;;  %vm5138_vm12 = vcmp.eq.f32.partialorder %v15918_v22, inf }
 0x5c6   : > { %v4509_v43 = vmul.f32 %v3949_v12, %v3949_v12  ;;  %v5147_v35 = vsub.f32 1.5, %v5146_v61  ;;  %v6754_v39 = vadd.f32 %v5130_v7, %v5118_v8  ;;  %v5158_v27 = vmul.f32 0.5, %v5157_v25  ;;  %10722 = vmatmul.msk.bf16.gmra.mxu2 %vm2042_vm0, %v12891_v60  ;;  %v21069_v7 = vld [vmem:[#allocation134_spill] sm:$0xff]  ;;  %10762 = vmatmul.msk.bf16.gmra.mxu3 %vm2042_vm0, %v12891_v60 }
 0x5c7   : > { %v12598_v63 = vpop.eup %12597  ;;  %v16023_v3 = vadd.f32 %v4508_v16, %v21067_v44  ;;  %v16026_v21 = vpop.f32.mrf.mxu0  ;;  %vm5140_vm13 = vcmp.eq.f32.partialorder %v15918_v22, 0.0  ;;  %v5141_v5 = vand.u32 2147483648, %v15918_v22  ;;  %vm5150_vm14 = vcmp.eq.f32.partialorder %v15951_v31, inf }
 0x5c8   : > { %v16029_v58 = vadd.f32 %v4509_v43, %v21068_v20  ;;  %v5148_v18 = vmul.f32 %v12594_v37, %v5147_v35  ;;  %v5168_v40 = vmul.f32 %v12598_v63, %v15995_v41  ;;  %6755 = vadd.xlane.f32.xlu2 %v6754_v39  ;;  %v5159_v23 = vsub.f32 1.5, %v5158_v27 }
 0x5c9   : > { %12601 = vrsqrt.f32 %v16023_v3  ;;  %v5139_v4 = vsel %vm5138_vm12, %v15918_v22, %v5137_v59  ;;  %vm5152_vm15 = vcmp.eq.f32.partialorder %v15951_v31, 0.0  ;;  %v5153_v48 = vand.u32 2147483648, %v15951_v31 }
 0x5ca   : > { %v4157_v53 = vpop.f32.mrf.mxu3  ;;  %v5149_v32 = vmul.f32 %v5148_v18, %v15951_v31  ;;  %v5169_v19 = vmul.f32 %v12598_v63, %v5168_v40  ;;  %v12600_v57 = vpop.eup %12599  ;;  %v5160_v17 = vmul.f32 %v12596_v15, %v5159_v23  ;;  %12603 = vrsqrt.f32 %v16029_v58 }
 0x5cb   : > { %v4158_v37 = vadd.f32 %v4157_v53, %v15866_v0  ;;  %v3951_v34 = vpop.f32.mrf.mxu2  ;;  %v5180_v61 = vmul.f32 %v12600_v57, %v16003_v10  ;;  %v5142_v0 = vsel %vm5140_vm13, %v5141_v5, %v5139_v4  ;;  %vm5162_vm1 = vcmp.eq.f32.partialorder %v15957_v1, inf }
 0x5cc   : > { %v3952_v52 = vadd.f32 %v3951_v34, %v15903_v56  ;;  %v5151_v12 = vsel %vm5150_vm14, %v15951_v31, %v5149_v32  ;;  %v5170_v62 = vmul.f32 0.5, %v5169_v19  ;;  %v5161_v8 = vmul.f32 %v5160_v17, %v15957_v1  ;;  %v12892_v56 = vld [vmem:[%s20667_s5 + $0x98] sm:$0xff] }
 0x5cd   : > { %v4510_v25 = vmul.f32 %v4158_v37, %v4158_v37  ;;  %v5154_v16 = vsel %vm5152_vm15, %v5153_v48, %v5151_v12  ;;  %v5181_v43 = vmul.f32 %v12600_v57, %v5180_v61  ;;  %10644 = vmatmul.msk.bf16.gmra.mxu0 %vm2042_vm0, %v12892_v56  ;;  %vm5164_vm2 = vcmp.eq.f32.partialorder %v15957_v1, 0.0  ;;  %v21070_v32 = vld [vmem:[#allocation135_spill] sm:$0xff] }
 0x5ce   : > { %v6757_v15 = vadd.f32 %v5154_v16, %v5142_v0  ;;  %v5171_v14 = vsub.f32 1.5, %v5170_v62  ;;  %v4511_v22 = vmul.f32 %v3952_v52, %v3952_v52  ;;  %v7104_v35 = vlaneseq  ;;  %10684 = vmatmul.msk.bf16.gmra.mxu1 %vm2042_vm0, %v12892_v56 }
 0x5cf   : > { %v12602_v31 = vpop.eup %12601  ;;  %v16062_v59 = vadd.f32 %v4510_v25, %v21069_v7  ;;  %v5165_v44 = vand.u32 2147483648, %v15957_v1  ;;  %vm5174_vm3 = vcmp.eq.f32.partialorder %v15995_v41, inf  ;;  %v5182_v27 = vmul.f32 0.5, %v5181_v43  ;;  %v16069_v20 = vpop.f32.mrf.mxu0 }
 0x5d0   : > { %6758 = vadd.xlane.f32.xlu0 %v6757_v15  ;;  %v5172_v39 = vmul.f32 %v12598_v63, %v5171_v14  ;;  %v12604_v18 = vpop.eup %12603  ;;  %vm5176_vm4 = vcmp.eq.f32.partialorder %v15995_v41, 0.0  ;;  %v5177_v40 = vand.u32 2147483648, %v15995_v41  ;;  %v5192_v60 = vmul.f32 %v12602_v31, %v16023_v3  ;;  %v21071_v14 = vld [vmem:[#allocation90_spill] sm:$0xff] }
 0x5d1   : > { %12605 = vrsqrt.f32 %v16062_v59  ;;  %v5163_v23 = vsel %vm5162_vm1, %v15957_v1, %v5161_v8  ;;  %v5183_v53 = vsub.f32 1.5, %v5182_v27  ;;  %v5204_v4 = vmul.f32 %v12604_v18, %v16029_v58  ;;  %v16094_v8 = vpop.f32.mrf.mxu1  ;;  %v21075_v1 = vld [vmem:[#allocation136_spill] sm:$0xff]  ;;  %v12893_v27 = vld [vmem:[%s20666_s4 + $0x90] sm:$0xff] }
 0x5d2   : > { %v4160_v5 = vpop.f32.mrf.mxu3  ;;  %v5173_v63 = vmul.f32 %v5172_v39, %v15995_v41  ;;  %v16081_v19 = vadd.f32 %v4511_v22, %v21070_v32  ;;  %v16084_v17 = vand.u32 127, %v7104_v35  ;;  %v5193_v52 = vmul.f32 %v12602_v31, %v5192_v60 }
 0x5d3   : > { %v4161_v37 = vadd.f32 %v4160_v5, %v15909_v36  ;;  %v3953_v48 = vpop.f32.mrf.mxu2  ;;  %v5184_v61 = vmul.f32 %v12600_v57, %v5183_v53  ;;  %v5205_v25 = vmul.f32 %v12604_v18, %v5204_v4  ;;  %v5166_v16 = vsel %vm5164_vm2, %v5165_v44, %v5163_v23  ;;  %v21073_v57 = vld [vmem:[#allocation91_spill] sm:$0xff] }
 0x5d4   : > { %v3954_v12 = vadd.f32 %v3953_v48, %v15940_v55  ;;  %v5175_v62 = vsel %vm5174_vm3, %v15995_v41, %v5173_v63  ;;  %v5194_v15 = vmul.f32 0.5, %v5193_v52  ;;  %v16098_v43 = vmul.f32 %v21071_v14, %v21071_v14  ;;  %v21076_v63 = vld [vmem:[#allocation137_spill] sm:$0xff] }
 0x5d5   : > { %v6717_v34 = vpop.xlane.xlu0 %6716  ;;  %v4512_v0 = vmul.f32 %v4161_v37, %v4161_v37  ;;  %v5178_v36 = vsel %vm5176_vm4, %v5177_v40, %v5175_v62  ;;  %v5206_v7 = vmul.f32 0.5, %v5205_v25  ;;  %v16102_v35 = vmul.f32 %v21073_v57, %v21073_v57 }
 0x5d6   : > { %21072 = vst [vmem:[#allocation84_spill] sm:$0xff] %v16098_v43  ;;  %v4513_v55 = vmul.f32 %v3954_v12, %v3954_v12  ;;  %v6760_v56 = vadd.f32 %v5178_v36, %v5166_v16  ;;  %v5185_v41 = vmul.f32 %v5184_v61, %v16003_v10  ;;  %v5195_v39 = vsub.f32 1.5, %v5194_v15  ;;  %10723 = vmatmul.msk.bf16.gmra.mxu2 %vm2042_vm0, %v12893_v27 }
 0x5d7   : > { %v12606_v22 = vpop.eup %12605  ;;  %21074 = vst [vmem:[#allocation85_spill] sm:$0xff] %v16102_v35  ;;  %v16105_v44 = vadd.f32 %v4512_v0, %v21075_v1  ;;  %v16113_v40 = vadd.s32 4294967288, %v16084_v17  ;;  %v5207_v60 = vsub.f32 1.5, %v5206_v7  ;;  %12607 = vrsqrt.f32 %v16081_v19  ;;  %v16117_v23 = vpop.f32.mrf.mxu0  ;;  %10763 = vmatmul.msk.bf16.gmra.mxu3 %vm2042_vm0, %v12893_v27 }
 0x5d8   : > { %6761 = vadd.xlane.f32.xlu1 %v6760_v56  ;;  %v5216_v5 = vmul.f32 %v12606_v22, %v16062_v59  ;;  %v16120_v53 = vadd.f32 %v4513_v55, %v21076_v63  ;;  %vm5186_vm5 = vcmp.eq.f32.partialorder %v16003_v10, inf  ;;  %vm5188_vm6 = vcmp.eq.f32.partialorder %v16003_v10, 0.0 }
 0x5d9   : > { %v5196_v4 = vmul.f32 %v12602_v31, %v5195_v39  ;;  %v5189_v37 = vand.u32 2147483648, %v16003_v10  ;;  %vm5198_vm7 = vcmp.eq.f32.partialorder %v16023_v3, inf  ;;  %12609 = vrsqrt.f32 %v16105_v44  ;;  %v16152_v1 = vpop.f32.mrf.mxu1 }
 0x5da   : > { %v4162_v32 = vpop.f32.mrf.mxu3  ;;  %v5217_v48 = vmul.f32 %v12606_v22, %v5216_v5  ;;  %v5187_v61 = vsel %vm5186_vm5, %v16003_v10, %v5185_v41  ;;  %v5208_v0 = vmul.f32 %v12604_v18, %v5207_v60  ;;  %vm5200_vm8 = vcmp.eq.f32.partialorder %v16023_v3, 0.0 }
 0x5db   : > { %v4163_v52 = vadd.f32 %v4162_v32, %v15954_v54  ;;  %v3956_v62 = vpop.f32.mrf.mxu2  ;;  %v5197_v25 = vmul.f32 %v5196_v4, %v16023_v3  ;;  %v5201_v31 = vand.u32 2147483648, %v16023_v3  ;;  %12611 = vrsqrt.f32 %v16120_v53 }
 0x5dc   : > { %v5218_v36 = vmul.f32 0.5, %v5217_v48  ;;  %v3957_v14 = vadd.f32 %v3956_v62, %v15980_v49  ;;  %v5190_v56 = vsel %vm5188_vm6, %v5189_v37, %v5187_v61  ;;  %vm5210_vm9 = vcmp.eq.f32.partialorder %v16029_v58, inf  ;;  %v21077_v49 = vld [vmem:[#allocation138_spill] sm:$0xff] }
 0x5dd   : > { %v4514_v15 = vmul.f32 %v4163_v52, %v4163_v52  ;;  %v5199_v55 = vsel %vm5198_vm7, %v16023_v3, %v5197_v25  ;;  %v16137_v54 = vpop.eup %12607  ;;  %vm5212_vm10 = vcmp.eq.f32.partialorder %v16029_v58, 0.0  ;;  %v5209_v10 = vmul.f32 %v5208_v0, %v16029_v58 }
 0x5de   : > { %v6720_v12 = vpop.xlane.xlu0 %6719  ;;  %v5202_v18 = vsel %vm5200_vm8, %v5201_v31, %v5199_v55  ;;  %v5219_v57 = vsub.f32 1.5, %v5218_v36  ;;  %v5213_v39 = vand.u32 2147483648, %v16029_v58  ;;  %vm5222_vm11 = vcmp.eq.f32.partialorder %v16062_v59, inf }
 0x5df   : > { %v16130_v16 = vpack.c.bf16 %v6720_v12, %v6717_v34  ;;  %v12894_v34 = vld [vmem:[%s20667_s5 + $0xa0] sm:$0xff]  ;;  %v16148_v3 = vadd.f32 %v4514_v15, %v21077_v49  ;;  %v6763_v7 = vadd.f32 %v5202_v18, %v5190_v56  ;;  %v12610_v41 = vpop.eup %12609  ;;  %vm5224_vm12 = vcmp.eq.f32.partialorder %v16062_v59, 0.0  ;;  %v16162_v32 = vpop.f32.mrf.mxu0 }
 0x5e0   : > { %10645 = vmatmul.msk.bf16.gmra.mxu0 %vm2042_vm0, %v12894_v34  ;;  %10685 = vmatmul.msk.bf16.gmra.mxu1 %vm2042_vm0, %v12894_v34  ;;  %v5225_v60 = vand.u32 2147483648, %v16062_v59  ;;  %vm7109_vm13 = vcmask 130112   ;;  %v4515_v5 = vmul.f32 %v3957_v14, %v3957_v14  ;;  %v5220_v27 = vmul.f32 %v12606_v22, %v5219_v57  ;;  %v21078_v56 = vld [vmem:[#allocation139_spill] sm:$0xff] }
 0x5e1   : > { %6764 = vadd.xlane.f32.xlu2 %v6763_v7  ;;  %v5228_v63 = vmul.f32 %v16137_v54, %v16081_v19  ;;  %v5240_v4 = vmul.f32 %v12610_v41, %v16105_v44  ;;  %v16165_v48 = vadd.s32 4294967280, %v16084_v17  ;;  %v16168_v52 = vadd.s32 4294967272, %v16084_v17  ;;  %v12612_v62 = vpop.eup %12611 }
 0x5e2   : > { %v4165_v37 = vpop.f32.mrf.mxu3  ;;  %12613 = vrsqrt.f32 %v16148_v3  ;;  %v5211_v25 = vsel %vm5210_vm9, %v16029_v58, %v5209_v10  ;;  %v5221_v0 = vmul.f32 %v5220_v27, %v16062_v59  ;;  %v7329_v15 = vunpack.c.l.b16 %v16130_v16  ;;  %v21079_v27 = vld [vmem:[#allocation92_spill] sm:$0xff]  ;;  %v12218_v58 = vld [vmem:[%s20668_s6 + $0x34] sm:$0xf0] }
 0x5e3   : > { %v3958_v61 = vpop.f32.mrf.mxu2  ;;  %v5229_v31 = vmul.f32 %v16137_v54, %v5228_v63  ;;  %v5241_v36 = vmul.f32 %v12610_v41, %v5240_v4  ;;  %v7330_v14 = vunpack.c.h.b16 %v16130_v16  ;;  %vm5234_vm14 = vcmp.eq.f32.partialorder %v16081_v19, inf }
 0x5e4   : > { %v6723_v22 = vpop.xlane.xlu2 %6722  ;;  %vm5246_vm15 = vcmp.eq.f32.partialorder %v16105_v44, inf  ;;  %v5252_v55 = vmul.f32 %v12612_v62, %v16120_v53  ;;  %v16183_v18 = vadd.f32 %v4515_v5, %v21078_v56  ;;  %v5223_v34 = vsel %vm5222_vm11, %v16062_v59, %v5221_v0 }
 0x5e5   : > { %v5230_v49 = vmul.f32 0.5, %v5229_v31  ;;  %v5242_v7 = vmul.f32 0.5, %v5241_v36  ;;  %v4166_v10 = vadd.f32 %v4165_v37, %v16007_v46  ;;  %v5214_v16 = vsel %vm5212_vm10, %v5213_v39, %v5211_v25  ;;  %v10853_v46 = vld [vmem:[%s20668_s6 + $0x30] sm:$0xf]  ;;  %v12895_v37 = vld [vmem:[%s20666_s4 + $0x98] sm:$0xff] }
 0x5e6   : > { %v5226_v57 = vsel %vm5224_vm12, %v5225_v60, %v5223_v34  ;;  %vm5236_vm1 = vcmp.eq.f32.partialorder %v16081_v19, 0.0  ;;  %vm5248_vm2 = vcmp.eq.f32.partialorder %v16105_v44, 0.0  ;;  %v5253_v5 = vmul.f32 %v12612_v62, %v5252_v55  ;;  %10724 = vmatmul.msk.bf16.gmra.mxu2 %vm2042_vm0, %v12895_v37 }
 0x5e7   : > { %v16197_v63 = vmul.f32 %v21079_v27, %v21079_v27  ;;  %v6766_v4 = vadd.f32 %v5226_v57, %v5214_v16  ;;  %vm7113_vm3 = vcmask 195712   ;;  %v5231_v0 = vsub.f32 1.5, %v5230_v49  ;;  %v16215_v49 = vpop.f32.mrf.mxu1  ;;  %v16218_v27 = vpop.f32.mrf.mxu0  ;;  %10764 = vmatmul.msk.bf16.gmra.mxu3 %vm2042_vm0, %v12895_v37 }
 0x5e8   : > { %v5243_v31 = vsub.f32 1.5, %v5242_v7  ;;  %v12614_v59 = vpop.eup %12613  ;;  %v7337_v39 = vperm.slane %v7329_v15, %v16084_v17  ;;  %v7338_v60 = vperm.slane %v7330_v14, %v16113_v40  ;;  %vm20719_vm4 = vcmask 261312  }
 0x5e9   : > { %21080 = vst [vmem:[#allocation86_spill] sm:$0xff] %v16197_v63  ;;  %v5249_v25 = vand.u32 2147483648, %v16105_v44  ;;  %v5254_v36 = vmul.f32 0.5, %v5253_v5  ;;  %v3959_v55 = vadd.f32 %v3958_v61, %v16026_v21  ;;  %6767 = vadd.xlane.f32.xlu0 %v6766_v4  ;;  %v5232_v56 = vmul.f32 %v16137_v54, %v5231_v0 }
 0x5ea   : > { %v5244_v34 = vmul.f32 %v12610_v41, %v5243_v31  ;;  %v5264_v15 = vmul.f32 %v12614_v59, %v16148_v3  ;;  %v4516_v14 = vmul.f32 %v4166_v10, %v4166_v10  ;;  %v4167_v7 = vpop.f32.mrf.mxu3  ;;  %v10854_v57 = vor.u32 %v12218_v58, %v10853_v46 }
 0x5eb   : > { %v5255_v16 = vsub.f32 1.5, %v5254_v36  ;;  %12615 = vrsqrt.f32 %v16183_v18  ;;  %v3961_v5 = vpop.f32.mrf.mxu2  ;;  %v5233_v21 = vmul.f32 %v5232_v56, %v16081_v19  ;;  %vm5258_vm5 = vcmp.eq.f32.partialorder %v16120_v53, inf  ;;  %v21081_v56 = vld [vmem:[#allocation140_spill] sm:$0xff] }
 0x5ec   : > { %v6726_v12 = vpop.xlane.xlu2 %6725  ;;  %v5245_v61 = vmul.f32 %v5244_v34, %v16105_v44  ;;  %v5265_v54 = vmul.f32 %v12614_v59, %v5264_v15  ;;  %v7339_v41 = vsel %vm7109_vm13, %v7338_v60, %v7337_v39  ;;  %v4168_v10 = vadd.f32 %v4167_v7, %v16046_v28  ;;  %7407 = vmatpush.bf16.msra.mxu3 %v10854_v57 }
 0x5ed   : > { %v6956_v4 = vpack.c.bf16 %v6726_v12, %v6723_v22  ;;  %v5256_v0 = vmul.f32 %v12612_v62, %v5255_v16  ;;  %v4517_v31 = vmul.f32 %v3959_v55, %v3959_v55  ;;  %v5235_v46 = vsel %vm5234_vm14, %v16081_v19, %v5233_v21  ;;  %v12896_v12 = vld [vmem:[%s20667_s5 + $0xa8] sm:$0xff] }
 0x5ee   : > { %v5247_v58 = vsel %vm5246_vm15, %v16105_v44, %v5245_v61  ;;  %v5266_v36 = vmul.f32 0.5, %v5265_v54  ;;  %v16232_v34 = vadd.f32 %v4516_v14, %v21081_v56  ;;  %v3962_v28 = vadd.f32 %v3961_v5, %v16069_v20  ;;  %v21083_v21 = vld [vmem:[#allocation141_spill] sm:$0xff]  ;;  %v10821_v56 = vld [vmem:[%s20668_s6 + $0x78] sm:$0xf0] }
 0x5ef   : > { %v7331_v15 = vunpack.c.l.b16 %v6956_v4  ;;  %v7332_v39 = vunpack.c.h.b16 %v6956_v4  ;;  %v21082_v62 = vand.u32 2147483648, %v16081_v19  ;;  %v5250_v60 = vsel %vm5248_vm2, %v5249_v25, %v5247_v58  ;;  %v16256_v25 = vpop.f32.mrf.mxu1 }
 0x5f0   : > { %10646 = vmatmul.msk.bf16.gmra.mxu0 %vm2042_vm0, %v12896_v12  ;;  %v5257_v55 = vmul.f32 %v5256_v0, %v16120_v53  ;;  %v5267_v14 = vsub.f32 1.5, %v5266_v36  ;;  %10686 = vmatmul.msk.bf16.gmra.mxu1 %vm2042_vm0, %v12896_v12  ;;  %v4518_v7 = vmul.f32 %v4168_v10, %v4168_v10  ;;  %vm5260_vm6 = vcmp.eq.f32.partialorder %v16120_v53, 0.0  ;;  %v12226_v0 = vld [vmem:[%s20668_s6 + $0x74] sm:$0xf0]  ;;  %v12225_v36 = vld [vmem:[%s20668_s6 + $0x74] sm:$0xf] }
 0x5f1   : > { %v5238_v22 = vsel %vm5236_vm1, %v21082_v62, %v5235_v46  ;;  %v16248_v20 = vpop.eup %12615  ;;  %v7340_v16 = vperm.slane %v7331_v15, %v16165_v48  ;;  %v7342_v37 = vperm.slane %v7332_v39, %v16168_v52  ;;  %v5261_v19 = vand.u32 2147483648, %v16120_v53  ;;  %v21084_v15 = vld [vmem:[#allocation23_spill] sm:$0xff] }
 0x5f2   : > { %v6769_v57 = vadd.f32 %v5250_v60, %v5238_v22  ;;  %v5268_v5 = vmul.f32 %v12614_v59, %v5267_v14  ;;  %v5276_v44 = vmul.f32 %v16248_v20, %v16183_v18  ;;  %v16259_v61 = vadd.f32 %v4517_v31, %v21083_v21  ;;  %v4170_v10 = vpop.f32.mrf.mxu3  ;;  %v10819_v59 = vld [vmem:[%s20668_s6 + $0x70] sm:$0xf]  ;;  %v16289_v22 = vpop.f32.mrf.mxu0 }
 0x5f3   : > { %v7341_v54 = vsel %vm7113_vm3, %v7340_v16, %v7339_v41  ;;  %v5259_v4 = vsel %vm5258_vm5, %v16120_v53, %v5257_v55  ;;  %12617 = vrsqrt.f32 %v16232_v34  ;;  %v3963_v41 = vpop.f32.mrf.mxu2  ;;  %vm5270_vm7 = vcmp.eq.f32.partialorder %v16148_v3, inf }
 0x5f4   : > { %6770 = vadd.xlane.f32.xlu1 %v6769_v57  ;;  %v16273_v31 = vsel %vm20719_vm4, %v7342_v37, %v7341_v54  ;;  %v5269_v46 = vmul.f32 %v5268_v5, %v16148_v3  ;;  %v5277_v58 = vmul.f32 %v16248_v20, %v5276_v44  ;;  %v16285_v39 = vadd.f32 %v4518_v7, %v21084_v15  ;;  %v21087_v44 = vld [vmem:[#allocation94_spill] sm:$0xff]  ;;  %v21089_v54 = vld [vmem:[#allocation95_spill] sm:$0xff] }
 0x5f5   : > { %v4519_v12 = vmul.f32 %v3962_v28, %v3962_v28  ;;  %vm5272_vm8 = vcmp.eq.f32.partialorder %v16148_v3, 0.0  ;;  %v5273_v62 = vand.u32 2147483648, %v16148_v3  ;;  %v5262_v60 = vsel %vm5260_vm6, %v5261_v19, %v5259_v4  ;;  %v21085_v28 = vld [vmem:[#allocation93_spill] sm:$0xff] }
 0x5f6   : > { %v5271_v55 = vsel %vm5270_vm7, %v16148_v3, %v5269_v46  ;;  %v5278_v14 = vmul.f32 0.5, %v5277_v58  ;;  %v10820_v16 = vor.u32 %v12226_v0, %v10819_v59  ;;  %v4171_v37 = vadd.f32 %v4170_v10, %v16094_v8  ;;  %v21091_v8 = vld [vmem:[#allocation24_spill] sm:$0xff] }
 0x5f7   : > { %v5274_v57 = vsel %vm5272_vm8, %v5273_v62, %v5271_v55  ;;  %v10824_v5 = vor.u32 %v12225_v36, %v10821_v56  ;;  %12619 = vrsqrt.f32 %v16259_v61  ;;  %v16298_v7 = vmul.f32 %v21085_v28, %v21085_v28  ;;  %v12897_v0 = vld [vmem:[%s20666_s4 + $0xa0] sm:$0xff]  ;;  %v21094_v36 = vld [vmem:[#allocation97_spill] sm:$0xff]  ;;  %v16329_v15 = vpop.f32.mrf.mxu1  ;;  %v6729_v62 = vpop.xlane.xlu2 %6728 }
 0x5f8   : > { %v16302_v21 = vmul.f32 %v21087_v44, %v21087_v44  ;;  %v6772_v53 = vadd.f32 %v5274_v57, %v5262_v60  ;;  %v5279_v19 = vsub.f32 1.5, %v5278_v14  ;;  %7303 = vmatpush.bf16.msra.mxu0 %v10820_v16  ;;  %v16306_v4 = vmul.f32 %v21089_v54, %v21089_v54  ;;  %10725 = vmatmul.msk.bf16.gmra.mxu2 %vm2042_vm0, %v12897_v0  ;;  %v21092_v46 = vld [vmem:[#allocation96_spill] sm:$0xff] }
 0x5f9   : > { %21086 = vst [vmem:[#allocation87_spill] sm:$0xff] %v16298_v7  ;;  %v12618_v3 = vpop.eup %12617  ;;  %v16309_v10 = vadd.f32 %v4519_v12, %v21091_v8  ;;  %v3964_v59 = vadd.f32 %v3963_v41, %v16117_v23  ;;  %7316 = vmatpush.bf16.msra.mxu1 %v10824_v5  ;;  %12621 = vrsqrt.f32 %v16285_v39  ;;  %v16319_v58 = vmul.f32 %v21092_v46, %v21092_v46 }
 0x5fa   : > { %21088 = vst [vmem:[#allocation128_spill] sm:$0xff] %v16302_v21  ;;  %v16323_v56 = vmul.f32 %v21094_v36, %v21094_v36  ;;  %6773 = vadd.xlane.f32.xlu2 %v6772_v53  ;;  %v16326_v23 = vadd.s32 4294967264, %v16084_v17  ;;  %v5288_v41 = vmul.f32 %v12618_v3, %v16232_v34  ;;  %v4520_v12 = vmul.f32 %v4171_v37, %v4171_v37  ;;  %v4172_v60 = vpop.f32.mrf.mxu3  ;;  %v16339_v37 = vpop.f32.mrf.mxu0  ;;  %v21096_v36 = vld [vmem:[#allocation25_spill] sm:$0xff] }
 0x5fb   : > { %21090 = vst [vmem:[#allocation88_spill] sm:$0xff] %v16306_v4  ;;  %vm20720_vm9 = vcmask 326912   ;;  %v16332_v55 = vadd.s32 4294967256, %v16084_v17  ;;  %vm20716_vm10 = vcmask 392512   ;;  %v6732_v14 = vpop.xlane.xlu0 %6731  ;;  %v3966_v16 = vpop.f32.mrf.mxu2  ;;  %v5280_v57 = vmul.f32 %v16248_v20, %v5279_v19  ;;  %10765 = vmatmul.msk.bf16.gmra.mxu3 %vm2042_vm0, %v12897_v0 }
 0x5fc   : > { %21093 = vst [vmem:[#allocation89_spill] sm:$0xff] %v16319_v58  ;;  %vm5282_vm11 = vcmp.eq.f32.partialorder %v16183_v18, inf  ;;  %v5285_v5 = vand.u32 2147483648, %v16183_v18  ;;  %v5289_v28 = vmul.f32 %v12618_v3, %v5288_v41  ;;  %v4521_v53 = vmul.f32 %v3964_v59, %v3964_v59 }
 0x5fd   : > { %21095 = vst [vmem:[#allocation129_spill] sm:$0xff] %v16323_v56  ;;  %v12620_v44 = vpop.eup %12619  ;;  %v6957_v54 = vpack.c.bf16 %v6732_v14, %v6729_v62  ;;  %vm5294_vm12 = vcmp.eq.f32.partialorder %v16232_v34, inf  ;;  %12623 = vrsqrt.f32 %v16309_v10  ;;  %v4173_v8 = vadd.f32 %v4172_v60, %v16152_v1  ;;  %v12898_v56 = vld [vmem:[%s20667_s5 + $0xb0] sm:$0xff] }
 0x5fe   : > { %vm5284_vm14 = vcmp.eq.f32.partialorder %v16183_v18, 0.0  ;;  %v5290_v46 = vmul.f32 0.5, %v5289_v28  ;;  %vm5296_vm15 = vcmp.eq.f32.partialorder %v16232_v34, 0.0  ;;  %v5300_v20 = vmul.f32 %v12620_v44, %v16259_v61 }
 0x5ff   : > { %v12622_v19 = vpop.eup %12621  ;;  %v16346_v41 = vadd.f32 %v4520_v12, %v21096_v36  ;;  %v7333_v59 = vunpack.c.l.b16 %v6957_v54  ;;  %v7334_v62 = vunpack.c.h.b16 %v6957_v54  ;;  %v5297_v14 = vand.u32 2147483648, %v16232_v34  ;;  %v21097_v12 = vld [vmem:[#allocation26_spill] sm:$0xff] }
 0x600   : > { %10647 = vmatmul.msk.bf16.gmra.mxu0 %vm2042_vm0, %v12898_v56  ;;  %v5281_v1 = vmul.f32 %v5280_v57, %v16183_v18  ;;  %v5291_v60 = vsub.f32 1.5, %v5290_v46  ;;  %v5301_v28 = vmul.f32 %v12620_v44, %v5300_v20  ;;  %v5312_v58 = vmul.f32 %v12622_v19, %v16285_v39  ;;  %10687 = vmatmul.msk.bf16.gmra.mxu1 %vm2042_vm0, %v12898_v56 }
 0x601   : > { %v16358_v54 = vadd.f32 %v4521_v53, %v21097_v12  ;;  %v7344_v36 = vperm.slane %v7333_v59, %v16326_v23  ;;  %v7346_v4 = vperm.slane %v7334_v62, %v16332_v55  ;;  %vm5306_vm1 = vcmp.eq.f32.partialorder %v16259_v61, inf  ;;  %v16368_v59 = vpop.f32.mrf.mxu1 }
 0x602   : > { %v4522_v21 = vmul.f32 %v4173_v8, %v4173_v8  ;;  %v5292_v7 = vmul.f32 %v12618_v3, %v5291_v60  ;;  %v5302_v0 = vmul.f32 0.5, %v5301_v28  ;;  %v5313_v63 = vmul.f32 %v12622_v19, %v5312_v58  ;;  %v4175_v56 = vpop.f32.mrf.mxu3  ;;  %v16382_v60 = vpop.f32.mrf.mxu0  ;;  %v21098_v28 = vld [vmem:[#allocation27_spill] sm:$0xff] }
 0x603   : > { %v12624_v57 = vpop.eup %12623  ;;  %v7345_v46 = vsel %vm20720_vm9, %v7344_v36, %v16273_v31  ;;  %v3967_v20 = vadd.f32 %v3966_v16, %v16162_v32  ;;  %v5309_v53 = vand.u32 2147483648, %v16259_v61  ;;  %12625 = vrsqrt.f32 %v16346_v41  ;;  %v3968_v8 = vpop.f32.mrf.mxu2 }
 0x604   : > { %v16371_v62 = vsel %vm20716_vm10, %v7346_v4, %v7345_v46  ;;  %v5283_v3 = vsel %vm5282_vm11, %v16183_v18, %v5281_v1  ;;  %v5293_v58 = vmul.f32 %v5292_v7, %v16232_v34  ;;  %v5303_v31 = vsub.f32 1.5, %v5302_v0 }
 0x605   : > { %vm5308_vm2 = vcmp.eq.f32.partialorder %v16259_v61, 0.0  ;;  %vm5318_vm5 = vcmp.eq.f32.partialorder %v16285_v39, inf  ;;  %v5314_v32 = vmul.f32 0.5, %v5313_v63  ;;  %vm5320_vm6 = vcmp.eq.f32.partialorder %v16285_v39, 0.0 }
 0x606   : > { %v5321_v16 = vand.u32 2147483648, %v16285_v39  ;;  %v5324_v4 = vmul.f32 %v12624_v57, %v16309_v10  ;;  %v16385_v12 = vadd.f32 %v4522_v21, %v21098_v28  ;;  %v5295_v7 = vsel %vm5294_vm12, %v16232_v34, %v5293_v58 }
 0x607   : > { %v5304_v1 = vmul.f32 %v12620_v44, %v5303_v31  ;;  %12627 = vrsqrt.f32 %v16358_v54  ;;  %v5286_v63 = vsel %vm5284_vm14, %v5285_v5, %v5283_v3  ;;  %v5298_v36 = vsel %vm5296_vm15, %v5297_v14, %v5295_v7  ;;  %v12899_v44 = vld [vmem:[%s20666_s4 + $0xa8] sm:$0xff] }
 0x608   : > { %v5315_v0 = vsub.f32 1.5, %v5314_v32  ;;  %v5325_v46 = vmul.f32 %v12624_v57, %v5324_v4  ;;  %v4523_v35 = vmul.f32 %v3967_v20, %v3967_v20  ;;  %v6775_v43 = vadd.f32 %v5298_v36, %v5286_v63  ;;  %10726 = vmatmul.msk.bf16.gmra.mxu2 %vm2042_vm0, %v12899_v44  ;;  %v6735_v32 = vpop.xlane.xlu1 %6734 }
 0x609   : > { %v4176_v21 = vadd.f32 %v4175_v56, %v16215_v49  ;;  %v5305_v28 = vmul.f32 %v5304_v1, %v16259_v61  ;;  %v12626_v45 = vpop.eup %12625  ;;  %v16402_v18 = vadd.s32 4294967248, %v16084_v17  ;;  %vm7129_vm7 = vcmask 458112  }
 0x60a   : > { %v5316_v47 = vmul.f32 %v12622_v19, %v5315_v0  ;;  %v5326_v34 = vmul.f32 0.5, %v5325_v46  ;;  %6776 = vadd.xlane.f32.xlu1 %v6775_v43  ;;  %v16408_v5 = vadd.s32 4294967240, %v16084_v17  ;;  %v5336_v19 = vmul.f32 %v12626_v45, %v16346_v41  ;;  %v4177_v20 = vpop.f32.mrf.mxu3  ;;  %v21099_v43 = vld [vmem:[#allocation28_spill] sm:$0xff] }
 0x60b   : > { %v5307_v49 = vsel %vm5306_vm1, %v16259_v61, %v5305_v28  ;;  %12629 = vrsqrt.f32 %v16385_v12  ;;  %vm7133_vm8 = vcmask 523712   ;;  %vm5330_vm11 = vcmp.eq.f32.partialorder %v16309_v10, inf  ;;  %v3971_v7 = vpop.f32.mrf.mxu2  ;;  %v6738_v36 = vpop.xlane.xlu2 %6737  ;;  %10766 = vmatmul.msk.bf16.gmra.mxu3 %vm2042_vm0, %v12899_v44 }
 0x60c   : > { %v5317_v14 = vmul.f32 %v5316_v47, %v16285_v39  ;;  %v5327_v56 = vsub.f32 1.5, %v5326_v34  ;;  %v16415_v58 = vadd.f32 %v4523_v35, %v21099_v43  ;;  %v4524_v31 = vmul.f32 %v4176_v21, %v4176_v21  ;;  %v16424_v28 = vpop.f32.mrf.mxu1 }
 0x60d   : > { %v12628_v3 = vpop.eup %12627  ;;  %v3969_v4 = vadd.f32 %v3968_v8, %v16218_v27  ;;  %v5337_v1 = vmul.f32 %v12626_v45, %v5336_v19  ;;  %v5310_v63 = vsel %vm5308_vm2, %v5309_v53, %v5307_v49  ;;  %v4178_v27 = vadd.f32 %v4177_v20, %v16256_v25  ;;  %v16430_v53 = vpop.f32.mrf.mxu0  ;;  %v12900_v49 = vld [vmem:[%s20667_s5 + $0xb8] sm:$0xff]  ;;  %v21100_v20 = vld [vmem:[#allocation29_spill] sm:$0xff] }
 0x60e   : > { %v5319_v47 = vsel %vm5318_vm5, %v16285_v39, %v5317_v14  ;;  %v5328_v0 = vmul.f32 %v12624_v57, %v5327_v56  ;;  %v5348_v46 = vmul.f32 %v12628_v3, %v16358_v54  ;;  %v6958_v8 = vpack.c.bf16 %v6738_v36, %v6735_v32 }
 0x60f   : > { %v5322_v35 = vsel %vm5320_vm6, %v5321_v16, %v5319_v47  ;;  %vm5332_vm12 = vcmp.eq.f32.partialorder %v16309_v10, 0.0  ;;  %v5338_v61 = vmul.f32 0.5, %v5337_v1  ;;  %v5333_v34 = vand.u32 2147483648, %v16309_v10 }
 0x610   : > { %v6778_v21 = vadd.f32 %v5322_v35, %v5310_v63  ;;  %vm5342_vm14 = vcmp.eq.f32.partialorder %v16346_v41, inf  ;;  %v5349_v57 = vmul.f32 %v12628_v3, %v5348_v46  ;;  %10648 = vmatmul.msk.bf16.gmra.mxu0 %vm2042_vm0, %v12900_v49  ;;  %v7335_v25 = vunpack.c.l.b16 %v6958_v8  ;;  %10688 = vmatmul.msk.bf16.gmra.mxu1 %vm2042_vm0, %v12900_v49 }
 0x611   : > { %v12630_v39 = vpop.eup %12629  ;;  %v7336_v16 = vunpack.c.h.b16 %v6958_v8  ;;  %v5329_v19 = vmul.f32 %v5328_v0, %v16309_v10  ;;  %v5339_v14 = vsub.f32 1.5, %v5338_v61  ;;  %v16442_v56 = vadd.f32 %v4524_v31, %v21100_v20 }
 0x612   : > { %v4525_v43 = vmul.f32 %v3969_v4, %v3969_v4  ;;  %6779 = vadd.xlane.f32.xlu2 %v6778_v21  ;;  %v5350_v32 = vmul.f32 0.5, %v5349_v57  ;;  %v5360_v1 = vmul.f32 %v12630_v39, %v16385_v12  ;;  %v4526_v63 = vmul.f32 %v4178_v27, %v4178_v27  ;;  %v4180_v44 = vpop.f32.mrf.mxu3 }
 0x613   : > { %v7348_v47 = vperm.slane %v7335_v25, %v16402_v18  ;;  %v7350_v36 = vperm.slane %v7336_v16, %v16408_v5  ;;  %v5340_v46 = vmul.f32 %v12626_v45, %v5339_v14  ;;  %vm5344_vm15 = vcmp.eq.f32.partialorder %v16346_v41, 0.0  ;;  %v6741_v61 = vpop.xlane.xlu1 %6740  ;;  %v3973_v45 = vpop.f32.mrf.mxu2 }
 0x614   : > { %v5351_v0 = vsub.f32 1.5, %v5350_v32  ;;  %v5361_v35 = vmul.f32 %v12630_v39, %v5360_v1  ;;  %12631 = vrsqrt.f32 %v16415_v58  ;;  %v3972_v4 = vadd.f32 %v3971_v7, %v16289_v22  ;;  %v16460_v16 = vpop.f32.mrf.mxu1  ;;  %v21102_v22 = vld [vmem:[#allocation13_spill] sm:$0xff] }
 0x615   : > { %v7349_v31 = vsel %vm7129_vm7, %v7348_v47, %v16371_v62  ;;  %v5331_v27 = vsel %vm5330_vm11, %v16309_v10, %v5329_v19  ;;  %v5341_v8 = vmul.f32 %v5340_v46, %v16346_v41  ;;  %v5345_v57 = vand.u32 2147483648, %v16346_v41  ;;  %v21101_v62 = vld [vmem:[#allocation12_spill] sm:$0xff]  ;;  %v16472_v20 = vpop.f32.mrf.mxu0  ;;  %v21103_v47 = vld [vmem:[#allocation98_spill] sm:$0xff] }
 0x616   : > { %v16457_v21 = vsel %vm7133_vm8, %v7350_v36, %v7349_v31  ;;  %v5352_v49 = vmul.f32 %v12628_v3, %v5351_v0  ;;  %v5362_v25 = vmul.f32 0.5, %v5361_v35  ;;  %v16463_v14 = vadd.f32 %v4525_v43, %v21101_v62  ;;  %v21105_v36 = vld [vmem:[#allocation99_spill] sm:$0xff] }
 0x617   : > { %v16466_v7 = vadd.f32 %v4526_v63, %v21102_v22  ;;  %v5343_v19 = vsel %vm5342_vm14, %v16346_v41, %v5341_v8  ;;  %12633 = vrsqrt.f32 %v16442_v56  ;;  %v5334_v3 = vsel %vm5332_vm12, %v5333_v34, %v5331_v27  ;;  %v12901_v34 = vld [vmem:[%s20666_s4 + $0xb0] sm:$0xff] }
 0x618   : > { %v5346_v32 = vsel %vm5344_vm15, %v5345_v57, %v5343_v19  ;;  %v5353_v43 = vmul.f32 %v5352_v49, %v16358_v54  ;;  %v5363_v1 = vsub.f32 1.5, %v5362_v25  ;;  %v16481_v63 = vmul.f32 %v21103_v47, %v21103_v47  ;;  %10727 = vmatmul.msk.bf16.gmra.mxu2 %vm2042_vm0, %v12901_v34  ;;  %v21107_v49 = vld [vmem:[#allocation14_spill] sm:$0xff] }
 0x619   : > { %v16485_v46 = vmul.f32 %v21105_v36, %v21105_v36  ;;  %v4527_v0 = vmul.f32 %v3972_v4, %v3972_v4  ;;  %v6781_v35 = vadd.f32 %v5346_v32, %v5334_v3  ;;  %v4181_v10 = vadd.f32 %v4180_v44, %v16329_v15 }
 0x61a   : > { %21104 = vst [vmem:[#allocation130_spill] sm:$0xff] %v16481_v63  ;;  %v12632_v31 = vpop.eup %12631  ;;  %vm5354_vm1 = vcmp.eq.f32.partialorder %v16358_v54, inf  ;;  %vm5356_vm2 = vcmp.eq.f32.partialorder %v16358_v54, 0.0  ;;  %v5364_v41 = vmul.f32 %v12630_v39, %v5363_v1  ;;  %v5357_v27 = vand.u32 2147483648, %v16358_v54  ;;  %v4182_v8 = vpop.f32.mrf.mxu3  ;;  %v21108_v1 = vld [vmem:[#allocation100_spill] sm:$0xff] }
 0x61b   : > { %21106 = vst [vmem:[#allocation131_spill] sm:$0xff] %v16485_v46  ;;  %6782 = vadd.xlane.f32.xlu2 %v6781_v35  ;;  %vm5366_vm5 = vcmp.eq.f32.partialorder %v16385_v12, inf  ;;  %v5372_v4 = vmul.f32 %v12632_v31, %v16415_v58  ;;  %12635 = vrsqrt.f32 %v16463_v14  ;;  %v3974_v15 = vadd.f32 %v3973_v45, %v16339_v37  ;;  %v6744_v22 = vpop.xlane.xlu1 %6743  ;;  %v3976_v19 = vpop.f32.mrf.mxu2  ;;  %10767 = vmatmul.msk.bf16.gmra.mxu3 %vm2042_vm0, %v12901_v34 }
 0x61c   : > { %v5355_v44 = vsel %vm5354_vm1, %v16358_v54, %v5353_v43  ;;  %v5365_v39 = vmul.f32 %v5364_v41, %v16385_v12  ;;  %12637 = vrsqrt.f32 %v16466_v7  ;;  %v16503_v25 = vadd.f32 %v4527_v0, %v21107_v49  ;;  %v21110_v41 = vld [vmem:[#allocation101_spill] sm:$0xff] }
 0x61d   : > { %v12634_v57 = vpop.eup %12633  ;;  %vm5368_vm6 = vcmp.eq.f32.partialorder %v16385_v12, 0.0  ;;  %v5369_v62 = vand.u32 2147483648, %v16385_v12  ;;  %v5373_v3 = vmul.f32 %v12632_v31, %v5372_v4  ;;  %v4528_v32 = vmul.f32 %v4181_v10, %v4181_v10 }
 0x61e   : > { %v5367_v37 = vsel %vm5366_vm5, %v16385_v12, %v5365_v39  ;;  %v16510_v45 = vpack.c.bf16 %v6744_v22, %v6741_v61  ;;  %v5384_v43 = vmul.f32 %v12634_v57, %v16442_v56  ;;  %v16515_v47 = vmul.f32 %v21108_v1, %v21108_v1  ;;  %v16524_v12 = vpop.f32.mrf.mxu1  ;;  %v16526_v61 = vpop.f32.mrf.mxu0  ;;  %v12902_v39 = vld [vmem:[%s20667_s5 + $0xc0] sm:$0xff] }
 0x61f   : > { %v5358_v36 = vsel %vm5356_vm2, %v5357_v27, %v5355_v44  ;;  %v5370_v0 = vsel %vm5368_vm6, %v5369_v62, %v5367_v37  ;;  %v5374_v35 = vmul.f32 0.5, %v5373_v3  ;;  %v16521_v10 = vmul.f32 %v21110_v41, %v21110_v41  ;;  %v21112_v22 = vld [vmem:[#allocation15_spill] sm:$0xff] }
 0x620   : > { %21109 = vst [vmem:[#allocation132_spill] sm:$0xff] %v16515_v47  ;;  %v4529_v4 = vmul.f32 %v3974_v15, %v3974_v15  ;;  %v6784_v49 = vadd.f32 %v5370_v0, %v5358_v36  ;;  %vm5378_vm11 = vcmp.eq.f32.partialorder %v16415_v58, inf  ;;  %10649 = vmatmul.msk.bf16.gmra.mxu0 %vm2042_vm0, %v12902_v39  ;;  %v5381_v44 = vand.u32 2147483648, %v16415_v58  ;;  %10689 = vmatmul.msk.bf16.gmra.mxu1 %vm2042_vm0, %v12902_v39  ;;  %v21113_v0 = vld [vmem:[#allocation19_spill] sm:$0xff] }
 0x621   : > { %21111 = vst [vmem:[#allocation134_spill] sm:$0xff] %v16521_v10  ;;  %v12636_v54 = vpop.eup %12635  ;;  %v5375_v27 = vsub.f32 1.5, %v5374_v35  ;;  %v5385_v15 = vmul.f32 %v12634_v57, %v5384_v43  ;;  %12639 = vrsqrt.f32 %v16503_v25  ;;  %v16537_v3 = vadd.f32 %v4528_v32, %v21112_v22 }
 0x622   : > { %v12638_v62 = vpop.eup %12637  ;;  %6785 = vadd.xlane.f32.xlu0 %v6784_v49  ;;  %v4183_v37 = vadd.f32 %v4182_v8, %v16368_v59  ;;  %vm5390_vm12 = vcmp.eq.f32.partialorder %v16442_v56, inf  ;;  %v5396_v1 = vmul.f32 %v12636_v54, %v16463_v14  ;;  %vm5380_vm14 = vcmp.eq.f32.partialorder %v16415_v58, 0.0  ;;  %v4185_v41 = vpop.f32.mrf.mxu3 }
 0x623   : > { %v5376_v34 = vmul.f32 %v12632_v31, %v5375_v27  ;;  %v5386_v36 = vmul.f32 0.5, %v5385_v15  ;;  %vm5392_vm15 = vcmp.eq.f32.partialorder %v16442_v56, 0.0  ;;  %v5408_v43 = vmul.f32 %v12638_v62, %v16466_v7  ;;  %v3978_v27 = vpop.f32.mrf.mxu2 }
 0x624   : > { %v16546_v35 = vadd.f32 %v4529_v4, %v21113_v0  ;;  %v5393_v32 = vand.u32 2147483648, %v16442_v56  ;;  %v5397_v49 = vmul.f32 %v12636_v54, %v5396_v1  ;;  %v5405_v59 = vand.u32 2147483648, %v16463_v14 }
 0x625   : > { %v3977_v8 = vadd.f32 %v3976_v19, %v16382_v60  ;;  %v5377_v31 = vmul.f32 %v5376_v34, %v16415_v58  ;;  %v5387_v39 = vsub.f32 1.5, %v5386_v36  ;;  %vm5402_vm1 = vcmp.eq.f32.partialorder %v16463_v14, inf }
 0x626   : > { %v5409_v15 = vmul.f32 %v12638_v62, %v5408_v43  ;;  %v4530_v22 = vmul.f32 %v4183_v37, %v4183_v37  ;;  %v7040_v10 = vunpack.c.l.b16 %v16510_v45  ;;  %v5398_v4 = vmul.f32 0.5, %v5397_v49  ;;  %v16575_v30 = vpop.f32.mrf.mxu0 }
 0x627   : > { %12641 = vrsqrt.f32 %v16537_v3  ;;  %v12640_v0 = vpop.eup %12639  ;;  %v5388_v47 = vmul.f32 %v12634_v57, %v5387_v39  ;;  %vm5404_vm2 = vcmp.eq.f32.partialorder %v16463_v14, 0.0  ;;  %vm5414_vm5 = vcmp.eq.f32.partialorder %v16466_v7, inf  ;;  %v21114_v39 = vld [vmem:[#allocation21_spill] sm:$0xff] }
 0x628   : > { %v5410_v1 = vmul.f32 0.5, %v5409_v15  ;;  %vm5416_vm6 = vcmp.eq.f32.partialorder %v16466_v7, 0.0  ;;  %v7041_v60 = vunpack.c.h.b16 %v16510_v45  ;;  %v5399_v19 = vsub.f32 1.5, %v5398_v4  ;;  %v12903_v45 = vld [vmem:[%s20666_s4 + $0xb8] sm:$0xff]  ;;  %v16573_v4 = vpop.f32.mrf.mxu1 }
 0x629   : > { %v5417_v34 = vand.u32 2147483648, %v16466_v7  ;;  %v5420_v37 = vmul.f32 %v12640_v0, %v16503_v25  ;;  %v4531_v36 = vmul.f32 %v3977_v8, %v3977_v8  ;;  %v5379_v43 = vsel %vm5378_vm11, %v16415_v58, %v5377_v31  ;;  %10728 = vmatmul.msk.bf16.gmra.mxu2 %vm2042_vm0, %v12903_v45 }
 0x62a   : > { %v5389_v57 = vmul.f32 %v5388_v47, %v16442_v56  ;;  %v5411_v49 = vsub.f32 1.5, %v5410_v1  ;;  %v16566_v15 = vadd.f32 %v4530_v22, %v21114_v39  ;;  %v7106_v46 = vperm.slane %v7040_v10, %v16084_v17  ;;  %v4187_v39 = vpop.f32.mrf.mxu3 }
 0x62b   : > { %v5400_v63 = vmul.f32 %v12636_v54, %v5399_v19  ;;  %v5421_v8 = vmul.f32 %v12640_v0, %v5420_v37  ;;  %v4186_v31 = vadd.f32 %v4185_v41, %v16424_v28  ;;  %12643 = vrsqrt.f32 %v16546_v35  ;;  %v6747_v19 = vpop.xlane.xlu0 %6746  ;;  %v3981_v41 = vpop.f32.mrf.mxu2  ;;  %10768 = vmatmul.msk.bf16.gmra.mxu3 %vm2042_vm0, %v12903_v45  ;;  %v21116_v45 = vld [vmem:[#allocation102_spill] sm:$0xff] }
 0x62c   : > { %v5391_v47 = vsel %vm5390_vm12, %v16442_v56, %v5389_v57  ;;  %v5412_v22 = vmul.f32 %v12638_v62, %v5411_v49  ;;  %v5382_v54 = vsel %vm5380_vm14, %v5381_v44, %v5379_v43  ;;  %v7108_v33 = vperm.slane %v7041_v60, %v16113_v40  ;;  %v6750_v62 = vpop.xlane.xlu1 %6749 }
 0x62d   : > { %v12642_v10 = vpop.eup %12641  ;;  %v5394_v1 = vsel %vm5392_vm15, %v5393_v32, %v5391_v47  ;;  %v5401_v37 = vmul.f32 %v5400_v63, %v16463_v14  ;;  %v5422_v38 = vmul.f32 0.5, %v5421_v8  ;;  %v16591_v58 = vadd.f32 %v4531_v36, %v21115_v13 }
 0x62e   : > { %v6787_v57 = vadd.f32 %v5394_v1, %v5382_v54  ;;  %v5413_v28 = vmul.f32 %v5412_v22, %v16466_v7  ;;  %v5432_v49 = vmul.f32 %v12642_v10, %v16537_v3  ;;  %v6960_v44 = vpack.c.bf16 %v6750_v62, %v6747_v19 }
 0x62f   : > { %v5403_v56 = vsel %vm5402_vm1, %v16463_v14, %v5401_v37  ;;  %v5423_v63 = vsub.f32 1.5, %v5422_v38  ;;  %v4532_v32 = vmul.f32 %v4186_v31, %v4186_v31  ;;  %v3979_v60 = vadd.f32 %v3978_v27, %v16430_v53  ;;  %v12904_v38 = vld [vmem:[%s20667_s5 + $0xc8] sm:$0xff]  ;;  %v16617_v37 = vpop.f32.mrf.mxu0 }
 0x630   : > { %6788 = vadd.xlane.f32.xlu0 %v6787_v57  ;;  %v5415_v43 = vsel %vm5414_vm5, %v16466_v7, %v5413_v28  ;;  %v5433_v8 = vmul.f32 %v12642_v10, %v5432_v49  ;;  %v5406_v47 = vsel %vm5404_vm2, %v5405_v59, %v5403_v56  ;;  %v7042_v36 = vunpack.c.l.b16 %v6960_v44  ;;  %10650 = vmatmul.msk.bf16.gmra.mxu0 %vm2042_vm0, %v12904_v38  ;;  %v16615_v19 = vpop.f32.mrf.mxu1 }
 0x631   : > { %v5418_v13 = vsel %vm5416_vm6, %v5417_v34, %v5415_v43  ;;  %v7043_v22 = vunpack.c.h.b16 %v6960_v44  ;;  %v12644_v53 = vpop.eup %12643  ;;  %v4188_v31 = vadd.f32 %v4187_v39, %v16460_v16  ;;  %v5424_v54 = vmul.f32 %v12640_v0, %v5423_v63  ;;  %10690 = vmatmul.msk.bf16.gmra.mxu1 %vm2042_vm0, %v12904_v38  ;;  %v21120_v38 = vld [vmem:[#allocation20_spill] sm:$0xff] }
 0x632   : > { %v6790_v27 = vadd.f32 %v5418_v13, %v5406_v47  ;;  %v5434_v14 = vmul.f32 0.5, %v5433_v8  ;;  %v7110_v7 = vsel %vm7109_vm13, %v7108_v33, %v7106_v46  ;;  %v7112_v59 = vperm.slane %v7042_v36, %v16165_v48  ;;  %v21118_v46 = vld [vmem:[#allocation16_spill] sm:$0xff]  ;;  %v4190_v62 = vpop.f32.mrf.mxu3  ;;  %v21119_v47 = vld [vmem:[#allocation18_spill] sm:$0xff] }
 0x633   : > { %v7116_v34 = vperm.slane %v7043_v22, %v16168_v52  ;;  %v5444_v1 = vmul.f32 %v12644_v53, %v16546_v35  ;;  %v4533_v57 = vmul.f32 %v3979_v60, %v3979_v60  ;;  %v5425_v16 = vmul.f32 %v5424_v54, %v16503_v25  ;;  %v3983_v43 = vpop.f32.mrf.mxu2 }
 0x634   : > { %6791 = vadd.xlane.f32.xlu1 %v6790_v27  ;;  %v5435_v0 = vsub.f32 1.5, %v5434_v14  ;;  %12645 = vrsqrt.f32 %v16566_v15  ;;  %v16623_v33 = vmul.f32 %v21116_v45, %v21116_v45  ;;  %v16626_v39 = vadd.f32 %v4532_v32, %v21118_v46 }
 0x635   : > { %v7114_v28 = vsel %vm7113_vm3, %v7112_v59, %v7110_v7  ;;  %v5445_v49 = vmul.f32 %v12644_v53, %v5444_v1  ;;  %v4534_v56 = vmul.f32 %v4188_v31, %v4188_v31  ;;  %v3982_v63 = vadd.f32 %v3981_v41, %v16472_v20  ;;  %v12905_v1 = vld [vmem:[%s20666_s4 + $0xc0] sm:$0xff] }
 0x636   : > { %21117 = vst [vmem:[#allocation135_spill] sm:$0xff] %v16623_v33  ;;  %v16630_v44 = vsel %vm20719_vm4, %v7116_v34, %v7114_v28  ;;  %v5436_v60 = vmul.f32 %v12642_v10, %v5435_v0  ;;  %vm5426_vm11 = vcmp.eq.f32.partialorder %v16503_v25, inf  ;;  %vm5428_vm12 = vcmp.eq.f32.partialorder %v16503_v25, 0.0  ;;  %v21125_v28 = vld [vmem:[#allocation105_spill] sm:$0xff] }
 0x637   : > { %v5429_v8 = vand.u32 2147483648, %v16503_v25  ;;  %v5446_v32 = vmul.f32 0.5, %v5445_v49  ;;  %v16637_v13 = vadd.f32 %v4533_v57, %v21119_v47  ;;  %v5427_v36 = vsel %vm5426_vm11, %v16503_v25, %v5425_v16  ;;  %v16660_v16 = vpop.f32.mrf.mxu0  ;;  %v21127_v49 = vld [vmem:[#allocation106_spill] sm:$0xff] }
 0x638   : > { %v5437_v22 = vmul.f32 %v5436_v60, %v16537_v3  ;;  %12647 = vrsqrt.f32 %v16591_v58  ;;  %vm5438_vm14 = vcmp.eq.f32.partialorder %v16537_v3, inf  ;;  %vm5440_vm15 = vcmp.eq.f32.partialorder %v16537_v3, 0.0  ;;  %v16658_v57 = vpop.f32.mrf.mxu1 }
 0x639   : > { %v5441_v20 = vand.u32 2147483648, %v16537_v3  ;;  %v5447_v10 = vsub.f32 1.5, %v5446_v32  ;;  %v16646_v27 = vadd.f32 %v4534_v56, %v21120_v38  ;;  %v4535_v31 = vmul.f32 %v3982_v63, %v3982_v63  ;;  %10729 = vmatmul.msk.bf16.gmra.mxu2 %vm2042_vm0, %v12905_v1  ;;  %v21129_v32 = vld [vmem:[#allocation17_spill] sm:$0xff] }
 0x63a   : > { %v12646_v41 = vpop.eup %12645  ;;  %v5439_v54 = vsel %vm5438_vm14, %v16537_v3, %v5437_v22  ;;  %12649 = vrsqrt.f32 %v16626_v39  ;;  %v5430_v14 = vsel %vm5428_vm12, %v5429_v8, %v5427_v36  ;;  %v4191_v59 = vadd.f32 %v4190_v62, %v16524_v12  ;;  %v21121_v3 = vld [vmem:[#allocation103_spill] sm:$0xff]  ;;  %v21123_v12 = vld [vmem:[#allocation104_spill] sm:$0xff]  ;;  %v16679_v60 = vpop.f32.mrf.mxu3 }
 0x63b   : > { %v5442_v7 = vsel %vm5440_vm15, %v5441_v20, %v5439_v54  ;;  %v5456_v34 = vmul.f32 %v12646_v41, %v16566_v15  ;;  %v16664_v0 = vmul.f32 %v21121_v3, %v21121_v3  ;;  %v5448_v45 = vmul.f32 %v12644_v53, %v5447_v10  ;;  %v16686_v36 = vpop.f32.mrf.mxu2  ;;  %v6753_v20 = vpop.xlane.xlu1 %6752  ;;  %10769 = vmatmul.msk.bf16.gmra.mxu3 %vm2042_vm0, %v12905_v1 }
 0x63c   : > { %v6793_v25 = vadd.f32 %v5442_v7, %v5430_v14  ;;  %12651 = vrsqrt.f32 %v16637_v13  ;;  %v16669_v46 = vmul.f32 %v21123_v12, %v21123_v12  ;;  %v16673_v62 = vmul.f32 %v21125_v28, %v21125_v28  ;;  %v6756_v54 = vpop.xlane.xlu2 %6755 }
 0x63d   : > { %21122 = vst [vmem:[#allocation90_spill] sm:$0xff] %v16664_v0  ;;  %v16677_v56 = vmul.f32 %v21127_v49, %v21127_v49  ;;  %v5457_v63 = vmul.f32 %v12646_v41, %v5456_v34  ;;  %v16682_v53 = vadd.f32 %v4535_v31, %v21129_v32  ;;  %v3984_v47 = vadd.f32 %v3983_v43, %v16526_v61  ;;  %v21130_v32 = vld [vmem:[#allocation30_spill] sm:$0xff] }
 0x63e   : > { %21124 = vst [vmem:[#allocation91_spill] sm:$0xff] %v16669_v46  ;;  %v12648_v8 = vpop.eup %12647  ;;  %6794 = vadd.xlane.f32.xlu0 %v6793_v25  ;;  %vm5450_vm1 = vcmp.eq.f32.partialorder %v16546_v35, inf  ;;  %12653 = vrsqrt.f32 %v16646_v27  ;;  %v4536_v22 = vmul.f32 %v4191_v59, %v4191_v59  ;;  %vm5452_vm2 = vcmp.eq.f32.partialorder %v16546_v35, 0.0  ;;  %v12906_v25 = vld [vmem:[%s20667_s5 + $0xd0] sm:$0xff] }
 0x63f   : > { %21126 = vst [vmem:[#allocation136_spill] sm:$0xff] %v16673_v62  ;;  %v5453_v10 = vand.u32 2147483648, %v16546_v35  ;;  %v5458_v38 = vmul.f32 0.5, %v5457_v63  ;;  %v5468_v31 = vmul.f32 %v12648_v8, %v16591_v58  ;;  %v5449_v7 = vmul.f32 %v5448_v45, %v16546_v35 }
 0x640   : > { %21128 = vst [vmem:[#allocation137_spill] sm:$0xff] %v16677_v56  ;;  %v12650_v14 = vpop.eup %12649  ;;  %vm5462_vm5 = vcmp.eq.f32.partialorder %v16566_v15, inf  ;;  %vm5464_vm6 = vcmp.eq.f32.partialorder %v16566_v15, 0.0  ;;  %v6961_v61 = vpack.c.bf16 %v6756_v54, %v6753_v20  ;;  %v5465_v59 = vand.u32 2147483648, %v16566_v15  ;;  %10651 = vmatmul.msk.bf16.gmra.mxu0 %vm2042_vm0, %v12906_v25 }
 0x641   : > { %v5459_v43 = vsub.f32 1.5, %v5458_v38  ;;  %v5469_v34 = vmul.f32 %v12648_v8, %v5468_v31  ;;  %v5480_v3 = vmul.f32 %v12650_v14, %v16626_v39  ;;  %v4537_v28 = vmul.f32 %v3984_v47, %v3984_v47  ;;  %10691 = vmatmul.msk.bf16.gmra.mxu1 %vm2042_vm0, %v12906_v25  ;;  %v16715_v25 = vpop.f32.mrf.mxu1 }
 0x642   : > { %v12652_v12 = vpop.eup %12651  ;;  %v7044_v45 = vunpack.c.l.b16 %v6961_v61  ;;  %v7045_v49 = vunpack.c.h.b16 %v6961_v61  ;;  %vm5474_vm11 = vcmp.eq.f32.partialorder %v16591_v58, inf  ;;  %v5477_v63 = vand.u32 2147483648, %v16591_v58 }
 0x643   : > { %v16706_v20 = vadd.f32 %v4536_v22, %v21130_v32  ;;  %v5460_v38 = vmul.f32 %v12646_v41, %v5459_v43  ;;  %v5470_v54 = vmul.f32 0.5, %v5469_v34  ;;  %v5481_v31 = vmul.f32 %v12650_v14, %v5480_v3  ;;  %v4195_v34 = vpop.f32.mrf.mxu3  ;;  %v3988_v46 = vpop.f32.mrf.mxu2 }
 0x644   : > { %v12654_v56 = vpop.eup %12653  ;;  %v5451_v47 = vsel %vm5450_vm1, %v16546_v35, %v5449_v7  ;;  %v7120_v61 = vperm.slane %v7044_v45, %v16326_v23  ;;  %v7124_v1 = vperm.slane %v7045_v49, %v16332_v55  ;;  %vm5486_vm12 = vcmp.eq.f32.partialorder %v16626_v39, inf  ;;  %v16720_v7 = vpop.f32.mrf.mxu0  ;;  %v21131_v45 = vld [vmem:[#allocation31_spill] sm:$0xff] }
 0x645   : > { %v5492_v62 = vmul.f32 %v12652_v12, %v16637_v13  ;;  %v5461_v22 = vmul.f32 %v5460_v38, %v16566_v15  ;;  %v5471_v41 = vsub.f32 1.5, %v5470_v54  ;;  %vm5476_vm14 = vcmp.eq.f32.partialorder %v16591_v58, 0.0 }
 0x646   : > { %v5482_v43 = vmul.f32 0.5, %v5481_v31  ;;  %v5504_v3 = vmul.f32 %v12654_v56, %v16646_v27  ;;  %v16723_v32 = vadd.f32 %v4537_v28, %v21131_v45  ;;  %v7122_v49 = vsel %vm20720_vm9, %v7120_v61, %v16630_v44 }
 0x647   : > { %v5493_v0 = vmul.f32 %v12652_v12, %v5492_v62  ;;  %12655 = vrsqrt.f32 %v16682_v53  ;;  %v5463_v38 = vsel %vm5462_vm5, %v16566_v15, %v5461_v22  ;;  %v16732_v54 = vsel %vm20716_vm10, %v7124_v1, %v7122_v49 }
 0x648   : > { %v5472_v31 = vmul.f32 %v12648_v8, %v5471_v41  ;;  %v5483_v33 = vsub.f32 1.5, %v5482_v43  ;;  %v5454_v28 = vsel %vm5452_vm2, %v5453_v10, %v5451_v47  ;;  %v5466_v45 = vsel %vm5464_vm6, %v5465_v59, %v5463_v38 }
 0x649   : > { %v4193_v44 = vadd.f32 %v16679_v60, %v16573_v4  ;;  %v5494_v62 = vmul.f32 0.5, %v5493_v0  ;;  %v6796_v61 = vadd.f32 %v5466_v45, %v5454_v28  ;;  %v5505_v22 = vmul.f32 %v12654_v56, %v5504_v3 }
 0x64a   : > { %v5473_v42 = vmul.f32 %v5472_v31, %v16591_v58  ;;  %v5484_v2 = vmul.f32 %v12650_v14, %v5483_v33  ;;  %vm5488_vm15 = vcmp.eq.f32.partialorder %v16626_v39, 0.0  ;;  %v5489_v8 = vand.u32 2147483648, %v16626_v39  ;;  %v12907_v33 = vld [vmem:[%s20666_s4 + $0xc8] sm:$0xff] }
 0x64b   : > { %v5495_v1 = vsub.f32 1.5, %v5494_v62  ;;  %vm5498_vm1 = vcmp.eq.f32.partialorder %v16637_v13, inf  ;;  %6797 = vadd.xlane.f32.xlu1 %v6796_v61  ;;  %vm5500_vm2 = vcmp.eq.f32.partialorder %v16637_v13, 0.0  ;;  %v5506_v4 = vmul.f32 0.5, %v5505_v22  ;;  %10730 = vmatmul.msk.bf16.gmra.mxu2 %vm2042_vm0, %v12907_v33  ;;  %v4197_v41 = vpop.f32.mrf.mxu3  ;;  %v6762_v49 = vpop.xlane.xlu1 %6761  ;;  %v12908_v22 = vld [vmem:[%s20667_s5 + $0xd8] sm:$0xff] }
 0x64c   : > { %v5475_v35 = vsel %vm5474_vm11, %v16591_v58, %v5473_v42  ;;  %v5485_v15 = vmul.f32 %v5484_v2, %v16626_v39  ;;  %v4538_v60 = vmul.f32 %v4193_v44, %v4193_v44  ;;  %v3987_v10 = vadd.f32 %v16686_v36, %v16575_v30  ;;  %v6759_v42 = vpop.xlane.xlu0 %6758  ;;  %v3991_v38 = vpop.f32.mrf.mxu2  ;;  %10770 = vmatmul.msk.bf16.gmra.mxu3 %vm2042_vm0, %v12907_v33 }
 0x64d   : > { %v12656_v0 = vpop.eup %12655  ;;  %v5496_v14 = vmul.f32 %v12652_v12, %v5495_v1  ;;  %v5501_v59 = vand.u32 2147483648, %v16637_v13  ;;  %v5507_v47 = vsub.f32 1.5, %v5506_v4  ;;  %12657 = vrsqrt.f32 %v16706_v20  ;;  %v16768_v44 = vpop.f32.mrf.mxu1 }
 0x64e   : > { %v5487_v2 = vsel %vm5486_vm12, %v16626_v39, %v5485_v15  ;;  %v5516_v43 = vmul.f32 %v12656_v0, %v16682_v53  ;;  %v5478_v3 = vsel %vm5476_vm14, %v5477_v63, %v5475_v35  ;;  %v4196_v36 = vadd.f32 %v4195_v34, %v16615_v19  ;;  %v16770_v62 = vpop.f32.mrf.mxu0 }
 0x64f   : > { %v5490_v30 = vsel %vm5488_vm15, %v5489_v8, %v5487_v2  ;;  %v5497_v12 = vmul.f32 %v5496_v14, %v16637_v13  ;;  %v5508_v28 = vmul.f32 %v12654_v56, %v5507_v47  ;;  %vm5510_vm5 = vcmp.eq.f32.partialorder %v16646_v27, inf  ;;  %v21132_v8 = vld [vmem:[#allocation32_spill] sm:$0xff]  ;;  %v21133_v47 = vld [vmem:[#allocation33_spill] sm:$0xff] }
 0x650   : > { %v6799_v31 = vadd.f32 %v5490_v30, %v5478_v3  ;;  %v6962_v45 = vpack.c.bf16 %v6762_v49, %v6759_v42  ;;  %v4539_v58 = vmul.f32 %v3987_v10, %v3987_v10  ;;  %v3989_v63 = vadd.f32 %v3988_v46, %v16617_v37  ;;  %10652 = vmatmul.msk.bf16.gmra.mxu0 %vm2042_vm0, %v12908_v22  ;;  %v21134_v49 = vld [vmem:[#allocation107_spill] sm:$0xff] }
 0x651   : > { %vm5512_vm6 = vcmp.eq.f32.partialorder %v16646_v27, 0.0  ;;  %v5517_v39 = vmul.f32 %v12656_v0, %v5516_v43  ;;  %v5499_v19 = vsel %vm5498_vm1, %v16637_v13, %v5497_v12  ;;  %v5509_v56 = vmul.f32 %v5508_v28, %v16646_v27  ;;  %10692 = vmatmul.msk.bf16.gmra.mxu1 %vm2042_vm0, %v12908_v22 }
 0x652   : > { %6800 = vadd.xlane.f32.xlu2 %v6799_v31  ;;  %v7046_v34 = vunpack.c.l.b16 %v6962_v45  ;;  %v7047_v61 = vunpack.c.h.b16 %v6962_v45  ;;  %v16783_v37 = vadd.f32 %v4538_v60, %v21132_v8  ;;  %v4540_v46 = vmul.f32 %v4196_v36, %v4196_v36  ;;  %v21136_v45 = vld [vmem:[#allocation108_spill] sm:$0xff] }
 0x653   : > { %v5513_v1 = vand.u32 2147483648, %v16646_v27  ;;  %v5518_v35 = vmul.f32 0.5, %v5517_v39  ;;  %v12658_v15 = vpop.eup %12657  ;;  %v5511_v4 = vsel %vm5510_vm5, %v16646_v27, %v5509_v56  ;;  %12659 = vrsqrt.f32 %v16723_v32  ;;  %v4200_v12 = vpop.f32.mrf.mxu3 }
 0x654   : > { %v7128_v10 = vperm.slane %v7046_v34, %v16402_v18  ;;  %v7132_v14 = vperm.slane %v7047_v61, %v16408_v5  ;;  %v5502_v60 = vsel %vm5500_vm2, %v5501_v59, %v5499_v19  ;;  %v5528_v42 = vmul.f32 %v12658_v15, %v16706_v20  ;;  %v3993_v28 = vpop.f32.mrf.mxu2  ;;  %v21138_v19 = vld [vmem:[#allocation109_spill] sm:$0xff]  ;;  %v21142_v61 = vld [vmem:[#allocation34_spill] sm:$0xff] }
 0x655   : > { %v5514_v33 = vsel %vm5512_vm6, %v5513_v1, %v5511_v4  ;;  %v5519_v2 = vsub.f32 1.5, %v5518_v35  ;;  %v16800_v43 = vadd.f32 %v4539_v58, %v21133_v47  ;;  %v4541_v3 = vmul.f32 %v3989_v63, %v3989_v63  ;;  %v16818_v39 = vpop.f32.mrf.mxu1  ;;  %v21147_v4 = vld [vmem:[#allocation35_spill] sm:$0xff]  ;;  %v12909_v47 = vld [vmem:[%s20666_s4 + $0xd0] sm:$0xff] }
 0x656   : > { %v6802_v30 = vadd.f32 %v5514_v33, %v5502_v60  ;;  %v7130_v36 = vsel %vm7129_vm7, %v7128_v10, %v16732_v54  ;;  %v16806_v31 = vmul.f32 %v21134_v49, %v21134_v49  ;;  %v5529_v59 = vmul.f32 %v12658_v15, %v5528_v42  ;;  %v16831_v1 = vpop.f32.mrf.mxu0 }
 0x657   : > { %v16809_v13 = vsel %vm7133_vm8, %v7132_v14, %v7130_v36  ;;  %v5520_v27 = vmul.f32 %v12656_v0, %v5519_v2  ;;  %v16813_v58 = vmul.f32 %v21136_v45, %v21136_v45  ;;  %v4198_v63 = vadd.f32 %v4197_v41, %v16658_v57  ;;  %v21140_v0 = vld [vmem:[#allocation110_spill] sm:$0xff] }
 0x658   : > { %21135 = vst [vmem:[#allocation138_spill] sm:$0xff] %v16806_v31  ;;  %6803 = vadd.xlane.f32.xlu0 %v6802_v30  ;;  %v3992_v54 = vadd.f32 %v3991_v38, %v16660_v16  ;;  %12661 = vrsqrt.f32 %v16783_v37  ;;  %v16822_v56 = vmul.f32 %v21138_v19, %v21138_v19  ;;  %v16826_v34 = vmul.f32 %v21140_v0, %v21140_v0  ;;  %v21143_v16 = vld [vmem:[#allocation111_spill] sm:$0xff]  ;;  %v21145_v38 = vld [vmem:[#allocation112_spill] sm:$0xff]  ;;  %v12922_v31 = vld [vmem:[%s20667_s5 + $0x110] sm:$0xff] }
 0x659   : > { %21137 = vst [vmem:[#allocation139_spill] sm:$0xff] %v16813_v58  ;;  %v16829_v22 = vadd.f32 %v4540_v46, %v21142_v61  ;;  %v5530_v8 = vmul.f32 0.5, %v5529_v59  ;;  %v12660_v57 = vpop.eup %12659  ;;  %v16835_v41 = vmul.f32 %v21143_v16, %v21143_v16  ;;  %v16839_v35 = vmul.f32 %v21145_v38, %v21145_v38  ;;  %v21148_v19 = vld [vmem:[#allocation36_spill] sm:$0xff]  ;;  %v21149_v61 = vld [vmem:[#allocation37_spill] sm:$0xff] }
 0x65a   : > { %21139 = vst [vmem:[#allocation92_spill] sm:$0xff] %v16822_v56  ;;  %v16842_v10 = vadd.f32 %v4541_v3, %v21147_v4  ;;  %12663 = vrsqrt.f32 %v16800_v43  ;;  %v5521_v46 = vmul.f32 %v5520_v27, %v16682_v53  ;;  %vm5522_vm11 = vcmp.eq.f32.partialorder %v16682_v53, inf }
 0x65b   : > { %21141 = vst [vmem:[#allocation140_spill] sm:$0xff] %v16826_v34  ;;  %v5531_v14 = vsub.f32 1.5, %v5530_v8  ;;  %v5540_v60 = vmul.f32 %v12660_v57, %v16723_v32  ;;  %v4542_v33 = vmul.f32 %v4198_v63, %v4198_v63  ;;  %v4543_v2 = vmul.f32 %v3992_v54, %v3992_v54  ;;  %10731 = vmatmul.msk.bf16.gmra.mxu2 %vm2042_vm0, %v12909_v47  ;;  %v16859_v59 = vpop.f32.mrf.mxu3 }
 0x65c   : > { %21144 = vst [vmem:[#allocation141_spill] sm:$0xff] %v16835_v41  ;;  %vm5524_vm12 = vcmp.eq.f32.partialorder %v16682_v53, 0.0  ;;  %v5525_v42 = vand.u32 2147483648, %v16682_v53  ;;  %v4201_v30 = vadd.f32 %v4200_v12, %v16715_v25  ;;  %12665 = vrsqrt.f32 %v16829_v22  ;;  %v3996_v63 = vpop.f32.mrf.mxu2  ;;  %v6768_v8 = vpop.xlane.xlu0 %6767  ;;  %10771 = vmatmul.msk.bf16.gmra.mxu3 %vm2042_vm0, %v12909_v47 }
 0x65d   : > { %21146 = vst [vmem:[#allocation23_spill] sm:$0xff] %v16839_v35  ;;  %v5532_v3 = vmul.f32 %v12658_v15, %v5531_v14  ;;  %v5541_v36 = vmul.f32 %v12660_v57, %v5540_v60  ;;  %vm5534_vm14 = vcmp.eq.f32.partialorder %v16706_v20, inf  ;;  %vm5536_vm15 = vcmp.eq.f32.partialorder %v16706_v20, 0.0  ;;  %v16875_v16 = vpop.f32.mrf.mxu1 }
 0x65e   : > { %v12662_v49 = vpop.eup %12661  ;;  %v3994_v27 = vadd.f32 %v3993_v28, %v16720_v7  ;;  %12667 = vrsqrt.f32 %v16842_v10  ;;  %v5523_v15 = vsel %vm5522_vm11, %v16682_v53, %v5521_v46  ;;  %v16868_v0 = vadd.f32 %v4542_v33, %v21148_v19  ;;  %v6765_v46 = vpop.xlane.xlu2 %6764 }
 0x65f   : > { %v5533_v25 = vmul.f32 %v5532_v3, %v16706_v20  ;;  %v5542_v12 = vmul.f32 0.5, %v5541_v36  ;;  %v5552_v45 = vmul.f32 %v12662_v49, %v16783_v37  ;;  %v16871_v7 = vadd.f32 %v4543_v2, %v21149_v61  ;;  %v16880_v33 = vpop.f32.mrf.mxu0 }
 0x660   : > { %v12664_v54 = vpop.eup %12663  ;;  %v5537_v28 = vand.u32 2147483648, %v16706_v20  ;;  %vm5546_vm1 = vcmp.eq.f32.partialorder %v16723_v32, inf  ;;  %v4544_v4 = vmul.f32 %v4201_v30, %v4201_v30  ;;  %v5526_v2 = vsel %vm5524_vm12, %v5525_v42, %v5523_v15 }
 0x661   : > { %v5535_v38 = vsel %vm5534_vm14, %v16706_v20, %v5533_v25  ;;  %v5543_v14 = vsub.f32 1.5, %v5542_v12  ;;  %v5553_v60 = vmul.f32 %v12662_v49, %v5552_v45  ;;  %v16886_v36 = vpack.c.bf16 %v6768_v8, %v6765_v46  ;;  %v12910_v25 = vld [vmem:[%s20667_s5 + $0xe0] sm:$0xff]  ;;  %v21150_v46 = vld [vmem:[#allocation38_spill] sm:$0xff] }
 0x662   : > { %v5538_v3 = vsel %vm5536_vm15, %v5537_v28, %v5535_v38  ;;  %v5564_v19 = vmul.f32 %v12664_v54, %v16800_v43  ;;  %10653 = vmatmul.msk.bf16.gmra.mxu0 %vm2042_vm0, %v12910_v25  ;;  %v12666_v30 = vpop.eup %12665  ;;  %v4545_v45 = vmul.f32 %v3994_v27, %v3994_v27  ;;  %10693 = vmatmul.msk.bf16.gmra.mxu1 %vm2042_vm0, %v12910_v25  ;;  %vm5548_vm2 = vcmp.eq.f32.partialorder %v16723_v32, 0.0 }
 0x663   : > { %v6805_v12 = vadd.f32 %v5538_v3, %v5526_v2  ;;  %v5544_v61 = vmul.f32 %v12660_v57, %v5543_v14  ;;  %v5554_v35 = vmul.f32 0.5, %v5553_v60  ;;  %v5549_v20 = vand.u32 2147483648, %v16723_v32  ;;  %v4205_v38 = vpop.f32.mrf.mxu3  ;;  %v21151_v60 = vld [vmem:[#allocation39_spill] sm:$0xff] }
 0x664   : > { %v12668_v53 = vpop.eup %12667  ;;  %vm5558_vm5 = vcmp.eq.f32.partialorder %v16783_v37, inf  ;;  %v5565_v42 = vmul.f32 %v12664_v54, %v5564_v19  ;;  %v5576_v27 = vmul.f32 %v12666_v30, %v16829_v22  ;;  %vm5560_vm6 = vcmp.eq.f32.partialorder %v16783_v37, 0.0  ;;  %v3998_v19 = vpop.f32.mrf.mxu2 }
 0x665   : > { %6806 = vadd.xlane.f32.xlu1 %v6805_v12  ;;  %v5545_v15 = vmul.f32 %v5544_v61, %v16723_v32  ;;  %v5555_v28 = vsub.f32 1.5, %v5554_v35  ;;  %v5588_v57 = vmul.f32 %v12668_v53, %v16842_v10  ;;  %v5561_v47 = vand.u32 2147483648, %v16783_v37  ;;  %v16913_v61 = vpop.f32.mrf.mxu1 }
 0x666   : > { %v5566_v8 = vmul.f32 0.5, %v5565_v42  ;;  %12669 = vrsqrt.f32 %v16868_v0  ;;  %v16905_v14 = vadd.f32 %v4544_v4, %v21150_v46  ;;  %v16908_v2 = vadd.f32 %v4545_v45, %v21151_v60 }
 0x667   : > { %v5556_v3 = vmul.f32 %v12662_v49, %v5555_v28  ;;  %v5577_v35 = vmul.f32 %v12666_v30, %v5576_v27  ;;  %vm5570_vm11 = vcmp.eq.f32.partialorder %v16800_v43, inf  ;;  %v5573_v12 = vand.u32 2147483648, %v16800_v43  ;;  %v16921_v28 = vpop.f32.mrf.mxu0 }
 0x668   : > { %v5567_v25 = vsub.f32 1.5, %v5566_v8  ;;  %vm5582_vm12 = vcmp.eq.f32.partialorder %v16829_v22, inf  ;;  %v5547_v4 = vsel %vm5546_vm1, %v16723_v32, %v5545_v15  ;;  %vm5572_vm14 = vcmp.eq.f32.partialorder %v16800_v43, 0.0 }
 0x669   : > { %v5557_v42 = vmul.f32 %v5556_v3, %v16783_v37  ;;  %v5578_v49 = vmul.f32 0.5, %v5577_v35  ;;  %vm5584_vm15 = vcmp.eq.f32.partialorder %v16829_v22, 0.0  ;;  %v5589_v45 = vmul.f32 %v12668_v53, %v5588_v57 }
 0x66a   : > { %v4203_v27 = vadd.f32 %v16859_v59, %v16768_v44  ;;  %v3997_v8 = vadd.f32 %v3996_v63, %v16770_v62  ;;  %v5568_v46 = vmul.f32 %v12664_v54, %v5567_v25  ;;  %v5585_v60 = vand.u32 2147483648, %v16829_v22  ;;  %v12911_v63 = vld [vmem:[%s20666_s4 + $0xd8] sm:$0xff] }
 0x66b   : > { %v5559_v15 = vsel %vm5558_vm5, %v16783_v37, %v5557_v42  ;;  %v7048_v3 = vunpack.c.l.b16 %v16886_v36  ;;  %v5579_v35 = vsub.f32 1.5, %v5578_v49  ;;  %v5590_v41 = vmul.f32 0.5, %v5589_v45  ;;  %10732 = vmatmul.msk.bf16.gmra.mxu2 %vm2042_vm0, %v12911_v63  ;;  %v4207_v37 = vpop.f32.mrf.mxu3 }
 0x66c   : > { %v12670_v34 = vpop.eup %12669  ;;  %v5550_v57 = vsel %vm5548_vm2, %v5549_v20, %v5547_v4  ;;  %v5562_v44 = vsel %vm5560_vm6, %v5561_v47, %v5559_v15  ;;  %v7049_v62 = vunpack.c.h.b16 %v16886_v36  ;;  %v5569_v59 = vmul.f32 %v5568_v46, %v16800_v43  ;;  %v6771_v4 = vpop.xlane.xlu1 %6770  ;;  %10772 = vmatmul.msk.bf16.gmra.mxu3 %vm2042_vm0, %v12911_v63 }
 0x66d   : > { %v6808_v54 = vadd.f32 %v5562_v44, %v5550_v57  ;;  %v5580_v25 = vmul.f32 %v12666_v30, %v5579_v35  ;;  %v5591_v42 = vsub.f32 1.5, %v5590_v41  ;;  %v5600_v49 = vmul.f32 %v12670_v34, %v16868_v0  ;;  %v4001_v41 = vpop.f32.mrf.mxu2  ;;  %v6774_v15 = vpop.xlane.xlu2 %6773 }
 0x66e   : > { %v4546_v32 = vmul.f32 %v4203_v27, %v4203_v27  ;;  %v4547_v20 = vmul.f32 %v3997_v8, %v3997_v8  ;;  %vm5594_vm1 = vcmp.eq.f32.partialorder %v16842_v10, inf  ;;  %12671 = vrsqrt.f32 %v16871_v7  ;;  %v16952_v35 = vpop.f32.mrf.mxu1 }
 0x66f   : > { %6809 = vadd.xlane.f32.xlu2 %v6808_v54  ;;  %v5571_v36 = vsel %vm5570_vm11, %v16800_v43, %v5569_v59  ;;  %v5581_v47 = vmul.f32 %v5580_v25, %v16829_v22  ;;  %v5592_v45 = vmul.f32 %v12668_v53, %v5591_v42  ;;  %v5601_v30 = vmul.f32 %v12670_v34, %v5600_v49 }
 0x670   : > { %v7135_v46 = vperm.slane %v7048_v3, %v16084_v17  ;;  %v7136_v27 = vperm.slane %v7049_v62, %v16113_v40  ;;  %v4206_v8 = vadd.f32 %v4205_v38, %v16818_v39  ;;  %12673 = vrsqrt.f32 %v16905_v14  ;;  %v16959_v3 = vpop.f32.mrf.mxu0 }
 0x671   : > { %v5583_v57 = vsel %vm5582_vm12, %v16829_v22, %v5581_v47  ;;  %v3999_v44 = vadd.f32 %v3998_v19, %v16831_v1  ;;  %vm5596_vm2 = vcmp.eq.f32.partialorder %v16842_v10, 0.0  ;;  %v5602_v53 = vmul.f32 0.5, %v5601_v30  ;;  %v12912_v1 = vld [vmem:[%s20667_s5 + $0xe8] sm:$0xff] }
 0x672   : > { %v6964_v59 = vpack.c.bf16 %v6774_v15, %v6771_v4  ;;  %v5574_v39 = vsel %vm5572_vm14, %v5573_v12, %v5571_v36  ;;  %v5586_v38 = vsel %vm5584_vm15, %v5585_v60, %v5583_v57  ;;  %v5593_v62 = vmul.f32 %v5592_v45, %v16842_v10  ;;  %10654 = vmatmul.msk.bf16.gmra.mxu0 %vm2042_vm0, %v12912_v1  ;;  %v21152_v19 = vld [vmem:[#allocation40_spill] sm:$0xff]  ;;  %v21153_v60 = vld [vmem:[#allocation41_spill] sm:$0xff] }
 0x673   : > { %v5597_v54 = vand.u32 2147483648, %v16842_v10  ;;  %v16972_v25 = vadd.f32 %v4546_v32, %v21152_v19  ;;  %v6811_v42 = vadd.f32 %v5586_v38, %v5574_v39  ;;  %v5603_v49 = vsub.f32 1.5, %v5602_v53  ;;  %10694 = vmatmul.msk.bf16.gmra.mxu1 %vm2042_vm0, %v12912_v1 }
 0x674   : > { %v7050_v43 = vunpack.c.l.b16 %v6964_v59  ;;  %v12672_v22 = vpop.eup %12671  ;;  %v7137_v12 = vsel %vm7109_vm13, %v7136_v27, %v7135_v46  ;;  %v16978_v36 = vadd.f32 %v4547_v20, %v21153_v60  ;;  %v4548_v47 = vmul.f32 %v4206_v8, %v4206_v8  ;;  %v4210_v27 = vpop.f32.mrf.mxu3 }
 0x675   : > { %v7051_v4 = vunpack.c.h.b16 %v6964_v59  ;;  %v4549_v45 = vmul.f32 %v3999_v44, %v3999_v44  ;;  %v5604_v30 = vmul.f32 %v12670_v34, %v5603_v49  ;;  %v5612_v15 = vmul.f32 %v12672_v22, %v16871_v7  ;;  %v4003_v53 = vpop.f32.mrf.mxu2 }
 0x676   : > { %v7138_v32 = vperm.slane %v7050_v43, %v16165_v48  ;;  %v12674_v57 = vpop.eup %12673  ;;  %v5595_v63 = vsel %vm5594_vm1, %v16842_v10, %v5593_v62  ;;  %vm5606_vm5 = vcmp.eq.f32.partialorder %v16868_v0, inf  ;;  %12675 = vrsqrt.f32 %v16908_v2  ;;  %v16997_v1 = vpop.f32.mrf.mxu1 }
 0x677   : > { %v7140_v46 = vperm.slane %v7051_v4, %v16168_v52  ;;  %6812 = vadd.xlane.f32.xlu2 %v6811_v42  ;;  %v5605_v20 = vmul.f32 %v5604_v30, %v16868_v0  ;;  %v5613_v8 = vmul.f32 %v12672_v22, %v5612_v15  ;;  %v5624_v44 = vmul.f32 %v12674_v57, %v16905_v14  ;;  %v21157_v15 = vld [vmem:[#allocation114_spill] sm:$0xff] }
 0x678   : > { %v7139_v34 = vsel %vm7113_vm3, %v7138_v32, %v7137_v12  ;;  %v5609_v59 = vand.u32 2147483648, %v16868_v0  ;;  %v4208_v39 = vadd.f32 %v4207_v37, %v16875_v16  ;;  %v4002_v62 = vadd.f32 %v4001_v41, %v16880_v33  ;;  %v17001_v43 = vpop.f32.mrf.mxu0  ;;  %v21154_v12 = vld [vmem:[#allocation42_spill] sm:$0xff]  ;;  %v21155_v33 = vld [vmem:[#allocation113_spill] sm:$0xff] }
 0x679   : > { %v16994_v38 = vsel %vm20719_vm4, %v7140_v46, %v7139_v34  ;;  %v5607_v19 = vsel %vm5606_vm5, %v16868_v0, %v5605_v20  ;;  %vm5608_vm6 = vcmp.eq.f32.partialorder %v16868_v0, 0.0  ;;  %v5614_v42 = vmul.f32 0.5, %v5613_v8 }
 0x67a   : > { %v5625_v49 = vmul.f32 %v12674_v57, %v5624_v44  ;;  %v17004_v60 = vadd.f32 %v4548_v47, %v21154_v12  ;;  %v5598_v16 = vsel %vm5596_vm2, %v5597_v54, %v5595_v63  ;;  %v5610_v37 = vsel %vm5608_vm6, %v5609_v59, %v5607_v19  ;;  %v21159_v47 = vld [vmem:[#allocation43_spill] sm:$0xff]  ;;  %v21160_v12 = vld [vmem:[#allocation44_spill] sm:$0xff] }
 0x67b   : > { %12677 = vrsqrt.f32 %v16972_v25  ;;  %v17011_v41 = vmul.f32 %v21155_v33, %v21155_v33  ;;  %v6814_v4 = vadd.f32 %v5610_v37, %v5598_v16  ;;  %v5615_v30 = vsub.f32 1.5, %v5614_v42  ;;  %v12913_v63 = vld [vmem:[%s20666_s4 + $0xe0] sm:$0xff]  ;;  %v21161_v37 = vld [vmem:[#allocation45_spill] sm:$0xff] }
 0x67c   : > { %v5626_v0 = vmul.f32 0.5, %v5625_v49  ;;  %v12676_v32 = vpop.eup %12675  ;;  %v17015_v46 = vmul.f32 %v21157_v15, %v21157_v15  ;;  %v17018_v20 = vadd.f32 %v4549_v45, %v21159_v47  ;;  %v4550_v10 = vmul.f32 %v4208_v39, %v4208_v39  ;;  %10733 = vmatmul.msk.bf16.gmra.mxu2 %vm2042_vm0, %v12913_v63  ;;  %v17029_v59 = vpop.f32.mrf.mxu3  ;;  %10773 = vmatmul.msk.bf16.gmra.mxu3 %vm2042_vm0, %v12913_v63 }
 0x67d   : > { %21156 = vst [vmem:[#allocation93_spill] sm:$0xff] %v17011_v41  ;;  %v4551_v54 = vmul.f32 %v4002_v62, %v4002_v62  ;;  %6815 = vadd.xlane.f32.xlu0 %v6814_v4  ;;  %v5616_v34 = vmul.f32 %v12672_v22, %v5615_v30  ;;  %v5636_v44 = vmul.f32 %v12676_v32, %v16908_v2  ;;  %12679 = vrsqrt.f32 %v16978_v36  ;;  %v17034_v42 = vpop.f32.mrf.mxu2 }
 0x67e   : > { %21158 = vst [vmem:[#allocation94_spill] sm:$0xff] %v17015_v46  ;;  %v5627_v8 = vsub.f32 1.5, %v5626_v0  ;;  %vm5618_vm11 = vcmp.eq.f32.partialorder %v16871_v7, inf  ;;  %vm5620_vm12 = vcmp.eq.f32.partialorder %v16871_v7, 0.0  ;;  %v4211_v45 = vadd.f32 %v4210_v27, %v16913_v61  ;;  %v17050_v47 = vpop.f32.mrf.mxu1 }
 0x67f   : > { %12681 = vrsqrt.f32 %v17004_v60  ;;  %v5617_v39 = vmul.f32 %v5616_v34, %v16871_v7  ;;  %v5621_v62 = vand.u32 2147483648, %v16871_v7  ;;  %v5637_v19 = vmul.f32 %v12676_v32, %v5636_v44 }
 0x680   : > { %v5628_v22 = vmul.f32 %v12674_v57, %v5627_v8  ;;  %v17037_v16 = vadd.f32 %v4550_v10, %v21160_v12  ;;  %v17040_v33 = vadd.f32 %v4551_v54, %v21161_v37  ;;  %vm5630_vm14 = vcmp.eq.f32.partialorder %v16905_v14, inf  ;;  %v17052_v10 = vpop.f32.mrf.mxu0  ;;  %v12914_v54 = vld [vmem:[%s20667_s5 + $0xf0] sm:$0xff] }
 0x681   : > { %v12678_v49 = vpop.eup %12677  ;;  %vm5632_vm15 = vcmp.eq.f32.partialorder %v16905_v14, 0.0  ;;  %v5619_v61 = vsel %vm5618_vm11, %v16871_v7, %v5617_v39  ;;  %v5638_v4 = vmul.f32 0.5, %v5637_v19  ;;  %v5633_v30 = vand.u32 2147483648, %v16905_v14 }
 0x682   : > { %v5629_v27 = vmul.f32 %v5628_v22, %v16905_v14  ;;  %v5648_v57 = vmul.f32 %v12678_v49, %v16972_v25  ;;  %v4552_v0 = vmul.f32 %v4211_v45, %v4211_v45  ;;  %v4004_v15 = vadd.f32 %v4003_v53, %v16921_v28  ;;  %10655 = vmatmul.msk.bf16.gmra.mxu0 %vm2042_vm0, %v12914_v54 }
 0x683   : > { %vm5642_vm1 = vcmp.eq.f32.partialorder %v16908_v2, inf  ;;  %v12680_v34 = vpop.eup %12679  ;;  %v5639_v44 = vsub.f32 1.5, %v5638_v4  ;;  %12683 = vrsqrt.f32 %v17018_v20  ;;  %10695 = vmatmul.msk.bf16.gmra.mxu1 %vm2042_vm0, %v12914_v54  ;;  %v5622_v53 = vsel %vm5620_vm12, %v5621_v62, %v5619_v61  ;;  %v6777_v4 = vpop.xlane.xlu1 %6776 }
 0x684   : > { %v5631_v8 = vsel %vm5630_vm14, %v16905_v14, %v5629_v27  ;;  %v5649_v39 = vmul.f32 %v12678_v49, %v5648_v57  ;;  %vm5644_vm2 = vcmp.eq.f32.partialorder %v16908_v2, 0.0  ;;  %v5645_v22 = vand.u32 2147483648, %v16908_v2  ;;  %v17073_v62 = vpop.f32.mrf.mxu3  ;;  %v21162_v14 = vld [vmem:[#allocation46_spill] sm:$0xff] }
 0x685   : > { %v12682_v28 = vpop.eup %12681  ;;  %v5634_v45 = vsel %vm5632_vm15, %v5633_v30, %v5631_v8  ;;  %v5660_v19 = vmul.f32 %v12680_v34, %v16978_v36  ;;  %v5640_v37 = vmul.f32 %v12676_v32, %v5639_v44  ;;  %v17070_v57 = vmul.f32 %v4004_v15, %v4004_v15  ;;  %v6780_v54 = vpop.xlane.xlu2 %6779 }
 0x686   : > { %v6817_v12 = vadd.f32 %v5634_v45, %v5622_v53  ;;  %v5650_v63 = vmul.f32 0.5, %v5649_v39  ;;  %v5672_v27 = vmul.f32 %v12682_v28, %v17004_v60  ;;  %vm5654_vm5 = vcmp.eq.f32.partialorder %v16972_v25, inf  ;;  %v17080_v44 = vpop.f32.mrf.mxu2 }
 0x687   : > { %v5661_v7 = vmul.f32 %v12680_v34, %v5660_v19  ;;  %12685 = vrsqrt.f32 %v17037_v16  ;;  %v17077_v61 = vadd.f32 %v4552_v0, %v21162_v14  ;;  %v5641_v30 = vmul.f32 %v5640_v37, %v16908_v2 }
 0x688   : > { %6818 = vadd.xlane.f32.xlu0 %v6817_v12  ;;  %v5651_v32 = vsub.f32 1.5, %v5650_v63  ;;  %v5673_v8 = vmul.f32 %v12682_v28, %v5672_v27  ;;  %vm5656_vm6 = vcmp.eq.f32.partialorder %v16972_v25, 0.0  ;;  %v5657_v15 = vand.u32 2147483648, %v16972_v25 }
 0x689   : > { %v6965_v39 = vpack.c.bf16 %v6780_v54, %v6777_v4  ;;  %v5662_v53 = vmul.f32 0.5, %v5661_v7  ;;  %v12684_v45 = vpop.eup %12683  ;;  %vm5666_vm11 = vcmp.eq.f32.partialorder %v16978_v36, inf  ;;  %vm5668_vm12 = vcmp.eq.f32.partialorder %v16978_v36, 0.0 }
 0x68a   : > { %v5652_v19 = vmul.f32 %v12678_v49, %v5651_v32  ;;  %v5674_v0 = vmul.f32 0.5, %v5673_v8  ;;  %v5643_v12 = vsel %vm5642_vm1, %v16908_v2, %v5641_v30  ;;  %v4213_v4 = vadd.f32 %v17029_v59, %v16952_v35  ;;  %v12915_v30 = vld [vmem:[%s20666_s4 + $0xe8] sm:$0xff]  ;;  %v17102_v35 = vpop.f32.mrf.mxu0 }
 0x68b   : > { %v7052_v37 = vunpack.c.l.b16 %v6965_v39  ;;  %v7053_v63 = vunpack.c.h.b16 %v6965_v39  ;;  %v5663_v27 = vsub.f32 1.5, %v5662_v53  ;;  %v5669_v7 = vand.u32 2147483648, %v16978_v36  ;;  %v17100_v39 = vpop.f32.mrf.mxu1 }
 0x68c   : > { %v5653_v14 = vmul.f32 %v5652_v19, %v16972_v25  ;;  %v5675_v49 = vsub.f32 1.5, %v5674_v0  ;;  %v5684_v41 = vmul.f32 %v12684_v45, %v17018_v20  ;;  %10734 = vmatmul.msk.bf16.gmra.mxu2 %vm2042_vm0, %v12915_v30  ;;  %v5646_v59 = vsel %vm5644_vm2, %v5645_v22, %v5643_v12  ;;  %v17115_v56 = vpop.f32.mrf.mxu3  ;;  %10774 = vmatmul.msk.bf16.gmra.mxu3 %vm2042_vm0, %v12915_v30 }
 0x68d   : > { %v12686_v32 = vpop.eup %12685  ;;  %v7142_v54 = vperm.slane %v7052_v37, %v16326_v23  ;;  %v7144_v8 = vperm.slane %v7053_v63, %v16332_v55  ;;  %v5664_v46 = vmul.f32 %v12680_v34, %v5663_v27  ;;  %vm5678_vm14 = vcmp.eq.f32.partialorder %v17004_v60, inf }
 0x68e   : > { %v5655_v53 = vsel %vm5654_vm5, %v16972_v25, %v5653_v14  ;;  %v5676_v34 = vmul.f32 %v12682_v28, %v5675_v49  ;;  %v5696_v19 = vmul.f32 %v12686_v32, %v17037_v16  ;;  %v5685_v27 = vmul.f32 %v12684_v45, %v5684_v41  ;;  %v17121_v14 = vpop.f32.mrf.mxu2 }
 0x68f   : > { %v5658_v0 = vsel %vm5656_vm6, %v5657_v15, %v5655_v53  ;;  %v7143_v37 = vsel %vm20720_vm9, %v7142_v54, %v16994_v38  ;;  %v5665_v63 = vmul.f32 %v5664_v46, %v16978_v36  ;;  %v5681_v38 = vand.u32 2147483648, %v17004_v60  ;;  %v21163_v54 = vld [vmem:[#allocation115_spill] sm:$0xff] }
 0x690   : > { %v6820_v2 = vadd.f32 %v5658_v0, %v5646_v59  ;;  %v17118_v22 = vsel %vm20716_vm10, %v7144_v8, %v7143_v37  ;;  %v5677_v12 = vmul.f32 %v5676_v34, %v17004_v60  ;;  %v5697_v28 = vmul.f32 %v12686_v32, %v5696_v19  ;;  %v12916_v19 = vld [vmem:[%s20667_s5 + $0xf8] sm:$0xff]  ;;  %v21168_v37 = vld [vmem:[#allocation117_spill] sm:$0xff] }
 0x691   : > { %v5667_v25 = vsel %vm5666_vm11, %v16978_v36, %v5665_v63  ;;  %v5686_v41 = vmul.f32 0.5, %v5685_v27  ;;  %v4007_v46 = vadd.f32 %v17034_v42, %v16959_v3  ;;  %vm5680_vm15 = vcmp.eq.f32.partialorder %v17004_v60, 0.0  ;;  %v21165_v3 = vld [vmem:[#allocation47_spill] sm:$0xff]  ;;  %v21166_v36 = vld [vmem:[#allocation116_spill] sm:$0xff] }
 0x692   : > { %6821 = vadd.xlane.f32.xlu1 %v6820_v2  ;;  %v5679_v15 = vsel %vm5678_vm14, %v17004_v60, %v5677_v12  ;;  %v5698_v49 = vmul.f32 0.5, %v5697_v28  ;;  %v17134_v8 = vmul.f32 %v21163_v54, %v21163_v54  ;;  %v5670_v59 = vsel %vm5668_vm12, %v5669_v7, %v5667_v25  ;;  %10656 = vmatmul.msk.bf16.gmra.mxu0 %vm2042_vm0, %v12916_v19  ;;  %v17159_v2 = vpop.f32.mrf.mxu0  ;;  %v6783_v25 = vpop.xlane.xlu2 %6782 }
 0x693   : > { %v5682_v53 = vsel %vm5680_vm15, %v5681_v38, %v5679_v15  ;;  %v5687_v34 = vsub.f32 1.5, %v5686_v41  ;;  %v17144_v42 = vadd.f32 %v17070_v57, %v21165_v3  ;;  %12687 = vrsqrt.f32 %v17040_v33  ;;  %10696 = vmatmul.msk.bf16.gmra.mxu1 %vm2042_vm0, %v12916_v19  ;;  %v17157_v57 = vpop.f32.mrf.mxu1  ;;  %v21170_v19 = vld [vmem:[#allocation48_spill] sm:$0xff] }
 0x694   : > { %21164 = vst [vmem:[#allocation95_spill] sm:$0xff] %v17134_v8  ;;  %v6823_v60 = vadd.f32 %v5682_v53, %v5670_v59  ;;  %v5699_v0 = vsub.f32 1.5, %v5698_v49  ;;  %v17151_v7 = vmul.f32 %v21166_v36, %v21166_v36  ;;  %v17155_v63 = vmul.f32 %v21168_v37, %v21168_v37  ;;  %v17166_v15 = vpop.f32.mrf.mxu3 }
 0x695   : > { %vm7240_vm1 = vcmask 1041409   ;;  %v5688_v27 = vmul.f32 %v12684_v45, %v5687_v34  ;;  %v4554_v12 = vmul.f32 %v4213_v4, %v4213_v4  ;;  %v4555_v30 = vmul.f32 %v4007_v46, %v4007_v46  ;;  %v6786_v46 = vpop.xlane.xlu0 %6785 }
 0x696   : > { %21167 = vst [vmem:[#allocation24_spill] sm:$0xff] %v17151_v7  ;;  %v5700_v28 = vmul.f32 %v12686_v32, %v5699_v0  ;;  %12689 = vrsqrt.f32 %v17077_v61  ;;  %vm5690_vm2 = vcmp.eq.f32.partialorder %v17018_v20, inf  ;;  %vm5692_vm5 = vcmp.eq.f32.partialorder %v17018_v20, 0.0  ;;  %v17173_v49 = vpop.f32.mrf.mxu2 }
 0x697   : > { %21169 = vst [vmem:[#allocation96_spill] sm:$0xff] %v17155_v63  ;;  %v5689_v38 = vmul.f32 %v5688_v27, %v17018_v20  ;;  %v5693_v41 = vand.u32 2147483648, %v17018_v20  ;;  %v4216_v45 = vadd.f32 %v17073_v62, %v16997_v1  ;;  %v4009_v4 = vadd.f32 %v17080_v44, %v17001_v43  ;;  %v21178_v63 = vld [vmem:[#allocation54_spill] sm:$0xff] }
 0x698   : > { %v5701_v32 = vmul.f32 %v5700_v28, %v17037_v16  ;;  %12691 = vrsqrt.f32 %v17144_v42  ;;  %vm5702_vm6 = vcmp.eq.f32.partialorder %v17037_v16, inf  ;;  %v5705_v59 = vand.u32 2147483648, %v17037_v16 }
 0x699   : > { %v5691_v54 = vsel %vm5690_vm2, %v17018_v20, %v5689_v38  ;;  %v6966_v53 = vpack.c.bf16 %v6786_v46, %v6783_v25  ;;  %v12688_v34 = vpop.eup %12687  ;;  %v17180_v1 = vadd.f32 %v4554_v12, %v21170_v19  ;;  %vm5704_vm11 = vcmp.eq.f32.partialorder %v17037_v16, 0.0  ;;  %v21173_v46 = vld [vmem:[#allocation49_spill] sm:$0xff] }
 0x69a   : > { %6824 = vadd.xlane.f32.xlu1 %v6823_v60  ;;  %v5694_v43 = vsel %vm5692_vm5, %v5693_v41, %v5691_v54  ;;  %v5703_v62 = vsel %vm5702_vm6, %v17037_v16, %v5701_v32  ;;  %v5708_v36 = vmul.f32 %v12688_v34, %v17040_v33  ;;  %v4556_v27 = vmul.f32 %v4216_v45, %v4216_v45  ;;  %v12917_v16 = vld [vmem:[%s20666_s4 + $0xf0] sm:$0xff]  ;;  %v10845_v45 = vld [vmem:[%s20668_s6 + $0x20] sm:$0xf] }
 0x69b   : > { %v5706_v44 = vsel %vm5704_vm11, %v5705_v59, %v5703_v62  ;;  %v7054_v3 = vunpack.c.l.b16 %v6966_v53  ;;  %v7055_v0 = vunpack.c.h.b16 %v6966_v53  ;;  %v4557_v28 = vmul.f32 %v4009_v4, %v4009_v4  ;;  %v21171_v4 = vld [vmem:[#allocation118_spill] sm:$0xff]  ;;  %v17212_v53 = vpop.f32.mrf.mxu1 }
 0x69c   : > { %v12690_v37 = vpop.eup %12689  ;;  %v6826_v25 = vadd.f32 %v5706_v44, %v5694_v43  ;;  %v4218_v12 = vadd.f32 %v17115_v56, %v17050_v47  ;;  %v5709_v38 = vmul.f32 %v12688_v34, %v5708_v36  ;;  %10735 = vmatmul.msk.bf16.gmra.mxu2 %vm2042_vm0, %v12917_v16  ;;  %v12216_v56 = vld [vmem:[%s20668_s6 + $0x24] sm:$0xf0]  ;;  %v17204_v32 = vmul.f32 %v21171_v4, %v21171_v4 }
 0x69d   : > { %v7146_v60 = vperm.slane %v7054_v3, %v16402_v18  ;;  %v7148_v20 = vperm.slane %v7055_v0, %v16408_v5  ;;  %v5720_v41 = vmul.f32 %v12690_v37, %v17077_v61  ;;  %v17207_v54 = vadd.f32 %v4555_v30, %v21173_v46  ;;  %v17217_v3 = vpop.f32.mrf.mxu3  ;;  %v17219_v0 = vpop.f32.mrf.mxu0  ;;  %10775 = vmatmul.msk.bf16.gmra.mxu3 %vm2042_vm0, %v12917_v16 }
 0x69e   : > { %v12692_v47 = vpop.eup %12691  ;;  %21172 = vst [vmem:[#allocation97_spill] sm:$0xff] %v17204_v32  ;;  %6827 = vadd.xlane.f32.xlu2 %v6826_v25  ;;  %v4012_v59 = vadd.f32 %v17121_v14, %v17052_v10  ;;  %12693 = vrsqrt.f32 %v17180_v1  ;;  %v5710_v43 = vmul.f32 0.5, %v5709_v38  ;;  %v17224_v30 = vsel %vm7240_vm1, %v16809_v13, %v16457_v21  ;;  %v17229_v36 = vpop.f32.mrf.mxu2  ;;  %v21174_v25 = vld [vmem:[#allocation50_spill] sm:$0xff]  ;;  %v21175_v38 = vld [vmem:[#allocation51_spill] sm:$0xff] }
 0x69f   : > { %v7147_v19 = vsel %vm7129_vm7, %v7146_v60, %v17118_v22  ;;  %v5721_v62 = vmul.f32 %v12690_v37, %v5720_v41  ;;  %v5732_v44 = vmul.f32 %v12692_v47, %v17144_v42  ;;  %v4558_v10 = vmul.f32 %v4218_v12, %v4218_v12 }
 0x6a0   : > { %v17227_v14 = vsel %vm7133_vm8, %v7148_v20, %v7147_v19  ;;  %v10846_v22 = vor.u32 %v12216_v56, %v10845_v45  ;;  %v17232_v60 = vadd.f32 %v4556_v27, %v21174_v25  ;;  %v17235_v41 = vadd.f32 %v4557_v28, %v21175_v38  ;;  %v12918_v28 = vld [vmem:[%s20667_s5 + $0x100] sm:$0xff] }
 0x6a1   : > { %v5711_v4 = vsub.f32 1.5, %v5710_v43  ;;  %v5722_v46 = vmul.f32 0.5, %v5721_v62  ;;  %v4559_v32 = vmul.f32 %v4012_v59, %v4012_v59  ;;  %vm5714_vm12 = vcmp.eq.f32.partialorder %v17040_v33, inf  ;;  %v21176_v56 = vld [vmem:[#allocation52_spill] sm:$0xff] }
 0x6a2   : > { %v5733_v21 = vmul.f32 %v12692_v47, %v5732_v44  ;;  %7408 = vmatpush.bf16.msra.mxu3 %v10846_v22  ;;  %12695 = vrsqrt.f32 %v17207_v54  ;;  %vm5716_vm14 = vcmp.eq.f32.partialorder %v17040_v33, 0.0  ;;  %v4221_v27 = vadd.f32 %v17166_v15, %v17100_v39  ;;  %10657 = vmatmul.msk.bf16.gmra.mxu0 %vm2042_vm0, %v12918_v28  ;;  %v10811_v44 = vld [vmem:[%s20668_s6 + $0x60] sm:$0xf] }
 0x6a3   : > { %v5712_v12 = vmul.f32 %v12688_v34, %v5711_v4  ;;  %v5723_v20 = vsub.f32 1.5, %v5722_v46  ;;  %v17247_v59 = vadd.f32 %v4558_v10, %v21176_v56  ;;  %v5717_v19 = vand.u32 2147483648, %v17040_v33  ;;  %10697 = vmatmul.msk.bf16.gmra.mxu1 %vm2042_vm0, %v12918_v28  ;;  %v6789_v38 = vpop.xlane.xlu0 %6788  ;;  %v17274_v56 = vpop.f32.mrf.mxu1 }
 0x6a4   : > { %v12694_v45 = vpop.eup %12693  ;;  %v4014_v34 = vadd.f32 %v17173_v49, %v17102_v35  ;;  %v5734_v43 = vmul.f32 0.5, %v5733_v21  ;;  %12697 = vrsqrt.f32 %v17232_v60  ;;  %v12224_v35 = vld [vmem:[%s20668_s6 + $0x64] sm:$0xf0]  ;;  %vm5726_vm15 = vcmp.eq.f32.partialorder %v17077_v61, inf }
 0x6a5   : > { %v5713_v39 = vmul.f32 %v5712_v12, %v17040_v33  ;;  %v5724_v15 = vmul.f32 %v12690_v37, %v5723_v20  ;;  %v5744_v62 = vmul.f32 %v12694_v45, %v17180_v1  ;;  %v21177_v49 = vld [vmem:[#allocation53_spill] sm:$0xff]  ;;  %vm5728_vm2 = vcmp.eq.f32.partialorder %v17077_v61, 0.0  ;;  %v4225_v46 = vpop.f32.mrf.mxu3 }
 0x6a6   : > { %v17264_v10 = vadd.f32 %v4559_v32, %v21177_v49  ;;  %v5735_v37 = vsub.f32 1.5, %v5734_v43  ;;  %v4560_v25 = vmul.f32 %v4221_v27, %v4221_v27  ;;  %v5729_v12 = vand.u32 2147483648, %v17077_v61  ;;  %v4018_v20 = vpop.f32.mrf.mxu2  ;;  %v17281_v49 = vpop.f32.mrf.mxu0 }
 0x6a7   : > { %v5715_v16 = vsel %vm5714_vm12, %v17040_v33, %v5713_v39  ;;  %v5725_v22 = vmul.f32 %v5724_v15, %v17077_v61  ;;  %v5745_v4 = vmul.f32 %v12694_v45, %v5744_v62  ;;  %vm5738_vm5 = vcmp.eq.f32.partialorder %v17144_v42, inf  ;;  %v6792_v15 = vpop.xlane.xlu1 %6791 }
 0x6a8   : > { %v12696_v21 = vpop.eup %12695  ;;  %v5736_v32 = vmul.f32 %v12692_v47, %v5735_v37  ;;  %v10812_v28 = vor.u32 %v12224_v35, %v10811_v44  ;;  %v4561_v39 = vmul.f32 %v4014_v34, %v4014_v34  ;;  %vm5740_vm6 = vcmp.eq.f32.partialorder %v17144_v42, 0.0 }
 0x6a9   : > { %v5727_v43 = vsel %vm5726_vm15, %v17077_v61, %v5725_v22  ;;  %v5746_v27 = vmul.f32 0.5, %v5745_v4  ;;  %v5756_v62 = vmul.f32 %v12696_v21, %v17207_v54  ;;  %v5718_v47 = vsel %vm5716_vm14, %v5717_v19, %v5715_v16  ;;  %v12223_v16 = vld [vmem:[%s20668_s6 + $0x64] sm:$0xf] }
 0x6aa   : > { %v5730_v44 = vsel %vm5728_vm2, %v5729_v12, %v5727_v43  ;;  %v5737_v35 = vmul.f32 %v5736_v32, %v17144_v42  ;;  %v17288_v37 = vpack.c.bf16 %v6792_v15, %v6789_v38  ;;  %7304 = vmatpush.bf16.msra.mxu0 %v10812_v28  ;;  %v12698_v34 = vpop.eup %12697  ;;  %v17291_v4 = vadd.f32 %v4560_v25, %v21178_v63  ;;  %v10813_v63 = vld [vmem:[%s20668_s6 + $0x68] sm:$0xf0]  ;;  %v21179_v25 = vld [vmem:[#allocation55_spill] sm:$0xff] }
 0x6ab   : > { %v6829_v22 = vadd.f32 %v5730_v44, %v5718_v47  ;;  %v5747_v7 = vsub.f32 1.5, %v5746_v27  ;;  %v5757_v8 = vmul.f32 %v12696_v21, %v5756_v62  ;;  %v5741_v58 = vand.u32 2147483648, %v17144_v42  ;;  %v17325_v47 = vpop.f32.mrf.mxu1 }
 0x6ac   : > { %v4223_v33 = vadd.f32 %v17217_v3, %v17157_v57  ;;  %v4017_v61 = vadd.f32 %v17229_v36, %v17159_v2  ;;  %v5768_v19 = vmul.f32 %v12698_v34, %v17232_v60  ;;  %v17306_v38 = vadd.f32 %v4561_v39, %v21179_v25  ;;  %v12919_v2 = vld [vmem:[%s20666_s4 + $0xf8] sm:$0xff] }
 0x6ad   : > { %6830 = vadd.xlane.f32.xlu1 %v6829_v22  ;;  %v5748_v12 = vmul.f32 %v12694_v45, %v5747_v7  ;;  %vm5750_vm11 = vcmp.eq.f32.partialorder %v17180_v1, inf  ;;  %v5758_v57 = vmul.f32 0.5, %v5757_v8  ;;  %10736 = vmatmul.msk.bf16.gmra.mxu2 %vm2042_vm0, %v12919_v2  ;;  %v5739_v3 = vsel %vm5738_vm5, %v17144_v42, %v5737_v35  ;;  %v17320_v8 = vpop.f32.mrf.mxu3 }
 0x6ae   : > { %vm5752_vm12 = vcmp.eq.f32.partialorder %v17180_v1, 0.0  ;;  %v5753_v36 = vand.u32 2147483648, %v17180_v1  ;;  %v5769_v32 = vmul.f32 %v12698_v34, %v5768_v19  ;;  %v10816_v28 = vor.u32 %v12223_v16, %v10813_v63  ;;  %v17323_v62 = vpop.f32.mrf.mxu2  ;;  %v17332_v19 = vpop.f32.mrf.mxu0  ;;  %10776 = vmatmul.msk.bf16.gmra.mxu3 %vm2042_vm0, %v12919_v2  ;;  %v21181_v63 = vld [vmem:[#allocation57_spill] sm:$0xff] }
 0x6af   : > { %v5749_v7 = vmul.f32 %v5748_v12, %v17180_v1  ;;  %v5759_v45 = vsub.f32 1.5, %v5758_v57  ;;  %12699 = vrsqrt.f32 %v17235_v41  ;;  %v4562_v43 = vmul.f32 %v4223_v33, %v4223_v33 }
 0x6b0   : > { %v4563_v39 = vmul.f32 %v4017_v61, %v4017_v61  ;;  %v5770_v27 = vmul.f32 0.5, %v5769_v32  ;;  %v4226_v15 = vadd.f32 %v4225_v46, %v17212_v53  ;;  %v4019_v22 = vadd.f32 %v4018_v20, %v17219_v0  ;;  %7317 = vmatpush.bf16.msra.mxu1 %v10816_v28  ;;  %v12920_v20 = vld [vmem:[%s20667_s5 + $0x108] sm:$0xff] }
 0x6b1   : > { %v5751_v44 = vsel %vm5750_vm11, %v17180_v1, %v5749_v7  ;;  %v5760_v35 = vmul.f32 %v12696_v21, %v5759_v45  ;;  %12701 = vrsqrt.f32 %v17247_v59  ;;  %v5742_v33 = vsel %vm5740_vm6, %v5741_v58, %v5739_v3  ;;  %v21180_v58 = vld [vmem:[#allocation56_spill] sm:$0xff] }
 0x6b2   : > { %v5754_v53 = vsel %vm5752_vm12, %v5753_v36, %v5751_v44  ;;  %vm5762_vm14 = vcmp.eq.f32.partialorder %v17207_v54, inf  ;;  %v5771_v46 = vsub.f32 1.5, %v5770_v27  ;;  %v7056_v16 = vunpack.c.l.b16 %v17288_v37  ;;  %10658 = vmatmul.msk.bf16.gmra.mxu0 %vm2042_vm0, %v12920_v20 }
 0x6b3   : > { %v6832_v61 = vadd.f32 %v5754_v53, %v5742_v33  ;;  %v7057_v21 = vunpack.c.h.b16 %v17288_v37  ;;  %v5761_v0 = vmul.f32 %v5760_v35, %v17207_v54  ;;  %v17347_v42 = vadd.f32 %v4562_v43, %v21180_v58  ;;  %10698 = vmatmul.msk.bf16.gmra.mxu1 %vm2042_vm0, %v12920_v20  ;;  %v17374_v35 = vpop.f32.mrf.mxu1  ;;  %v21182_v53 = vld [vmem:[#allocation58_spill] sm:$0xff] }
 0x6b4   : > { %vm5764_vm15 = vcmp.eq.f32.partialorder %v17207_v54, 0.0  ;;  %v5772_v1 = vmul.f32 %v12698_v34, %v5771_v46  ;;  %12703 = vrsqrt.f32 %v17264_v10  ;;  %v17354_v25 = vadd.f32 %v4563_v39, %v21181_v63 }
 0x6b5   : > { %v12700_v37 = vpop.eup %12699  ;;  %6833 = vadd.xlane.f32.xlu2 %v6832_v61  ;;  %v5765_v12 = vand.u32 2147483648, %v17207_v54  ;;  %v4564_v57 = vmul.f32 %v4226_v15, %v4226_v15  ;;  %v4565_v3 = vmul.f32 %v4019_v22, %v4019_v22  ;;  %v5763_v36 = vsel %vm5762_vm14, %v17207_v54, %v5761_v0  ;;  %v17367_v43 = vpop.f32.mrf.mxu3  ;;  %v21183_v61 = vld [vmem:[#allocation59_spill] sm:$0xff] }
 0x6b6   : > { %v5773_v34 = vmul.f32 %v5772_v1, %v17232_v60  ;;  %vm5774_vm2 = vcmp.eq.f32.partialorder %v17232_v60, inf  ;;  %v5780_v2 = vmul.f32 %v12700_v37, %v17235_v41  ;;  %v7150_v7 = vperm.slane %v7056_v16, %v16084_v17  ;;  %v17372_v44 = vpop.f32.mrf.mxu2 }
 0x6b7   : > { %v12702_v32 = vpop.eup %12701  ;;  %v7151_v45 = vperm.slane %v7057_v21, %v16113_v40  ;;  %v5777_v28 = vand.u32 2147483648, %v17232_v60  ;;  %12705 = vrsqrt.f32 %v17291_v4  ;;  %vm5776_vm5 = vcmp.eq.f32.partialorder %v17232_v60, 0.0  ;;  %v17384_v21 = vpop.f32.mrf.mxu0 }
 0x6b8   : > { %v5775_v39 = vsel %vm5774_vm2, %v17232_v60, %v5773_v34  ;;  %v5781_v27 = vmul.f32 %v12700_v37, %v5780_v2  ;;  %v5792_v15 = vmul.f32 %v12702_v32, %v17247_v59  ;;  %v5766_v22 = vsel %vm5764_vm15, %v5765_v12, %v5763_v36 }
 0x6b9   : > { %v5778_v33 = vsel %vm5776_vm5, %v5777_v28, %v5775_v39  ;;  %v17379_v46 = vadd.f32 %v4564_v57, %v21182_v53  ;;  %v17382_v16 = vadd.f32 %v4565_v3, %v21183_v61  ;;  %12707 = vrsqrt.f32 %v17306_v38  ;;  %v6795_v28 = vpop.xlane.xlu0 %6794 }
 0x6ba   : > { %v12704_v60 = vpop.eup %12703  ;;  %v6835_v0 = vadd.f32 %v5778_v33, %v5766_v22  ;;  %v5782_v20 = vmul.f32 0.5, %v5781_v27  ;;  %v5793_v58 = vmul.f32 %v12702_v32, %v5792_v15  ;;  %v17388_v1 = vsel %vm7109_vm13, %v7151_v45, %v7150_v7 }
 0x6bb   : > { %vm5786_vm6 = vcmp.eq.f32.partialorder %v17235_v41, inf  ;;  %v4228_v54 = vadd.f32 %v17320_v8, %v17274_v56  ;;  %v5804_v63 = vmul.f32 %v12704_v60, %v17264_v10  ;;  %vm5788_vm11 = vcmp.eq.f32.partialorder %v17235_v41, 0.0  ;;  %v12921_v56 = vld [vmem:[%s20666_s4 + $0x100] sm:$0xff] }
 0x6bc   : > { %v5783_v12 = vsub.f32 1.5, %v5782_v20  ;;  %v5789_v57 = vand.u32 2147483648, %v17235_v41  ;;  %v5794_v3 = vmul.f32 0.5, %v5793_v58  ;;  %vm5798_vm12 = vcmp.eq.f32.partialorder %v17247_v59, inf }
 0x6bd   : > { %v12706_v36 = vpop.eup %12705  ;;  %6836 = vadd.xlane.f32.xlu2 %v6835_v0  ;;  %vm5800_vm14 = vcmp.eq.f32.partialorder %v17247_v59, 0.0  ;;  %v5805_v34 = vmul.f32 %v12704_v60, %v5804_v63  ;;  %12709 = vrsqrt.f32 %v17347_v42  ;;  %10737 = vmatmul.msk.bf16.gmra.mxu2 %vm2042_vm0, %v12921_v56  ;;  %v4022_v7 = vadd.f32 %v17323_v62, %v17281_v49  ;;  %v17408_v22 = vpop.f32.mrf.mxu3 }
 0x6be   : > { %v5784_v8 = vmul.f32 %v12700_v37, %v5783_v12  ;;  %v5795_v2 = vsub.f32 1.5, %v5794_v3  ;;  %v5816_v45 = vmul.f32 %v12706_v36, %v17291_v4  ;;  %v5801_v39 = vand.u32 2147483648, %v17247_v59  ;;  %v6798_v37 = vpop.xlane.xlu1 %6797  ;;  %v17411_v20 = vpop.f32.mrf.mxu2  ;;  %10777 = vmatmul.msk.bf16.gmra.mxu3 %vm2042_vm0, %v12921_v56 }
 0x6bf   : > { %v4566_v27 = vmul.f32 %v4228_v54, %v4228_v54  ;;  %v5806_v15 = vmul.f32 0.5, %v5805_v34  ;;  %vm5810_vm15 = vcmp.eq.f32.partialorder %v17264_v10, inf  ;;  %v12708_v33 = vpop.eup %12707  ;;  %12711 = vrsqrt.f32 %v17354_v25  ;;  %v17417_v63 = vpop.f32.mrf.mxu1 }
 0x6c0   : > { %v5785_v53 = vmul.f32 %v5784_v8, %v17235_v41  ;;  %v5796_v61 = vmul.f32 %v12702_v32, %v5795_v2  ;;  %v5817_v0 = vmul.f32 %v12706_v36, %v5816_v45  ;;  %v6968_v49 = vpack.c.bf16 %v6798_v37, %v6795_v28  ;;  %v17423_v8 = vpop.f32.mrf.mxu0 }
 0x6c1   : > { %v5807_v62 = vsub.f32 1.5, %v5806_v15  ;;  %vm5812_vm2 = vcmp.eq.f32.partialorder %v17264_v10, 0.0  ;;  %v5813_v58 = vand.u32 2147483648, %v17264_v10  ;;  %v5828_v54 = vmul.f32 %v12708_v33, %v17306_v38 }
 0x6c2   : > { %v5787_v32 = vsel %vm5786_vm6, %v17235_v41, %v5785_v53  ;;  %v5797_v12 = vmul.f32 %v5796_v61, %v17247_v59  ;;  %v4567_v3 = vmul.f32 %v4022_v7, %v4022_v7  ;;  %v5818_v34 = vmul.f32 0.5, %v5817_v0  ;;  %10659 = vmatmul.msk.bf16.gmra.mxu0 %vm2042_vm0, %v12922_v31 }
 0x6c3   : > { %v12710_v2 = vpop.eup %12709  ;;  %v5790_v45 = vsel %vm5788_vm11, %v5789_v57, %v5787_v32  ;;  %v7058_v28 = vunpack.c.l.b16 %v6968_v49  ;;  %v7059_v15 = vunpack.c.h.b16 %v6968_v49  ;;  %v5808_v37 = vmul.f32 %v12704_v60, %v5807_v62  ;;  %10699 = vmatmul.msk.bf16.gmra.mxu1 %vm2042_vm0, %v12922_v31 }
 0x6c4   : > { %v5799_v7 = vsel %vm5798_vm12, %v17247_v59, %v5797_v12  ;;  %v5819_v53 = vsub.f32 1.5, %v5818_v34  ;;  %v5829_v61 = vmul.f32 %v12708_v33, %v5828_v54  ;;  %v5840_v0 = vmul.f32 %v12710_v2, %v17347_v42 }
 0x6c5   : > { %v5802_v41 = vsel %vm5800_vm14, %v5801_v39, %v5799_v7  ;;  %v7153_v60 = vperm.slane %v7058_v28, %v16165_v48  ;;  %v7155_v57 = vperm.slane %v7059_v15, %v16168_v52  ;;  %v5809_v49 = vmul.f32 %v5808_v37, %v17264_v10  ;;  %v17442_v62 = vpop.eup %12711  ;;  %v17453_v56 = vpop.f32.mrf.mxu3  ;;  %v21185_v37 = vld [vmem:[#allocation61_spill] sm:$0xff] }
 0x6c6   : > { %v6838_v32 = vadd.f32 %v5802_v41, %v5790_v45  ;;  %v5820_v12 = vmul.f32 %v12706_v36, %v5819_v53  ;;  %v5830_v54 = vmul.f32 0.5, %v5829_v61  ;;  %v5841_v34 = vmul.f32 %v12710_v2, %v5840_v0  ;;  %v17459_v45 = vpop.f32.mrf.mxu2  ;;  %v6801_v41 = vpop.xlane.xlu2 %6800 }
 0x6c7   : > { %v17445_v6 = vadd.f32 %v4566_v27, %v21184_v50  ;;  %v7154_v31 = vsel %vm7113_vm3, %v7153_v60, %v17388_v1  ;;  %v5811_v59 = vsel %vm5810_vm15, %v17264_v10, %v5809_v49  ;;  %vm5822_vm5 = vcmp.eq.f32.partialorder %v17291_v4, inf }
 0x6c8   : > { %6839 = vadd.xlane.f32.xlu0 %v6838_v32  ;;  %v7156_v39 = vsel %vm20719_vm4, %v7155_v57, %v7154_v31  ;;  %v5821_v36 = vmul.f32 %v5820_v12, %v17291_v4  ;;  %v4231_v50 = vadd.f32 %v17367_v43, %v17325_v47  ;;  %v5831_v27 = vsub.f32 1.5, %v5830_v54  ;;  %v17471_v43 = vpop.f32.mrf.mxu1 }
 0x6c9   : > { %vm5824_vm6 = vcmp.eq.f32.partialorder %v17291_v4, 0.0  ;;  %v5825_v1 = vand.u32 2147483648, %v17291_v4  ;;  %v5842_v28 = vmul.f32 0.5, %v5841_v34  ;;  %v5852_v15 = vmul.f32 %v17442_v62, %v17354_v25  ;;  %v12923_v34 = vld [vmem:[%s20666_s4 + $0x108] sm:$0xff] }
 0x6ca   : > { %v17466_v7 = vadd.f32 %v4567_v3, %v21185_v37  ;;  %v5814_v53 = vsel %vm5812_vm2, %v5813_v58, %v5811_v59  ;;  %v5823_v61 = vsel %vm5822_vm5, %v17291_v4, %v5821_v36  ;;  %v5832_v47 = vmul.f32 %v12708_v33, %v5831_v27  ;;  %v17478_v4 = vpop.f32.mrf.mxu0 }
 0x6cb   : > { %vm20717_vm11 = vcmask 1042434   ;;  %v5826_v0 = vsel %vm5824_vm6, %v5825_v1, %v5823_v61  ;;  %v5843_v60 = vsub.f32 1.5, %v5842_v28  ;;  %v5853_v57 = vmul.f32 %v17442_v62, %v5852_v15  ;;  %v6804_v58 = vpop.xlane.xlu0 %6803 }
 0x6cc   : > { %12713 = vrsqrt.f32 %v17379_v46  ;;  %v6841_v49 = vadd.f32 %v5826_v0, %v5814_v53  ;;  %v4568_v32 = vmul.f32 %v4231_v50, %v4231_v50  ;;  %v4024_v3 = vadd.f32 %v17372_v44, %v17332_v19 }
 0x6cd   : > { %v5833_v10 = vmul.f32 %v5832_v47, %v17306_v38  ;;  %vm5834_vm12 = vcmp.eq.f32.partialorder %v17306_v38, inf  ;;  %v5844_v33 = vmul.f32 %v12710_v2, %v5843_v60  ;;  %v6969_v12 = vpack.c.bf16 %v6804_v58, %v6801_v41  ;;  %10738 = vmatmul.msk.bf16.gmra.mxu2 %vm2042_vm0, %v12923_v34  ;;  %v17493_v50 = vpop.f32.mrf.mxu3 }
 0x6ce   : > { %v5854_v54 = vmul.f32 0.5, %v5853_v57  ;;  %6842 = vadd.xlane.f32.xlu1 %v6841_v49  ;;  %vm5836_vm14 = vcmp.eq.f32.partialorder %v17306_v38, 0.0  ;;  %v4233_v19 = vadd.f32 %v17408_v22, %v17374_v35  ;;  %v4027_v44 = vadd.f32 %v17411_v20, %v17384_v21  ;;  %v17498_v22 = vpop.f32.mrf.mxu2  ;;  %10778 = vmatmul.msk.bf16.gmra.mxu3 %vm2042_vm0, %v12923_v34  ;;  %v21188_v34 = vld [vmem:[#allocation120_spill] sm:$0xff] }
 0x6cf   : > { %12715 = vrsqrt.f32 %v17382_v16  ;;  %v5835_v2 = vsel %vm5834_vm12, %v17306_v38, %v5833_v10  ;;  %v5845_v31 = vmul.f32 %v5844_v33, %v17347_v42  ;;  %v7060_v59 = vunpack.c.l.b16 %v6969_v12 }
 0x6d0   : > { %v7061_v36 = vunpack.c.h.b16 %v6969_v12  ;;  %v5837_v27 = vand.u32 2147483648, %v17306_v38  ;;  %vm5846_vm15 = vcmp.eq.f32.partialorder %v17347_v42, inf  ;;  %v5849_v1 = vand.u32 2147483648, %v17347_v42  ;;  %v17507_v0 = vpop.f32.mrf.mxu1 }
 0x6d1   : > { %v5855_v35 = vsub.f32 1.5, %v5854_v54  ;;  %v5847_v20 = vsel %vm5846_vm15, %v17347_v42, %v5845_v31  ;;  %vm5848_vm2 = vcmp.eq.f32.partialorder %v17347_v42, 0.0  ;;  %v7157_v28 = vperm.slane %v7060_v59, %v16326_v23  ;;  %v12924_v42 = vld [vmem:[%s20667_s5 + $0x118] sm:$0xff] }
 0x6d2   : > { %v12714_v21 = vpop.eup %12713  ;;  %v7159_v15 = vperm.slane %v7061_v36, %v16332_v55  ;;  %v4569_v37 = vmul.f32 %v4024_v3, %v4024_v3  ;;  %v5838_v53 = vsel %vm5836_vm14, %v5837_v27, %v5835_v2  ;;  %v5850_v61 = vsel %vm5848_vm2, %v5849_v1, %v5847_v20  ;;  %10660 = vmatmul.msk.bf16.gmra.mxu0 %vm2042_vm0, %v12924_v42  ;;  %v17520_v33 = vpop.f32.mrf.mxu0  ;;  %v21191_v1 = vld [vmem:[#allocation65_spill] sm:$0xff] }
 0x6d3   : > { %v5864_v47 = vmul.f32 %v12714_v21, %v17379_v46  ;;  %v6844_v41 = vadd.f32 %v5850_v61, %v5838_v53  ;;  %v4570_v60 = vmul.f32 %v4233_v19, %v4233_v19  ;;  %v7158_v57 = vsel %vm20720_vm9, %v7157_v28, %v7156_v39  ;;  %10700 = vmatmul.msk.bf16.gmra.mxu1 %vm2042_vm0, %v12924_v42  ;;  %v21186_v39 = vld [vmem:[#allocation62_spill] sm:$0xff] }
 0x6d4   : > { %v4571_v49 = vmul.f32 %v4027_v44, %v4027_v44  ;;  %v17515_v38 = vsel %vm20716_vm10, %v7159_v15, %v7158_v57  ;;  %v5856_v10 = vmul.f32 %v17442_v62, %v5855_v35  ;;  %12717 = vrsqrt.f32 %v17445_v6  ;;  %v21187_v44 = vld [vmem:[#allocation119_spill] sm:$0xff] }
 0x6d5   : > { %v12716_v3 = vpop.eup %12715  ;;  %v5865_v58 = vmul.f32 %v12714_v21, %v5864_v47  ;;  %v17524_v12 = vadd.f32 %v4568_v32, %v21186_v39  ;;  %6845 = vadd.xlane.f32.xlu2 %v6844_v41  ;;  %v4236_v54 = vadd.f32 %v17453_v56, %v17417_v63  ;;  %v4029_v19 = vadd.f32 %v17459_v45, %v17423_v8  ;;  %v21189_v63 = vld [vmem:[#allocation63_spill] sm:$0xff]  ;;  %v21190_v8 = vld [vmem:[#allocation64_spill] sm:$0xff]  ;;  %v17551_v27 = vpop.f32.mrf.mxu3 }
 0x6d6   : > { %v5876_v62 = vmul.f32 %v12716_v3, %v17382_v16  ;;  %v17533_v2 = vmul.f32 %v21187_v44, %v21187_v44  ;;  %v17537_v31 = vmul.f32 %v21188_v34, %v21188_v34  ;;  %v17542_v32 = vsel %vm20717_vm11, %v17227_v14, %v17224_v30  ;;  %v17558_v28 = vpop.f32.mrf.mxu2 }
 0x6d7   : > { %v5866_v59 = vmul.f32 0.5, %v5865_v58  ;;  %v17545_v56 = vadd.f32 %v4569_v37, %v21189_v63  ;;  %v17548_v45 = vadd.f32 %v4570_v60, %v21190_v8  ;;  %12719 = vrsqrt.f32 %v17466_v7  ;;  %v12925_v63 = vld [vmem:[%s20666_s4 + $0x110] sm:$0xff] }
 0x6d8   : > { %v5877_v36 = vmul.f32 %v12716_v3, %v5876_v62  ;;  %v17554_v35 = vadd.f32 %v4571_v49, %v21191_v1  ;;  %v5857_v20 = vmul.f32 %v5856_v10, %v17354_v25  ;;  %vm5858_vm5 = vcmp.eq.f32.partialorder %v17354_v25, inf  ;;  %v17567_v42 = vpop.f32.mrf.mxu1  ;;  %v21193_v62 = vld [vmem:[#allocation67_spill] sm:$0xff] }
 0x6d9   : > { %v5867_v30 = vsub.f32 1.5, %v5866_v59  ;;  %v4572_v15 = vmul.f32 %v4236_v54, %v4236_v54  ;;  %v4573_v37 = vmul.f32 %v4029_v19, %v4029_v19  ;;  %12721 = vrsqrt.f32 %v17524_v12  ;;  %v21192_v54 = vld [vmem:[#allocation66_spill] sm:$0xff] }
 0x6da   : > { %v5878_v53 = vmul.f32 0.5, %v5877_v36  ;;  %v12718_v61 = vpop.eup %12717  ;;  %vm5860_vm6 = vcmp.eq.f32.partialorder %v17354_v25, 0.0  ;;  %v5861_v47 = vand.u32 2147483648, %v17354_v25  ;;  %vm5870_vm12 = vcmp.eq.f32.partialorder %v17379_v46, inf }
 0x6db   : > { %v5868_v41 = vmul.f32 %v12714_v21, %v5867_v30  ;;  %vm5872_vm14 = vcmp.eq.f32.partialorder %v17379_v46, 0.0  ;;  %v5873_v60 = vand.u32 2147483648, %v17379_v46  ;;  %v5888_v49 = vmul.f32 %v12718_v61, %v17445_v6  ;;  %v17575_v21 = vpop.f32.mrf.mxu0 }
 0x6dc   : > { %v5879_v57 = vsub.f32 1.5, %v5878_v53  ;;  %v5859_v10 = vsel %vm5858_vm5, %v17354_v25, %v5857_v20  ;;  %vm5882_vm15 = vcmp.eq.f32.partialorder %v17382_v16, inf  ;;  %12723 = vrsqrt.f32 %v17545_v56 }
 0x6dd   : > { %v5869_v58 = vmul.f32 %v5868_v41, %v17379_v46  ;;  %v12720_v39 = vpop.eup %12719  ;;  %v17578_v19 = vadd.f32 %v4572_v15, %v21192_v54  ;;  %v17581_v44 = vadd.f32 %v4573_v37, %v21193_v62  ;;  %v5889_v59 = vmul.f32 %v12718_v61, %v5888_v49  ;;  %10739 = vmatmul.msk.bf16.gmra.mxu2 %vm2042_vm0, %v12925_v63  ;;  %v17600_v53 = vpop.f32.mrf.mxu3 }
 0x6de   : > { %v5880_v34 = vmul.f32 %v12716_v3, %v5879_v57  ;;  %vm5884_vm2 = vcmp.eq.f32.partialorder %v17382_v16, 0.0  ;;  %v5885_v36 = vand.u32 2147483648, %v17382_v16  ;;  %vm5894_vm5 = vcmp.eq.f32.partialorder %v17445_v6, inf  ;;  %v17604_v54 = vpop.f32.mrf.mxu2  ;;  %10779 = vmatmul.msk.bf16.gmra.mxu3 %vm2042_vm0, %v12925_v63 }
 0x6df   : > { %v5871_v8 = vsel %vm5870_vm12, %v17379_v46, %v5869_v58  ;;  %v5900_v1 = vmul.f32 %v12720_v39, %v17466_v7  ;;  %v12722_v3 = vpop.eup %12721  ;;  %v5862_v20 = vsel %vm5860_vm6, %v5861_v47, %v5859_v10  ;;  %v5890_v15 = vmul.f32 0.5, %v5889_v59 }
 0x6e0   : > { %v5874_v30 = vsel %vm5872_vm14, %v5873_v60, %v5871_v8  ;;  %v4238_v37 = vadd.f32 %v17493_v50, %v17471_v43  ;;  %v5881_v57 = vmul.f32 %v5880_v34, %v17382_v16  ;;  %v5912_v58 = vmul.f32 %v12722_v3, %v17524_v12  ;;  %v6807_v60 = vpop.xlane.xlu1 %6806 }
 0x6e1   : > { %v6847_v41 = vadd.f32 %v5874_v30, %v5862_v20  ;;  %v5901_v49 = vmul.f32 %v12720_v39, %v5900_v1  ;;  %v5891_v62 = vsub.f32 1.5, %v5890_v15  ;;  %vm5896_vm6 = vcmp.eq.f32.partialorder %v17445_v6, 0.0  ;;  %v12926_v1 = vld [vmem:[%s20667_s5 + $0x120] sm:$0xff] }
 0x6e2   : > { %v5897_v25 = vand.u32 2147483648, %v17445_v6  ;;  %12725 = vrsqrt.f32 %v17548_v45  ;;  %v12724_v46 = vpop.eup %12723  ;;  %vm7244_vm12 = vcmask 1043459   ;;  %v4032_v43 = vadd.f32 %v17498_v22, %v17478_v4  ;;  %v6810_v59 = vpop.xlane.xlu2 %6809  ;;  %10661 = vmatmul.msk.bf16.gmra.mxu0 %vm2042_vm0, %v12926_v1 }
 0x6e3   : > { %6848 = vadd.xlane.f32.xlu0 %v6847_v41  ;;  %v5902_v50 = vmul.f32 0.5, %v5901_v49  ;;  %v5913_v47 = vmul.f32 %v12722_v3, %v5912_v58  ;;  %v5892_v10 = vmul.f32 %v12718_v61, %v5891_v62  ;;  %v17611_v34 = vmul.f32 %v4238_v37, %v4238_v37  ;;  %10701 = vmatmul.msk.bf16.gmra.mxu1 %vm2042_vm0, %v12926_v1  ;;  %v17627_v37 = vpop.f32.mrf.mxu1  ;;  %v17629_v62 = vpop.f32.mrf.mxu0 }
 0x6e4   : > { %vm5906_vm14 = vcmp.eq.f32.partialorder %v17466_v7, inf  ;;  %v5924_v8 = vmul.f32 %v12724_v46, %v17545_v56  ;;  %v5883_v4 = vsel %vm5882_vm15, %v17382_v16, %v5881_v57  ;;  %v6970_v22 = vpack.c.bf16 %v6810_v59, %v6807_v60 }
 0x6e5   : > { %v5903_v20 = vsub.f32 1.5, %v5902_v50  ;;  %v5914_v61 = vmul.f32 0.5, %v5913_v47  ;;  %v5893_v30 = vmul.f32 %v5892_v10, %v17445_v6  ;;  %vm5908_vm10 = vcmp.eq.f32.partialorder %v17466_v7, 0.0  ;;  %v17638_v59 = vpop.f32.mrf.mxu3 }
 0x6e6   : > { %v5925_v15 = vmul.f32 %v12724_v46, %v5924_v8  ;;  %12727 = vrsqrt.f32 %v17554_v35  ;;  %v7062_v41 = vunpack.c.l.b16 %v6970_v22  ;;  %v7063_v49 = vunpack.c.h.b16 %v6970_v22 }
 0x6e7   : > { %v5904_v58 = vmul.f32 %v12720_v39, %v5903_v20  ;;  %v5915_v57 = vsub.f32 1.5, %v5914_v61  ;;  %v5886_v63 = vsel %vm5884_vm2, %v5885_v36, %v5883_v4  ;;  %v5895_v47 = vsel %vm5894_vm5, %v17445_v6, %v5893_v30  ;;  %v17645_v36 = vpop.f32.mrf.mxu2 }
 0x6e8   : > { %v12726_v50 = vpop.eup %12725  ;;  %v4241_v60 = vadd.f32 %v17551_v27, %v17507_v0  ;;  %v5926_v10 = vmul.f32 0.5, %v5925_v15  ;;  %v5898_v39 = vsel %vm5896_vm6, %v5897_v25, %v5895_v47  ;;  %v7161_v8 = vperm.slane %v7062_v41, %v16402_v18 }
 0x6e9   : > { %v7163_v1 = vperm.slane %v7063_v49, %v16408_v5  ;;  %v5905_v16 = vmul.f32 %v5904_v58, %v17466_v7  ;;  %v6850_v4 = vadd.f32 %v5898_v39, %v5886_v63  ;;  %v5916_v22 = vmul.f32 %v12722_v3, %v5915_v57 }
 0x6ea   : > { %v5927_v20 = vsub.f32 1.5, %v5926_v10  ;;  %v5936_v61 = vmul.f32 %v12726_v50, %v17548_v45  ;;  %v7162_v0 = vsel %vm7129_vm7, %v7161_v8, %v17515_v38  ;;  %v4575_v27 = vmul.f32 %v4032_v43, %v4032_v43 }
 0x6eb   : > { %v5909_v6 = vand.u32 2147483648, %v17466_v7  ;;  %vm5918_vm15 = vcmp.eq.f32.partialorder %v17524_v12, inf  ;;  %6851 = vadd.xlane.f32.xlu1 %v6850_v4  ;;  %v17655_v30 = vsel %vm7133_vm8, %v7163_v1, %v7162_v0  ;;  %v5907_v3 = vsel %vm5906_vm14, %v17466_v7, %v5905_v16  ;;  %v21195_v0 = vld [vmem:[#allocation69_spill] sm:$0xff] }
 0x6ec   : > { %v17652_v25 = vpop.eup %12727  ;;  %v5917_v15 = vmul.f32 %v5916_v22, %v17524_v12  ;;  %v4034_v38 = vadd.f32 %v17558_v28, %v17520_v33  ;;  %v17666_v43 = vsel %vm7244_vm12, %v17655_v30, %v17542_v32  ;;  %v5921_v41 = vand.u32 2147483648, %v17524_v12  ;;  %v12927_v33 = vld [vmem:[%s20666_s4 + $0x118] sm:$0xff]  ;;  %v17677_v32 = vpop.f32.mrf.mxu1 }
 0x6ed   : > { %v5928_v49 = vmul.f32 %v12724_v46, %v5927_v20  ;;  %v5937_v58 = vmul.f32 %v12726_v50, %v5936_v61  ;;  %vm5920_vm2 = vcmp.eq.f32.partialorder %v17524_v12, 0.0  ;;  %v4576_v63 = vmul.f32 %v4241_v60, %v4241_v60  ;;  %10740 = vmatmul.msk.bf16.gmra.mxu2 %vm2042_vm0, %v12927_v33  ;;  %v17683_v60 = vpop.f32.mrf.mxu0  ;;  %v17687_v16 = vpop.f32.mrf.mxu3  ;;  %v21194_v20 = vld [vmem:[#allocation68_spill] sm:$0xff] }
 0x6ee   : > { %v5919_v57 = vsel %vm5918_vm15, %v17524_v12, %v5917_v15  ;;  %v5948_v47 = vmul.f32 %v17652_v25, %v17554_v35  ;;  %v5910_v28 = vsel %vm5908_vm10, %v5909_v6, %v5907_v3  ;;  %v4243_v12 = vadd.f32 %v17600_v53, %v17567_v42  ;;  %v6813_v3 = vpop.xlane.xlu2 %6812  ;;  %10780 = vmatmul.msk.bf16.gmra.mxu3 %vm2042_vm0, %v12927_v33 }
 0x6ef   : > { %v5922_v46 = vsel %vm5920_vm2, %v5921_v41, %v5919_v57  ;;  %v5938_v10 = vmul.f32 0.5, %v5937_v58  ;;  %v4577_v8 = vmul.f32 %v4034_v38, %v4034_v38  ;;  %12729 = vrsqrt.f32 %v17578_v19  ;;  %v17695_v53 = vpop.f32.mrf.mxu2  ;;  %v12928_v57 = vld [vmem:[%s20667_s5 + $0x128] sm:$0xff] }
 0x6f0   : > { %v6853_v39 = vadd.f32 %v5922_v46, %v5910_v28  ;;  %v5949_v1 = vmul.f32 %v17652_v25, %v5948_v47  ;;  %v7241_v7 = vsel %vm7240_vm1, %v17227_v14, %v16809_v13  ;;  %v5929_v4 = vmul.f32 %v5928_v49, %v17545_v56  ;;  %v6816_v13 = vpop.xlane.xlu0 %6815 }
 0x6f1   : > { %v5939_v22 = vsub.f32 1.5, %v5938_v10  ;;  %v4037_v42 = vadd.f32 %v17604_v54, %v17575_v21  ;;  %v17699_v61 = vadd.f32 %v17611_v34, %v21194_v20  ;;  %v17702_v6 = vadd.f32 %v4575_v27, %v21195_v0  ;;  %v21196_v21 = vld [vmem:[#allocation70_spill] sm:$0xff]  ;;  %v21197_v34 = vld [vmem:[#allocation71_spill] sm:$0xff] }
 0x6f2   : > { %6854 = vadd.xlane.f32.xlu2 %v6853_v39  ;;  %vm5930_vm10 = vcmp.eq.f32.partialorder %v17545_v56, inf  ;;  %v5950_v15 = vmul.f32 0.5, %v5949_v1  ;;  %v4578_v41 = vmul.f32 %v4243_v12, %v4243_v12  ;;  %v17705_v49 = vpack.c.bf16 %v6816_v13, %v6813_v3  ;;  %10662 = vmatmul.msk.bf16.gmra.mxu0 %vm2042_vm0, %v12928_v57 }
 0x6f3   : > { %v5940_v38 = vmul.f32 %v12726_v50, %v5939_v22  ;;  %12731 = vrsqrt.f32 %v17581_v44  ;;  %v17709_v54 = vadd.f32 %v4576_v63, %v21196_v21  ;;  %v17712_v58 = vadd.f32 %v4577_v8, %v21197_v34  ;;  %10702 = vmatmul.msk.bf16.gmra.mxu1 %vm2042_vm0, %v12928_v57  ;;  %v21198_v8 = vld [vmem:[#allocation72_spill] sm:$0xff] }
 0x6f4   : > { %vm5932_vm5 = vcmp.eq.f32.partialorder %v17545_v56, 0.0  ;;  %v5951_v27 = vsub.f32 1.5, %v5950_v15  ;;  %v5931_v50 = vsel %vm5930_vm10, %v17545_v56, %v5929_v4  ;;  %v5933_v47 = vand.u32 2147483648, %v17545_v56  ;;  %v17728_v12 = vpop.f32.mrf.mxu1 }
 0x6f5   : > { %v5941_v28 = vmul.f32 %v5940_v38, %v17548_v45  ;;  %v4579_v63 = vmul.f32 %v4037_v42, %v4037_v42  ;;  %v12730_v46 = vpop.eup %12729  ;;  %vm5942_vm6 = vcmp.eq.f32.partialorder %v17548_v45, inf  ;;  %vm5944_vm14 = vcmp.eq.f32.partialorder %v17548_v45, 0.0  ;;  %v17737_v22 = vpop.f32.mrf.mxu0 }
 0x6f6   : > { %v5945_v10 = vand.u32 2147483648, %v17548_v45  ;;  %12733 = vrsqrt.f32 %v17699_v61  ;;  %v17732_v1 = vadd.f32 %v4578_v41, %v21198_v8  ;;  %v5960_v33 = vmul.f32 %v12730_v46, %v17578_v19  ;;  %v12929_v8 = vld [vmem:[%s20666_s4 + $0x120] sm:$0xff] }
 0x6f7   : > { %v5943_v39 = vsel %vm5942_vm6, %v17548_v45, %v5941_v28  ;;  %v4246_v4 = vadd.f32 %v17638_v59, %v17627_v37  ;;  %v5934_v42 = vsel %vm5932_vm5, %v5933_v47, %v5931_v50  ;;  %v5952_v0 = vmul.f32 %v17652_v25, %v5951_v27  ;;  %v17744_v45 = vpop.f32.mrf.mxu3  ;;  %v21199_v37 = vld [vmem:[#allocation73_spill] sm:$0xff]  ;;  %v17753_v56 = vpop.f32.mrf.mxu2 }
 0x6f8   : > { %v5946_v20 = vsel %vm5944_vm14, %v5945_v10, %v5943_v39  ;;  %v4039_v3 = vadd.f32 %v17645_v36, %v17629_v62  ;;  %v17748_v15 = vsel %vm20717_vm11, %v17655_v30, %v7241_v7  ;;  %v17751_v59 = vadd.f32 %v4579_v63, %v21199_v37 }
 0x6f9   : > { %v12732_v13 = vpop.eup %12731  ;;  %v6856_v38 = vadd.f32 %v5946_v20, %v5934_v42  ;;  %v5961_v41 = vmul.f32 %v12730_v46, %v5960_v33  ;;  %vm5954_vm15 = vcmp.eq.f32.partialorder %v17554_v35, inf  ;;  %vm5956_vm2 = vcmp.eq.f32.partialorder %v17554_v35, 0.0 }
 0x6fa   : > { %v5957_v62 = vand.u32 2147483648, %v17554_v35  ;;  %v5972_v36 = vmul.f32 %v12732_v13, %v17581_v44  ;;  %vm5966_vm10 = vcmp.eq.f32.partialorder %v17578_v19, inf  ;;  %v4580_v7 = vmul.f32 %v4246_v4, %v4246_v4 }
 0x6fb   : > { %6857 = vadd.xlane.f32.xlu0 %v6856_v38  ;;  %v5962_v25 = vmul.f32 0.5, %v5961_v41  ;;  %12735 = vrsqrt.f32 %v17702_v6  ;;  %v7064_v34 = vunpack.c.l.b16 %v17705_v49  ;;  %v5953_v27 = vmul.f32 %v5952_v0, %v17554_v35 }
 0x6fc   : > { %v12734_v21 = vpop.eup %12733  ;;  %v4581_v57 = vmul.f32 %v4039_v3, %v4039_v3  ;;  %v5973_v50 = vmul.f32 %v12732_v13, %v5972_v36  ;;  %v7065_v47 = vunpack.c.h.b16 %v17705_v49  ;;  %12737 = vrsqrt.f32 %v17709_v54  ;;  %v17778_v20 = vpop.f32.mrf.mxu1 }
 0x6fd   : > { %v5963_v28 = vsub.f32 1.5, %v5962_v25  ;;  %v5984_v63 = vmul.f32 %v12734_v21, %v17699_v61  ;;  %vm5968_vm5 = vcmp.eq.f32.partialorder %v17578_v19, 0.0  ;;  %v5969_v10 = vand.u32 2147483648, %v17578_v19  ;;  %10741 = vmatmul.msk.bf16.gmra.mxu2 %vm2042_vm0, %v12929_v8 }
 0x6fe   : > { %v5974_v39 = vmul.f32 0.5, %v5973_v50  ;;  %vm5978_vm6 = vcmp.eq.f32.partialorder %v17581_v44, inf  ;;  %v17774_v49 = vadd.f32 %v4580_v7, %v15508_v11  ;;  %vm5980_vm14 = vcmp.eq.f32.partialorder %v17581_v44, 0.0  ;;  %v17789_v11 = vpop.f32.mrf.mxu0  ;;  %10781 = vmatmul.msk.bf16.gmra.mxu3 %vm2042_vm0, %v12929_v8 }
 0x6ff   : > { %v5964_v33 = vmul.f32 %v12730_v46, %v5963_v28  ;;  %v5981_v4 = vand.u32 2147483648, %v17581_v44  ;;  %v5985_v42 = vmul.f32 %v12734_v21, %v5984_v63  ;;  %v5955_v0 = vsel %vm5954_vm15, %v17554_v35, %v5953_v27  ;;  %v17787_v46 = vpop.f32.mrf.mxu3  ;;  %v17794_v50 = vpop.f32.mrf.mxu2  ;;  %v12930_v35 = vld [vmem:[%s20667_s5 + $0x130] sm:$0xff] }
 0x700   : > { %v17784_v3 = vadd.f32 %v4581_v57, %v15520_v24  ;;  %v5975_v38 = vsub.f32 1.5, %v5974_v39  ;;  %12739 = vrsqrt.f32 %v17712_v58  ;;  %v7165_v41 = vperm.slane %v7064_v34, %v16084_v17 }
 0x701   : > { %v12736_v37 = vpop.eup %12735  ;;  %v7166_v36 = vperm.slane %v7065_v47, %v16113_v40  ;;  %v5965_v25 = vmul.f32 %v5964_v33, %v17578_v19  ;;  %v5986_v7 = vmul.f32 0.5, %v5985_v42  ;;  %vm5990_vm15 = vcmp.eq.f32.partialorder %v17699_v61, inf }
 0x702   : > { %v5976_v27 = vmul.f32 %v12732_v13, %v5975_v38  ;;  %vm5992_vm11 = vcmp.eq.f32.partialorder %v17699_v61, 0.0  ;;  %v5996_v24 = vmul.f32 %v12736_v37, %v17702_v6  ;;  %v12738_v57 = vpop.eup %12737  ;;  %v5958_v28 = vsel %vm5956_vm2, %v5957_v62, %v5955_v0  ;;  %10663 = vmatmul.msk.bf16.gmra.mxu0 %vm2042_vm0, %v12930_v35 }
 0x703   : > { %v5967_v34 = vsel %vm5966_vm10, %v17578_v19, %v5965_v25  ;;  %v5987_v47 = vsub.f32 1.5, %v5986_v7  ;;  %12741 = vrsqrt.f32 %v17732_v1  ;;  %v6008_v33 = vmul.f32 %v12738_v57, %v17709_v54  ;;  %10703 = vmatmul.msk.bf16.gmra.mxu1 %vm2042_vm0, %v12930_v35 }
 0x704   : > { %v5970_v13 = vsel %vm5968_vm5, %v5969_v10, %v5967_v34  ;;  %v5977_v63 = vmul.f32 %v5976_v27, %v17581_v44  ;;  %v5997_v39 = vmul.f32 %v12736_v37, %v5996_v24  ;;  %v7167_v62 = vsel %vm7109_vm13, %v7166_v36, %v7165_v41  ;;  %v6819_v10 = vpop.xlane.xlu0 %6818  ;;  %v17832_v35 = vpop.f32.mrf.mxu1 }
 0x705   : > { %v6859_v42 = vadd.f32 %v5970_v13, %v5958_v28  ;;  %v5988_v0 = vmul.f32 %v12734_v21, %v5987_v47  ;;  %v5993_v38 = vand.u32 2147483648, %v17699_v61  ;;  %v4248_v7 = vadd.f32 %v17687_v16, %v17677_v32  ;;  %v6822_v27 = vpop.xlane.xlu1 %6821 }
 0x706   : > { %v12740_v19 = vpop.eup %12739  ;;  %v5979_v25 = vsel %vm5978_vm6, %v17581_v44, %v5977_v63  ;;  %v5998_v24 = vmul.f32 0.5, %v5997_v39  ;;  %v6009_v34 = vmul.f32 %v12738_v57, %v6008_v33  ;;  %v6972_v41 = vpack.c.bf16 %v6822_v27, %v6819_v10 }
 0x707   : > { %6860 = vadd.xlane.f32.xlu0 %v6859_v42  ;;  %v5989_v21 = vmul.f32 %v5988_v0, %v17699_v61  ;;  %v4042_v8 = vadd.f32 %v17695_v53, %v17683_v60  ;;  %v6020_v36 = vmul.f32 %v12740_v19, %v17712_v58  ;;  %v5982_v28 = vsel %vm5980_vm14, %v5981_v4, %v5979_v25  ;;  %v17834_v60 = vpop.f32.mrf.mxu3  ;;  %v17839_v0 = vpop.f32.mrf.mxu0 }
 0x708   : > { %v5999_v47 = vsub.f32 1.5, %v5998_v24  ;;  %vm6002_vm2 = vcmp.eq.f32.partialorder %v17702_v6, inf  ;;  %v6010_v32 = vmul.f32 0.5, %v6009_v34  ;;  %v7066_v63 = vunpack.c.l.b16 %v6972_v41  ;;  %v17841_v10 = vpop.f32.mrf.mxu2 }
 0x709   : > { %v12742_v16 = vpop.eup %12741  ;;  %v5991_v13 = vsel %vm5990_vm15, %v17699_v61, %v5989_v21  ;;  %v7067_v39 = vunpack.c.h.b16 %v6972_v41  ;;  %v6021_v33 = vmul.f32 %v12740_v19, %v6020_v36  ;;  %v4582_v21 = vmul.f32 %v4248_v7, %v4248_v7 }
 0x70a   : > { %v5994_v44 = vsel %vm5992_vm11, %v5993_v38, %v5991_v13  ;;  %v6000_v53 = vmul.f32 %v12736_v37, %v5999_v47  ;;  %v6011_v4 = vsub.f32 1.5, %v6010_v32  ;;  %v6032_v42 = vmul.f32 %v12742_v16, %v17732_v1 }
 0x70b   : > { %v6862_v25 = vadd.f32 %v5994_v44, %v5982_v28  ;;  %v7168_v27 = vperm.slane %v7066_v63, %v16165_v48  ;;  %v7170_v24 = vperm.slane %v7067_v39, %v16168_v52  ;;  %v6022_v34 = vmul.f32 0.5, %v6021_v33 }
 0x70c   : > { %v6001_v41 = vmul.f32 %v6000_v53, %v17702_v6  ;;  %v6012_v36 = vmul.f32 %v12738_v57, %v6011_v4  ;;  %v6033_v61 = vmul.f32 %v12742_v16, %v6032_v42  ;;  %v17847_v38 = vmul.f32 %v4042_v8, %v4042_v8  ;;  %v12931_v57 = vld [vmem:[%s20666_s4 + $0x128] sm:$0xff] }
 0x70d   : > { %6863 = vadd.xlane.f32.xlu1 %v6862_v25  ;;  %v7169_v37 = vsel %vm7113_vm3, %v7168_v27, %v7167_v62  ;;  %v6023_v47 = vsub.f32 1.5, %v6022_v34  ;;  %12743 = vrsqrt.f32 %v17751_v59  ;;  %10742 = vmatmul.msk.bf16.gmra.mxu2 %vm2042_vm0, %v12931_v57  ;;  %v6005_v62 = vand.u32 2147483648, %v17702_v6  ;;  %v6825_v42 = vpop.xlane.xlu1 %6824 }
 0x70e   : > { %v17851_v28 = vsel %vm20719_vm4, %v7170_v24, %v7169_v37  ;;  %v6003_v32 = vsel %vm6002_vm2, %v17702_v6, %v6001_v41  ;;  %v6013_v7 = vmul.f32 %v6012_v36, %v17709_v54  ;;  %v6034_v13 = vmul.f32 0.5, %v6033_v61  ;;  %10782 = vmatmul.msk.bf16.gmra.mxu3 %vm2042_vm0, %v12931_v57 }
 0x70f   : > { %vm6014_vm11 = vcmp.eq.f32.partialorder %v17709_v54, inf  ;;  %v6017_v8 = vand.u32 2147483648, %v17709_v54  ;;  %v6024_v63 = vmul.f32 %v12740_v19, %v6023_v47  ;;  %vm6004_vm10 = vcmp.eq.f32.partialorder %v17702_v6, 0.0  ;;  %v10977_v6 = vld [vmem:[%s20670_s8 + $0xf0] sm:$0xf] }
 0x710   : > { %v6015_v39 = vsel %vm6014_vm11, %v17709_v54, %v6013_v7  ;;  %vm6016_vm5 = vcmp.eq.f32.partialorder %v17709_v54, 0.0  ;;  %v6035_v33 = vsub.f32 1.5, %v6034_v13  ;;  %v17868_v44 = vadd.f32 %v4582_v21, %v15547_v9  ;;  %v12266_v9 = vld [vmem:[%s20670_s8 + $0xf4] sm:$0x30]  ;;  %v17880_v54 = vpop.f32.mrf.mxu1 }
 0x711   : > { %v6006_v53 = vsel %vm6004_vm10, %v6005_v62, %v6003_v32  ;;  %v6018_v4 = vsel %vm6016_vm5, %v6017_v8, %v6015_v39  ;;  %v6025_v25 = vmul.f32 %v6024_v63, %v17712_v58  ;;  %v4251_v24 = vadd.f32 %v17744_v45, %v17728_v12  ;;  %v6828_v34 = vpop.xlane.xlu2 %6827  ;;  %v17886_v45 = vpop.f32.mrf.mxu3 }
 0x712   : > { %v6865_v27 = vadd.f32 %v6018_v4, %v6006_v53  ;;  %v6036_v19 = vmul.f32 %v12742_v16, %v6035_v33  ;;  %12745 = vrsqrt.f32 %v17774_v49  ;;  %v4044_v41 = vadd.f32 %v17753_v56, %v17737_v22  ;;  %v17888_v16 = vpop.f32.mrf.mxu0  ;;  %v17894_v32 = vpop.f32.mrf.mxu2  ;;  %v12932_v22 = vld [vmem:[%s20667_s5 + $0x138] sm:$0xff] }
 0x713   : > { %v12744_v21 = vpop.eup %12743  ;;  %vm6026_vm6 = vcmp.eq.f32.partialorder %v17712_v58, inf  ;;  %vm6028_vm14 = vcmp.eq.f32.partialorder %v17712_v58, 0.0  ;;  %v6973_v12 = vpack.c.bf16 %v6828_v34, %v6825_v42  ;;  %v6029_v61 = vand.u32 2147483648, %v17712_v58  ;;  %10664 = vmatmul.msk.bf16.gmra.mxu0 %vm2042_vm0, %v12932_v22  ;;  %10704 = vmatmul.msk.bf16.gmra.mxu1 %vm2042_vm0, %v12932_v22 }
 0x714   : > { %6866 = vadd.xlane.f32.xlu0 %v6865_v27  ;;  %v6027_v36 = vsel %vm6026_vm6, %v17712_v58, %v6025_v25  ;;  %v6037_v37 = vmul.f32 %v6036_v19, %v17732_v1  ;;  %v6044_v47 = vmul.f32 %v12744_v21, %v17751_v59  ;;  %vm6038_vm15 = vcmp.eq.f32.partialorder %v17732_v1, inf }
 0x715   : > { %vm6040_vm2 = vcmp.eq.f32.partialorder %v17732_v1, 0.0  ;;  %v6041_v56 = vand.u32 2147483648, %v17732_v1  ;;  %v10978_v7 = vor.u32 %v12266_v9, %v10977_v6  ;;  %v4253_v62 = vadd.f32 %v17787_v46, %v17778_v20 }
 0x716   : > { %v6039_v13 = vsel %vm6038_vm15, %v17732_v1, %v6037_v37  ;;  %v6045_v8 = vmul.f32 %v12744_v21, %v6044_v47  ;;  %vm20718_vm11 = vcmask 1045504   ;;  %v4584_v63 = vmul.f32 %v4251_v24, %v4251_v24 }
 0x717   : > { %v6030_v39 = vsel %vm6028_vm14, %v6029_v61, %v6027_v36  ;;  %v6042_v33 = vsel %vm6040_vm2, %v6041_v56, %v6039_v13  ;;  %v7068_v53 = vunpack.c.l.b16 %v6973_v12  ;;  %v4047_v57 = vadd.f32 %v17794_v50, %v17789_v11  ;;  %v21200_v61 = vld [vmem:[#allocation74_spill] sm:$0xff] }
 0x718   : > { %v12746_v4 = vpop.eup %12745  ;;  %v6868_v42 = vadd.f32 %v6042_v33, %v6030_v39  ;;  %v6046_v25 = vmul.f32 0.5, %v6045_v8  ;;  %v7693_v1 = vsel %vm20718_vm11, %v10978_v7, 0  ;;  %v17915_v20 = vadd.f32 %v17847_v38, %v15598_v51  ;;  %v17921_v50 = vpop.f32.mrf.mxu1  ;;  %v21201_v7 = vld [vmem:[#allocation75_spill] sm:$0xff] }
 0x719   : > { %v4585_v46 = vmul.f32 %v4044_v41, %v4044_v41  ;;  %v6056_v27 = vmul.f32 %v12746_v4, %v17774_v49  ;;  %7698 = vmatpush.bf16.msra.mxu2 %v7693_v1  ;;  %12747 = vrsqrt.f32 %v17784_v3  ;;  %v4586_v58 = vmul.f32 %v4253_v62, %v4253_v62  ;;  %v17927_v38 = vpop.f32.mrf.mxu3 }
 0x71a   : > { %6869 = vadd.xlane.f32.xlu1 %v6868_v42  ;;  %v7069_v24 = vunpack.c.h.b16 %v6973_v12  ;;  %v6047_v19 = vsub.f32 1.5, %v6046_v25  ;;  %v4256_v11 = vadd.f32 %v17834_v60, %v17832_v35  ;;  %v7172_v34 = vperm.slane %v7068_v53, %v16326_v23  ;;  %v17929_v9 = vpop.f32.mrf.mxu0  ;;  %v17939_v36 = vpop.f32.mrf.mxu2  ;;  %v21203_v53 = vld [vmem:[#allocation76_spill] sm:$0xff] }
 0x71b   : > { %v6057_v6 = vmul.f32 %v12746_v4, %v6056_v27  ;;  %v4049_v51 = vadd.f32 %v17841_v10, %v17839_v0  ;;  %12749 = vrsqrt.f32 %v17868_v44  ;;  %v17934_v41 = vsel %vm7240_vm1, %v17655_v30, %v17227_v14 }
 0x71c   : > { %v17937_v35 = vadd.f32 %v4584_v63, %v15602_v26  ;;  %v4587_v60 = vmul.f32 %v4047_v57, %v4047_v57  ;;  %v6048_v12 = vmul.f32 %v12744_v21, %v6047_v19  ;;  %v17942_v0 = vadd.f32 %v4585_v46, %v15636_v29  ;;  %v12933_v26 = vld [vmem:[%s20666_s4 + $0x130] sm:$0xff] }
 0x71d   : > { %vm6050_vm10 = vcmp.eq.f32.partialorder %v17751_v59, inf  ;;  %vm6052_vm5 = vcmp.eq.f32.partialorder %v17751_v59, 0.0  ;;  %v6058_v10 = vmul.f32 0.5, %v6057_v6  ;;  %v17947_v37 = vadd.f32 %v4586_v58, %v21200_v61  ;;  %10743 = vmatmul.msk.bf16.gmra.mxu2 %vm2042_vm0, %v12933_v26  ;;  %v21204_v46 = vld [vmem:[#allocation77_spill] sm:$0xff] }
 0x71e   : > { %v7174_v14 = vperm.slane %v7069_v24, %v16332_v55  ;;  %v4588_v30 = vmul.f32 %v4256_v11, %v4256_v11  ;;  %12751 = vrsqrt.f32 %v17915_v20  ;;  %v7173_v21 = vsel %vm20720_vm9, %v7172_v34, %v17851_v28  ;;  %10783 = vmatmul.msk.bf16.gmra.mxu3 %vm2042_vm0, %v12933_v26 }
 0x71f   : > { %v12748_v29 = vpop.eup %12747  ;;  %v6049_v47 = vmul.f32 %v6048_v12, %v17751_v59  ;;  %v6059_v22 = vsub.f32 1.5, %v6058_v10  ;;  %v4589_v56 = vmul.f32 %v4049_v51, %v4049_v51  ;;  %v17959_v13 = vadd.f32 %v4587_v60, %v21201_v7 }
 0x720   : > { %v6053_v62 = vand.u32 2147483648, %v17751_v59  ;;  %v6068_v8 = vmul.f32 %v12748_v29, %v17784_v3  ;;  %12753 = vrsqrt.f32 %v17937_v35  ;;  %vm6062_vm1 = vcmp.eq.f32.partialorder %v17774_v49, inf  ;;  %v17982_v58 = vpop.f32.mrf.mxu1 }
 0x721   : > { %v12750_v63 = vpop.eup %12749  ;;  %v6060_v39 = vmul.f32 %v12746_v4, %v6059_v22  ;;  %vm6064_vm6 = vcmp.eq.f32.partialorder %v17774_v49, 0.0  ;;  %v6065_v28 = vand.u32 2147483648, %v17774_v49  ;;  %vm21202_vm14 = vcmask 392512   ;;  %v17986_v6 = vpop.f32.mrf.mxu3 }
 0x722   : > { %v17968_v33 = vsel %vm21202_vm14, %v7174_v14, %v7173_v21  ;;  %v17971_v42 = vadd.f32 %v4588_v30, %v21203_v53  ;;  %v6069_v57 = vmul.f32 %v12748_v29, %v6068_v8  ;;  %v6080_v25 = vmul.f32 %v12750_v63, %v17868_v44  ;;  %v17988_v51 = vpop.f32.mrf.mxu0  ;;  %v17997_v61 = vpop.f32.mrf.mxu2 }
 0x723   : > { %v6051_v1 = vsel %vm6050_vm10, %v17751_v59, %v6049_v47  ;;  %v6061_v4 = vmul.f32 %v6060_v39, %v17774_v49  ;;  %v17979_v27 = vadd.f32 %v4589_v56, %v21204_v46  ;;  %12755 = vrsqrt.f32 %v17942_v0 }
 0x724   : > { %v12752_v24 = vpop.eup %12751  ;;  %v6070_v19 = vmul.f32 0.5, %v6069_v57  ;;  %vm6074_vm15 = vcmp.eq.f32.partialorder %v17784_v3, inf  ;;  %v6077_v11 = vand.u32 2147483648, %v17784_v3  ;;  %v6081_v34 = vmul.f32 %v12750_v63, %v6080_v25 }
 0x725   : > { %v6063_v60 = vsel %vm6062_vm1, %v17774_v49, %v6061_v4  ;;  %vm6076_vm2 = vcmp.eq.f32.partialorder %v17784_v3, 0.0  ;;  %vm6086_vm10 = vcmp.eq.f32.partialorder %v17868_v44, inf  ;;  %v6089_v12 = vand.u32 2147483648, %v17868_v44  ;;  %v6831_v49 = vpop.xlane.xlu1 %6830 }
 0x726   : > { %v6092_v10 = vmul.f32 %v12752_v24, %v17915_v20  ;;  %v12754_v14 = vpop.eup %12753  ;;  %v6054_v30 = vsel %vm6052_vm5, %v6053_v62, %v6051_v1  ;;  %v6066_v21 = vsel %vm6064_vm6, %v6065_v28, %v6063_v60  ;;  %v6071_v47 = vsub.f32 1.5, %v6070_v19 }
 0x727   : > { %v6082_v22 = vmul.f32 0.5, %v6081_v34  ;;  %vm6088_vm1 = vcmp.eq.f32.partialorder %v17868_v44, 0.0  ;;  %v6871_v56 = vadd.f32 %v6066_v21, %v6054_v30  ;;  %v4258_v7 = vadd.f32 %v17886_v45, %v17880_v54 }
 0x728   : > { %v6093_v8 = vmul.f32 %v12752_v24, %v6092_v10  ;;  %v6104_v39 = vmul.f32 %v12754_v14, %v17937_v35  ;;  %v6072_v53 = vmul.f32 %v12748_v29, %v6071_v47  ;;  %vm7246_vm14 = vcmask 1044484   ;;  %v6834_v62 = vpop.xlane.xlu2 %6833  ;;  %v18021_v47 = vpop.f32.mrf.mxu1 }
 0x729   : > { %v6083_v26 = vsub.f32 1.5, %v6082_v22  ;;  %12757 = vrsqrt.f32 %v17947_v37  ;;  %v12756_v59 = vpop.eup %12755  ;;  %6872 = vadd.xlane.f32.xlu0 %v6871_v56  ;;  %v4052_v28 = vadd.f32 %v17894_v32, %v17888_v16  ;;  %vm6098_vm5 = vcmp.eq.f32.partialorder %v17915_v20, inf }
 0x72a   : > { %v6094_v57 = vmul.f32 0.5, %v6093_v8  ;;  %v6105_v25 = vmul.f32 %v12754_v14, %v6104_v39  ;;  %v6073_v54 = vmul.f32 %v6072_v53, %v17784_v3  ;;  %v6974_v1 = vpack.c.bf16 %v6834_v62, %v6831_v49  ;;  %v18030_v53 = vpop.f32.mrf.mxu3 }
 0x72b   : > { %v6084_v45 = vmul.f32 %v12750_v63, %v6083_v26  ;;  %v6116_v29 = vmul.f32 %v12756_v59, %v17942_v0  ;;  %v4590_v4 = vmul.f32 %v4258_v7, %v4258_v7  ;;  %vm6100_vm6 = vcmp.eq.f32.partialorder %v17915_v20, 0.0  ;;  %v12934_v26 = vld [vmem:[%s20666_s4 + $0x138] sm:$0xff] }
 0x72c   : > { %v6095_v46 = vsub.f32 1.5, %v6094_v57  ;;  %v6101_v19 = vand.u32 2147483648, %v17915_v20  ;;  %v6106_v34 = vmul.f32 0.5, %v6105_v25  ;;  %v6075_v16 = vsel %vm6074_vm15, %v17784_v3, %v6073_v54  ;;  %v18041_v57 = vpop.f32.mrf.mxu2 }
 0x72d   : > { %v6085_v32 = vmul.f32 %v6084_v45, %v17868_v44  ;;  %v7070_v60 = vunpack.c.l.b16 %v6974_v1  ;;  %v7071_v10 = vunpack.c.h.b16 %v6974_v1  ;;  %vm6110_vm11 = vcmp.eq.f32.partialorder %v17937_v35, inf  ;;  %10744 = vmatmul.msk.bf16.gmra.mxu2 %vm2042_vm0, %v12934_v26 }
 0x72e   : > { %v6096_v30 = vmul.f32 %v12752_v24, %v6095_v46  ;;  %v6107_v63 = vsub.f32 1.5, %v6106_v34  ;;  %v6117_v21 = vmul.f32 %v12756_v59, %v6116_v29  ;;  %v6078_v56 = vsel %vm6076_vm2, %v6077_v11, %v6075_v16  ;;  %v18032_v24 = vpop.f32.mrf.mxu0  ;;  %10784 = vmatmul.msk.bf16.gmra.mxu3 %vm2042_vm0, %v12934_v26 }
 0x72f   : > { %v12758_v22 = vpop.eup %12757  ;;  %v6087_v7 = vsel %vm6086_vm10, %v17868_v44, %v6085_v32  ;;  %v7176_v8 = vperm.slane %v7070_v60, %v16402_v18  ;;  %v7178_v39 = vperm.slane %v7071_v10, %v16408_v5  ;;  %vm6112_vm15 = vcmp.eq.f32.partialorder %v17937_v35, 0.0 }
 0x730   : > { %v6090_v3 = vsel %vm6088_vm1, %v6089_v12, %v6087_v7  ;;  %v6097_v11 = vmul.f32 %v6096_v30, %v17915_v20  ;;  %v6108_v49 = vmul.f32 %v12754_v14, %v6107_v63  ;;  %v6118_v62 = vmul.f32 0.5, %v6117_v21  ;;  %v21206_v30 = vld [vmem:[#allocation121_spill] sm:$0xff]  ;;  %v21209_v7 = vld [vmem:[#allocation123_spill] sm:$0xff] }
 0x731   : > { %v6874_v25 = vadd.f32 %v6090_v3, %v6078_v56  ;;  %v7177_v54 = vsel %vm7129_vm7, %v7176_v8, %v17968_v33  ;;  %v6128_v45 = vmul.f32 %v12758_v22, %v17947_v37  ;;  %vm21205_vm2 = vcmask 1042434  }
 0x732   : > { %v7179_v1 = vsel %vm7133_vm8, %v7178_v39, %v7177_v54  ;;  %v6099_v44 = vsel %vm6098_vm5, %v17915_v20, %v6097_v11  ;;  %v6109_v12 = vmul.f32 %v6108_v49, %v17937_v35  ;;  %v6119_v14 = vsub.f32 1.5, %v6118_v62  ;;  %v21207_v20 = vld [vmem:[#allocation122_spill] sm:$0xff]  ;;  %v21210_v11 = vld [vmem:[#allocation124_spill] sm:$0xff] }
 0x733   : > { %6875 = vadd.xlane.f32.xlu1 %v6874_v25  ;;  %v18054_v29 = vsel %vm7244_vm12, %v7179_v1, %v17748_v15  ;;  %v18058_v33 = vsel %vm7246_vm14, %v7179_v1, %v17666_v43  ;;  %v18062_v46 = vsel %vm21205_vm2, %v7179_v1, %v17934_v41  ;;  %v6113_v34 = vand.u32 2147483648, %v17937_v35  ;;  %v21212_v25 = vld [vmem:[#allocation126_spill] sm:$0xff] }
 0x734   : > { %v6111_v16 = vsel %vm6110_vm11, %v17937_v35, %v6109_v12  ;;  %v4261_v32 = vadd.f32 %v17927_v38, %v17921_v50  ;;  %v6120_v60 = vmul.f32 %v12756_v59, %v6119_v14  ;;  %v6129_v15 = vmul.f32 %v12758_v22, %v6128_v45  ;;  %v18081_v38 = vpop.f32.mrf.mxu1  ;;  %v21208_v59 = vld [vmem:[#allocation78_spill] sm:$0xff]  ;;  %v21213_v45 = vld [vmem:[#allocation79_spill] sm:$0xff] }
 0x735   : > { %v6102_v10 = vsel %vm6100_vm6, %v6101_v19, %v6099_v44  ;;  %v6114_v43 = vsel %vm6112_vm15, %v6113_v34, %v6111_v16  ;;  %v4054_v41 = vadd.f32 %v17939_v36, %v17929_v9  ;;  %12759 = vrsqrt.f32 %v17959_v13  ;;  %v18094_v36 = vpop.f32.mrf.mxu3  ;;  %v21214_v16 = vld [vmem:[#allocation80_spill] sm:$0xff] }
 0x736   : > { %v18079_v63 = vmul.f32 %v21206_v30, %v21206_v30  ;;  %v4591_v21 = vmul.f32 %v4052_v28, %v4052_v28  ;;  %v6877_v56 = vadd.f32 %v6114_v43, %v6102_v10  ;;  %v6130_v50 = vmul.f32 0.5, %v6129_v15  ;;  %v18096_v28 = vpop.f32.mrf.mxu0 }
 0x737   : > { %v18086_v35 = vmul.f32 %v21207_v20, %v21207_v20  ;;  %v18089_v19 = vadd.f32 %v4590_v4, %v21208_v59  ;;  %v4263_v9 = vadd.f32 %v17986_v6, %v17982_v58  ;;  %12761 = vrsqrt.f32 %v17971_v42  ;;  %v18103_v4 = vpop.f32.mrf.mxu2  ;;  %v21211_v6 = vld [vmem:[#allocation125_spill] sm:$0xff] }
 0x738   : > { %v18100_v8 = vmul.f32 %v21209_v7, %v21209_v7  ;;  %6878 = vadd.xlane.f32.xlu0 %v6877_v56  ;;  %v4592_v39 = vmul.f32 %v4261_v32, %v4261_v32  ;;  %v6121_v26 = vmul.f32 %v6120_v60, %v17942_v0  ;;  %v6131_v3 = vsub.f32 1.5, %v6130_v50 }
 0x739   : > { %v18107_v58 = vmul.f32 %v21210_v11, %v21210_v11  ;;  %v18111_v49 = vmul.f32 %v21211_v6, %v21211_v6  ;;  %v4593_v62 = vmul.f32 %v4054_v41, %v4054_v41  ;;  %12763 = vrsqrt.f32 %v17979_v27  ;;  %v21215_v41 = vld [vmem:[#allocation81_spill] sm:$0xff] }
 0x73a   : > { %v18116_v54 = vmul.f32 %v21212_v25, %v21212_v25  ;;  %v18119_v1 = vadd.f32 %v4591_v21, %v21213_v45  ;;  %vm6122_vm0 = vcmp.eq.f32.partialorder %v17942_v0, inf  ;;  %v6132_v44 = vmul.f32 %v12758_v22, %v6131_v3 }
 0x73b   : > { %v12760_v12 = vpop.eup %12759  ;;  %vm6124_vm11 = vcmp.eq.f32.partialorder %v17942_v0, 0.0  ;;  %v6125_v14 = vand.u32 2147483648, %v17942_v0  ;;  %v4594_v34 = vmul.f32 %v4263_v9, %v4263_v9  ;;  %12765 = vrsqrt.f32 %v18089_v19 }
 0x73c   : > { %v18126_v32 = vadd.f32 %v4592_v39, %v21214_v16  ;;  %v6123_v60 = vsel %vm6122_vm0, %v17942_v0, %v6121_v26  ;;  %v6133_v15 = vmul.f32 %v6132_v44, %v17947_v37  ;;  %v6140_v10 = vmul.f32 %v12760_v12, %v17959_v13  ;;  %v18141_v59 = vpop.f32.mrf.mxu1  ;;  %v21216_v26 = vld [vmem:[#allocation82_spill] sm:$0xff] }
 0x73d   : > { %v12762_v43 = vpop.eup %12761  ;;  %v18132_v22 = vadd.f32 %v4593_v62, %v21215_v41  ;;  %vm6134_vm10 = vcmp.eq.f32.partialorder %v17947_v37, inf  ;;  %v6137_v30 = vand.u32 2147483648, %v17947_v37  ;;  %v4057_v21 = vadd.f32 %v17997_v61, %v17988_v51  ;;  %v18149_v51 = vpop.f32.mrf.mxu3 }
 0x73e   : > { %v6135_v56 = vsel %vm6134_vm10, %v17947_v37, %v6133_v15  ;;  %vm6136_vm1 = vcmp.eq.f32.partialorder %v17947_v37, 0.0  ;;  %v6141_v50 = vmul.f32 %v12760_v12, %v6140_v10  ;;  %v6152_v20 = vmul.f32 %v12762_v43, %v17971_v42  ;;  %v18151_v61 = vpop.f32.mrf.mxu0 }
 0x73f   : > { %v12764_v9 = vpop.eup %12763  ;;  %v6126_v7 = vsel %vm6124_vm11, %v6125_v14, %v6123_v60  ;;  %v6138_v39 = vsel %vm6136_vm1, %v6137_v30, %v6135_v56  ;;  %v18146_v3 = vadd.f32 %v4594_v34, %v21216_v26  ;;  %12767 = vrsqrt.f32 %v18119_v1  ;;  %v18156_v62 = vpop.f32.mrf.mxu2 }
 0x740   : > { %v6880_v37 = vadd.f32 %v6138_v39, %v6126_v7  ;;  %v6142_v11 = vmul.f32 0.5, %v6141_v50  ;;  %vm6146_vm5 = vcmp.eq.f32.partialorder %v17959_v13, inf  ;;  %v4266_v6 = vadd.f32 %v18030_v53, %v18021_v47  ;;  %v6837_v34 = vpop.xlane.xlu2 %6836  ;;  %v6840_v7 = vpop.xlane.xlu0 %6839 }
 0x741   : > { %v12766_v0 = vpop.eup %12765  ;;  %v18158_v25 = vmul.f32 %v4057_v21, %v4057_v21  ;;  %v6153_v45 = vmul.f32 %v12762_v43, %v6152_v20  ;;  %v4059_v44 = vadd.f32 %v18041_v57, %v18032_v24  ;;  %v6164_v14 = vmul.f32 %v12764_v9, %v17979_v27 }
 0x742   : > { %6881 = vadd.xlane.f32.xlu1 %v6880_v37  ;;  %v6143_v16 = vsub.f32 1.5, %v6142_v11  ;;  %vm6148_vm6 = vcmp.eq.f32.partialorder %v17959_v13, 0.0  ;;  %v6149_v60 = vand.u32 2147483648, %v17959_v13  ;;  %vm6158_vm15 = vcmp.eq.f32.partialorder %v17971_v42, inf }
 0x743   : > { %v6176_v47 = vmul.f32 %v12766_v0, %v18089_v19  ;;  %v6154_v53 = vmul.f32 0.5, %v6153_v45  ;;  %vm6160_vm2 = vcmp.eq.f32.partialorder %v17971_v42, 0.0  ;;  %v6161_v15 = vand.u32 2147483648, %v17971_v42 }
 0x744   : > { %v6165_v10 = vmul.f32 %v12764_v9, %v6164_v14  ;;  %v6144_v24 = vmul.f32 %v12760_v12, %v6143_v16  ;;  %v4596_v57 = vmul.f32 %v4266_v6, %v4266_v6  ;;  %vm6170_vm0 = vcmp.eq.f32.partialorder %v17979_v27, inf }
 0x745   : > { %v6173_v41 = vand.u32 2147483648, %v17979_v27  ;;  %v6177_v30 = vmul.f32 %v12766_v0, %v6176_v47  ;;  %v12768_v21 = vpop.eup %12767  ;;  %v6155_v56 = vsub.f32 1.5, %v6154_v53  ;;  %v4597_v50 = vmul.f32 %v4059_v44, %v4059_v44  ;;  %v18184_v47 = vpop.f32.mrf.mxu1 }
 0x746   : > { %v6166_v20 = vmul.f32 0.5, %v6165_v10  ;;  %12769 = vrsqrt.f32 %v18126_v32  ;;  %v6145_v39 = vmul.f32 %v6144_v24, %v17959_v13  ;;  %vm6172_vm11 = vcmp.eq.f32.partialorder %v17979_v27, 0.0  ;;  %v18188_v10 = vpop.f32.mrf.mxu3  ;;  %v18190_v24 = vpop.f32.mrf.mxu0 }
 0x747   : > { %v6178_v26 = vmul.f32 0.5, %v6177_v30  ;;  %v4268_v12 = vadd.f32 %v18094_v36, %v18081_v38  ;;  %v6188_v37 = vmul.f32 %v12768_v21, %v18119_v1  ;;  %v6156_v11 = vmul.f32 %v12762_v43, %v6155_v56 }
 0x748   : > { %v6167_v6 = vsub.f32 1.5, %v6166_v20  ;;  %vm6182_vm10 = vcmp.eq.f32.partialorder %v18089_v19, inf  ;;  %v4062_v45 = vadd.f32 %v18103_v4, %v18096_v28  ;;  %v6147_v44 = vsel %vm6146_vm5, %v17959_v13, %v6145_v39  ;;  %v6846_v30 = vpop.xlane.xlu2 %6845  ;;  %v18193_v20 = vpop.f32.mrf.mxu2 }
 0x749   : > { %v6179_v14 = vsub.f32 1.5, %v6178_v26  ;;  %vm6184_vm1 = vcmp.eq.f32.partialorder %v18089_v19, 0.0  ;;  %v6189_v16 = vmul.f32 %v12768_v21, %v6188_v37  ;;  %v6975_v38 = vpack.c.bf16 %v6840_v7, %v6837_v34 }
 0x74a   : > { %v6157_v36 = vmul.f32 %v6156_v11, %v17971_v42  ;;  %v6168_v43 = vmul.f32 %v12764_v9, %v6167_v6  ;;  %v6185_v53 = vand.u32 2147483648, %v18089_v19  ;;  %v4598_v4 = vmul.f32 %v4268_v12, %v4268_v12  ;;  %v6843_v12 = vpop.xlane.xlu1 %6842 }
 0x74b   : > { %v6180_v28 = vmul.f32 %v12766_v0, %v6179_v14  ;;  %v6190_v56 = vmul.f32 0.5, %v6189_v16  ;;  %12771 = vrsqrt.f32 %v18132_v22  ;;  %v6150_v34 = vsel %vm6148_vm6, %v6149_v60, %v6147_v44 }
 0x74c   : > { %v12770_v39 = vpop.eup %12769  ;;  %v6159_v9 = vsel %vm6158_vm15, %v17971_v42, %v6157_v36  ;;  %v6169_v7 = vmul.f32 %v6168_v43, %v17979_v27  ;;  %v4599_v26 = vmul.f32 %v4062_v45, %v4062_v45  ;;  %v7072_v14 = vunpack.c.l.b16 %v6975_v38  ;;  %v21217_v36 = vld [vmem:[#allocation83_spill] sm:$0xff] }
 0x74d   : > { %v6162_v0 = vsel %vm6160_vm2, %v6161_v15, %v6159_v9  ;;  %v6181_v37 = vmul.f32 %v6180_v28, %v18089_v19  ;;  %v6191_v11 = vsub.f32 1.5, %v6190_v56  ;;  %v6200_v6 = vmul.f32 %v12770_v39, %v18126_v32  ;;  %v21218_v28 = vld [vmem:[#allocation84_spill] sm:$0xff]  ;;  %v21219_v9 = vld [vmem:[#allocation85_spill] sm:$0xff] }
 0x74e   : > { %v6883_v16 = vadd.f32 %v6162_v0, %v6150_v34  ;;  %v6171_v13 = vsel %vm6170_vm0, %v17979_v27, %v6169_v7  ;;  %v6976_v60 = vpack.c.bf16 %v6846_v30, %v6843_v12  ;;  %v7073_v44 = vunpack.c.h.b16 %v6975_v38  ;;  %v21220_v0 = vld [vmem:[#allocation86_spill] sm:$0xff] }
 0x74f   : > { %v6183_v45 = vsel %vm6182_vm10, %v18089_v19, %v6181_v37  ;;  %v6192_v42 = vmul.f32 %v12768_v21, %v6191_v11  ;;  %v6201_v15 = vmul.f32 %v12770_v39, %v6200_v6  ;;  %v18213_v43 = vadd.f32 %v18158_v25, %v21217_v36  ;;  %v18228_v37 = vpop.f32.mrf.mxu1  ;;  %v21221_v6 = vld [vmem:[#allocation87_spill] sm:$0xff] }
 0x750   : > { %6884 = vadd.xlane.f32.xlu2 %v6883_v16  ;;  %v18216_v56 = vadd.f32 %v4596_v57, %v21218_v28  ;;  %v6174_v34 = vsel %vm6172_vm11, %v6173_v41, %v6171_v13  ;;  %v6186_v38 = vsel %vm6184_vm1, %v6185_v53, %v6183_v45  ;;  %v18223_v7 = vadd.f32 %v4597_v50, %v21219_v9  ;;  %v18235_v41 = vpop.f32.mrf.mxu3  ;;  %v18246_v16 = vpop.f32.mrf.mxu0 }
 0x751   : > { %v12772_v30 = vpop.eup %12771  ;;  %v6886_v21 = vadd.f32 %v6186_v38, %v6174_v34  ;;  %v18226_v12 = vadd.f32 %v4598_v4, %v21220_v0  ;;  %v6202_v25 = vmul.f32 0.5, %v6201_v15  ;;  %v7180_v57 = vperm.slane %v7072_v14, %v16084_v17  ;;  %v10837_v14 = vld [vmem:[%s20668_s6 + $0x10] sm:$0xf]  ;;  %v18248_v13 = vpop.f32.mrf.mxu2 }
 0x752   : > { %v7074_v11 = vunpack.c.l.b16 %v6976_v60  ;;  %v18232_v27 = vadd.f32 %v4599_v26, %v21221_v6  ;;  %v6212_v19 = vmul.f32 %v12772_v30, %v18132_v22  ;;  %v7181_v50 = vperm.slane %v7073_v44, %v16113_v40  ;;  %v12214_v26 = vld [vmem:[%s20668_s6 + $0x14] sm:$0xf0] }
 0x753   : > { %6887 = vadd.xlane.f32.xlu0 %v6886_v21  ;;  %v6193_v53 = vmul.f32 %v6192_v42, %v18119_v1  ;;  %v6203_v4 = vsub.f32 1.5, %v6202_v25  ;;  %12773 = vrsqrt.f32 %v18146_v3  ;;  %vm6194_vm5 = vcmp.eq.f32.partialorder %v18119_v1, inf }
 0x754   : > { %vm6196_vm6 = vcmp.eq.f32.partialorder %v18119_v1, 0.0  ;;  %v6197_v44 = vand.u32 2147483648, %v18119_v1  ;;  %v6213_v45 = vmul.f32 %v12772_v30, %v6212_v19  ;;  %v7075_v42 = vunpack.c.h.b16 %v6976_v60  ;;  %v12221_v19 = vld [vmem:[%s20668_s6 + $0x54] sm:$0xf] }
 0x755   : > { %v6204_v15 = vmul.f32 %v12770_v39, %v6203_v4  ;;  %v4271_v36 = vadd.f32 %v18149_v51, %v18141_v59  ;;  %v4064_v28 = vadd.f32 %v18156_v62, %v18151_v61  ;;  %v7183_v34 = vperm.slane %v7074_v11, %v16165_v48  ;;  %v10803_v61 = vld [vmem:[%s20668_s6 + $0x50] sm:$0xf]  ;;  %v12222_v62 = vld [vmem:[%s20668_s6 + $0x54] sm:$0xf0] }
 0x756   : > { %v6214_v38 = vmul.f32 0.5, %v6213_v45  ;;  %v10838_v9 = vor.u32 %v12214_v26, %v10837_v14  ;;  %12775 = vrsqrt.f32 %v18213_v43  ;;  %v6195_v21 = vsel %vm6194_vm5, %v18119_v1, %v6193_v53 }
 0x757   : > { %v6205_v0 = vmul.f32 %v6204_v15, %v18126_v32  ;;  %vm6206_vm15 = vcmp.eq.f32.partialorder %v18126_v32, inf  ;;  %vm6208_vm2 = vcmp.eq.f32.partialorder %v18126_v32, 0.0  ;;  %v7182_v39 = vsel %vm7109_vm13, %v7181_v50, %v7180_v57  ;;  %v10805_v50 = vld [vmem:[%s20668_s6 + $0x58] sm:$0xf0]  ;;  %v18280_v53 = vpop.f32.mrf.mxu1 }
 0x758   : > { %v6209_v59 = vand.u32 2147483648, %v18126_v32  ;;  %v6215_v51 = vsub.f32 1.5, %v6214_v38  ;;  %7409 = vmatpush.bf16.msra.mxu3 %v10838_v9  ;;  %12777 = vrsqrt.f32 %v18216_v56  ;;  %v7185_v25 = vperm.slane %v7075_v42, %v16168_v52  ;;  %v18288_v42 = vpop.f32.mrf.mxu3 }
 0x759   : > { %v12774_v60 = vpop.eup %12773  ;;  %v6207_v11 = vsel %vm6206_vm15, %v18126_v32, %v6205_v0  ;;  %v4600_v57 = vmul.f32 %v4271_v36, %v4271_v36  ;;  %v4601_v6 = vmul.f32 %v4064_v28, %v4064_v28  ;;  %v7184_v4 = vsel %vm7113_vm3, %v7183_v34, %v7182_v39  ;;  %v18292_v9 = vpop.f32.mrf.mxu2  ;;  %v21222_v32 = vld [vmem:[#allocation128_spill] sm:$0xff] }
 0x75a   : > { %v6198_v14 = vsel %vm6196_vm6, %v6197_v44, %v6195_v21  ;;  %v6210_v26 = vsel %vm6208_vm2, %v6209_v59, %v6207_v11  ;;  %v6224_v45 = vmul.f32 %v12774_v60, %v18146_v3  ;;  %v6216_v36 = vmul.f32 %v12772_v30, %v6215_v51  ;;  %v21223_v39 = vld [vmem:[#allocation88_spill] sm:$0xff] }
 0x75b   : > { %v6889_v15 = vadd.f32 %v6210_v26, %v6198_v14  ;;  %v4273_v28 = vadd.f32 %v18188_v10, %v18184_v47  ;;  %v10804_v38 = vor.u32 %v12222_v62, %v10803_v61  ;;  %v4067_v1 = vadd.f32 %v18193_v20, %v18190_v24  ;;  %v18304_v10 = vpop.f32.mrf.mxu0 }
 0x75c   : > { %v12776_v0 = vpop.eup %12775  ;;  %v6225_v34 = vmul.f32 %v12774_v60, %v6224_v45  ;;  %v10808_v44 = vor.u32 %v12221_v19, %v10805_v50  ;;  %12779 = vrsqrt.f32 %v18223_v7  ;;  %v18298_v21 = vadd.f32 %v4600_v57, %v21222_v32 }
 0x75d   : > { %6890 = vadd.xlane.f32.xlu2 %v6889_v15  ;;  %v18301_v30 = vadd.f32 %v4601_v6, %v21223_v39  ;;  %v6236_v47 = vmul.f32 %v12776_v0, %v18213_v43  ;;  %7305 = vmatpush.bf16.msra.mxu0 %v10804_v38  ;;  %vm6218_vm0 = vcmp.eq.f32.partialorder %v18132_v22, inf  ;;  %vm6220_vm11 = vcmp.eq.f32.partialorder %v18132_v22, 0.0  ;;  %v21225_v39 = vld [vmem:[#allocation129_spill] sm:$0xff] }
 0x75e   : > { %v12778_v59 = vpop.eup %12777  ;;  %v6221_v24 = vand.u32 2147483648, %v18132_v22  ;;  %v6226_v20 = vmul.f32 0.5, %v6225_v34  ;;  %7318 = vmatpush.bf16.msra.mxu1 %v10808_v44  ;;  %v18310_v51 = vsel %vm20719_vm4, %v7185_v25, %v7184_v4  ;;  %v6217_v61 = vmul.f32 %v6216_v36, %v18132_v22  ;;  %v21224_v44 = vld [vmem:[#allocation89_spill] sm:$0xff] }
 0x75f   : > { %v6237_v62 = vmul.f32 %v12776_v0, %v6236_v47  ;;  %v6248_v11 = vmul.f32 %v12778_v59, %v18216_v56  ;;  %v4602_v6 = vmul.f32 %v4273_v28, %v4273_v28  ;;  %v4603_v19 = vmul.f32 %v4067_v1, %v4067_v1  ;;  %v18320_v15 = vpop.f32.mrf.mxu1  ;;  %v6852_v28 = vpop.xlane.xlu1 %6851 }
 0x760   : > { %v6227_v57 = vsub.f32 1.5, %v6226_v20  ;;  %12781 = vrsqrt.f32 %v18226_v12  ;;  %vm6230_vm10 = vcmp.eq.f32.partialorder %v18146_v3, inf  ;;  %vm6232_vm1 = vcmp.eq.f32.partialorder %v18146_v3, 0.0  ;;  %v18335_v20 = vpop.f32.mrf.mxu3 }
 0x761   : > { %v6238_v50 = vmul.f32 0.5, %v6237_v62  ;;  %v6249_v14 = vmul.f32 %v12778_v59, %v6248_v11  ;;  %v6233_v25 = vand.u32 2147483648, %v18146_v3  ;;  %vm6242_vm5 = vcmp.eq.f32.partialorder %v18213_v43, inf }
 0x762   : > { %v12780_v26 = vpop.eup %12779  ;;  %v6228_v45 = vmul.f32 %v12774_v60, %v6227_v57  ;;  %v6245_v4 = vand.u32 2147483648, %v18213_v43  ;;  %v6219_v36 = vsel %vm6218_vm0, %v18132_v22, %v6217_v61  ;;  %vm6244_vm6 = vcmp.eq.f32.partialorder %v18213_v43, 0.0  ;;  %v6849_v61 = vpop.xlane.xlu0 %6848 }
 0x763   : > { %v6239_v38 = vsub.f32 1.5, %v6238_v50  ;;  %v6250_v34 = vmul.f32 0.5, %v6249_v14  ;;  %v6260_v1 = vmul.f32 %v12780_v26, %v18223_v7  ;;  %v18329_v32 = vadd.f32 %v4602_v6, %v21224_v44  ;;  %v18339_v14 = vpop.f32.mrf.mxu2 }
 0x764   : > { %v6229_v60 = vmul.f32 %v6228_v45, %v18146_v3  ;;  %v18332_v47 = vadd.f32 %v4603_v19, %v21225_v39  ;;  %vm6254_vm15 = vcmp.eq.f32.partialorder %v18216_v56, inf  ;;  %v4276_v57 = vadd.f32 %v18235_v41, %v18228_v37 }
 0x765   : > { %v6240_v62 = vmul.f32 %v12776_v0, %v6239_v38  ;;  %v6251_v11 = vsub.f32 1.5, %v6250_v34  ;;  %v6261_v50 = vmul.f32 %v12780_v26, %v6260_v1  ;;  %v6222_v6 = vsel %vm6220_vm11, %v6221_v24, %v6219_v36  ;;  %v18351_v34 = vpop.f32.mrf.mxu0 }
 0x766   : > { %v12782_v45 = vpop.eup %12781  ;;  %v6231_v19 = vsel %vm6230_vm10, %v18146_v3, %v6229_v60  ;;  %v6977_v44 = vpack.c.bf16 %v6852_v28, %v6849_v61  ;;  %v4069_v39 = vadd.f32 %v18248_v13, %v18246_v16  ;;  %vm6256_vm2 = vcmp.eq.f32.partialorder %v18216_v56, 0.0 }
 0x767   : > { %v6234_v0 = vsel %vm6232_vm1, %v6233_v25, %v6231_v19  ;;  %v6241_v37 = vmul.f32 %v6240_v62, %v18213_v43  ;;  %v6252_v41 = vmul.f32 %v12778_v59, %v6251_v11  ;;  %v6262_v38 = vmul.f32 0.5, %v6261_v50  ;;  %v10969_v62 = vld [vmem:[%s20670_s8 + $0xe0] sm:$0xf]  ;;  %v12264_v11 = vld [vmem:[%s20670_s8 + $0xe4] sm:$0xf0] }
 0x768   : > { %v6892_v1 = vadd.f32 %v6234_v0, %v6222_v6  ;;  %v6257_v22 = vand.u32 2147483648, %v18216_v56  ;;  %v6272_v24 = vmul.f32 %v12782_v45, %v18226_v12  ;;  %v4604_v13 = vmul.f32 %v4276_v57, %v4276_v57  ;;  %v18372_v57 = vpop.f32.mrf.mxu1  ;;  %v18379_v19 = vpop.f32.mrf.mxu3 }
 0x769   : > { %v6243_v16 = vsel %vm6242_vm5, %v18213_v43, %v6241_v37  ;;  %v6253_v3 = vmul.f32 %v6252_v41, %v18216_v56  ;;  %v6263_v25 = vsub.f32 1.5, %v6262_v38  ;;  %v7076_v59 = vunpack.c.l.b16 %v6977_v44 }
 0x76a   : > { %6893 = vadd.xlane.f32.xlu0 %v6892_v1  ;;  %v4605_v36 = vmul.f32 %v4069_v39, %v4069_v39  ;;  %v6273_v28 = vmul.f32 %v12782_v45, %v6272_v24  ;;  %12783 = vrsqrt.f32 %v18232_v27  ;;  %vm6266_vm0 = vcmp.eq.f32.partialorder %v18223_v7, inf }
 0x76b   : > { %v6255_v60 = vsel %vm6254_vm15, %v18216_v56, %v6253_v3  ;;  %v6264_v61 = vmul.f32 %v12780_v26, %v6263_v25  ;;  %vm6268_vm11 = vcmp.eq.f32.partialorder %v18223_v7, 0.0  ;;  %v6246_v50 = vsel %vm6244_vm6, %v6245_v4, %v6243_v16  ;;  %v18386_v56 = vpop.f32.mrf.mxu2  ;;  %v21227_v16 = vld [vmem:[#allocation131_spill] sm:$0xff] }
 0x76c   : > { %v6258_v26 = vsel %vm6256_vm2, %v6257_v22, %v6255_v60  ;;  %v6274_v6 = vmul.f32 0.5, %v6273_v28  ;;  %12785 = vrsqrt.f32 %v18298_v21  ;;  %v6269_v37 = vand.u32 2147483648, %v18223_v7  ;;  %v21226_v22 = vld [vmem:[#allocation130_spill] sm:$0xff] }
 0x76d   : > { %v6895_v39 = vadd.f32 %v6258_v26, %v6246_v50  ;;  %v6265_v0 = vmul.f32 %v6264_v61, %v18223_v7  ;;  %v4278_v41 = vadd.f32 %v18288_v42, %v18280_v53  ;;  %v7077_v38 = vunpack.c.h.b16 %v6977_v44  ;;  %v6855_v53 = vpop.xlane.xlu2 %6854  ;;  %v18405_v61 = vpop.f32.mrf.mxu0 }
 0x76e   : > { %v7187_v43 = vperm.slane %v7076_v59, %v16326_v23  ;;  %v6275_v4 = vsub.f32 1.5, %v6274_v6  ;;  %v10970_v1 = vor.u32 %v12264_v11, %v10969_v62  ;;  %v18389_v24 = vadd.f32 %v4604_v13, %v21226_v22  ;;  %v6858_v59 = vpop.xlane.xlu0 %6857 }
 0x76f   : > { %6896 = vadd.xlane.f32.xlu1 %v6895_v39  ;;  %v18392_v3 = vadd.f32 %v4605_v36, %v21227_v16  ;;  %vm6278_vm10 = vcmp.eq.f32.partialorder %v18226_v12, inf  ;;  %12787 = vrsqrt.f32 %v18301_v30  ;;  %vm6280_vm1 = vcmp.eq.f32.partialorder %v18226_v12, 0.0 }
 0x770   : > { %v12784_v25 = vpop.eup %12783  ;;  %v6276_v42 = vmul.f32 %v12782_v45, %v6275_v4  ;;  %v6281_v44 = vand.u32 2147483648, %v18226_v12  ;;  %v4072_v28 = vadd.f32 %v18292_v9, %v18304_v10  ;;  %7699 = vmatpush.bf16.msra.mxu2 %v10970_v1  ;;  %v6267_v13 = vsel %vm6266_vm0, %v18223_v7, %v6265_v0  ;;  %v18425_v7 = vpop.f32.mrf.mxu1 }
 0x771   : > { %v6978_v36 = vpack.c.bf16 %v6858_v59, %v6855_v53  ;;  %v6284_v60 = vmul.f32 %v12784_v25, %v18232_v27  ;;  %12789 = vrsqrt.f32 %v18329_v32  ;;  %v7188_v62 = vsel %vm20720_vm9, %v7187_v43, %v18310_v51  ;;  %v18419_v51 = vpop.f32.mrf.mxu3 }
 0x772   : > { %v12786_v45 = vpop.eup %12785  ;;  %v7189_v11 = vperm.slane %v7077_v38, %v16332_v55  ;;  %v6277_v9 = vmul.f32 %v6276_v42, %v18226_v12  ;;  %v4606_v10 = vmul.f32 %v4278_v41, %v4278_v41  ;;  %v6270_v0 = vsel %vm6268_vm11, %v6269_v37, %v6267_v13  ;;  %v21229_v13 = vld [vmem:[#allocation132_spill] sm:$0xff] }
 0x773   : > { %v7078_v50 = vunpack.c.l.b16 %v6978_v36  ;;  %v7079_v26 = vunpack.c.h.b16 %v6978_v36  ;;  %v6285_v6 = vmul.f32 %v12784_v25, %v6284_v60  ;;  %v6296_v39 = vmul.f32 %v12786_v45, %v18298_v21 }
 0x774   : > { %v6279_v4 = vsel %vm6278_vm10, %v18226_v12, %v6277_v9  ;;  %vm7248_vm5 = vcmask 1045509   ;;  %v18417_v1 = vmul.f32 %v4072_v28, %v4072_v28  ;;  %vm21228_vm6 = vcmask 392512  }
 0x775   : > { %v12788_v38 = vpop.eup %12787  ;;  %v6282_v41 = vsel %vm6280_vm1, %v6281_v44, %v6279_v4  ;;  %v7191_v43 = vperm.slane %v7078_v50, %v16402_v18  ;;  %v7193_v22 = vperm.slane %v7079_v26, %v16408_v5  ;;  %v6286_v16 = vmul.f32 0.5, %v6285_v6 }
 0x776   : > { %v7190_v37 = vsel %vm21228_vm6, %v7189_v11, %v7188_v62  ;;  %v6898_v53 = vadd.f32 %v6282_v41, %v6270_v0  ;;  %v6297_v42 = vmul.f32 %v12786_v45, %v6296_v39  ;;  %v6308_v59 = vmul.f32 %v12788_v38, %v18301_v30  ;;  %v18436_v11 = vpop.f32.mrf.mxu2 }
 0x777   : > { %v12790_v28 = vpop.eup %12789  ;;  %v18430_v36 = vadd.f32 %v4606_v10, %v21229_v13  ;;  %v7192_v12 = vsel %vm7129_vm7, %v7191_v43, %v7190_v37  ;;  %v6287_v44 = vsub.f32 1.5, %v6286_v16  ;;  %12791 = vrsqrt.f32 %v18332_v47 }
 0x778   : > { %6899 = vadd.xlane.f32.xlu2 %v6898_v53  ;;  %v7194_v60 = vsel %vm7133_vm8, %v7193_v22, %v7192_v12  ;;  %v6298_v9 = vmul.f32 0.5, %v6297_v42  ;;  %v6309_v50 = vmul.f32 %v12788_v38, %v6308_v59  ;;  %v6320_v62 = vmul.f32 %v12790_v28, %v18329_v32  ;;  %v3660_v22 = vpop.f32.mrf.mxu0 }
 0x779   : > { %v18440_v26 = vsel %vm7246_vm14, %v7194_v60, %v18054_v29  ;;  %v18444_v10 = vsel %vm7248_vm5, %v7194_v60, %v18058_v33  ;;  %v18448_v6 = vsel %vm7244_vm12, %v7194_v60, %v18062_v46  ;;  %v6288_v39 = vmul.f32 %v12784_v25, %v6287_v44  ;;  %v18466_v13 = vpop.f32.mrf.mxu3 }
 0x77a   : > { %vm6290_vm15 = vcmp.eq.f32.partialorder %v18232_v27, inf  ;;  %v6299_v0 = vsub.f32 1.5, %v6298_v9  ;;  %v6310_v4 = vmul.f32 0.5, %v6309_v50  ;;  %v6321_v41 = vmul.f32 %v12790_v28, %v6320_v62 }
 0x77b   : > { %v6289_v43 = vmul.f32 %v6288_v39, %v18232_v27  ;;  %vm6292_vm2 = vcmp.eq.f32.partialorder %v18232_v27, 0.0  ;;  %v6293_v29 = vand.u32 2147483648, %v18232_v27  ;;  %v4281_v33 = vadd.f32 %v18335_v20, %v18320_v15 }
 0x77c   : > { %v6300_v16 = vmul.f32 %v12786_v45, %v6299_v0  ;;  %vm6302_vm12 = vcmp.eq.f32.partialorder %v18298_v21, inf  ;;  %v6311_v46 = vsub.f32 1.5, %v6310_v4  ;;  %v6322_v25 = vmul.f32 0.5, %v6321_v41 }
 0x77d   : > { %v12792_v37 = vpop.eup %12791  ;;  %vm6304_vm0 = vcmp.eq.f32.partialorder %v18298_v21, 0.0  ;;  %v6305_v53 = vand.u32 2147483648, %v18298_v21  ;;  %v4074_v42 = vadd.f32 %v18339_v14, %v18351_v34  ;;  %12793 = vrsqrt.f32 %v18389_v24  ;;  %v18471_v14 = vpop.f32.mrf.mxu1 }
 0x77e   : > { %v6291_v15 = vsel %vm6290_vm15, %v18232_v27, %v6289_v43  ;;  %v6301_v20 = vmul.f32 %v6300_v16, %v18298_v21  ;;  %v6312_v45 = vmul.f32 %v12788_v38, %v6311_v46  ;;  %v6323_v59 = vsub.f32 1.5, %v6322_v25 }
 0x77f   : > { %v4608_v12 = vmul.f32 %v4281_v33, %v4281_v33  ;;  %vm6314_vm11 = vcmp.eq.f32.partialorder %v18301_v30, inf  ;;  %vm6316_vm10 = vcmp.eq.f32.partialorder %v18301_v30, 0.0  ;;  %v6332_v44 = vmul.f32 %v12792_v37, %v18332_v47  ;;  %v18486_v33 = vpop.f32.mrf.mxu2 }
 0x780   : > { %v6303_v34 = vsel %vm6302_vm12, %v18298_v21, %v6301_v20  ;;  %v6313_v60 = vmul.f32 %v6312_v45, %v18301_v30  ;;  %v6324_v9 = vmul.f32 %v12790_v28, %v6323_v59  ;;  %v4283_v38 = vadd.f32 %v18379_v19, %v18372_v57  ;;  %v21230_v20 = vld [vmem:[#allocation127_spill] sm:$0xff]  ;;  %v21231_v59 = vld [vmem:[#allocation134_spill] sm:$0xff] }
 0x781   : > { %v6294_v50 = vsel %vm6292_vm2, %v6293_v29, %v6291_v15  ;;  %v6306_v62 = vsel %vm6304_vm0, %v6305_v53, %v6303_v34  ;;  %v6333_v39 = vmul.f32 %v12792_v37, %v6332_v44  ;;  %12795 = vrsqrt.f32 %v18392_v3  ;;  %v18498_v15 = vpop.f32.mrf.mxu0 }
 0x782   : > { %v6901_v0 = vadd.f32 %v6306_v62, %v6294_v50  ;;  %v4609_v4 = vmul.f32 %v4074_v42, %v4074_v42  ;;  %v6315_v41 = vsel %vm6314_vm11, %v18301_v30, %v6313_v60  ;;  %v6325_v43 = vmul.f32 %v6324_v9, %v18329_v32  ;;  %v21232_v50 = vld [vmem:[#allocation133_spill] sm:$0xff] }
 0x783   : > { %v12794_v28 = vpop.eup %12793  ;;  %v6317_v57 = vand.u32 2147483648, %v18301_v30  ;;  %vm6326_vm1 = vcmp.eq.f32.partialorder %v18329_v32, inf  ;;  %v6329_v27 = vand.u32 2147483648, %v18329_v32  ;;  %v6334_v21 = vmul.f32 0.5, %v6333_v39 }
 0x784   : > { %6902 = vadd.xlane.f32.xlu2 %v6901_v0  ;;  %v6327_v19 = vsel %vm6326_vm1, %v18329_v32, %v6325_v43  ;;  %vm6328_vm6 = vcmp.eq.f32.partialorder %v18329_v32, 0.0  ;;  %v4077_v29 = vadd.f32 %v18386_v56, %v18405_v61  ;;  %v6344_v16 = vmul.f32 %v12794_v28, %v18389_v24  ;;  %v6864_v56 = vpop.xlane.xlu1 %6863 }
 0x785   : > { %v6318_v46 = vsel %vm6316_vm10, %v6317_v57, %v6315_v41  ;;  %v6330_v25 = vsel %vm6328_vm6, %v6329_v27, %v6327_v19  ;;  %v4610_v53 = vmul.f32 %v4283_v38, %v4283_v38  ;;  %v6335_v42 = vsub.f32 1.5, %v6334_v21  ;;  %v18512_v38 = vpop.f32.mrf.mxu3  ;;  %v18528_v27 = vpop.f32.mrf.mxu1 }
 0x786   : > { %v18502_v45 = vmul.f32 %v21230_v20, %v21230_v20  ;;  %v18506_v32 = vadd.f32 %v18417_v1, %v21231_v59  ;;  %v6904_v44 = vadd.f32 %v6330_v25, %v6318_v46  ;;  %v6345_v61 = vmul.f32 %v12794_v28, %v6344_v16  ;;  %v6861_v1 = vpop.xlane.xlu0 %6860 }
 0x787   : > { %v12796_v34 = vpop.eup %12795  ;;  %v6336_v60 = vmul.f32 %v12792_v37, %v6335_v42  ;;  %v4286_v30 = vadd.f32 %v18419_v51, %v18425_v7  ;;  %v4079_v9 = vadd.f32 %v18436_v11, %v3660_v22  ;;  %12797 = vrsqrt.f32 %v18430_v36  ;;  %v21233_v37 = vld [vmem:[#allocation135_spill] sm:$0xff]  ;;  %v21234_v51 = vld [vmem:[#allocation90_spill] sm:$0xff]  ;;  %v18538_v20 = vpop.f32.mrf.mxu2 }
 0x788   : > { %v18516_v62 = vmul.f32 %v21232_v50, %v21232_v50  ;;  %6905 = vadd.xlane.f32.xlu0 %v6904_v44  ;;  %v4611_v39 = vmul.f32 %v4077_v29, %v4077_v29  ;;  %v6346_v0 = vmul.f32 0.5, %v6345_v61  ;;  %v6356_v41 = vmul.f32 %v12796_v34, %v18392_v3  ;;  %v21235_v11 = vld [vmem:[#allocation91_spill] sm:$0xff]  ;;  %v21237_v50 = vld [vmem:[#allocation137_spill] sm:$0xff] }
 0x789   : > { %v18520_v43 = vadd.f32 %v4608_v12, %v21233_v37  ;;  %v18523_v7 = vadd.f32 %v4609_v4, %v21234_v51  ;;  %v18526_v22 = vadd.f32 %v4610_v53, %v21235_v11  ;;  %v6979_v57 = vpack.c.bf16 %v6864_v56, %v6861_v1  ;;  %v21236_v4 = vld [vmem:[#allocation136_spill] sm:$0xff] }
 0x78a   : > { %v6337_v21 = vmul.f32 %v6336_v60, %v18332_v47  ;;  %v6347_v19 = vsub.f32 1.5, %v6346_v0  ;;  %v6357_v16 = vmul.f32 %v12796_v34, %v6356_v41  ;;  %12799 = vrsqrt.f32 %v18506_v32  ;;  %v3665_v41 = vpop.f32.mrf.mxu0 }
 0x78b   : > { %vm6338_vm15 = vcmp.eq.f32.partialorder %v18332_v47, inf  ;;  %vm6340_vm2 = vcmp.eq.f32.partialorder %v18332_v47, 0.0  ;;  %v4612_v12 = vmul.f32 %v4286_v30, %v4286_v30  ;;  %v4613_v29 = vmul.f32 %v4079_v9, %v4079_v9 }
 0x78c   : > { %v18535_v46 = vadd.f32 %v4611_v39, %v21236_v4  ;;  %v6341_v25 = vand.u32 2147483648, %v18332_v47  ;;  %v6348_v53 = vmul.f32 %v12794_v28, %v6347_v19  ;;  %v6358_v42 = vmul.f32 0.5, %v6357_v16  ;;  %v21238_v39 = vld [vmem:[#allocation138_spill] sm:$0xff] }
 0x78d   : > { %v12798_v59 = vpop.eup %12797  ;;  %v7080_v44 = vunpack.c.l.b16 %v6979_v57  ;;  %v7081_v56 = vunpack.c.h.b16 %v6979_v57  ;;  %vm6350_vm12 = vcmp.eq.f32.partialorder %v18389_v24, inf  ;;  %12801 = vrsqrt.f32 %v18520_v43 }
 0x78e   : > { %v6339_v61 = vsel %vm6338_vm15, %v18332_v47, %v6337_v21  ;;  %v6349_v60 = vmul.f32 %v6348_v53, %v18389_v24  ;;  %v6359_v30 = vsub.f32 1.5, %v6358_v42  ;;  %v6368_v9 = vmul.f32 %v12798_v59, %v18430_v36  ;;  %v6870_v21 = vpop.xlane.xlu1 %6869  ;;  %v6867_v42 = vpop.xlane.xlu0 %6866 }
 0x78f   : > { %vm6352_vm0 = vcmp.eq.f32.partialorder %v18389_v24, 0.0  ;;  %v6353_v28 = vand.u32 2147483648, %v18389_v24  ;;  %v18548_v1 = vadd.f32 %v4612_v12, %v21237_v50  ;;  %v18551_v0 = vadd.f32 %v4613_v29, %v21238_v39  ;;  %v18560_v29 = vpop.f32.mrf.mxu3 }
 0x790   : > { %v12800_v37 = vpop.eup %12799  ;;  %v6351_v51 = vsel %vm6350_vm12, %v18389_v24, %v6349_v60  ;;  %v6360_v11 = vmul.f32 %v12796_v34, %v6359_v30  ;;  %vm6362_vm11 = vcmp.eq.f32.partialorder %v18392_v3, inf  ;;  %v6369_v57 = vmul.f32 %v12798_v59, %v6368_v9 }
 0x791   : > { %v6342_v19 = vsel %vm6340_vm2, %v6341_v25, %v6339_v61  ;;  %v6354_v16 = vsel %vm6352_vm0, %v6353_v28, %v6351_v51  ;;  %v4288_v12 = vadd.f32 %v18466_v13, %v18471_v14  ;;  %v6380_v4 = vmul.f32 %v12800_v37, %v18506_v32  ;;  %v18568_v13 = vpop.f32.mrf.mxu1 }
 0x792   : > { %v7195_v53 = vperm.slane %v7080_v44, %v16084_v17  ;;  %v7196_v24 = vperm.slane %v7081_v56, %v16113_v40  ;;  %v6907_v34 = vadd.f32 %v6354_v16, %v6342_v19  ;;  %v6370_v60 = vmul.f32 0.5, %v6369_v57 }
 0x793   : > { %v12802_v30 = vpop.eup %12801  ;;  %vm6364_vm10 = vcmp.eq.f32.partialorder %v18392_v3, 0.0  ;;  %v6365_v47 = vand.u32 2147483648, %v18392_v3  ;;  %v18566_v25 = vpack.c.bf16 %v6870_v21, %v6867_v42  ;;  %v6381_v61 = vmul.f32 %v12800_v37, %v6380_v4  ;;  %v18578_v21 = vpop.f32.mrf.mxu2 }
 0x794   : > { %6908 = vadd.xlane.f32.xlu1 %v6907_v34  ;;  %v6361_v14 = vmul.f32 %v6360_v11, %v18392_v3  ;;  %v6371_v9 = vsub.f32 1.5, %v6370_v60  ;;  %vm6374_vm1 = vcmp.eq.f32.partialorder %v18430_v36, inf  ;;  %v6392_v44 = vmul.f32 %v12802_v30, %v18520_v43  ;;  %v3668_v42 = vpop.f32.mrf.mxu0 }
 0x795   : > { %v4614_v56 = vmul.f32 %v4288_v12, %v4288_v12  ;;  %v4082_v28 = vadd.f32 %v18486_v33, %v18498_v15  ;;  %v6382_v50 = vmul.f32 0.5, %v6381_v61  ;;  %12803 = vrsqrt.f32 %v18523_v7  ;;  %v21239_v12 = vld [vmem:[#allocation139_spill] sm:$0xff] }
 0x796   : > { %v7197_v39 = vsel %vm7109_vm13, %v7196_v24, %v7195_v53  ;;  %v6372_v51 = vmul.f32 %v12798_v59, %v6371_v9  ;;  %vm6376_vm6 = vcmp.eq.f32.partialorder %v18430_v36, 0.0  ;;  %v6393_v57 = vmul.f32 %v12802_v30, %v6392_v44 }
 0x797   : > { %v6377_v11 = vand.u32 2147483648, %v18430_v36  ;;  %v7082_v19 = vunpack.c.l.b16 %v18566_v25  ;;  %v6383_v16 = vsub.f32 1.5, %v6382_v50  ;;  %vm6386_vm15 = vcmp.eq.f32.partialorder %v18506_v32, inf }
 0x798   : > { %v6363_v33 = vsel %vm6362_vm11, %v18392_v3, %v6361_v14  ;;  %v6373_v15 = vmul.f32 %v6372_v51, %v18430_v36  ;;  %vm6388_vm2 = vcmp.eq.f32.partialorder %v18506_v32, 0.0  ;;  %v6394_v59 = vmul.f32 0.5, %v6393_v57 }
 0x799   : > { %12805 = vrsqrt.f32 %v18526_v22  ;;  %v18590_v4 = vadd.f32 %v4614_v56, %v21239_v12  ;;  %v4615_v53 = vmul.f32 %v4082_v28, %v4082_v28  ;;  %v6384_v24 = vmul.f32 %v12800_v37, %v6383_v16 }
 0x79a   : > { %v4291_v34 = vadd.f32 %v18512_v38, %v18528_v27  ;;  %v6375_v60 = vsel %vm6374_vm1, %v18430_v36, %v6373_v15  ;;  %v6395_v61 = vsub.f32 1.5, %v6394_v59  ;;  %v4084_v14 = vadd.f32 %v18538_v20, %v3665_v41  ;;  %v18605_v27 = vpop.f32.mrf.mxu3  ;;  %v21240_v41 = vld [vmem:[#allocation92_spill] sm:$0xff]  ;;  %v18615_v36 = vpop.f32.mrf.mxu1 }
 0x79b   : > { %12807 = vrsqrt.f32 %v18535_v46  ;;  %v12804_v9 = vpop.eup %12803  ;;  %v6366_v44 = vsel %vm6364_vm10, %v6365_v47, %v6363_v33  ;;  %v6378_v37 = vsel %vm6376_vm6, %v6377_v11, %v6375_v60  ;;  %v7083_v56 = vunpack.c.h.b16 %v18566_v25 }
 0x79c   : > { %v6385_v38 = vmul.f32 %v6384_v24, %v18506_v32  ;;  %v6910_v28 = vadd.f32 %v6378_v37, %v6366_v44  ;;  %v7198_v50 = vperm.slane %v7082_v19, %v16165_v48  ;;  %v6396_v51 = vmul.f32 %v12802_v30, %v6395_v61  ;;  %v4088_v61 = vpop.f32.mrf.mxu2 }
 0x79d   : > { %v6404_v20 = vmul.f32 %v12804_v9, %v18523_v7  ;;  %v18610_v57 = vadd.f32 %v4615_v53, %v21240_v41  ;;  %v6389_v3 = vand.u32 2147483648, %v18506_v32  ;;  %vm6398_vm12 = vcmp.eq.f32.partialorder %v18520_v43, inf }
 0x79e   : > { %vm6400_vm0 = vcmp.eq.f32.partialorder %v18520_v43, 0.0  ;;  %6911 = vadd.xlane.f32.xlu2 %v6910_v28  ;;  %v6387_v25 = vsel %vm6386_vm15, %v18506_v32, %v6385_v38  ;;  %v6397_v30 = vmul.f32 %v6396_v51, %v18520_v43  ;;  %v6401_v11 = vand.u32 2147483648, %v18520_v43  ;;  %v21242_v51 = vld [vmem:[#allocation141_spill] sm:$0xff] }
 0x79f   : > { %v12806_v47 = vpop.eup %12805  ;;  %v6405_v19 = vmul.f32 %v12804_v9, %v6404_v20  ;;  %v4616_v16 = vmul.f32 %v4291_v34, %v4291_v34  ;;  %v4617_v33 = vmul.f32 %v4084_v14, %v4084_v14  ;;  %12809 = vrsqrt.f32 %v18548_v1 }
 0x7a0   : > { %v6416_v15 = vmul.f32 %v12806_v47, %v18526_v22  ;;  %v7199_v12 = vsel %vm7113_vm3, %v7198_v50, %v7197_v39  ;;  %v7200_v53 = vperm.slane %v7083_v56, %v16168_v52  ;;  %v6399_v24 = vsel %vm6398_vm12, %v18520_v43, %v6397_v30  ;;  %v21241_v56 = vld [vmem:[#allocation140_spill] sm:$0xff]  ;;  %v3670_v43 = vpop.f32.mrf.mxu0 }
 0x7a1   : > { %v12808_v59 = vpop.eup %12807  ;;  %v6406_v60 = vmul.f32 0.5, %v6405_v19  ;;  %v6390_v44 = vsel %vm6388_vm2, %v6389_v3, %v6387_v25  ;;  %v6402_v34 = vsel %vm6400_vm0, %v6401_v11, %v6399_v24  ;;  %v4293_v39 = vadd.f32 %v18560_v29, %v18568_v13 }
 0x7a2   : > { %v6417_v14 = vmul.f32 %v12806_v47, %v6416_v15  ;;  %v6428_v37 = vmul.f32 %v12808_v59, %v18535_v46  ;;  %v6913_v38 = vadd.f32 %v6402_v34, %v6390_v44  ;;  %12811 = vrsqrt.f32 %v18551_v0  ;;  %v4297_v19 = vpop.f32.mrf.mxu3 }
 0x7a3   : > { %v6407_v28 = vsub.f32 1.5, %v6406_v60  ;;  %v18638_v50 = vadd.f32 %v4616_v16, %v21241_v56  ;;  %v18641_v20 = vadd.f32 %v4617_v33, %v21242_v51  ;;  %v18644_v3 = vsel %vm20719_vm4, %v7200_v53, %v7199_v12 }
 0x7a4   : > { %v6418_v32 = vmul.f32 0.5, %v6417_v14  ;;  %v6429_v41 = vmul.f32 %v12808_v59, %v6428_v37  ;;  %6914 = vadd.xlane.f32.xlu0 %v6913_v38  ;;  %vm6410_vm11 = vcmp.eq.f32.partialorder %v18523_v7, inf  ;;  %v4087_v29 = vadd.f32 %v18578_v21, %v3668_v42  ;;  %v3879_v42 = vpop.f32.mrf.mxu1 }
 0x7a5   : > { %v6408_v25 = vmul.f32 %v12804_v9, %v6407_v28  ;;  %v12810_v13 = vpop.eup %12809  ;;  %vm6412_vm10 = vcmp.eq.f32.partialorder %v18523_v7, 0.0  ;;  %12813 = vrsqrt.f32 %v18590_v4  ;;  %v6413_v33 = vand.u32 2147483648, %v18523_v7  ;;  %v6873_v28 = vpop.xlane.xlu0 %6872 }
 0x7a6   : > { %v6419_v30 = vsub.f32 1.5, %v6418_v32  ;;  %v6430_v11 = vmul.f32 0.5, %v6429_v41  ;;  %v4618_v15 = vmul.f32 %v4293_v39, %v4293_v39  ;;  %v6440_v12 = vmul.f32 %v12810_v13, %v18548_v1  ;;  %v6876_v60 = vpop.xlane.xlu1 %6875  ;;  %v21243_v39 = vld [vmem:[#allocation23_spill] sm:$0xff]  ;;  %v4091_v41 = vpop.f32.mrf.mxu2 }
 0x7a7   : > { %v6409_v16 = vmul.f32 %v6408_v25, %v18523_v7  ;;  %vm6422_vm1 = vcmp.eq.f32.partialorder %v18526_v22, inf  ;;  %vm6424_vm6 = vcmp.eq.f32.partialorder %v18526_v22, 0.0  ;;  %v6425_v24 = vand.u32 2147483648, %v18526_v22 }
 0x7a8   : > { %v6420_v9 = vmul.f32 %v12806_v47, %v6419_v30  ;;  %v6431_v21 = vsub.f32 1.5, %v6430_v11  ;;  %v12812_v53 = vpop.eup %12811  ;;  %v4619_v44 = vmul.f32 %v4087_v29, %v4087_v29  ;;  %vm6434_vm15 = vcmp.eq.f32.partialorder %v18535_v46, inf }
 0x7a9   : > { %v6441_v34 = vmul.f32 %v12810_v13, %v6440_v12  ;;  %v6411_v14 = vsel %vm6410_vm11, %v18523_v7, %v6409_v16  ;;  %v6452_v38 = vmul.f32 %v12812_v53, %v18551_v0  ;;  %v18663_v56 = vadd.f32 %v4618_v15, %v21243_v39 }
 0x7aa   : > { %v6421_v47 = vmul.f32 %v6420_v9, %v18526_v22  ;;  %v6432_v37 = vmul.f32 %v12808_v59, %v6431_v21  ;;  %vm6436_vm2 = vcmp.eq.f32.partialorder %v18535_v46, 0.0  ;;  %v4296_v32 = vadd.f32 %v18605_v27, %v18615_v36 }
 0x7ab   : > { %v6442_v51 = vmul.f32 0.5, %v6441_v34  ;;  %v12814_v25 = vpop.eup %12813  ;;  %v18671_v30 = vpack.c.bf16 %v6876_v60, %v6873_v28  ;;  %v6437_v59 = vand.u32 2147483648, %v18535_v46  ;;  %v6453_v11 = vmul.f32 %v12812_v53, %v6452_v38  ;;  %v21244_v60 = vld [vmem:[#allocation93_spill] sm:$0xff] }
 0x7ac   : > { %v6423_v29 = vsel %vm6422_vm1, %v18526_v22, %v6421_v47  ;;  %v6414_v16 = vsel %vm6412_vm10, %v6413_v33, %v6411_v14  ;;  %v6433_v12 = vmul.f32 %v6432_v37, %v18535_v46  ;;  %v4089_v9 = vadd.f32 %v4088_v61, %v3670_v43  ;;  %v3673_v47 = vpop.f32.mrf.mxu0  ;;  %v18686_v14 = vpop.f32.mrf.mxu3 }
 0x7ad   : > { %v6426_v15 = vsel %vm6424_vm6, %v6425_v24, %v6423_v29  ;;  %v6443_v27 = vsub.f32 1.5, %v6442_v51  ;;  %v6454_v21 = vmul.f32 0.5, %v6453_v11  ;;  %v6464_v34 = vmul.f32 %v12814_v25, %v18590_v4  ;;  %v18695_v51 = vpop.f32.mrf.mxu1  ;;  %v21245_v29 = vld [vmem:[#allocation94_spill] sm:$0xff] }
 0x7ae   : > { %v6916_v36 = vadd.f32 %v6426_v15, %v6414_v16  ;;  %v18681_v28 = vadd.f32 %v4619_v44, %v21244_v60  ;;  %vm6446_vm12 = vcmp.eq.f32.partialorder %v18548_v1, inf  ;;  %v4620_v7 = vmul.f32 %v4296_v32, %v4296_v32  ;;  %v6879_v60 = vpop.xlane.xlu0 %6878 }
 0x7af   : > { %v6444_v39 = vmul.f32 %v12810_v13, %v6443_v27  ;;  %vm6448_vm0 = vcmp.eq.f32.partialorder %v18548_v1, 0.0  ;;  %v6449_v22 = vand.u32 2147483648, %v18548_v1  ;;  %v6455_v33 = vsub.f32 1.5, %v6454_v21 }
 0x7b0   : > { %6917 = vadd.xlane.f32.xlu1 %v6916_v36  ;;  %v6465_v24 = vmul.f32 %v12814_v25, %v6464_v34  ;;  %v7084_v61 = vunpack.c.l.b16 %v18671_v30  ;;  %v6435_v43 = vsel %vm6434_vm15, %v18535_v46, %v6433_v12  ;;  %12815 = vrsqrt.f32 %v18610_v57  ;;  %v18711_v34 = vpop.f32.mrf.mxu2 }
 0x7b1   : > { %v6445_v13 = vmul.f32 %v6444_v39, %v18548_v1  ;;  %v4621_v44 = vmul.f32 %v4089_v9, %v4089_v9  ;;  %v6456_v37 = vmul.f32 %v12812_v53, %v6455_v33  ;;  %vm6458_vm11 = vcmp.eq.f32.partialorder %v18551_v0, inf }
 0x7b2   : > { %v6466_v38 = vmul.f32 0.5, %v6465_v24  ;;  %v18701_v11 = vadd.f32 %v4620_v7, %v21245_v29  ;;  %v4298_v16 = vadd.f32 %v4297_v19, %v3879_v42  ;;  %12817 = vrsqrt.f32 %v18638_v50  ;;  %v21246_v19 = vld [vmem:[#allocation95_spill] sm:$0xff] }
 0x7b3   : > { %v6447_v32 = vsel %vm6446_vm12, %v18548_v1, %v6445_v13  ;;  %v6438_v15 = vsel %vm6436_vm2, %v6437_v59, %v6435_v43  ;;  %v6457_v12 = vmul.f32 %v6456_v37, %v18551_v0  ;;  %v7085_v36 = vunpack.c.h.b16 %v18671_v30 }
 0x7b4   : > { %v6450_v53 = vsel %vm6448_vm0, %v6449_v22, %v6447_v32  ;;  %v6467_v27 = vsub.f32 1.5, %v6466_v38  ;;  %v7202_v9 = vperm.slane %v7084_v61, %v16326_v23  ;;  %12819 = vrsqrt.f32 %v18641_v20  ;;  %v3675_v61 = vpop.f32.mrf.mxu0  ;;  %v18732_v29 = vpop.f32.mrf.mxu3 }
 0x7b5   : > { %v6919_v21 = vadd.f32 %v6450_v53, %v6438_v15  ;;  %v18715_v42 = vadd.f32 %v4621_v44, %v21246_v19  ;;  %vm6460_vm10 = vcmp.eq.f32.partialorder %v18551_v0, 0.0  ;;  %v6461_v46 = vand.u32 2147483648, %v18551_v0  ;;  %v6882_v39 = vpop.xlane.xlu1 %6881  ;;  %v3884_v19 = vpop.f32.mrf.mxu1 }
 0x7b6   : > { %v6468_v1 = vmul.f32 %v12814_v25, %v6467_v27  ;;  %v12816_v59 = vpop.eup %12815  ;;  %v6459_v30 = vsel %vm6458_vm11, %v18551_v0, %v6457_v12  ;;  %vm6470_vm1 = vcmp.eq.f32.partialorder %v18590_v4, inf  ;;  %vm6472_vm6 = vcmp.eq.f32.partialorder %v18590_v4, 0.0 }
 0x7b7   : > { %6920 = vadd.xlane.f32.xlu2 %v6919_v21  ;;  %v4092_v7 = vadd.f32 %v4091_v41, %v3673_v47  ;;  %v6982_v33 = vpack.c.bf16 %v6882_v39, %v6879_v60  ;;  %v6476_v24 = vmul.f32 %v12816_v59, %v18610_v57  ;;  %12821 = vrsqrt.f32 %v18663_v56  ;;  %v21248_v60 = vld [vmem:[#allocation24_spill] sm:$0xff] }
 0x7b8   : > { %v6469_v22 = vmul.f32 %v6468_v1, %v18590_v4  ;;  %v12818_v25 = vpop.eup %12817  ;;  %v7203_v43 = vsel %vm20720_vm9, %v7202_v9, %v18644_v3  ;;  %v7204_v13 = vperm.slane %v7085_v36, %v16332_v55  ;;  %v6473_v44 = vand.u32 2147483648, %v18590_v4 }
 0x7b9   : > { %v4622_v37 = vmul.f32 %v4298_v16, %v4298_v16  ;;  %v7086_v41 = vunpack.c.l.b16 %v6982_v33  ;;  %v7087_v47 = vunpack.c.h.b16 %v6982_v33  ;;  %v6477_v32 = vmul.f32 %v12816_v59, %v6476_v24 }
 0x7ba   : > { %v6471_v38 = vsel %vm6470_vm1, %v18590_v4, %v6469_v22  ;;  %v12820_v15 = vpop.eup %12819  ;;  %v6462_v53 = vsel %vm6460_vm10, %v6461_v46, %v6459_v30  ;;  %v4623_v3 = vmul.f32 %v4092_v7, %v4092_v7  ;;  %v6488_v27 = vmul.f32 %v12818_v25, %v18638_v50 }
 0x7bb   : > { %v6474_v12 = vsel %vm6472_vm6, %v6473_v44, %v6471_v38  ;;  %v7206_v16 = vperm.slane %v7086_v41, %v16402_v18  ;;  %v7208_v9 = vperm.slane %v7087_v47, %v16408_v5  ;;  %v6478_v21 = vmul.f32 0.5, %v6477_v32  ;;  %v21249_v38 = vld [vmem:[#allocation96_spill] sm:$0xff] }
 0x7bc   : > { %v6922_v36 = vadd.f32 %v6474_v12, %v6462_v53  ;;  %vm21247_vm15 = vcmask 392512   ;;  %v18743_v39 = vadd.f32 %v4622_v37, %v21248_v60  ;;  %v6489_v0 = vmul.f32 %v12818_v25, %v6488_v27 }
 0x7bd   : > { %v7205_v1 = vsel %vm21247_vm15, %v7204_v13, %v7203_v43  ;;  %v6500_v46 = vmul.f32 %v12820_v15, %v18641_v20  ;;  %v12822_v4 = vpop.eup %12821  ;;  %v6479_v7 = vsub.f32 1.5, %v6478_v21  ;;  %vm6482_vm2 = vcmp.eq.f32.partialorder %v18610_v57, inf  ;;  %v4096_v13 = vpop.f32.mrf.mxu2 }
 0x7be   : > { %6923 = vadd.xlane.f32.xlu0 %v6922_v36  ;;  %v7207_v30 = vsel %vm7129_vm7, %v7206_v16, %v7205_v1  ;;  %12823 = vrsqrt.f32 %v18681_v28  ;;  %vm6484_vm12 = vcmp.eq.f32.partialorder %v18610_v57, 0.0  ;;  %v6490_v33 = vmul.f32 0.5, %v6489_v0  ;;  %v12262_v1 = vld [vmem:[%s20670_s8 + $0xd4] sm:$0xf0] }
 0x7bf   : > { %v18750_v22 = vsel %vm7133_vm8, %v7208_v9, %v7207_v30  ;;  %v6501_v24 = vmul.f32 %v12820_v15, %v6500_v46  ;;  %v6512_v43 = vmul.f32 %v12822_v4, %v18663_v56  ;;  %v18765_v41 = vadd.f32 %v4623_v3, %v21249_v38 }
 0x7c0   : > { %v18757_v44 = vsel %vm7248_vm5, %v18750_v22, %v18440_v26  ;;  %v18762_v37 = vsel %vm7246_vm14, %v18750_v22, %v18448_v6  ;;  %v6480_v47 = vmul.f32 %v12816_v59, %v6479_v7  ;;  %v6485_v32 = vand.u32 2147483648, %v18610_v57  ;;  %v3678_v6 = vpop.f32.mrf.mxu0  ;;  %v10961_v59 = vld [vmem:[%s20670_s8 + $0xd0] sm:$0xf] }
 0x7c1   : > { %v6491_v53 = vsub.f32 1.5, %v6490_v33  ;;  %v6502_v12 = vmul.f32 0.5, %v6501_v24  ;;  %v6513_v27 = vmul.f32 %v12822_v4, %v6512_v43  ;;  %vm6494_vm0 = vcmp.eq.f32.partialorder %v18638_v50, inf  ;;  %v3887_v33 = vpop.f32.mrf.mxu1 }
 0x7c2   : > { %v6481_v36 = vmul.f32 %v6480_v47, %v18610_v57  ;;  %v4301_v26 = vadd.f32 %v18686_v14, %v18695_v51  ;;  %v4094_v16 = vadd.f32 %v18711_v34, %v3675_v61  ;;  %12825 = vrsqrt.f32 %v18701_v11  ;;  %v4305_v51 = vpop.f32.mrf.mxu3 }
 0x7c3   : > { %v6492_v9 = vmul.f32 %v12818_v25, %v6491_v53  ;;  %v6503_v21 = vsub.f32 1.5, %v6502_v12  ;;  %v6514_v3 = vmul.f32 0.5, %v6513_v27  ;;  %vm6496_vm14 = vcmp.eq.f32.partialorder %v18638_v50, 0.0 }
 0x7c4   : > { %v12824_v60 = vpop.eup %12823  ;;  %v6497_v14 = vand.u32 2147483648, %v18638_v50  ;;  %vm6506_vm11 = vcmp.eq.f32.partialorder %v18641_v20, inf  ;;  %vm6508_vm10 = vcmp.eq.f32.partialorder %v18641_v20, 0.0  ;;  %vm7250_vm1 = vcmask 1046534  }
 0x7c5   : > { %v6483_v34 = vsel %vm6482_vm2, %v18610_v57, %v6481_v36  ;;  %v6493_v61 = vmul.f32 %v6492_v9, %v18638_v50  ;;  %v6504_v25 = vmul.f32 %v12820_v15, %v6503_v21  ;;  %v6515_v0 = vsub.f32 1.5, %v6514_v3  ;;  %v6885_v21 = vpop.xlane.xlu2 %6884  ;;  %v4098_v57 = vpop.f32.mrf.mxu2 }
 0x7c6   : > { %v4624_v46 = vmul.f32 %v4301_v26, %v4301_v26  ;;  %v4625_v30 = vmul.f32 %v4094_v16, %v4094_v16  ;;  %v6524_v7 = vmul.f32 %v12824_v60, %v18681_v28  ;;  %v10962_v24 = vor.u32 %v12262_v1, %v10961_v59  ;;  %v6888_v12 = vpop.xlane.xlu0 %6887 }
 0x7c7   : > { %v6495_v43 = vsel %vm6494_vm0, %v18638_v50, %v6493_v61  ;;  %v6505_v38 = vmul.f32 %v6504_v25, %v18641_v20  ;;  %v6516_v47 = vmul.f32 %v12822_v4, %v6515_v0  ;;  %v4303_v53 = vadd.f32 %v18732_v29, %v3884_v19 }
 0x7c8   : > { %v6486_v15 = vsel %vm6484_vm12, %v6485_v32, %v6483_v34  ;;  %v6498_v27 = vsel %vm6496_vm14, %v6497_v14, %v6495_v43  ;;  %v6509_v36 = vand.u32 2147483648, %v18641_v20  ;;  %v6525_v26 = vmul.f32 %v12824_v60, %v6524_v7  ;;  %7700 = vmatpush.bf16.msra.mxu2 %v10962_v24  ;;  %v12826_v16 = vpop.eup %12825  ;;  %v3680_v7 = vpop.f32.mrf.mxu0 }
 0x7c9   : > { %v6925_v9 = vadd.f32 %v6498_v27, %v6486_v15  ;;  %v6507_v4 = vsel %vm6506_vm11, %v18641_v20, %v6505_v38  ;;  %v6517_v29 = vmul.f32 %v6516_v47, %v18663_v56  ;;  %vm6518_vm6 = vcmp.eq.f32.partialorder %v18663_v56, inf  ;;  %v21250_v47 = vld [vmem:[#allocation97_spill] sm:$0xff] }
 0x7ca   : > { %vm6520_vm15 = vcmp.eq.f32.partialorder %v18663_v56, 0.0  ;;  %v6521_v50 = vand.u32 2147483648, %v18663_v56  ;;  %v6983_v19 = vpack.c.bf16 %v6888_v12, %v6885_v21  ;;  %v6526_v32 = vmul.f32 0.5, %v6525_v26 }
 0x7cb   : > { %6926 = vadd.xlane.f32.xlu1 %v6925_v9  ;;  %v6519_v3 = vsel %vm6518_vm6, %v18663_v56, %v6517_v29  ;;  %v4626_v59 = vmul.f32 %v4303_v53, %v4303_v53  ;;  %v4097_v1 = vadd.f32 %v4096_v13, %v3678_v6  ;;  %v6536_v14 = vmul.f32 %v12826_v16, %v18701_v11  ;;  %v4307_v6 = vpop.f32.mrf.mxu3 }
 0x7cc   : > { %v6510_v34 = vsel %vm6508_vm10, %v6509_v36, %v6507_v4  ;;  %v6522_v61 = vsel %vm6520_vm15, %v6521_v50, %v6519_v3  ;;  %v6527_v25 = vsub.f32 1.5, %v6526_v32  ;;  %v4306_v0 = vadd.f32 %v4305_v51, %v3887_v33 }
 0x7cd   : > { %v6928_v24 = vadd.f32 %v6522_v61, %v6510_v34  ;;  %v6537_v43 = vmul.f32 %v12826_v16, %v6536_v14  ;;  %v4099_v38 = vadd.f32 %v4098_v57, %v3680_v7  ;;  %12827 = vrsqrt.f32 %v18715_v42  ;;  %v4101_v4 = vpop.f32.mrf.mxu2 }
 0x7ce   : > { %v18812_v12 = vadd.f32 %v4624_v46, %v21250_v47  ;;  %v7088_v56 = vunpack.c.l.b16 %v6983_v19  ;;  %v7089_v53 = vunpack.c.h.b16 %v6983_v19  ;;  %v6528_v13 = vmul.f32 %v12824_v60, %v6527_v25  ;;  %v3889_v60 = vpop.f32.mrf.mxu1 }
 0x7cf   : > { %v18815_v15 = vadd.f32 %v4625_v30, %v17533_v2  ;;  %6929 = vadd.xlane.f32.xlu2 %v6928_v24  ;;  %v4627_v20 = vmul.f32 %v4097_v1, %v4097_v1  ;;  %v6538_v27 = vmul.f32 0.5, %v6537_v43  ;;  %12829 = vrsqrt.f32 %v18743_v39 }
 0x7d0   : > { %v18821_v51 = vsel %vm7250_vm1, %v18750_v22, %v18444_v10  ;;  %v18824_v46 = vadd.f32 %v4626_v59, %v17537_v31  ;;  %v6529_v33 = vmul.f32 %v6528_v13, %v18681_v28  ;;  %vm6530_vm2 = vcmp.eq.f32.partialorder %v18681_v28, inf  ;;  %v3683_v34 = vpop.f32.mrf.mxu0 }
 0x7d1   : > { %v6539_v2 = vsub.f32 1.5, %v6538_v27  ;;  %v4628_v30 = vmul.f32 %v4306_v0, %v4306_v0  ;;  %v4629_v36 = vmul.f32 %v4099_v38, %v4099_v38  ;;  %12831 = vrsqrt.f32 %v18765_v41 }
 0x7d2   : > { %v7210_v26 = vperm.slane %v7088_v56, %v16084_v17  ;;  %v7211_v9 = vperm.slane %v7089_v53, %v16113_v40  ;;  %vm6532_vm12 = vcmp.eq.f32.partialorder %v18681_v28, 0.0  ;;  %v6533_v10 = vand.u32 2147483648, %v18681_v28 }
 0x7d3   : > { %v12828_v31 = vpop.eup %12827  ;;  %v18834_v22 = vadd.f32 %v4627_v20, %v18079_v63  ;;  %v6540_v21 = vmul.f32 %v12826_v16, %v6539_v2  ;;  %vm6542_vm0 = vcmp.eq.f32.partialorder %v18701_v11, inf  ;;  %12833 = vrsqrt.f32 %v18812_v12  ;;  %v4310_v47 = vpop.f32.mrf.mxu3 }
 0x7d4   : > { %v6531_v29 = vsel %vm6530_vm2, %v18681_v28, %v6529_v33  ;;  %vm6544_vm14 = vcmp.eq.f32.partialorder %v18701_v11, 0.0  ;;  %v6545_v57 = vand.u32 2147483648, %v18701_v11  ;;  %v6548_v50 = vmul.f32 %v12828_v31, %v18715_v42 }
 0x7d5   : > { %v12830_v19 = vpop.eup %12829  ;;  %v6541_v63 = vmul.f32 %v6540_v21, %v18701_v11  ;;  %v18846_v16 = vadd.f32 %v4628_v30, %v18086_v35  ;;  %v18849_v32 = vadd.f32 %v4629_v36, %v18100_v8  ;;  %v4308_v3 = vadd.f32 %v4307_v6, %v3889_v60 }
 0x7d6   : > { %v18852_v59 = vsel %vm7109_vm13, %v7211_v9, %v7210_v26  ;;  %v6549_v1 = vmul.f32 %v12828_v31, %v6548_v50  ;;  %v6560_v14 = vmul.f32 %v12830_v19, %v18743_v39  ;;  %12835 = vrsqrt.f32 %v18815_v15  ;;  %v3892_v33 = vpop.f32.mrf.mxu1 }
 0x7d7   : > { %v12832_v61 = vpop.eup %12831  ;;  %v6534_v25 = vsel %vm6532_vm12, %v6533_v10, %v6531_v29  ;;  %v6543_v35 = vsel %vm6542_vm0, %v18701_v11, %v6541_v63  ;;  %vm6554_vm11 = vcmp.eq.f32.partialorder %v18715_v42, inf  ;;  %v6557_v8 = vand.u32 2147483648, %v18715_v42 }
 0x7d8   : > { %v4102_v0 = vadd.f32 %v4101_v4, %v3683_v34  ;;  %v6546_v7 = vsel %vm6544_vm14, %v6545_v57, %v6543_v35  ;;  %v6550_v24 = vmul.f32 0.5, %v6549_v1  ;;  %v6561_v43 = vmul.f32 %v12830_v19, %v6560_v14  ;;  %v4103_v4 = vpop.f32.mrf.mxu2  ;;  %v6891_v57 = vpop.xlane.xlu2 %6890 }
 0x7d9   : > { %v6572_v38 = vmul.f32 %v12832_v61, %v18765_v41  ;;  %v12834_v56 = vpop.eup %12833  ;;  %v6931_v28 = vadd.f32 %v6546_v7, %v6534_v25  ;;  %vm6566_vm10 = vcmp.eq.f32.partialorder %v18743_v39, inf  ;;  %v6569_v53 = vand.u32 2147483648, %v18743_v39  ;;  %v3685_v7 = vpop.f32.mrf.mxu0 }
 0x7da   : > { %v4630_v13 = vmul.f32 %v4308_v3, %v4308_v3  ;;  %v6551_v6 = vsub.f32 1.5, %v6550_v24  ;;  %vm6556_vm6 = vcmp.eq.f32.partialorder %v18715_v42, 0.0  ;;  %v6562_v20 = vmul.f32 0.5, %v6561_v43 }
 0x7db   : > { %vm6568_vm15 = vcmp.eq.f32.partialorder %v18743_v39, 0.0  ;;  %v6573_v11 = vmul.f32 %v12832_v61, %v6572_v38  ;;  %v6584_v27 = vmul.f32 %v12834_v56, %v18812_v12  ;;  %6932 = vadd.xlane.f32.xlu0 %v6931_v28  ;;  %v4631_v60 = vmul.f32 %v4102_v0, %v4102_v0 }
 0x7dc   : > { %vm6578_vm2 = vcmp.eq.f32.partialorder %v18765_v41, inf  ;;  %v6581_v2 = vand.u32 2147483648, %v18765_v41  ;;  %12837 = vrsqrt.f32 %v18824_v46  ;;  %v12836_v30 = vpop.eup %12835  ;;  %v6552_v36 = vmul.f32 %v12828_v31, %v6551_v6 }
 0x7dd   : > { %v6563_v26 = vsub.f32 1.5, %v6562_v20  ;;  %v6574_v9 = vmul.f32 0.5, %v6573_v11  ;;  %v6585_v10 = vmul.f32 %v12834_v56, %v6584_v27  ;;  %v18875_v21 = vadd.f32 %v4630_v13, %v18107_v58  ;;  %v6894_v3 = vpop.xlane.xlu0 %6893  ;;  %v4312_v27 = vpop.f32.mrf.mxu3 }
 0x7de   : > { %vm6590_vm12 = vcmp.eq.f32.partialorder %v18812_v12, inf  ;;  %v6596_v29 = vmul.f32 %v12836_v30, %v18815_v15  ;;  %12839 = vrsqrt.f32 %v18834_v22  ;;  %v6553_v50 = vmul.f32 %v6552_v36, %v18715_v42 }
 0x7df   : > { %v6564_v63 = vmul.f32 %v12830_v19, %v6563_v26  ;;  %v6575_v1 = vsub.f32 1.5, %v6574_v9  ;;  %vm6580_vm0 = vcmp.eq.f32.partialorder %v18765_v41, 0.0  ;;  %v6586_v31 = vmul.f32 0.5, %v6585_v10 }
 0x7e0   : > { %v6984_v14 = vpack.c.bf16 %v6894_v3, %v6891_v57  ;;  %v18883_v58 = vadd.f32 %v4631_v60, %v18111_v49  ;;  %vm6592_vm14 = vcmp.eq.f32.partialorder %v18812_v12, 0.0  ;;  %v6597_v34 = vmul.f32 %v12836_v30, %v6596_v29 }
 0x7e1   : > { %v6555_v25 = vsel %vm6554_vm11, %v18715_v42, %v6553_v50  ;;  %v6565_v35 = vmul.f32 %v6564_v63, %v18743_v39  ;;  %v6576_v0 = vmul.f32 %v12832_v61, %v6575_v1  ;;  %v6587_v19 = vsub.f32 1.5, %v6586_v31 }
 0x7e2   : > { %v12838_v24 = vpop.eup %12837  ;;  %v6593_v43 = vand.u32 2147483648, %v18812_v12  ;;  %v4311_v38 = vadd.f32 %v4310_v47, %v3892_v33  ;;  %v4104_v28 = vadd.f32 %v4103_v4, %v3685_v7  ;;  %v6598_v13 = vmul.f32 0.5, %v6597_v34  ;;  %v3894_v4 = vpop.f32.mrf.mxu1 }
 0x7e3   : > { %v6567_v49 = vsel %vm6566_vm10, %v18743_v39, %v6565_v35  ;;  %v6577_v6 = vmul.f32 %v6576_v0, %v18765_v41  ;;  %v6588_v20 = vmul.f32 %v12834_v56, %v6587_v19  ;;  %v6608_v11 = vmul.f32 %v12838_v24, %v18824_v46 }
 0x7e4   : > { %v12840_v60 = vpop.eup %12839  ;;  %v6558_v61 = vsel %vm6556_vm6, %v6557_v8, %v6555_v25  ;;  %v6570_v36 = vsel %vm6568_vm15, %v6569_v53, %v6567_v49  ;;  %v7090_v47 = vunpack.c.l.b16 %v6984_v14  ;;  %v6599_v33 = vsub.f32 1.5, %v6598_v13 }
 0x7e5   : > { %v6934_v26 = vadd.f32 %v6570_v36, %v6558_v61  ;;  %v6579_v9 = vsel %vm6578_vm2, %v18765_v41, %v6577_v6  ;;  %v6589_v10 = vmul.f32 %v6588_v20, %v18812_v12  ;;  %v6609_v56 = vmul.f32 %v12838_v24, %v6608_v11 }
 0x7e6   : > { %v4632_v29 = vmul.f32 %v4311_v38, %v4311_v38  ;;  %v4633_v57 = vmul.f32 %v4104_v28, %v4104_v28  ;;  %v6600_v50 = vmul.f32 %v12836_v30, %v6599_v33  ;;  %v4313_v63 = vadd.f32 %v4312_v27, %v3894_v4 }
 0x7e7   : > { %6935 = vadd.xlane.f32.xlu1 %v6934_v26  ;;  %v7091_v42 = vunpack.c.h.b16 %v6984_v14  ;;  %v6591_v39 = vsel %vm6590_vm12, %v18812_v12, %v6589_v10  ;;  %v6610_v8 = vmul.f32 0.5, %v6609_v56  ;;  %v6620_v53 = vmul.f32 %v12840_v60, %v18834_v22 }
 0x7e8   : > { %v7213_v3 = vperm.slane %v7090_v47, %v16165_v48  ;;  %v6582_v1 = vsel %vm6580_vm0, %v6581_v2, %v6579_v9  ;;  %v6594_v31 = vsel %vm6592_vm14, %v6593_v43, %v6591_v39  ;;  %12841 = vrsqrt.f32 %v18846_v16  ;;  %v6897_v43 = vpop.xlane.xlu1 %6896 }
 0x7e9   : > { %v6937_v30 = vadd.f32 %v6594_v31, %v6582_v1  ;;  %v6601_v14 = vmul.f32 %v6600_v50, %v18815_v15  ;;  %v6611_v34 = vsub.f32 1.5, %v6610_v8  ;;  %v6621_v25 = vmul.f32 %v12840_v60, %v6620_v53 }
 0x7ea   : > { %v18916_v35 = vadd.f32 %v4632_v29, %v18116_v54  ;;  %vm6602_vm11 = vcmp.eq.f32.partialorder %v18815_v15, inf  ;;  %vm6604_vm10 = vcmp.eq.f32.partialorder %v18815_v15, 0.0  ;;  %12843 = vrsqrt.f32 %v18849_v32 }
 0x7eb   : > { %6938 = vadd.xlane.f32.xlu2 %v6937_v30  ;;  %v18922_v41 = vadd.f32 %v4633_v57, %v18502_v45  ;;  %v6605_v12 = vand.u32 2147483648, %v18815_v15  ;;  %v6612_v2 = vmul.f32 %v12838_v24, %v6611_v34  ;;  %v6622_v0 = vmul.f32 0.5, %v6621_v25  ;;  %v6900_v28 = vpop.xlane.xlu2 %6899 }
 0x7ec   : > { %v7215_v19 = vperm.slane %v7091_v42, %v16168_v52  ;;  %vm6614_vm6 = vcmp.eq.f32.partialorder %v18824_v46, inf  ;;  %v4634_v54 = vmul.f32 %v4313_v63, %v4313_v63  ;;  %12845 = vrsqrt.f32 %v18875_v21  ;;  %v12217_v63 = vld [vmem:[%s20668_s6 + $0x34] sm:$0xf]  ;;  %v10855_v42 = vld [vmem:[%s20668_s6 + $0x38] sm:$0xf0] }
 0x7ed   : > { %v7214_v7 = vsel %vm7113_vm3, %v7213_v3, %v18852_v59  ;;  %v6603_v38 = vsel %vm6602_vm11, %v18815_v15, %v6601_v14  ;;  %v6613_v45 = vmul.f32 %v6612_v2, %v18824_v46  ;;  %v6623_v13 = vsub.f32 1.5, %v6622_v0  ;;  %v12212_v15 = vld [vmem:[%s20668_s6 + $0x4] sm:$0xf0] }
 0x7ee   : > { %v12842_v49 = vpop.eup %12841  ;;  %vm6616_vm15 = vcmp.eq.f32.partialorder %v18824_v46, 0.0  ;;  %v6617_v24 = vand.u32 2147483648, %v18824_v46  ;;  %v6985_v6 = vpack.c.bf16 %v6900_v28, %v6897_v43  ;;  %12847 = vrsqrt.f32 %v18883_v58 }
 0x7ef   : > { %v6615_v20 = vsel %vm6614_vm6, %v18824_v46, %v6613_v45  ;;  %v6624_v11 = vmul.f32 %v12840_v60, %v6623_v13  ;;  %vm6626_vm2 = vcmp.eq.f32.partialorder %v18834_v22, inf  ;;  %v6632_v59 = vmul.f32 %v12842_v49, %v18846_v16 }
 0x7f0   : > { %v12844_v27 = vpop.eup %12843  ;;  %v7216_v61 = vsel %vm20719_vm4, %v7215_v19, %v7214_v7  ;;  %v6606_v36 = vsel %vm6604_vm10, %v6605_v12, %v6603_v38  ;;  %v6618_v47 = vsel %vm6616_vm15, %v6617_v24, %v6615_v20  ;;  %v18942_v33 = vadd.f32 %v4634_v54, %v18516_v62  ;;  %v10829_v62 = vld [vmem:[%s20668_s6] sm:$0xf] }
 0x7f1   : > { %v6940_v26 = vadd.f32 %v6618_v47, %v6606_v36  ;;  %v7092_v9 = vunpack.c.l.b16 %v6985_v6  ;;  %vm6628_vm12 = vcmp.eq.f32.partialorder %v18834_v22, 0.0  ;;  %v6633_v46 = vmul.f32 %v12842_v49, %v6632_v59  ;;  %v12215_v36 = vld [vmem:[%s20668_s6 + $0x24] sm:$0xf] }
 0x7f2   : > { %v6644_v60 = vmul.f32 %v12844_v27, %v18849_v32  ;;  %v12846_v10 = vpop.eup %12845  ;;  %v6625_v56 = vmul.f32 %v6624_v11, %v18834_v22  ;;  %v6629_v4 = vand.u32 2147483648, %v18834_v22  ;;  %vm6638_vm0 = vcmp.eq.f32.partialorder %v18846_v16, inf }
 0x7f3   : > { %12849 = vrsqrt.f32 %v18916_v35  ;;  %6941 = vadd.xlane.f32.xlu0 %v6940_v26  ;;  %v6634_v29 = vmul.f32 0.5, %v6633_v46  ;;  %vm6640_vm14 = vcmp.eq.f32.partialorder %v18846_v16, 0.0  ;;  %v6656_v50 = vmul.f32 %v12846_v10, %v18875_v21  ;;  %v10839_v46 = vld [vmem:[%s20668_s6 + $0x18] sm:$0xf0] }
 0x7f4   : > { %v6645_v57 = vmul.f32 %v12844_v27, %v6644_v60  ;;  %v18964_v39 = vpop.eup %12847  ;;  %v7093_v8 = vunpack.c.h.b16 %v6985_v6  ;;  %v6641_v53 = vand.u32 2147483648, %v18846_v16  ;;  %vm6650_vm11 = vcmp.eq.f32.partialorder %v18849_v32, inf }
 0x7f5   : > { %v6653_v3 = vand.u32 2147483648, %v18849_v32  ;;  %v7217_v1 = vperm.slane %v7092_v9, %v16326_v23  ;;  %v6635_v31 = vsub.f32 1.5, %v6634_v29  ;;  %vm6652_vm10 = vcmp.eq.f32.partialorder %v18849_v32, 0.0  ;;  %v12213_v9 = vld [vmem:[%s20668_s6 + $0x14] sm:$0xf] }
 0x7f6   : > { %v6646_v30 = vmul.f32 0.5, %v6645_v57  ;;  %v6657_v14 = vmul.f32 %v12846_v10, %v6656_v50  ;;  %v6627_v34 = vsel %vm6626_vm2, %v18834_v22, %v6625_v56  ;;  %vm6662_vm6 = vcmp.eq.f32.partialorder %v18875_v21, inf  ;;  %v10847_v22 = vld [vmem:[%s20668_s6 + $0x28] sm:$0xf0] }
 0x7f7   : > { %v6668_v25 = vmul.f32 %v18964_v39, %v18883_v58  ;;  %v10830_v12 = vor.u32 %v12212_v15, %v10829_v62  ;;  %v10858_v2 = vor.u32 %v12217_v63, %v10855_v42  ;;  %v6636_v0 = vmul.f32 %v12842_v49, %v6635_v31  ;;  %v10795_v62 = vld [vmem:[%s20668_s6 + $0x40] sm:$0xf]  ;;  %v12220_v15 = vld [vmem:[%s20668_s6 + $0x44] sm:$0xf0]  ;;  %v6903_v50 = vpop.xlane.xlu2 %6902 }
 0x7f8   : > { %v6647_v19 = vsub.f32 1.5, %v6646_v30  ;;  %v6658_v54 = vmul.f32 0.5, %v6657_v14  ;;  %vm6664_vm15 = vcmp.eq.f32.partialorder %v18875_v21, 0.0  ;;  %12851 = vrsqrt.f32 %v18922_v41 }
 0x7f9   : > { %v12850_v7 = vpop.eup %12849  ;;  %v18980_v43 = vperm.slane %v7093_v8, %v16332_v55  ;;  %v6665_v38 = vand.u32 2147483648, %v18875_v21  ;;  %v6669_v45 = vmul.f32 %v18964_v39, %v6668_v25  ;;  %v6677_v28 = vand.u32 2147483648, %v18883_v58  ;;  %7410 = vmatpush.bf16.msra.mxu3 %v10830_v12 }
 0x7fa   : > { %v6637_v13 = vmul.f32 %v6636_v0, %v18846_v16  ;;  %v6648_v49 = vmul.f32 %v12844_v27, %v6647_v19  ;;  %v6659_v24 = vsub.f32 1.5, %v6658_v54  ;;  %vm6674_vm2 = vcmp.eq.f32.partialorder %v18883_v58, inf }
 0x7fb   : > { %v6680_v6 = vmul.f32 %v12850_v7, %v18916_v35  ;;  %v7218_v20 = vsel %vm20720_vm9, %v7217_v1, %v7216_v61  ;;  %v6630_v11 = vsel %vm6628_vm12, %v6629_v4, %v6627_v34  ;;  %v6670_v59 = vmul.f32 0.5, %v6669_v45  ;;  %v6906_v42 = vpop.xlane.xlu0 %6905 }
 0x7fc   : > { %12853 = vrsqrt.f32 %v18942_v33  ;;  %v6639_v27 = vsel %vm6638_vm0, %v18846_v16, %v6637_v13  ;;  %v6649_v47 = vmul.f32 %v6648_v49, %v18849_v32  ;;  %v6660_v26 = vmul.f32 %v12846_v10, %v6659_v24 }
 0x7fd   : > { %7420 = vmatpush.bf16.msrb.mxu3 %v10858_v2  ;;  %vm7252_vm4 = vcmask 1047559   ;;  %vm6676_vm9 = vcmp.eq.f32.partialorder %v18883_v58, 0.0  ;;  %v6681_v61 = vmul.f32 %v12850_v7, %v6680_v6  ;;  %v6642_v60 = vsel %vm6640_vm14, %v6641_v53, %v6639_v27  ;;  %v12219_v2 = vld [vmem:[%s20668_s6 + $0x44] sm:$0xf] }
 0x7fe   : > { %v6671_v10 = vsub.f32 1.5, %v6670_v59  ;;  %vm6686_vm12 = vcmp.eq.f32.partialorder %v18916_v35, inf  ;;  %v6689_v56 = vand.u32 2147483648, %v18916_v35  ;;  %v10850_v4 = vor.u32 %v12215_v36, %v10847_v22  ;;  %v12852_v29 = vpop.eup %12851  ;;  %v12211_v6 = vld [vmem:[%s20668_s6 + $0x4] sm:$0xf] }
 0x7ff   : > { %v6943_v57 = vadd.f32 %v6642_v60, %v6630_v11  ;;  %v6651_v16 = vsel %vm6650_vm11, %v18849_v32, %v6649_v47  ;;  %v6661_v63 = vmul.f32 %v6660_v26, %v18875_v21  ;;  %v6682_v8 = vmul.f32 0.5, %v6681_v61  ;;  %v10797_v32 = vld [vmem:[%s20668_s6 + $0x48] sm:$0xf0] }
 0x800   : > { %vm6688_vm0 = vcmp.eq.f32.partialorder %v18916_v35, 0.0  ;;  %v6654_v53 = vsel %vm6652_vm10, %v6653_v3, %v6651_v16  ;;  %v6986_v1 = vpack.c.bf16 %v6906_v42, %v6903_v50  ;;  %v6672_v31 = vmul.f32 %v18964_v39, %v6671_v10  ;;  %v10831_v11 = vld [vmem:[%s20668_s6 + $0x8] sm:$0xf0] }
 0x801   : > { %v6692_v30 = vmul.f32 %v12852_v29, %v18922_v41  ;;  %7421 = vmatpush.bf16.msrb.mxu3 %v10850_v4  ;;  %6944 = vadd.xlane.f32.xlu1 %v6943_v57  ;;  %v6663_v14 = vsel %vm6662_vm6, %v18875_v21, %v6661_v63  ;;  %v6683_v34 = vsub.f32 1.5, %v6682_v8  ;;  %v10842_v25 = vor.u32 %v12213_v9, %v10839_v46  ;;  %v12260_v63 = vld [vmem:[%s20670_s8 + $0xc4] sm:$0xf0] }
 0x802   : > { %v10796_v12 = vor.u32 %v12220_v15, %v10795_v62  ;;  %v12854_v39 = vpop.eup %12853  ;;  %v6666_v3 = vsel %vm6664_vm15, %v6665_v38, %v6663_v14  ;;  %v7094_v0 = vunpack.c.l.b16 %v6986_v1  ;;  %v7095_v19 = vunpack.c.h.b16 %v6986_v1 }
 0x803   : > { %v6673_v54 = vmul.f32 %v6672_v31, %v18883_v58  ;;  %v6946_v45 = vadd.f32 %v6666_v3, %v6654_v53  ;;  %v6684_v13 = vmul.f32 %v12850_v7, %v6683_v34  ;;  %v6693_v49 = vmul.f32 %v12852_v29, %v6692_v30 }
 0x804   : > { %v6704_v24 = vmul.f32 %v12854_v39, %v18942_v33  ;;  %7306 = vmatpush.bf16.msra.mxu0 %v10796_v12  ;;  %v7221_v21 = vperm.slane %v7094_v0, %v16402_v18  ;;  %v7223_v38 = vperm.slane %v7095_v19, %v16408_v5  ;;  %v10800_v59 = vor.u32 %v12219_v2, %v10797_v32 }
 0x805   : > { %v6675_v7 = vsel %vm6674_vm2, %v18883_v58, %v6673_v54  ;;  %7422 = vmatpush.bf16.msrb.mxu3 %v10842_v25  ;;  %vm21251_vm14 = vcmask 392512   ;;  %6947 = vadd.xlane.f32.xlu2 %v6946_v45  ;;  %v6685_v27 = vmul.f32 %v6684_v13, %v18916_v35  ;;  %v6694_v47 = vmul.f32 0.5, %v6693_v49 }
 0x806   : > { %v7220_v36 = vsel %vm21251_vm14, %v18980_v43, %v7218_v20  ;;  %v6705_v26 = vmul.f32 %v12854_v39, %v6704_v24  ;;  %v6678_v22 = vsel %vm6676_vm9, %v6677_v28, %v6675_v7  ;;  %vm7295_vm11 = vcmask 523264   ;;  %7319 = vmatpush.bf16.msra.mxu1 %v10800_v59 }
 0x807   : > { %v7222_v61 = vsel %vm7129_vm7, %v7221_v21, %v7220_v36  ;;  %v10834_v9 = vor.u32 %v12211_v6, %v10831_v11  ;;  %v6687_v43 = vsel %vm6686_vm12, %v18916_v35, %v6685_v27  ;;  %v6695_v20 = vsub.f32 1.5, %v6694_v47  ;;  %v6909_v30 = vpop.xlane.xlu1 %6908  ;;  %vm21254_vm12 = vmmov %vm21251_vm14 }
 0x808   : > { %v7224_v46 = vsel %vm7133_vm8, %v7223_v38, %v7222_v61  ;;  %v6706_v60 = vmul.f32 0.5, %v6705_v26  ;;  %v6690_v28 = vsel %vm6688_vm0, %v6689_v56, %v6687_v43  ;;  %vm6698_vm9 = vcmp.eq.f32.partialorder %v18922_v41, inf }
 0x809   : > { %v19066_v10 = vsel %vm7250_vm1, %v7224_v46, %v18757_v44  ;;  %v7358_v4 = vsel %vm7252_vm4, %v7224_v46, %v18821_v51  ;;  %v19072_v58 = vsel %vm7248_vm5, %v7224_v46, %v18762_v37  ;;  %7423 = vmatpush.bf16.msrb.mxu3 %v10834_v9  ;;  %v6949_v15 = vadd.f32 %v6690_v28, %v6678_v22 }
 0x80a   : > { %v7359_v62 = vpack.c.b16 %v7358_v4, %v7358_v4  ;;  %v6696_v57 = vmul.f32 %v12852_v29, %v6695_v20  ;;  %v6707_v50 = vsub.f32 1.5, %v6706_v60  ;;  %v6701_v37 = vand.u32 2147483648, %v18922_v41  ;;  %v10953_v29 = vld [vmem:[%s20670_s8 + $0xc0] sm:$0xf] }
 0x80b   : > { %6950 = vadd.xlane.f32.xlu0 %v6949_v15  ;;  %vm6710_vm5 = vcmp.eq.f32.partialorder %v18942_v33, inf  ;;  %v6713_v56 = vand.u32 2147483648, %v18942_v33  ;;  %vm6700_vm10 = vcmp.eq.f32.partialorder %v18922_v41, 0.0  ;;  %vm6712_vm6 = vcmp.eq.f32.partialorder %v18942_v33, 0.0  ;;  %v10945_v15 = vld [vmem:[%s20670_s8 + $0xb0] sm:$0xf] }
 0x80c   : > { %10859 = vmatmul.msk.bf16.vlgmr.msra.gmra.mxu3 %vm7295_vm11, %v7359_v62  ;;  %v6697_v44 = vmul.f32 %v6696_v57, %v18922_v41  ;;  %v6708_v16 = vmul.f32 %v12854_v39, %v6707_v50  ;;  %v10954_v8 = vor.u32 %v12260_v63, %v10953_v29  ;;  %vm21252_vm15 = vcmask 261312   ;;  %v12258_v57 = vld [vmem:[%s20670_s8 + $0xb4] sm:$0xf0]  ;;  %v12232_v29 = vld [vmem:[%s20668_s6 + $0xa4] sm:$0xf0] }
 0x80d   : > { %vm21253_vm2 = vcmask 326912   ;;  %v10946_v50 = vor.u32 %v12258_v57, %v10945_v15  ;;  %v12231_v63 = vld [vmem:[%s20668_s6 + $0xa4] sm:$0xf] }
 0x80e   : > { %v6699_v51 = vsel %vm6698_vm9, %v18922_v41, %v6697_v44  ;;  %v6709_v35 = vmul.f32 %v6708_v16, %v18942_v33  ;;  %7701 = vmatpush.bf16.msra.mxu2 %v10954_v8  ;;  %v12233_v44 = vld [vmem:[%s20668_s6 + $0xb4] sm:$0xf]  ;;  %v10897_v16 = vld [vmem:[%s20668_s6 + $0xb8] sm:$0xf0]  ;;  %v10889_v8 = vld [vmem:[%s20668_s6 + $0xa8] sm:$0xf0] }
 0x80f   : > { %v6702_v53 = vsel %vm6700_vm10, %v6701_v37, %v6699_v51  ;;  %v10900_v37 = vor.u32 %v12233_v44, %v10897_v16  ;;  %vm7687_vm9 = vcmask 1014784   ;;  %vm7986_vm10 = vcmask 64512  }
 0x810   : > { %v6711_v42 = vsel %vm6710_vm5, %v18942_v33, %v6709_v35  ;;  %vm8108_vm5 = vcmask 1043456  }
 0x811   : > { %v6714_v1 = vsel %vm6712_vm6, %v6713_v56, %v6711_v42  ;;  %v6912_v34 = vpop.xlane.xlu2 %6911  ;;  %7537 = vmatpush.bf16.msrb.mxu1 %v10900_v37  ;;  %v10887_v56 = vld [vmem:[%s20668_s6 + $0xa0] sm:$0xf]  ;;  %vm8104_vm6 = vcmask 982016  }
 0x812   : > { %v6952_v31 = vadd.f32 %v6714_v1, %v6702_v53  ;;  %v6995_v12 = vpack.c.bf16 %v6912_v34, %v6909_v30  ;;  %7702 = vmatpush.bf16.msra.mxu2 %v10946_v50  ;;  %v10888_v42 = vor.u32 %v12232_v29, %v10887_v56  ;;  %v10879_v53 = vld [vmem:[%s20668_s6 + $0x90] sm:$0xf]  ;;  %v12230_v1 = vld [vmem:[%s20668_s6 + $0x94] sm:$0xf0]  ;;  %v10892_v30 = vor.u32 %v12231_v63, %v10889_v8  ;;  %v10881_v34 = vld [vmem:[%s20668_s6 + $0x98] sm:$0xf0] }
 0x813   : > { %v10929_v63 = vld [vmem:[%s20670_s8 + $0x90] sm:$0xf] }
 0x814   : > { %6953 = vadd.xlane.f32.xlu1 %v6952_v31  ;;  %v7096_v41 = vunpack.c.l.b16 %v6995_v12  ;;  %v7097_v39 = vunpack.c.h.b16 %v6995_v12 }
 0x815   : > { %7538 = vmatpush.bf16.msrb.mxu1 %v10892_v30 }
 0x816   : > { %v7225_v19 = vperm.slane %v7096_v41, %v16084_v17  ;;  %v7226_v54 = vperm.slane %v7097_v39, %v16113_v40  ;;  %v12228_v41 = vld [vmem:[%s20668_s6 + $0x84] sm:$0xf0]  ;;  %v12227_v39 = vld [vmem:[%s20668_s6 + $0x84] sm:$0xf] }
 0x817   : > { %v6915_v14 = vpop.xlane.xlu0 %6914 }
 0x818   : > { %v7227_v24 = vsel %vm7109_vm13, %v7226_v54, %v7225_v19 }
 0x81c   : > { %10860 = vmatmul.msk.bf16.vlgmr.msrb.gmra.mxu3 %vm7295_vm11, %v7359_v62 }
 0x823   : > { %v6918_v25 = vpop.xlane.xlu1 %6917 }
 0x824   : > { %v6996_v2 = vpack.c.bf16 %v6918_v25, %v6915_v14  ;;  %v12229_v14 = vld [vmem:[%s20668_s6 + $0x94] sm:$0xf]  ;;  %v10880_v25 = vor.u32 %v12230_v1, %v10879_v53  ;;  %v10979_v53 = vld [vmem:[%s20670_s8 + $0xf8] sm:$0x30]  ;;  %v12263_v1 = vld [vmem:[%s20670_s8 + $0xe4] sm:$0xf] }
 0x826   : > { %v7098_v0 = vunpack.c.l.b16 %v6996_v2  ;;  %v7099_v45 = vunpack.c.h.b16 %v6996_v2  ;;  %v10884_v2 = vor.u32 %v12229_v14, %v10881_v34  ;;  %v11043_v14 = vld [vmem:[%s20670_s8 + $0x70] sm:$0xf]  ;;  %v12250_v34 = vld [vmem:[%s20670_s8 + $0x74] sm:$0x30] }
 0x828   : > { %v7228_v13 = vperm.slane %v7098_v0, %v16165_v48  ;;  %v7230_v6 = vperm.slane %v7099_v45, %v16168_v52  ;;  %7539 = vmatpush.bf16.msrb.mxu1 %v10884_v2  ;;  %v11045_v2 = vld [vmem:[%s20670_s8 + $0x78] sm:$0x30] }
 0x82a   : > { %v6921_v3 = vpop.xlane.xlu2 %6920  ;;  %v7229_v21 = vsel %vm7113_vm3, %v7228_v13, %v7227_v24 }
 0x82b   : > { %v7231_v27 = vsel %vm21252_vm15, %v7230_v6, %v7229_v21 }
 0x831   : > { %v6924_v32 = vpop.xlane.xlu0 %6923 }
 0x832   : > { %v6997_v33 = vpack.c.bf16 %v6924_v32, %v6921_v3  ;;  %v10871_v32 = vld [vmem:[%s20668_s6 + $0x80] sm:$0xf]  ;;  %v10873_v3 = vld [vmem:[%s20668_s6 + $0x88] sm:$0xf0] }
 0x833   : > { %v10876_v54 = vor.u32 %v12227_v39, %v10873_v3  ;;  %v11035_v39 = vld [vmem:[%s20670_s8 + $0x60] sm:$0xf]  ;;  %v12248_v3 = vld [vmem:[%s20670_s8 + $0x64] sm:$0xf0] }
 0x834   : > { %v7100_v49 = vunpack.c.l.b16 %v6997_v33  ;;  %v7101_v11 = vunpack.c.h.b16 %v6997_v33  ;;  %v10872_v33 = vor.u32 %v12228_v41, %v10871_v32 }
 0x835   : > { %7540 = vmatpush.bf16.msrb.mxu1 %v10876_v54  ;;  %v11037_v54 = vld [vmem:[%s20670_s8 + $0x68] sm:$0xf0] }
 0x836   : > { %v7232_v38 = vperm.slane %v7100_v49, %v16326_v23  ;;  %v7234_v47 = vperm.slane %v7101_v11, %v16332_v55 }
 0x838   : > { %v7233_v26 = vsel %vm21253_vm2, %v7232_v38, %v7231_v27 }
 0x839   : > { %v7235_v43 = vsel %vm21254_vm12, %v7234_v47, %v7233_v26 }
 0x83e   : > { %v6927_v7 = vpop.xlane.xlu1 %6926 }
 0x842   : > { %v6930_v59 = vpop.xlane.xlu2 %6929 }
 0x843   : > { %v6998_v36 = vpack.c.bf16 %v6930_v59, %v6927_v7 }
 0x845   : > { %v7102_v61 = vunpack.c.l.b16 %v6998_v36  ;;  %v7103_v22 = vunpack.c.h.b16 %v6998_v36 }
 0x847   : > { %v7236_v9 = vperm.slane %v7102_v61, %v16402_v18  ;;  %v7238_v46 = vperm.slane %v7103_v22, %v16408_v5 }
 0x849   : > { %v7237_v20 = vsel %vm7129_vm7, %v7236_v9, %v7235_v43 }
 0x84a   : > { %v7239_v60 = vsel %vm7133_vm8, %v7238_v46, %v7237_v20 }
 0x84b   : > { %v7253_v4 = vsel %vm7252_vm4, %v7239_v60, %v19066_v10  ;;  %v19113_v28 = vsel %vm7250_vm1, %v7239_v60, %v19072_v58  ;;  %v10895_v10 = vld [vmem:[%s20668_s6 + $0xb0] sm:$0xf]  ;;  %v12234_v58 = vld [vmem:[%s20668_s6 + $0xb4] sm:$0xf0]  ;;  %vm21256_vm1 = vmmov %vm21253_vm2  ;;  %vm8601_vm2 = vcmask 916480  }
 0x84c   : > { %v7254_v62 = vpack.c.b16 %v7253_v4, %v7253_v4  ;;  %v10896_v51 = vor.u32 %v12234_v58, %v10895_v10 }
 0x84e   : > { %10825 = vmatmul.msk.bf16.vlgmr.msra.gmra.mxu0 %vm7295_vm11, %v7254_v62  ;;  %10826 = vmatmul.msk.bf16.vlgmr.msra.gmra.mxu1 %vm7295_vm11, %v7254_v62  ;;  %v6933_v35 = vpop.xlane.xlu0 %6932 }
 0x84f   : > { %7524 = vmatpush.bf16.msrb.mxu0 %v10896_v51 }
 0x853   : > { %7525 = vmatpush.bf16.msrb.mxu0 %v10888_v42  ;;  %v12265_v42 = vld [vmem:[%s20670_s8 + $0xf4] sm:$0xf] }
 0x854   : > { %v10982_v30 = vor.u32 %v12265_v42, %v10979_v53  ;;  %v11005_v53 = vld [vmem:[%s20670_s8 + $0x28] sm:$0xf0] }
 0x857   : > { %7526 = vmatpush.bf16.msrb.mxu0 %v10880_v25  ;;  %v12249_v25 = vld [vmem:[%s20670_s8 + $0x74] sm:$0xf] }
 0x858   : > { %v11048_v41 = vor.u32 %v12249_v25, %v11045_v2  ;;  %v12253_v25 = vld [vmem:[%s20670_s8 + $0x94] sm:$0xf] }
 0x85a   : > { %v6936_v12 = vpop.xlane.xlu1 %6935 }
 0x85b   : > { %v7429_v19 = vpack.c.bf16 %v6936_v12, %v6933_v35  ;;  %7527 = vmatpush.bf16.msrb.mxu0 %v10872_v33  ;;  %v11044_v12 = vor.u32 %v12250_v34, %v11043_v14 }
 0x85d   : > { %v7446_v49 = vunpack.c.l.b16 %v7429_v19  ;;  %v7447_v24 = vunpack.c.h.b16 %v7429_v19  ;;  %v12247_v19 = vld [vmem:[%s20670_s8 + $0x64] sm:$0xf] }
 0x85e   : > { %v6939_v31 = vpop.xlane.xlu2 %6938 }
 0x85f   : > { %v7454_v38 = vperm.slane %v7446_v49, %v16084_v17  ;;  %v7455_v7 = vperm.slane %v7447_v24, %v16113_v40  ;;  %v10937_v17 = vld [vmem:[%s20670_s8 + $0xa0] sm:$0xf]  ;;  %v12256_v40 = vld [vmem:[%s20670_s8 + $0xa4] sm:$0xf0]  ;;  %v10963_v49 = vld [vmem:[%s20670_s8 + $0xd8] sm:$0xf0]  ;;  %v11036_v24 = vor.u32 %v12248_v3, %v11035_v39 }
 0x860   : > { %v10938_v20 = vor.u32 %v12256_v40, %v10937_v17  ;;  %v10921_v17 = vld [vmem:[%s20670_s8 + $0x80] sm:$0xf]  ;;  %v12252_v40 = vld [vmem:[%s20670_s8 + $0x84] sm:$0xf0] }
 0x861   : > { %v7456_v47 = vsel %vm7109_vm13, %v7455_v7, %v7454_v38  ;;  %vm21255_vm13 = vmmov %vm21252_vm15  ;;  %v12245_v38 = vld [vmem:[%s20670_s8 + $0x54] sm:$0xf]  ;;  %v11029_v7 = vld [vmem:[%s20670_s8 + $0x58] sm:$0xf0]  ;;  %vm8396_vm15 = vcmask 130048  }
 0x862   : > { %7703 = vmatpush.bf16.msra.mxu2 %v10938_v20  ;;  %v10947_v20 = vld [vmem:[%s20670_s8 + $0xb8] sm:$0xf0] }
 0x866   : > { %v6942_v0 = vpop.xlane.xlu0 %6941 }
 0x867   : > { %v7430_v45 = vpack.c.bf16 %v6942_v0, %v6939_v31  ;;  %v10971_v31 = vld [vmem:[%s20670_s8 + $0xe8] sm:$0xf0] }
 0x868   : > { %v10974_v0 = vor.u32 %v12263_v1, %v10971_v31 }
 0x869   : > { %v7448_v11 = vunpack.c.l.b16 %v7430_v45  ;;  %v7449_v59 = vunpack.c.h.b16 %v7430_v45 }
 0x86b   : > { %v7457_v36 = vperm.slane %v7448_v11, %v16165_v48  ;;  %v7459_v26 = vperm.slane %v7449_v59, %v16168_v52  ;;  %v11027_v11 = vld [vmem:[%s20670_s8 + $0x50] sm:$0xf] }
 0x86d   : > { %v7458_v22 = vsel %vm7113_vm3, %v7457_v36, %v7456_v47  ;;  %vm21257_vm3 = vmmov %vm21254_vm12  ;;  %v12259_v36 = vld [vmem:[%s20670_s8 + $0xc4] sm:$0xf]  ;;  %vm9721_vm12 = vcmask 90112  }
 0x86e   : > { %v7460_v60 = vsel %vm21255_vm13, %v7459_v26, %v7458_v22  ;;  %v11032_v26 = vor.u32 %v12245_v38, %v11029_v7  ;;  %v12244_v22 = vld [vmem:[%s20670_s8 + $0x44] sm:$0xf0]  ;;  %v10995_v7 = vld [vmem:[%s20670_s8 + $0x10] sm:$0xf] }
 0x874   : > { %v6945_v6 = vpop.xlane.xlu1 %6944 }
 0x878   : > { %v6948_v13 = vpop.xlane.xlu2 %6947 }
 0x879   : > { %v7431_v21 = vpack.c.bf16 %v6948_v13, %v6945_v6  ;;  %v12261_v13 = vld [vmem:[%s20670_s8 + $0xd4] sm:$0xf]  ;;  %v11040_v6 = vor.u32 %v12247_v19, %v11037_v54  ;;  %v12251_v19 = vld [vmem:[%s20670_s8 + $0x84] sm:$0xf]  ;;  %v10923_v54 = vld [vmem:[%s20670_s8 + $0x88] sm:$0xf0] }
 0x87a   : > { %v10966_v59 = vor.u32 %v12261_v13, %v10963_v49 }
 0x87b   : > { %v7450_v27 = vunpack.c.l.b16 %v7431_v21  ;;  %v7451_v61 = vunpack.c.h.b16 %v7431_v21  ;;  %v12246_v21 = vld [vmem:[%s20670_s8 + $0x54] sm:$0xf0] }
 0x87c   : > { %v11028_v47 = vor.u32 %v12246_v21, %v11027_v11 }
 0x87d   : > { %v7461_v9 = vperm.slane %v7450_v27, %v16326_v23  ;;  %v7463_v52 = vperm.slane %v7451_v61, %v16332_v55  ;;  %v10955_v27 = vld [vmem:[%s20670_s8 + $0xc8] sm:$0xf0]  ;;  %v11019_v61 = vld [vmem:[%s20670_s8 + $0x40] sm:$0xf] }
 0x87e   : > { %v6951_v46 = vpop.xlane.xlu0 %6950 }
 0x87f   : > { %v7462_v4 = vsel %vm21256_vm1, %v7461_v9, %v7460_v60  ;;  %v12243_v9 = vld [vmem:[%s20670_s8 + $0x44] sm:$0xf]  ;;  %v11020_v60 = vor.u32 %v12244_v22, %v11019_v61  ;;  %v12280_v61 = vld [vmem:[%s20670_s8 + $0x164] sm:$0xf0] }
 0x880   : > { %v7464_v10 = vsel %vm21257_vm3, %v7463_v52, %v7462_v4  ;;  %v10922_v52 = vor.u32 %v12252_v40, %v10921_v17  ;;  %v10987_v17 = vld [vmem:[%s20670_s8] sm:$0xf] }
 0x887   : > { %v6954_v43 = vpop.xlane.xlu1 %6953 }
 0x888   : > { %v7432_v48 = vpack.c.bf16 %v6954_v43, %v6951_v46  ;;  %v11021_v46 = vld [vmem:[%s20670_s8 + $0x48] sm:$0xf0]  ;;  %v10958_v43 = vor.u32 %v12259_v36, %v10955_v27  ;;  %v12237_v36 = vld [vmem:[%s20670_s8 + $0x14] sm:$0xf] }
 0x889   : > { %v11024_v4 = vor.u32 %v12243_v9, %v11021_v46  ;;  %v12279_v46 = vld [vmem:[%s20670_s8 + $0x164] sm:$0xf] }
 0x88a   : > { %v7452_v62 = vunpack.c.l.b16 %v7432_v48  ;;  %v7453_v23 = vunpack.c.h.b16 %v7432_v48  ;;  %v12257_v48 = vld [vmem:[%s20670_s8 + $0xb4] sm:$0xf] }
 0x88c   : > { %v7465_v15 = vperm.slane %v7452_v62, %v16402_v18  ;;  %v7467_v57 = vperm.slane %v7453_v23, %v16408_v5  ;;  %v11011_v62 = vld [vmem:[%s20670_s8 + $0x30] sm:$0xf]  ;;  %v12242_v23 = vld [vmem:[%s20670_s8 + $0x34] sm:$0xf0] }
 0x88e   : > { %v7466_v50 = vsel %vm7129_vm7, %v7465_v15, %v7464_v10  ;;  %v11125_v15 = vld [vmem:[%s20670_s8 + $0x170] sm:$0xf]  ;;  %v11013_v10 = vld [vmem:[%s20670_s8 + $0x38] sm:$0xf0] }
 0x88f   : > { %v7468_v58 = vsel %vm7133_vm8, %v7467_v57, %v7466_v50  ;;  %v19192_v44 = vpop.f32.mrf.mxu3  ;;  %v12241_v57 = vld [vmem:[%s20670_s8 + $0x34] sm:$0xf]  ;;  %v12282_v50 = vld [vmem:[%s20670_s8 + $0x174] sm:$0x30] }
 0x890   : > { %v7475_v55 = vsel %vm7252_vm4, %v7468_v58, %v19113_v28  ;;  %v12254_v28 = vld [vmem:[%s20670_s8 + $0x94] sm:$0xf0]  ;;  %vm21258_vm4 = vcmask 1045504   ;;  %v10950_v58 = vor.u32 %v12257_v48, %v10947_v20  ;;  %v12236_v48 = vld [vmem:[%s20670_s8 + $0x4] sm:$0xf0] }
 0x891   : > { %v7476_v16 = vpack.c.b16 %v7475_v55, %v7475_v55  ;;  %v10930_v8 = vor.u32 %v12254_v28, %v10929_v63  ;;  %v7696_v32 = vsel %vm21258_vm4, %v10982_v30, 0  ;;  %vm21259_vm7 = vmmov %vm21258_vm4  ;;  %v11126_v55 = vor.u32 %v12282_v50, %v11125_v15  ;;  %v11003_v63 = vld [vmem:[%s20670_s8 + $0x20] sm:$0xf]  ;;  %v12240_v28 = vld [vmem:[%s20670_s8 + $0x24] sm:$0xf0] }
 0x892   : > { %7711 = vmatpush.bf16.msra.mxu3 %v7696_v32  ;;  %v7805_v33 = vsel %vm21259_vm7, %v11044_v12, 0  ;;  %vm21260_vm8 = vmmov %vm21258_vm4  ;;  %v10931_v12 = vld [vmem:[%s20670_s8 + $0x98] sm:$0xf0]  ;;  %v11004_v2 = vor.u32 %v12240_v28, %v11003_v63  ;;  %v12235_v20 = vld [vmem:[%s20670_s8 + $0x4] sm:$0xf] }
 0x893   : > { %10901 = vmatmul.msk.bf16.vlgmr.msrb.gmra.mxu0 %vm7295_vm11, %v7476_v16  ;;  %10902 = vmatmul.msk.bf16.vlgmr.msrb.gmra.mxu1 %vm7295_vm11, %v7476_v16  ;;  %v7808_v45 = vsel %vm21260_vm8, %v11048_v41, 0  ;;  %v7548_v16 = vld [vmem:[%s20669_s7] sm:$0x3]  ;;  %vm21261_vm0 = vmmov %vm21258_vm4  ;;  %v10934_v3 = vor.u32 %v12253_v25, %v10931_v12  ;;  %v12277_v15 = vld [vmem:[%s20670_s8 + $0x154] sm:$0xf]  ;;  %vm7564_vm11 = vcmask 31744  }
 0x894   : > { %7704 = vmatpush.bf16.msra.mxu2 %v10930_v8  ;;  %7810 = vmatpush.bf16.msra.mxu0 %v7805_v33  ;;  %v7937_v42 = vsel %vm21261_vm0, %v11126_v55, 0  ;;  %v12239_v8 = vld [vmem:[%s20670_s8 + $0x24] sm:$0xf]  ;;  %v7550_v14 = vperm.slane %v7548_v16, 0  ;;  %v7551_v34 = vperm.slane %v7548_v16, 1  ;;  %vm21262_vm14 = vmmov %vm21261_vm0 }
 0x895   : > { %7823 = vmatpush.bf16.msra.mxu1 %v7808_v45  ;;  %v11101_v50 = vld [vmem:[%s20670_s8 + $0x140] sm:$0xf]  ;;  %v12276_v55 = vld [vmem:[%s20670_s8 + $0x144] sm:$0xf0]  ;;  %v12275_v16 = vld [vmem:[%s20670_s8 + $0x144] sm:$0xf] }
 0x896   : > { %7712 = vmatpush.bf16.msra.mxu3 %v10974_v0  ;;  %v12274_v63 = vld [vmem:[%s20670_s8 + $0x134] sm:$0xf0]  ;;  %v12273_v28 = vld [vmem:[%s20670_s8 + $0x134] sm:$0xf]  ;;  %v11077_v12 = vld [vmem:[%s20670_s8 + $0x110] sm:$0xf] }
 0x897   : > { %v7414_v51 = vpop.f32.mrf.mxu3 }
 0x898   : > { %7811 = vmatpush.bf16.msra.mxu0 %v11036_v24  ;;  %7705 = vmatpush.bf16.msra.mxu2 %v10922_v52  ;;  %v12255_v51 = vld [vmem:[%s20670_s8 + $0xa4] sm:$0xf]  ;;  %v10926_v24 = vor.u32 %v12251_v19, %v10923_v54  ;;  %v10988_v52 = vor.u32 %v12236_v48, %v10987_v17 }
 0x899   : > { %7824 = vmatpush.bf16.msra.mxu1 %v11040_v6 }
 0x89a   : > { %7713 = vmatpush.bf16.msra.mxu3 %v10966_v59  ;;  %v12238_v59 = vld [vmem:[%s20670_s8 + $0x14] sm:$0xf0] }
 0x89b   : > { %v10996_v27 = vor.u32 %v12238_v59, %v10995_v7 }
 0x89c   : > { %7812 = vmatpush.bf16.msra.mxu0 %v11028_v47  ;;  %7942 = vmatpush.bf16.msrb.mxu2 %v7937_v42  ;;  %v10997_v47 = vld [vmem:[%s20670_s8 + $0x18] sm:$0xf0] }
 0x89d   : > { %7825 = vmatpush.bf16.msra.mxu1 %v11032_v26  ;;  %v11117_v26 = vld [vmem:[%s20670_s8 + $0x160] sm:$0xf]  ;;  %v11000_v22 = vor.u32 %v12237_v36, %v10997_v47  ;;  %v11095_v42 = vld [vmem:[%s20670_s8 + $0x138] sm:$0xf0] }
 0x89e   : > { %7714 = vmatpush.bf16.msra.mxu3 %v10958_v43  ;;  %v11118_v9 = vor.u32 %v12280_v61, %v11117_v26  ;;  %v11119_v43 = vld [vmem:[%s20670_s8 + $0x168] sm:$0xf0]  ;;  %v8005_v61 = vld [vmem:[%s20672_s10 + $0x70] sm:$0xff] }
 0x89f   : > { %v19198_v18 = vpop.f32.mrf.mxu3  ;;  %v11122_v40 = vor.u32 %v12279_v46, %v11119_v43  ;;  %v8184_v46 = vunpack.c.l.b16 %v8005_v61  ;;  %v8185_v43 = vunpack.c.h.b16 %v8005_v61 }
 0x8a0   : > { %7813 = vmatpush.bf16.msra.mxu0 %v11020_v60  ;;  %v10989_v60 = vld [vmem:[%s20670_s8 + $0x8] sm:$0xf0]  ;;  %7943 = vmatpush.bf16.msrb.mxu2 %v11118_v9  ;;  %v12310_v9 = vld [vmem:[%s20672_s10 + $0xdc] sm:$0xf0] }
 0x8a1   : > { %7826 = vmatpush.bf16.msra.mxu1 %v11024_v4  ;;  %v10992_v4 = vor.u32 %v12235_v20, %v10989_v60  ;;  %v12309_v60 = vld [vmem:[%s20672_s10 + $0xdc] sm:$0xf] }
 0x8a2   : > { %7715 = vmatpush.bf16.msra.mxu3 %v10950_v58 }
 0x8a7   : > { %v7427_v5 = vpop.f32.mrf.mxu3 }
 0x8a8   : > { %v10939_v5 = vld [vmem:[%s20670_s8 + $0xa8] sm:$0xf0] }
 0x8a9   : > { %v10942_v31 = vor.u32 %v12255_v51, %v10939_v5  ;;  %v11103_v51 = vld [vmem:[%s20670_s8 + $0x148] sm:$0xf0]  ;;  %v11102_v5 = vor.u32 %v12276_v55, %v11101_v50 }
 0x8ab   : > { %7716 = vmatpush.bf16.msra.mxu3 %v10942_v31  ;;  %v12272_v31 = vld [vmem:[%s20670_s8 + $0x124] sm:$0xf0] }
 0x8af   : > { %7717 = vmatpush.bf16.msra.mxu3 %v10934_v3  ;;  %v11071_v3 = vld [vmem:[%s20670_s8 + $0x108] sm:$0xf0] }
 0x8b3   : > { %7718 = vmatpush.bf16.msra.mxu3 %v10926_v24 }
 0x8cb   : > { %v19200_v37 = vpop.f32.mrf.mxu0  ;;  %v19202_v35 = vpop.f32.mrf.mxu1 }
 0x8cc   : > { %v7413_v1 = vadd.f32 %v19192_v44, %v19200_v37  ;;  %v7426_v30 = vadd.f32 %v19198_v18, %v19202_v35  ;;  %v11008_v44 = vor.u32 %v12239_v8, %v11005_v53  ;;  %v12281_v18 = vld [vmem:[%s20670_s8 + $0x174] sm:$0xf]  ;;  %v11127_v35 = vld [vmem:[%s20670_s8 + $0x178] sm:$0x30]  ;;  %v11098_v53 = vor.u32 %v12273_v28, %v11095_v42  ;;  %v12307_v42 = vld [vmem:[%s20672_s10 + $0xcc] sm:$0xf] }
 0x8cd   : > { %v11130_v45 = vor.u32 %v12281_v18, %v11127_v35  ;;  %v12268_v18 = vld [vmem:[%s20670_s8 + $0x104] sm:$0xf0]  ;;  %v12267_v35 = vld [vmem:[%s20670_s8 + $0x104] sm:$0xf] }
 0x8cf   : > { %v7940_v38 = vsel %vm21262_vm14, %v11130_v45, 0 }
 0x8d0   : > { %7955 = vmatpush.bf16.msrb.mxu3 %v7940_v38 }
 0x8d3   : > { %v7310_v56 = vpop.f32.mrf.mxu0  ;;  %v7323_v29 = vpop.f32.mrf.mxu1 }
 0x8d4   : > { %v11012_v56 = vor.u32 %v12242_v23, %v11011_v62  ;;  %v11016_v29 = vor.u32 %v12241_v57, %v11013_v10  ;;  %v11109_v62 = vld [vmem:[%s20670_s8 + $0x150] sm:$0xf]  ;;  %v12278_v23 = vld [vmem:[%s20670_s8 + $0x154] sm:$0xf0]  ;;  %7956 = vmatpush.bf16.msrb.mxu3 %v11122_v40  ;;  %v11111_v10 = vld [vmem:[%s20670_s8 + $0x158] sm:$0xf0] }
 0x8d5   : > { %v11110_v57 = vor.u32 %v12278_v23, %v11109_v62  ;;  %v11114_v58 = vor.u32 %v12277_v15, %v11111_v10  ;;  %v8200_v62 = vpack.c.b16 %v8184_v46, %v8184_v46  ;;  %v8201_v23 = vpack.c.b16 %v8185_v43, %v8185_v43  ;;  %v12296_v15 = vld [vmem:[%s20672_s10 + $0x64] sm:$0xf0]  ;;  %v11258_v10 = vld [vmem:[%s20672_s10 + $0x68] sm:$0xf0]  ;;  %v12302_v46 = vld [vmem:[%s20672_s10 + $0x9c] sm:$0xf0] }
 0x8d6   : > { %7814 = vmatpush.bf16.msra.mxu0 %v11012_v56  ;;  %7827 = vmatpush.bf16.msra.mxu1 %v11016_v29  ;;  %v11106_v56 = vor.u32 %v12275_v16, %v11103_v51  ;;  %v11093_v29 = vld [vmem:[%s20670_s8 + $0x130] sm:$0xf]  ;;  %v12301_v43 = vld [vmem:[%s20672_s10 + $0x9c] sm:$0xf] }
 0x8d7   : > { %7944 = vmatpush.bf16.msrb.mxu2 %v11110_v57  ;;  %v11094_v8 = vor.u32 %v12274_v63, %v11093_v29  ;;  %v12295_v57 = vld [vmem:[%s20672_s10 + $0x64] sm:$0xf]  ;;  %v8219_v51 = vsel %vm8108_vm5, %v8200_v62, 0  ;;  %v12308_v29 = vld [vmem:[%s20672_s10 + $0xcc] sm:$0xf0] }
 0x8d8   : > { %7957 = vmatpush.bf16.msrb.mxu3 %v11114_v58 }
 0x8da   : > { %7815 = vmatpush.bf16.msra.mxu0 %v11004_v2  ;;  %7828 = vmatpush.bf16.msra.mxu1 %v11008_v44  ;;  %v12270_v2 = vld [vmem:[%s20670_s8 + $0x114] sm:$0xf0] }
 0x8db   : > { %7945 = vmatpush.bf16.msrb.mxu2 %v11102_v5  ;;  %v11078_v44 = vor.u32 %v12270_v2, %v11077_v12  ;;  %v8222_v5 = vsel %vm8108_vm5, %v8201_v23, 0  ;;  %v11182_v2 = vld [vmem:[%s20672_s10 + $0xb8] sm:$0xf] }
 0x8dc   : > { %7958 = vmatpush.bf16.msrb.mxu3 %v11106_v56  ;;  %v11190_v56 = vld [vmem:[%s20672_s10 + $0xc8] sm:$0xf] }
 0x8de   : > { %7816 = vmatpush.bf16.msra.mxu0 %v10996_v27  ;;  %7829 = vmatpush.bf16.msra.mxu1 %v11000_v22  ;;  %v11198_v22 = vld [vmem:[%s20672_s10 + $0xd8] sm:$0xf] }
 0x8df   : > { %7946 = vmatpush.bf16.msrb.mxu2 %v11094_v8  ;;  %v11199_v55 = vor.u32 %v12310_v9, %v11198_v22  ;;  %v11192_v8 = vld [vmem:[%s20672_s10 + $0xd0] sm:$0xf0]  ;;  %v11166_v9 = vld [vmem:[%s20672_s10 + $0x98] sm:$0xf] }
 0x8e0   : > { %7959 = vmatpush.bf16.msrb.mxu3 %v11098_v53  ;;  %v11195_v12 = vor.u32 %v12307_v42, %v11192_v8 }
 0x8e2   : > { %7817 = vmatpush.bf16.msra.mxu0 %v10988_v52  ;;  %7830 = vmatpush.bf16.msra.mxu1 %v10992_v4  ;;  %v11200_v52 = vld [vmem:[%s20672_s10 + $0xe0] sm:$0xf0]  ;;  %v11256_v4 = vld [vmem:[%s20672_s10 + $0x60] sm:$0xf] }
 0x8e3   : > { %v11203_v16 = vor.u32 %v12309_v60, %v11200_v52  ;;  %v11257_v53 = vor.u32 %v12296_v15, %v11256_v4  ;;  %v12288_v60 = vld [vmem:[%s20672_s10 + $0x24] sm:$0xf0]  ;;  %v12287_v52 = vld [vmem:[%s20672_s10 + $0x24] sm:$0xf]  ;;  %v11226_v4 = vld [vmem:[%s20672_s10 + $0x28] sm:$0xf0] }
 0x8e4   : > { %v11278_v15 = vld [vmem:[%s20672_s10 + $0x160] sm:$0xff] }
 0x8e5   : > { %v8311_v42 = vunpack.c.l.b16 %v11278_v15  ;;  %v8312_v8 = vunpack.c.h.b16 %v11278_v15 }
 0x910   : > { %v7529_v32 = vpop.f32.mrf.mxu0  ;;  %v7542_v41 = vpop.f32.mrf.mxu1 }
 0x911   : > { %v7546_v37 = vadd.f32 %v7529_v32, %v7413_v1  ;;  %v7547_v39 = vadd.f32 %v7542_v41, %v7426_v30  ;;  %v11085_v1 = vld [vmem:[%s20670_s8 + $0x120] sm:$0xf]  ;;  %v12271_v30 = vld [vmem:[%s20670_s8 + $0x124] sm:$0xf]  ;;  %v12269_v32 = vld [vmem:[%s20670_s8 + $0x114] sm:$0xf] }
 0x912   : > { %v11079_v41 = vld [vmem:[%s20670_s8 + $0x118] sm:$0xf0] }
 0x913   : > { %v19353_v0 = vadd.f32 %v7550_v14, %v7546_v37  ;;  %v7555_v33 = vadd.f32 %v7551_v34, %v7547_v39  ;;  %v11087_v14 = vld [vmem:[%s20670_s8 + $0x128] sm:$0xf0]  ;;  %v11086_v34 = vor.u32 %v12272_v31, %v11085_v1  ;;  %v11082_v37 = vor.u32 %v12269_v32, %v11079_v41  ;;  %v11069_v39 = vld [vmem:[%s20670_s8 + $0x100] sm:$0xf]  ;;  %v11248_v31 = vld [vmem:[%s20672_s10 + $0x50] sm:$0xf] }
 0x914   : > { %v11090_v25 = vor.u32 %v12271_v30, %v11087_v14  ;;  %v11070_v19 = vor.u32 %v12268_v18, %v11069_v39  ;;  %v11261_v1 = vor.u32 %v12295_v57, %v11258_v10  ;;  %v12294_v30 = vld [vmem:[%s20672_s10 + $0x54] sm:$0xf0]  ;;  %v12293_v14 = vld [vmem:[%s20672_s10 + $0x54] sm:$0xf]  ;;  %v12306_v32 = vld [vmem:[%s20672_s10 + $0xbc] sm:$0xf0] }
 0x915   : > { %v7556_v13 = vmax.f32 %v19353_v0, 0.0  ;;  %v7557_v49 = vmax.f32 %v7555_v33, 0.0  ;;  %7947 = vmatpush.bf16.msrb.mxu2 %v11086_v34  ;;  %v11147_v0 = vld [vmem:[%s20672_s10 + $0xe8] sm:$0xff]  ;;  %v11250_v34 = vld [vmem:[%s20672_s10 + $0x58] sm:$0xf0] }
 0x916   : > { %7960 = vmatpush.bf16.msrb.mxu3 %v11090_v25  ;;  %v8073_v26 = vunpack.c.h.b16 %v11147_v0  ;;  %v11191_v25 = vor.u32 %v12308_v29, %v11190_v56  ;;  %v12305_v41 = vld [vmem:[%s20672_s10 + $0xbc] sm:$0xf]  ;;  %v11253_v39 = vor.u32 %v12293_v14, %v11250_v34  ;;  %v11240_v18 = vld [vmem:[%s20672_s10 + $0x40] sm:$0xf]  ;;  %v11229_v29 = vor.u32 %v12287_v52, %v11226_v4  ;;  %v11150_v14 = vld [vmem:[%s20672_s10 + $0x78] sm:$0xf] }
 0x917   : > { %v12520_v6 = vpack.i.bf16 %v7557_v49, %v7556_v13  ;;  %v11074_v49 = vor.u32 %v12267_v35, %v11071_v3  ;;  %v12292_v35 = vld [vmem:[%s20672_s10 + $0x44] sm:$0xf0]  ;;  %v12291_v3 = vld [vmem:[%s20672_s10 + $0x44] sm:$0xf]  ;;  %v12298_v34 = vld [vmem:[%s20672_s10 + $0x7c] sm:$0xf0] }
 0x918   : > { %v7531_v11 = vpop.f32.mrf.mxu0  ;;  %v7544_v21 = vpop.f32.mrf.mxu1  ;;  %v8089_v20 = vpack.c.b16 %v8073_v26, %v8073_v26  ;;  %v7970_v26 = vld [vmem:[%s20671_s9] sm:$0x3]  ;;  %v12320_v4 = vld [vmem:[%s20672_s10 + $0x134] sm:$0xf0] }
 0x919   : > { %12521 = vrot.lane.b32.xlu2 %v12520_v6, %s12999_s30  ;;  %7948 = vmatpush.bf16.msrb.mxu2 %v11078_v44  ;;  %v11184_v44 = vld [vmem:[%s20672_s10 + $0xc0] sm:$0xf0]  ;;  %v7972_v23 = vperm.slane %v7970_v26, 0  ;;  %v7973_v10 = vperm.slane %v7970_v26, 1  ;;  %v12284_v26 = vld [vmem:[%s20672_s10 + $0x4] sm:$0xf0] }
 0x91a   : > { %7961 = vmatpush.bf16.msrb.mxu3 %v11082_v37  ;;  %v8113_v58 = vsel %vm8108_vm5, %v8089_v20, 0  ;;  %v11249_v37 = vor.u32 %v12294_v30, %v11248_v31  ;;  %v11224_v20 = vld [vmem:[%s20672_s10 + $0x20] sm:$0xf]  ;;  %s12951_s30 = scalar_lea.hbm %s12950_s20, 1 }
 0x91b   : > { %8128 = vmatpush.bf16.msrb.mxu1 %v8113_v58  ;;  %v11225_v56 = vor.u32 %v12288_v60, %v11224_v20  ;;  %v11323_v20 = vld [vmem:[%s20672_s10 + $0x148] sm:$0xf0]  ;;  %v11313_v60 = vld [vmem:[%s20672_s10 + $0x130] sm:$0xf]  ;;  %p12952_p11 = scmp.ne.s32.totalorder %s12950_s20, %s12951_s30  ;;  %p12957_p1 = scmp.lt.s32.totalorder %s12955_s2, %s12951_s30 }
 0x91c   : > { %v11314_v15 = vor.u32 %v12320_v4, %v11313_v60  ;;  %v11457_v60 = vld [vmem:[%s20674_s12 + $0x198] sm:$0xf0]  ;;  %v12371_v4 = vld [vmem:[%s20674_s12 + $0x16c] sm:$0xf0] }
 0x91d   : > { %7949 = vmatpush.bf16.msrb.mxu2 %v11070_v19  ;;  %v11183_v19 = vor.u32 %v12306_v32, %v11182_v2  ;;  %p12953_p12 = pnand %p12952_p11, %p13135_p5  ;;  %p12958_p2 = por %p12957_p1, %p12956_p0 }
 0x91e   : > { %7962 = vmatpush.bf16.msrb.mxu3 %v11074_v49  ;;  %v12304_v49 = vld [vmem:[%s20672_s10 + $0xac] sm:$0xf0] }
 0x91f   : > { %8129 = vmatpush.bf16.msrb.mxu1 %v11203_v16  ;;  %p12954_p13 = pneg %p12953_p12 }
 0x921   : > { %p12959_p3 = pnand %p12958_p2, %p12954_p13 }
 0x923   : > { %8130 = vmatpush.bf16.msrb.mxu1 %v11195_v12  ;;  %v11152_v12 = vld [vmem:[%s20672_s10 + $0x80] sm:$0xf0] }
 0x973   : > { %v12522_v33 = vpop.permute.xlu2 %12521 }
 0x974   : > { %v12524_v54 = vunpack.i.h.bf16 %v12522_v33  ;;  %v12523_v45 = vunpack.i.l.bf16 %v12522_v33  ;;  %v11242_v33 = vld [vmem:[%s20672_s10 + $0x48] sm:$0xf0] }
 0x976   : > { %v7565_v24 = vsel %vm7564_vm11, %v12523_v45, %v12524_v54  ;;  %v11187_v54 = vor.u32 %v12305_v41, %v11184_v44  ;;  %v11174_v45 = vld [vmem:[%s20672_s10 + $0xa8] sm:$0xf]  ;;  %v8327_v41 = vpack.c.b16 %v8311_v42, %v8311_v42  ;;  %v8328_v44 = vpack.c.b16 %v8312_v8, %v8312_v8  ;;  %v12313_v8 = vld [vmem:[%s20672_s10 + $0x104] sm:$0xf] }
 0x977   : > { %v7567_v6 = vmax.f32 %v7556_v13, %v7565_v24  ;;  %v8072_v13 = vunpack.c.l.b16 %v11147_v0  ;;  %v12289_v0 = vld [vmem:[%s20672_s10 + $0x34] sm:$0xf]  ;;  %v11175_v61 = vor.u32 %v12304_v49, %v11174_v45  ;;  %v12286_v45 = vld [vmem:[%s20672_s10 + $0x14] sm:$0xf0]  ;;  %v12314_v42 = vld [vmem:[%s20672_s10 + $0x104] sm:$0xf0] }
 0x978   : > { %8131 = vmatpush.bf16.msrb.mxu1 %v11187_v54  ;;  %v11216_v54 = vld [vmem:[%s20672_s10 + $0x10] sm:$0xf]  ;;  %v12285_v49 = vld [vmem:[%s20672_s10 + $0x14] sm:$0xf] }
 0x979   : > { %v7568_v11 = vpack.c.bf16 %v7567_v6, %v7567_v6  ;;  %v8088_v48 = vpack.c.b16 %v8072_v13, %v8072_v13  ;;  %v11234_v13 = vld [vmem:[%s20672_s10 + $0x38] sm:$0xf0] }
 0x97b   : > { %v7605_v21 = vshll.u32 %v7568_v11, 16  ;;  %11049 = vmatmul.msk.bf16.vlgmr.msra.gmra.mxu0 %vm7687_vm9, %v7568_v11  ;;  %11050 = vmatmul.msk.bf16.vlgmr.msra.gmra.mxu1 %vm7687_vm9, %v7568_v11  ;;  %v7603_v38 = vshrl.u32 %v7568_v11, 16  ;;  %v7854_v36 = vrot.slane %v7568_v11, 1  ;;  %v8110_v50 = vsel %vm8108_vm5, %v8088_v48, 0  ;;  %v12303_v11 = vld [vmem:[%s20672_s10 + $0xac] sm:$0xf] }
 0x97c   : > { %8115 = vmatpush.bf16.msrb.mxu0 %v8110_v50  ;;  %v11237_v48 = vor.u32 %v12289_v0, %v11234_v13  ;;  %v11167_v50 = vor.u32 %v12302_v46, %v11166_v9  ;;  %v11208_v0 = vld [vmem:[%s20672_s10] sm:$0xf] }
 0x97d   : > { %v7607_v7 = vrot.slane %v7605_v21, 1  ;;  %v11176_v21 = vld [vmem:[%s20672_s10 + $0xb0] sm:$0xf0]  ;;  %v11209_v9 = vor.u32 %v12284_v26, %v11208_v0  ;;  %v11473_v0 = vld [vmem:[%s20674_s12 + $0x1b8] sm:$0xf0] }
 0x97e   : > { %v11179_v22 = vor.u32 %v12303_v11, %v11176_v21  ;;  %v11329_v11 = vld [vmem:[%s20672_s10 + $0x150] sm:$0xf]  ;;  %v12324_v21 = vld [vmem:[%s20672_s10 + $0x154] sm:$0xf0] }
 0x97f   : > { %v7608_v59 = vor.u32 %v7607_v7, %v7603_v38  ;;  %v11241_v38 = vor.u32 %v12292_v35, %v11240_v18  ;;  %v11245_v7 = vor.u32 %v12291_v3, %v11242_v33  ;;  %v8347_v33 = vsel %vm8108_vm5, %v8327_v41, 0 }
 0x980   : > { %8116 = vmatpush.bf16.msrb.mxu0 %v11199_v55  ;;  %8132 = vmatpush.bf16.msrb.mxu1 %v11179_v22  ;;  %v11158_v55 = vld [vmem:[%s20672_s10 + $0x88] sm:$0xf]  ;;  %v11210_v22 = vld [vmem:[%s20672_s10 + $0x8] sm:$0xf0] }
 0x981   : > { %10983 = vmatmul.msk.bf16.vlgmr.msra.gmra.mxu2 %vm7687_vm9, %v7608_v59  ;;  %10984 = vmatmul.msk.bf16.vlgmr.msra.gmra.mxu3 %vm7687_vm9, %v7608_v59  ;;  %v11232_v59 = vld [vmem:[%s20672_s10 + $0x30] sm:$0xf] }
 0x982   : > { %8224 = vmatpush.bf16.msra.mxu2 %v8219_v51  ;;  %8237 = vmatpush.bf16.msra.mxu3 %v8222_v5  ;;  %v11160_v5 = vld [vmem:[%s20672_s10 + $0x90] sm:$0xf0] }
 0x984   : > { %8117 = vmatpush.bf16.msrb.mxu0 %v11191_v25  ;;  %v12297_v25 = vld [vmem:[%s20672_s10 + $0x7c] sm:$0xf] }
 0x985   : > { %v11155_v18 = vor.u32 %v12297_v25, %v11152_v12  ;;  %v12311_v25 = vld [vmem:[%s20672_s10 + $0xf4] sm:$0xf]  ;;  %v11283_v12 = vld [vmem:[%s20672_s10 + $0xf8] sm:$0xf0] }
 0x986   : > { %8225 = vmatpush.bf16.msra.mxu2 %v11257_v53  ;;  %8238 = vmatpush.bf16.msra.mxu3 %v11261_v1 }
 0x988   : > { %8118 = vmatpush.bf16.msrb.mxu0 %v11183_v19  ;;  %v8350_v19 = vsel %vm8108_vm5, %v8328_v44, 0 }
 0x98a   : > { %8226 = vmatpush.bf16.msra.mxu2 %v11249_v37  ;;  %8239 = vmatpush.bf16.msra.mxu3 %v11253_v39  ;;  %v11151_v39 = vor.u32 %v12298_v34, %v11150_v14  ;;  %v11281_v14 = vld [vmem:[%s20672_s10 + $0xf0] sm:$0xf]  ;;  %v12312_v34 = vld [vmem:[%s20672_s10 + $0xf4] sm:$0xf0] }
 0x98b   : > { %v11282_v41 = vor.u32 %v12312_v34, %v11281_v14  ;;  %v11425_v14 = vld [vmem:[%s20674_s12 + $0x158] sm:$0xf0] }
 0x98c   : > { %8119 = vmatpush.bf16.msrb.mxu0 %v11175_v61  ;;  %v12283_v61 = vld [vmem:[%s20672_s10 + $0x4] sm:$0xf] }
 0x98d   : > { %v11213_v46 = vor.u32 %v12283_v61, %v11210_v22  ;;  %v12375_v61 = vld [vmem:[%s20674_s12 + $0x18c] sm:$0xf0]  ;;  %v12373_v22 = vld [vmem:[%s20674_s12 + $0x184] sm:$0xf] }
 0x98e   : > { %8227 = vmatpush.bf16.msra.mxu2 %v11241_v38  ;;  %8240 = vmatpush.bf16.msra.mxu3 %v11245_v7  ;;  %v11330_v7 = vor.u32 %v12324_v21, %v11329_v11  ;;  %v11465_v11 = vld [vmem:[%s20674_s12 + $0x1b0] sm:$0xf0]  ;;  %v11471_v21 = vld [vmem:[%s20674_s12 + $0x1a8] sm:$0xf] }
 0x990   : > { %8120 = vmatpush.bf16.msrb.mxu0 %v11167_v50  ;;  %v12318_v50 = vld [vmem:[%s20672_s10 + $0x124] sm:$0xf0] }
 0x991   : > { %11131 = vmatmul.msk.bf16.vlgmr.msrb.gmra.mxu2 %vm7687_vm9, %v7854_v36  ;;  %11132 = vmatmul.msk.bf16.vlgmr.msrb.gmra.mxu3 %vm7687_vm9, %v7854_v36  ;;  %v12290_v36 = vld [vmem:[%s20672_s10 + $0x34] sm:$0xf0] }
 0x992   : > { %8241 = vmatpush.bf16.msra.mxu3 %v11237_v48 }
 0x996   : > { %8242 = vmatpush.bf16.msra.mxu3 %v11229_v29 }
 0x9f8   : > { %v19475_v27 = vpop.f32.mrf.mxu0  ;;  %v19477_v47 = vpop.f32.mrf.mxu1 }
 0xa00   : > { %v7821_v17 = vpop.f32.mrf.mxu0  ;;  %v7834_v40 = vpop.f32.mrf.mxu1 }
 0xa01   : > { %v11168_v17 = vld [vmem:[%s20672_s10 + $0xa0] sm:$0xf0]  ;;  %v11233_v40 = vor.u32 %v12290_v36, %v11232_v59  ;;  %v12323_v59 = vld [vmem:[%s20672_s10 + $0x154] sm:$0xf]  ;;  %v11331_v36 = vld [vmem:[%s20672_s10 + $0x158] sm:$0xf0] }
 0xa02   : > { %v11171_v58 = vor.u32 %v12301_v43, %v11168_v17  ;;  %v11334_v13 = vor.u32 %v12323_v59, %v11331_v36  ;;  %v11321_v43 = vld [vmem:[%s20672_s10 + $0x140] sm:$0xf]  ;;  %v12322_v17 = vld [vmem:[%s20672_s10 + $0x144] sm:$0xf0]  ;;  %v12378_v36 = vld [vmem:[%s20674_s12 + $0x1ac] sm:$0xf] }
 0xa03   : > { %8228 = vmatpush.bf16.msra.mxu2 %v11233_v40  ;;  %v12321_v40 = vld [vmem:[%s20672_s10 + $0x144] sm:$0xf]  ;;  %v11322_v48 = vor.u32 %v12322_v17, %v11321_v43  ;;  %v11476_v26 = vor.u32 %v12378_v36, %v11473_v0  ;;  %v11455_v17 = vld [vmem:[%s20674_s12 + $0x188] sm:$0xf]  ;;  %v12360_v0 = vld [vmem:[%s20674_s12 + $0x114] sm:$0xf0] }
 0xa04   : > { %v19519_v63 = vpop.f32.mrf.mxu2  ;;  %v19521_v28 = vpop.f32.mrf.mxu3  ;;  %8133 = vmatpush.bf16.msrb.mxu1 %v11171_v58  ;;  %v11326_v52 = vor.u32 %v12321_v40, %v11323_v20  ;;  %v12317_v58 = vld [vmem:[%s20672_s10 + $0x124] sm:$0xf]  ;;  %v12376_v40 = vld [vmem:[%s20674_s12 + $0x194] sm:$0xf0]  ;;  %v11391_v36 = vld [vmem:[%s20674_s12 + $0x108] sm:$0xf] }
 0xa05   : > { %v7820_v62 = vadd.f32 %v19475_v27, %v19519_v63  ;;  %v7833_v57 = vadd.f32 %v19477_v47, %v19521_v28  ;;  %v12300_v27 = vld [vmem:[%s20672_s10 + $0x8c] sm:$0xf0]  ;;  %v12299_v47 = vld [vmem:[%s20672_s10 + $0x8c] sm:$0xf]  ;;  %v11456_v20 = vor.u32 %v12376_v40, %v11455_v17  ;;  %v11392_v40 = vor.u32 %v12360_v0, %v11391_v36  ;;  %v12344_v36 = vld [vmem:[%s20674_s12 + $0x94] sm:$0xf0] }
 0xa06   : > { %v11159_v53 = vor.u32 %v12300_v27, %v11158_v55  ;;  %v11163_v30 = vor.u32 %v12299_v47, %v11160_v5  ;;  %v11307_v55 = vld [vmem:[%s20672_s10 + $0x128] sm:$0xf0]  ;;  %v12316_v47 = vld [vmem:[%s20672_s10 + $0x114] sm:$0xf0]  ;;  %v12315_v5 = vld [vmem:[%s20672_s10 + $0x114] sm:$0xf] }
 0xa07   : > { %8229 = vmatpush.bf16.msra.mxu2 %v11225_v56  ;;  %v11299_v56 = vld [vmem:[%s20672_s10 + $0x118] sm:$0xf0]  ;;  %v12342_v0 = vld [vmem:[%s20674_s12 + $0x8c] sm:$0xf] }
 0xa08   : > { %8121 = vmatpush.bf16.msrb.mxu0 %v11159_v53  ;;  %8134 = vmatpush.bf16.msrb.mxu1 %v11163_v30  ;;  %v11291_v53 = vld [vmem:[%s20672_s10 + $0x108] sm:$0xf0] }
 0xa09   : > { %v11294_v30 = vor.u32 %v12313_v8, %v11291_v53  ;;  %v11417_v8 = vld [vmem:[%s20674_s12 + $0x150] sm:$0xf0]  ;;  %v11423_v53 = vld [vmem:[%s20674_s12 + $0x148] sm:$0xf] }
 0xa0c   : > { %v7709_v24 = vpop.f32.mrf.mxu2  ;;  %v7722_v6 = vpop.f32.mrf.mxu3  ;;  %8122 = vmatpush.bf16.msrb.mxu0 %v11151_v39  ;;  %8135 = vmatpush.bf16.msrb.mxu1 %v11155_v18  ;;  %v11286_v39 = vor.u32 %v12311_v25, %v11283_v12 }
 0xa0d   : > { %v11217_v24 = vor.u32 %v12286_v45, %v11216_v54  ;;  %v11218_v6 = vld [vmem:[%s20672_s10 + $0x18] sm:$0xf0] }
 0xa0e   : > { %v11221_v38 = vor.u32 %v12285_v49, %v11218_v6 }
 0xa0f   : > { %8230 = vmatpush.bf16.msra.mxu2 %v11217_v24  ;;  %v12377_v24 = vld [vmem:[%s20674_s12 + $0x1a4] sm:$0xf] }
 0xa10   : > { %8352 = vmatpush.bf16.msra.mxu0 %v8347_v33  ;;  %8365 = vmatpush.bf16.msra.mxu1 %v8350_v19 }
 0xa11   : > { %8243 = vmatpush.bf16.msra.mxu3 %v11221_v38  ;;  %v12380_v38 = vld [vmem:[%s20674_s12 + $0x1b4] sm:$0xf0] }
 0xa12   : > { %v11472_v59 = vor.u32 %v12380_v38, %v11471_v21  ;;  %v12359_v21 = vld [vmem:[%s20674_s12 + $0x10c] sm:$0xf0]  ;;  %v12357_v38 = vld [vmem:[%s20674_s12 + $0x104] sm:$0xf] }
 0xa13   : > { %8231 = vmatpush.bf16.msra.mxu2 %v11209_v9  ;;  %v11449_v9 = vld [vmem:[%s20674_s12 + $0x190] sm:$0xf0] }
 0xa14   : > { %v7951_v16 = vpop.f32.mrf.mxu2  ;;  %v7964_v51 = vpop.f32.mrf.mxu3  ;;  %8353 = vmatpush.bf16.msra.mxu0 %v11330_v7  ;;  %8366 = vmatpush.bf16.msra.mxu1 %v11334_v13  ;;  %v11468_v7 = vor.u32 %v12377_v24, %v11465_v11  ;;  %v11447_v13 = vld [vmem:[%s20674_s12 + $0x180] sm:$0xf]  ;;  %v11452_v43 = vor.u32 %v12373_v22, %v11449_v9 }
 0xa15   : > { %v7968_v63 = vadd.f32 %v7951_v16, %v7820_v62  ;;  %v7969_v28 = vadd.f32 %v7964_v51, %v7833_v57  ;;  %v12319_v62 = vld [vmem:[%s20672_s10 + $0x134] sm:$0xf]  ;;  %8244 = vmatpush.bf16.msra.mxu3 %v11213_v46  ;;  %v11310_v16 = vor.u32 %v12317_v58, %v11307_v55  ;;  %v11297_v51 = vld [vmem:[%s20672_s10 + $0x110] sm:$0xf]  ;;  %v11448_v46 = vor.u32 %v12375_v61, %v11447_v13  ;;  %v12372_v55 = vld [vmem:[%s20674_s12 + $0x174] sm:$0xf0] }
 0xa16   : > { %v11298_v29 = vor.u32 %v12316_v47, %v11297_v51  ;;  %v11383_v11 = vld [vmem:[%s20674_s12 + $0x100] sm:$0xf]  ;;  %v12358_v13 = vld [vmem:[%s20674_s12 + $0x10c] sm:$0xf] }
 0xa17   : > { %v19635_v1 = vadd.f32 %v7972_v23, %v7968_v63  ;;  %v7977_v31 = vadd.f32 %v7973_v10, %v7969_v28  ;;  %v11315_v23 = vld [vmem:[%s20672_s10 + $0x138] sm:$0xf0]  ;;  %v11305_v10 = vld [vmem:[%s20672_s10 + $0x120] sm:$0xf]  ;;  %v11302_v63 = vor.u32 %v12315_v5, %v11299_v56  ;;  %v11384_v9 = vor.u32 %v12359_v21, %v11383_v11 }
 0xa18   : > { %8354 = vmatpush.bf16.msra.mxu0 %v11322_v48  ;;  %8367 = vmatpush.bf16.msra.mxu1 %v11326_v52  ;;  %v11318_v57 = vor.u32 %v12319_v62, %v11315_v23  ;;  %v11306_v27 = vor.u32 %v12318_v50, %v11305_v10  ;;  %v11289_v28 = vld [vmem:[%s20672_s10 + $0x100] sm:$0xf]  ;;  %v12374_v48 = vld [vmem:[%s20674_s12 + $0x18c] sm:$0xf]  ;;  %v12369_v23 = vld [vmem:[%s20674_s12 + $0x164] sm:$0xf] }
 0xa19   : > { %v7978_v2 = vmax.f32 %v19635_v1, 0.0  ;;  %v7979_v32 = vmax.f32 %v7977_v31, 0.0  ;;  %v11290_v31 = vor.u32 %v12314_v42, %v11289_v28  ;;  %v11463_v1 = vld [vmem:[%s20674_s12 + $0x1a0] sm:$0xf]  ;;  %8619 = vmatpush.bf16.msrb.mxu3 %v11468_v7  ;;  %v11460_v62 = vor.u32 %v12374_v48, %v11457_v60  ;;  %v12365_v28 = vld [vmem:[%s20674_s12 + $0x144] sm:$0xf] }
 0xa1a   : > { %v11431_v52 = vld [vmem:[%s20674_s12 + $0x160] sm:$0xf]  ;;  %v11420_v25 = vor.u32 %v12365_v28, %v11417_v8  ;;  %v12353_v48 = vld [vmem:[%s20674_s12 + $0xe4] sm:$0xf]  ;;  %v11375_v60 = vld [vmem:[%s20674_s12 + $0xe8] sm:$0xf] }
 0xa1b   : > { %v12525_v37 = vpack.i.bf16 %v7979_v32, %v7978_v2  ;;  %v11432_v58 = vor.u32 %v12371_v4, %v11431_v52  ;;  %v12356_v4 = vld [vmem:[%s20674_s12 + $0xf4] sm:$0xf0]  ;;  %v11589_v8 = vld [vmem:[%s20674_s12 + $0xd8] sm:$0xf0] }
 0xa1c   : > { %v7953_v35 = vpop.f32.mrf.mxu2  ;;  %v7966_v3 = vpop.f32.mrf.mxu3  ;;  %8355 = vmatpush.bf16.msra.mxu0 %v11314_v15  ;;  %8368 = vmatpush.bf16.msra.mxu1 %v11318_v57  ;;  %v11433_v15 = vld [vmem:[%s20674_s12 + $0x170] sm:$0xf0]  ;;  %v11439_v57 = vld [vmem:[%s20674_s12 + $0x168] sm:$0xf]  ;;  %v11376_v28 = vor.u32 %v12356_v4, %v11375_v60  ;;  %v12338_v60 = vld [vmem:[%s20674_s12 + $0x6c] sm:$0xf] }
 0xa1d   : > { %12526 = vrot.lane.b32.xlu0 %v12525_v37, %s13000_s23  ;;  %8620 = vmatpush.bf16.msrb.mxu3 %v11452_v43  ;;  %v11436_v5 = vor.u32 %v12369_v23, %v11433_v15  ;;  %v11440_v56 = vor.u32 %v12372_v55, %v11439_v57  ;;  %v12355_v43 = vld [vmem:[%s20674_s12 + $0xec] sm:$0xf0]  ;;  %v11377_v23 = vld [vmem:[%s20674_s12 + $0xf8] sm:$0xf0]  ;;  %s582_s23 = scalar_lea.vmem [#allocation2], %s581_s21 }
 0xa1e   : > { %v12351_v55 = vld [vmem:[%s20674_s12 + $0xcc] sm:$0xf0]  ;;  %s9734_s24 = sshll.u32 %s582_s23, 4  ;;  %s9735_s24 = int_to_ptr.vmem [resolvable:$true] %s9734_s24 }
 0xa20   : > { %8356 = vmatpush.bf16.msra.mxu0 %v11306_v27  ;;  %8369 = vmatpush.bf16.msra.mxu1 %v11310_v16  ;;  %v12370_v27 = vld [vmem:[%s20674_s12 + $0x16c] sm:$0xf]  ;;  %v11441_v16 = vld [vmem:[%s20674_s12 + $0x178] sm:$0xf0] }
 0xa21   : > { %v11444_v42 = vor.u32 %v12370_v27, %v11441_v16  ;;  %8621 = vmatpush.bf16.msrb.mxu3 %v11436_v5  ;;  %v12349_v27 = vld [vmem:[%s20674_s12 + $0xc4] sm:$0xf] }
 0xa24   : > { %8357 = vmatpush.bf16.msra.mxu0 %v11298_v29  ;;  %8370 = vmatpush.bf16.msra.mxu1 %v11302_v63  ;;  %v11415_v29 = vld [vmem:[%s20674_s12 + $0x140] sm:$0xf]  ;;  %v12367_v63 = vld [vmem:[%s20674_s12 + $0x14c] sm:$0xf0] }
 0xa25   : > { %v11416_v34 = vor.u32 %v12367_v63, %v11415_v29  ;;  %8622 = vmatpush.bf16.msrb.mxu3 %v11420_v25 }
 0xa28   : > { %8358 = vmatpush.bf16.msra.mxu0 %v11290_v31  ;;  %8371 = vmatpush.bf16.msra.mxu1 %v11294_v30  ;;  %v12368_v31 = vld [vmem:[%s20674_s12 + $0x154] sm:$0xf0]  ;;  %v12366_v30 = vld [vmem:[%s20674_s12 + $0x14c] sm:$0xf] }
 0xa29   : > { %v11424_v12 = vor.u32 %v12368_v31, %v11423_v53 }
 0xa2c   : > { %8359 = vmatpush.bf16.msra.mxu0 %v11282_v41  ;;  %8372 = vmatpush.bf16.msra.mxu1 %v11286_v39  ;;  %v12363_v41 = vld [vmem:[%s20674_s12 + $0x12c] sm:$0xf0]  ;;  %v11401_v39 = vld [vmem:[%s20674_s12 + $0x130] sm:$0xf0] }
 0xa8f   : > { %v12527_v32 = vpop.permute.xlu0 %12526 }
 0xa90   : > { %v12529_v44 = vunpack.i.h.bf16 %v12527_v32  ;;  %v12528_v37 = vunpack.i.l.bf16 %v12527_v32  ;;  %v11399_v32 = vld [vmem:[%s20674_s12 + $0x120] sm:$0xf] }
 0xa92   : > { %v7987_v18 = vsel %vm7986_vm10, %v12528_v37, %v12529_v44  ;;  %v12361_v44 = vld [vmem:[%s20674_s12 + $0x124] sm:$0xf]  ;;  %v11428_v37 = vor.u32 %v12366_v30, %v11425_v14 }
 0xa93   : > { %v7989_v35 = vmax.f32 %v7978_v2, %v7987_v18  ;;  %v12379_v2 = vld [vmem:[%s20674_s12 + $0x1ac] sm:$0xf0]  ;;  %v11407_v18 = vld [vmem:[%s20674_s12 + $0x128] sm:$0xf]  ;;  %v11404_v24 = vor.u32 %v12361_v44, %v11401_v39 }
 0xa94   : > { %v11464_v6 = vor.u32 %v12379_v2, %v11463_v1  ;;  %v11571_v39 = vld [vmem:[%s20674_s12 + $0xa8] sm:$0xf] }
 0xa95   : > { %v7990_v3 = vpack.c.bf16 %v7989_v35, %v7989_v35  ;;  %v12364_v35 = vld [vmem:[%s20674_s12 + $0x134] sm:$0xf0]  ;;  %8623 = vmatpush.bf16.msrb.mxu3 %v11404_v24  ;;  %v12343_v24 = vld [vmem:[%s20674_s12 + $0x8c] sm:$0xf0] }
 0xa96   : > { %8606 = vmatpush.bf16.msrb.mxu2 %v11464_v6  ;;  %v11408_v6 = vor.u32 %v12364_v35, %v11407_v18  ;;  %v12348_v18 = vld [vmem:[%s20674_s12 + $0xb4] sm:$0xf0] }
 0xa97   : > { %v8025_v33 = vshll.u32 %v7990_v3, 16  ;;  %11262 = vmatmul.msk.bf16.vlgmr.msra.gmra.mxu2 %vm8104_vm6, %v7990_v3  ;;  %11263 = vmatmul.msk.bf16.vlgmr.msra.gmra.mxu3 %vm8104_vm6, %v7990_v3  ;;  %v8023_v19 = vshrl.u32 %v7990_v3, 16  ;;  %v8267_v49 = vrot.slane %v7990_v3, 1  ;;  %v12362_v3 = vld [vmem:[%s20674_s12 + $0x12c] sm:$0xf] }
 0xa99   : > { %v8027_v54 = vrot.slane %v8025_v33, 1  ;;  %v11409_v33 = vld [vmem:[%s20674_s12 + $0x138] sm:$0xf0] }
 0xa9a   : > { %8607 = vmatpush.bf16.msrb.mxu2 %v11448_v46  ;;  %v11412_v7 = vor.u32 %v12362_v3, %v11409_v33  ;;  %v11367_v46 = vld [vmem:[%s20674_s12 + $0xe0] sm:$0xf]  ;;  %v12346_v33 = vld [vmem:[%s20674_s12 + $0xac] sm:$0xf] }
 0xa9b   : > { %v8028_v45 = vor.u32 %v8027_v54, %v8023_v19 }
 0xa9d   : > { %11204 = vmatmul.msk.bf16.vlgmr.msrb.gmra.mxu0 %vm8104_vm6, %v8028_v45  ;;  %11205 = vmatmul.msk.bf16.vlgmr.msrb.gmra.mxu1 %vm8104_vm6, %v8028_v45  ;;  %v8380_v45 = vld [vmem:[%s20673_s11] sm:$0x3] }
 0xa9e   : > { %8632 = vmatpush.bf16.msrb.mxu0 %v11472_v59  ;;  %8645 = vmatpush.bf16.msrb.mxu1 %v11476_v26  ;;  %v11385_v59 = vld [vmem:[%s20674_s12 + $0x110] sm:$0xf0]  ;;  %v11393_v26 = vld [vmem:[%s20674_s12 + $0x118] sm:$0xf0]  ;;  %v8382_v61 = vperm.slane %v8380_v45, 0  ;;  %v8383_v22 = vperm.slane %v8380_v45, 1 }
 0xa9f   : > { %8608 = vmatpush.bf16.msrb.mxu2 %v11432_v58  ;;  %v11388_v17 = vor.u32 %v12357_v38, %v11385_v59  ;;  %v11396_v52 = vor.u32 %v12358_v13, %v11393_v26  ;;  %v11579_v58 = vld [vmem:[%s20674_s12 + $0xc0] sm:$0xf]  ;;  %v11555_v59 = vld [vmem:[%s20674_s12 + $0x88] sm:$0xf]  ;;  %v11557_v13 = vld [vmem:[%s20674_s12 + $0x98] sm:$0xf0] }
 0xaa0   : > { %v11580_v31 = vor.u32 %v12351_v55, %v11579_v58  ;;  %v12335_v58 = vld [vmem:[%s20674_s12 + $0x4c] sm:$0xf0]  ;;  %v12333_v55 = vld [vmem:[%s20674_s12 + $0x44] sm:$0xf] }
 0xaa1   : > { %8624 = vmatpush.bf16.msrb.mxu3 %v11388_v17  ;;  %v11560_v17 = vor.u32 %v12342_v0, %v11557_v13  ;;  %v11725_v0 = vld [vmem:[%s20674_s12 + $0x290] sm:$0xf0]  ;;  %v12408_v13 = vld [vmem:[%s20674_s12 + $0x294] sm:$0xf0] }
 0xaa2   : > { %8633 = vmatpush.bf16.msrb.mxu0 %v11456_v20  ;;  %8646 = vmatpush.bf16.msrb.mxu1 %v11460_v62  ;;  %v11369_v20 = vld [vmem:[%s20674_s12 + $0xf0] sm:$0xf0]  ;;  %v12354_v62 = vld [vmem:[%s20674_s12 + $0xec] sm:$0xf] }
 0xaa3   : > { %8609 = vmatpush.bf16.msrb.mxu2 %v11416_v34  ;;  %v11380_v53 = vor.u32 %v12354_v62, %v11377_v23 }
 0xaa6   : > { %8634 = vmatpush.bf16.msrb.mxu0 %v11440_v56  ;;  %8647 = vmatpush.bf16.msrb.mxu1 %v11444_v42  ;;  %v11368_v56 = vor.u32 %v12355_v43, %v11367_v46  ;;  %v12350_v42 = vld [vmem:[%s20674_s12 + $0xcc] sm:$0xf]  ;;  %v12339_v46 = vld [vmem:[%s20674_s12 + $0x6c] sm:$0xf0]  ;;  %v12337_v43 = vld [vmem:[%s20674_s12 + $0x64] sm:$0xf] }
 0xaa7   : > { %v11592_v44 = vor.u32 %v12350_v42, %v11589_v8  ;;  %v12329_v42 = vld [vmem:[%s20674_s12 + $0x24] sm:$0xf]  ;;  %v11501_v8 = vld [vmem:[%s20674_s12 + $0x30] sm:$0xf0] }
 0xaaa   : > { %8635 = vmatpush.bf16.msrb.mxu0 %v11424_v12  ;;  %8648 = vmatpush.bf16.msrb.mxu1 %v11428_v37  ;;  %v11563_v12 = vld [vmem:[%s20674_s12 + $0xa0] sm:$0xf]  ;;  %v11565_v37 = vld [vmem:[%s20674_s12 + $0xb0] sm:$0xf0] }
 0xaad   : > { %11335 = vmatmul.msk.bf16.vlgmr.msra.gmra.mxu0 %vm8104_vm6, %v8267_v49  ;;  %11336 = vmatmul.msk.bf16.vlgmr.msra.gmra.mxu1 %vm8104_vm6, %v8267_v49  ;;  %v11400_v49 = vor.u32 %v12363_v41, %v11399_v32  ;;  %v12347_v32 = vld [vmem:[%s20674_s12 + $0xac] sm:$0xf0]  ;;  %v12345_v41 = vld [vmem:[%s20674_s12 + $0xa4] sm:$0xf] }
 0xaae   : > { %8636 = vmatpush.bf16.msrb.mxu0 %v11408_v6  ;;  %8649 = vmatpush.bf16.msrb.mxu1 %v11412_v7  ;;  %v12341_v6 = vld [vmem:[%s20674_s12 + $0x84] sm:$0xf]  ;;  %v11549_v7 = vld [vmem:[%s20674_s12 + $0x90] sm:$0xf0] }
 0xaaf   : > { %8610 = vmatpush.bf16.msrb.mxu2 %v11400_v49  ;;  %v11568_v49 = vor.u32 %v12345_v41, %v11565_v37  ;;  %v11483_v41 = vld [vmem:[%s20674_s12] sm:$0xf] }
 0xab2   : > { %8637 = vmatpush.bf16.msrb.mxu0 %v11392_v40  ;;  %8650 = vmatpush.bf16.msrb.mxu1 %v11396_v52  ;;  %v11533_v40 = vld [vmem:[%s20674_s12 + $0x70] sm:$0xf0]  ;;  %v11541_v52 = vld [vmem:[%s20674_s12 + $0x78] sm:$0xf0] }
 0xab3   : > { %8611 = vmatpush.bf16.msrb.mxu2 %v11384_v9  ;;  %v11531_v9 = vld [vmem:[%s20674_s12 + $0x60] sm:$0xf]  ;;  %v11536_v62 = vor.u32 %v12337_v43, %v11533_v40 }
 0xab4   : > { %v11532_v4 = vor.u32 %v12339_v46, %v11531_v9  ;;  %v11707_v43 = vld [vmem:[%s20674_s12 + $0x260] sm:$0xf] }
 0xab6   : > { %8638 = vmatpush.bf16.msrb.mxu0 %v11376_v28  ;;  %8651 = vmatpush.bf16.msrb.mxu1 %v11380_v53  ;;  %v12331_v28 = vld [vmem:[%s20674_s12 + $0x2c] sm:$0xf0] }
 0xab7   : > { %8612 = vmatpush.bf16.msrb.mxu2 %v11368_v56  ;;  %v12336_v56 = vld [vmem:[%s20674_s12 + $0x54] sm:$0xf0] }
 0xaba   : > { %8839 = vmatpush.bf16.msra.mxu1 %v11592_v44  ;;  %v12327_v44 = vld [vmem:[%s20674_s12 + $0xc] sm:$0xf0] }
 0xabb   : > { %8800 = vmatpush.bf16.msra.mxu2 %v11580_v31  ;;  %v11504_v31 = vor.u32 %v12329_v42, %v11501_v8  ;;  %v12395_v42 = vld [vmem:[%s20674_s12 + $0x22c] sm:$0xf0] }
 0xb1a   : > { %v19827_v10 = vpop.f32.mrf.mxu0  ;;  %v19829_v50 = vpop.f32.mrf.mxu1 }
 0xb1b   : > { %v19840_v51 = vpop.f32.mrf.mxu2  ;;  %v19842_v47 = vpop.f32.mrf.mxu3 }
 0xb1c   : > { %v8234_v15 = vadd.f32 %v19840_v51, %v19827_v10  ;;  %v8247_v57 = vadd.f32 %v19842_v47, %v19829_v50  ;;  %v11372_v10 = vor.u32 %v12353_v48, %v11369_v20  ;;  %v11581_v50 = vld [vmem:[%s20674_s12 + $0xd0] sm:$0xf0]  ;;  %v11587_v51 = vld [vmem:[%s20674_s12 + $0xc8] sm:$0xf]  ;;  %v12352_v47 = vld [vmem:[%s20674_s12 + $0xd4] sm:$0xf0] }
 0xb1d   : > { %v11584_v34 = vor.u32 %v12349_v27, %v11581_v50  ;;  %v11588_v25 = vor.u32 %v12352_v47, %v11587_v51  ;;  %v11539_v48 = vld [vmem:[%s20674_s12 + $0x68] sm:$0xf]  ;;  %v12340_v20 = vld [vmem:[%s20674_s12 + $0x74] sm:$0xf0]  ;;  %v12334_v51 = vld [vmem:[%s20674_s12 + $0x4c] sm:$0xf] }
 0xb1e   : > { %8625 = vmatpush.bf16.msrb.mxu3 %v11372_v10  ;;  %v11540_v23 = vor.u32 %v12340_v20, %v11539_v48  ;;  %v11525_v47 = vld [vmem:[%s20674_s12 + $0x58] sm:$0xf0]  ;;  %v12401_v20 = vld [vmem:[%s20674_s12 + $0x264] sm:$0xf] }
 0xb1f   : > { %8826 = vmatpush.bf16.msra.mxu0 %v11588_v25  ;;  %v12330_v25 = vld [vmem:[%s20674_s12 + $0x2c] sm:$0xf] }
 0xb22   : > { %v8126_v19 = vpop.f32.mrf.mxu0  ;;  %v8139_v54 = vpop.f32.mrf.mxu1  ;;  %8813 = vmatpush.bf16.msra.mxu3 %v11584_v34  ;;  %v12332_v34 = vld [vmem:[%s20674_s12 + $0x34] sm:$0xf0] }
 0xb23   : > { %v8235_v1 = vpop.f32.mrf.mxu2  ;;  %v8248_v2 = vpop.f32.mrf.mxu3  ;;  %v11573_v19 = vld [vmem:[%s20674_s12 + $0xb8] sm:$0xf0]  ;;  %v11564_v54 = vor.u32 %v12347_v32, %v11563_v12 }
 0xb24   : > { %v11572_v1 = vor.u32 %v12348_v18, %v11571_v39  ;;  %v11547_v2 = vld [vmem:[%s20674_s12 + $0x80] sm:$0xf]  ;;  %v11576_v38 = vor.u32 %v12346_v33, %v11573_v19  ;;  %v11509_v32 = vld [vmem:[%s20674_s12 + $0x38] sm:$0xf0]  ;;  %v12325_v39 = vld [vmem:[%s20674_s12 + $0x4] sm:$0xf]  ;;  %v11484_v33 = vor.u32 %v12327_v44, %v11483_v41 }
 0xb25   : > { %8801 = vmatpush.bf16.msra.mxu2 %v11564_v54  ;;  %v11548_v26 = vor.u32 %v12343_v24, %v11547_v2  ;;  %v11512_v37 = vor.u32 %v12330_v25, %v11509_v32  ;;  %v11485_v18 = vld [vmem:[%s20674_s12 + $0x10] sm:$0xf0]  ;;  %v12328_v19 = vld [vmem:[%s20674_s12 + $0x14] sm:$0xf0]  ;;  %v12326_v54 = vld [vmem:[%s20674_s12 + $0xc] sm:$0xf] }
 0xb26   : > { %8814 = vmatpush.bf16.msra.mxu3 %v11568_v49  ;;  %8827 = vmatpush.bf16.msra.mxu0 %v11572_v1  ;;  %v11488_v49 = vor.u32 %v12325_v39, %v11485_v18  ;;  %v12396_v25 = vld [vmem:[%s20674_s12 + $0x234] sm:$0xf0]  ;;  %v11685_v32 = vld [vmem:[%s20674_s12 + $0x238] sm:$0xf0]  ;;  %v12391_v39 = vld [vmem:[%s20674_s12 + $0x20c] sm:$0xf0] }
 0xb27   : > { %8840 = vmatpush.bf16.msra.mxu1 %v11576_v38 }
 0xb29   : > { %8802 = vmatpush.bf16.msra.mxu2 %v11548_v26  ;;  %v12406_v26 = vld [vmem:[%s20674_s12 + $0x28c] sm:$0xf] }
 0xb2a   : > { %v8361_v16 = vpop.f32.mrf.mxu0  ;;  %v8374_v5 = vpop.f32.mrf.mxu1 }
 0xb2b   : > { %v8378_v29 = vadd.f32 %v8361_v16, %v8234_v15  ;;  %v8379_v63 = vadd.f32 %v8374_v5, %v8247_v57  ;;  %8841 = vmatpush.bf16.msra.mxu1 %v11560_v17  ;;  %v11544_v15 = vor.u32 %v12338_v60, %v11541_v52  ;;  %v11515_v57 = vld [vmem:[%s20674_s12 + $0x40] sm:$0xf]  ;;  %v11517_v16 = vld [vmem:[%s20674_s12 + $0x50] sm:$0xf0]  ;;  %v11523_v5 = vld [vmem:[%s20674_s12 + $0x48] sm:$0xf] }
 0xb2c   : > { %v11516_v27 = vor.u32 %v12335_v58, %v11515_v57  ;;  %v11520_v10 = vor.u32 %v12333_v55, %v11517_v16  ;;  %v11524_v50 = vor.u32 %v12336_v56, %v11523_v5  ;;  %v12403_v17 = vld [vmem:[%s20674_s12 + $0x26c] sm:$0xf0]  ;;  %v11709_v60 = vld [vmem:[%s20674_s12 + $0x270] sm:$0xf0]  ;;  %v11715_v52 = vld [vmem:[%s20674_s12 + $0x268] sm:$0xf] }
 0xb2d   : > { %v19971_v30 = vadd.f32 %v8382_v61, %v8378_v29  ;;  %v8387_v14 = vadd.f32 %v8383_v22, %v8379_v63  ;;  %v11552_v61 = vor.u32 %v12341_v6, %v11549_v7  ;;  %v11556_v22 = vor.u32 %v12344_v36, %v11555_v59  ;;  %8803 = vmatpush.bf16.msra.mxu2 %v11532_v4  ;;  %v11499_v29 = vld [vmem:[%s20674_s12 + $0x20] sm:$0xf]  ;;  %v12407_v59 = vld [vmem:[%s20674_s12 + $0x28c] sm:$0xf0]  ;;  %v12405_v36 = vld [vmem:[%s20674_s12 + $0x284] sm:$0xf] }
 0xb2e   : > { %v11528_v63 = vor.u32 %v12334_v51, %v11525_v47  ;;  %v11500_v53 = vor.u32 %v12331_v28, %v11499_v29  ;;  %v11723_v7 = vld [vmem:[%s20674_s12 + $0x280] sm:$0xf]  ;;  %v11728_v46 = vor.u32 %v12405_v36, %v11725_v0  ;;  %v12404_v4 = vld [vmem:[%s20674_s12 + $0x274] sm:$0xf0]  ;;  %v11712_v57 = vor.u32 %v12401_v20, %v11709_v60  ;;  %v12399_v55 = vld [vmem:[%s20674_s12 + $0x24c] sm:$0xf0] }
 0xb2f   : > { %v8388_v35 = vmax.f32 %v19971_v30, 0.0  ;;  %v8389_v3 = vmax.f32 %v8387_v14, 0.0  ;;  %8815 = vmatpush.bf16.msra.mxu3 %v11552_v61  ;;  %8828 = vmatpush.bf16.msra.mxu0 %v11556_v22  ;;  %v11507_v14 = vld [vmem:[%s20674_s12 + $0x28] sm:$0xf]  ;;  %v11733_v61 = vld [vmem:[%s20674_s12 + $0x298] sm:$0xf0]  ;;  %v11724_v9 = vor.u32 %v12407_v59, %v11723_v7 }
 0xb30   : > { %8842 = vmatpush.bf16.msra.mxu1 %v11544_v15  ;;  %v11508_v12 = vor.u32 %v12332_v34, %v11507_v14  ;;  %v11731_v30 = vld [vmem:[%s20674_s12 + $0x288] sm:$0xf]  ;;  %v11736_v48 = vor.u32 %v12406_v26, %v11733_v61  ;;  %v11708_v15 = vor.u32 %v12403_v17, %v11707_v43  ;;  %v11691_v58 = vld [vmem:[%s20674_s12 + $0x240] sm:$0xf]  ;;  %v12397_v5 = vld [vmem:[%s20674_s12 + $0x244] sm:$0xf] }
 0xb31   : > { %v12530_v45 = vpack.i.bf16 %v8389_v3, %v8388_v35  ;;  %8804 = vmatpush.bf16.msra.mxu2 %v11516_v27  ;;  %v11491_v3 = vld [vmem:[%s20674_s12 + $0x8] sm:$0xf]  ;;  %v11732_v40 = vor.u32 %v12408_v13, %v11731_v30  ;;  %v11716_v27 = vor.u32 %v12404_v4, %v11715_v52  ;;  %v11693_v56 = vld [vmem:[%s20674_s12 + $0x250] sm:$0xf0]  ;;  %v12398_v51 = vld [vmem:[%s20674_s12 + $0x24c] sm:$0xf]  ;;  %v11692_v29 = vor.u32 %v12399_v55, %v11691_v58 }
 0xb32   : > { %v8363_v11 = vpop.f32.mrf.mxu0  ;;  %v8376_v21 = vpop.f32.mrf.mxu1  ;;  %v11492_v1 = vor.u32 %v12328_v19, %v11491_v3  ;;  %v11701_v47 = vld [vmem:[%s20674_s12 + $0x258] sm:$0xf0]  ;;  %v11675_v28 = vld [vmem:[%s20674_s12 + $0x220] sm:$0xf]  ;;  %v11677_v14 = vld [vmem:[%s20674_s12 + $0x230] sm:$0xf0] }
 0xb33   : > { %12531 = vrot.lane.b32.xlu1 %v12530_v45, %s13001_s29  ;;  %8816 = vmatpush.bf16.msra.mxu3 %v11536_v62  ;;  %v11493_v45 = vld [vmem:[%s20674_s12 + $0x18] sm:$0xf0]  ;;  %v12402_v62 = vld [vmem:[%s20674_s12 + $0x26c] sm:$0xf]  ;;  %v11683_v34 = vld [vmem:[%s20674_s12 + $0x228] sm:$0xf]  ;;  %v11676_v41 = vor.u32 %v12395_v42, %v11675_v28 }
 0xb34   : > { %8829 = vmatpush.bf16.msra.mxu0 %v11540_v23  ;;  %8843 = vmatpush.bf16.msra.mxu1 %v11528_v63  ;;  %v11496_v2 = vor.u32 %v12326_v54, %v11493_v45  ;;  %v11717_v23 = vld [vmem:[%s20674_s12 + $0x278] sm:$0xf0]  ;;  %v11696_v63 = vor.u32 %v12397_v5, %v11693_v56  ;;  %v11684_v18 = vor.u32 %v12396_v25, %v11683_v34  ;;  %v11661_v19 = vld [vmem:[%s20674_s12 + $0x210] sm:$0xf0]  ;;  %v11667_v54 = vld [vmem:[%s20674_s12 + $0x208] sm:$0xf] }
 0xb35   : > { %8805 = vmatpush.bf16.msra.mxu2 %v11500_v53  ;;  %v11720_v16 = vor.u32 %v12402_v62, %v11717_v23  ;;  %v11704_v53 = vor.u32 %v12398_v51, %v11701_v47  ;;  %v12392_v45 = vld [vmem:[%s20674_s12 + $0x214] sm:$0xf0]  ;;  %v12385_v7 = vld [vmem:[%s20674_s12 + $0x1e4] sm:$0xf]  ;;  %v11645_v59 = vld [vmem:[%s20674_s12 + $0x1f0] sm:$0xf0] }
 0xb36   : > { %v11651_v36 = vld [vmem:[%s20674_s12 + $0x1e8] sm:$0xf]  ;;  %v12388_v0 = vld [vmem:[%s20674_s12 + $0x1f4] sm:$0xf0]  ;;  %v12386_v30 = vld [vmem:[%s20674_s12 + $0x1ec] sm:$0xf] }
 0xb37   : > { %8817 = vmatpush.bf16.msra.mxu3 %v11520_v10  ;;  %v11699_v10 = vld [vmem:[%s20674_s12 + $0x248] sm:$0xf]  ;;  %v11653_v13 = vld [vmem:[%s20674_s12 + $0x1f8] sm:$0xf0]  ;;  %v11627_v26 = vld [vmem:[%s20674_s12 + $0x1c0] sm:$0xf] }
 0xb38   : > { %8830 = vmatpush.bf16.msra.mxu0 %v11524_v50  ;;  %8844 = vmatpush.bf16.msra.mxu1 %v11512_v37  ;;  %v12400_v50 = vld [vmem:[%s20674_s12 + $0x254] sm:$0xf0]  ;;  %v11659_v37 = vld [vmem:[%s20674_s12 + $0x200] sm:$0xf]  ;;  %v12381_v43 = vld [vmem:[%s20674_s12 + $0x1c4] sm:$0xf] }
 0xb39   : > { %8806 = vmatpush.bf16.msra.mxu2 %v11484_v33  ;;  %v11700_v8 = vor.u32 %v12400_v50, %v11699_v10  ;;  %v12389_v33 = vld [vmem:[%s20674_s12 + $0x204] sm:$0xf]  ;;  %v11629_v17 = vld [vmem:[%s20674_s12 + $0x1d0] sm:$0xf0]  ;;  %v11635_v20 = vld [vmem:[%s20674_s12 + $0x1c8] sm:$0xf] }
 0xb3a   : > { %v12384_v60 = vld [vmem:[%s20674_s12 + $0x1d4] sm:$0xf0]  ;;  %v12382_v52 = vld [vmem:[%s20674_s12 + $0x1cc] sm:$0xf]  ;;  %v11637_v4 = vld [vmem:[%s20674_s12 + $0x1d8] sm:$0xf0] }
 0xb3b   : > { %8818 = vmatpush.bf16.msra.mxu3 %v11504_v31  ;;  %v12393_v31 = vld [vmem:[%s20674_s12 + $0x224] sm:$0xf]  ;;  %v11867_v62 = vld [vmem:[%s20674_s12 + $0x360] sm:$0xf]  ;;  %v12435_v23 = vld [vmem:[%s20674_s12 + $0x36c] sm:$0xf0]  ;;  %v11636_v10 = vor.u32 %v12384_v60, %v11635_v20  ;;  %v11640_v50 = vor.u32 %v12382_v52, %v11637_v4 }
 0xb3c   : > { %8831 = vmatpush.bf16.msra.mxu0 %v11508_v12  ;;  %8845 = vmatpush.bf16.msra.mxu1 %v11496_v2  ;;  %v12394_v12 = vld [vmem:[%s20674_s12 + $0x22c] sm:$0xf]  ;;  %v11680_v44 = vor.u32 %v12393_v31, %v11677_v14  ;;  %v11660_v2 = vor.u32 %v12391_v39, %v11659_v37  ;;  %v11875_v58 = vld [vmem:[%s20674_s12 + $0x368] sm:$0xf]  ;;  %v11877_v56 = vld [vmem:[%s20674_s12 + $0x378] sm:$0xf0]  ;;  %v11868_v51 = vor.u32 %v12435_v23, %v11867_v62 }
 0xb3d   : > { %v11688_v3 = vor.u32 %v12394_v12, %v11685_v32  ;;  %v12434_v5 = vld [vmem:[%s20674_s12 + $0x36c] sm:$0xf]  ;;  %v11859_v31 = vld [vmem:[%s20674_s12 + $0x348] sm:$0xf]  ;;  %v12432_v14 = vld [vmem:[%s20674_s12 + $0x354] sm:$0xf0] }
 0xb3e   : > { %v11880_v42 = vor.u32 %v12434_v5, %v11877_v56  ;;  %v12430_v34 = vld [vmem:[%s20674_s12 + $0x34c] sm:$0xf]  ;;  %v11861_v25 = vld [vmem:[%s20674_s12 + $0x358] sm:$0xf0]  ;;  %v11860_v37 = vor.u32 %v12432_v14, %v11859_v31  ;;  %v11787_v62 = vld [vmem:[%s20674_s12 + $0x2c0] sm:$0xf] }
 0xb3f   : > { %8819 = vmatpush.bf16.msra.mxu3 %v11488_v49  ;;  %v12390_v49 = vld [vmem:[%s20674_s12 + $0x20c] sm:$0xf]  ;;  %v11864_v39 = vor.u32 %v12430_v34, %v11861_v25  ;;  %v11813_v60 = vld [vmem:[%s20674_s12 + $0x2f8] sm:$0xf0]  ;;  %v12415_v23 = vld [vmem:[%s20674_s12 + $0x2cc] sm:$0xf0] }
 0xb40   : > { %8832 = vmatpush.bf16.msra.mxu0 %v11492_v1  ;;  %v11669_v1 = vld [vmem:[%s20674_s12 + $0x218] sm:$0xf0]  ;;  %v12418_v20 = vld [vmem:[%s20674_s12 + $0x2ec] sm:$0xf] }
 0xb41   : > { %v12414_v5 = vld [vmem:[%s20674_s12 + $0x2cc] sm:$0xf]  ;;  %v11797_v56 = vld [vmem:[%s20674_s12 + $0x2d8] sm:$0xf0] }
 0xb42   : > { %v12410_v31 = vld [vmem:[%s20674_s12 + $0x2ac] sm:$0xf]  ;;  %v11781_v14 = vld [vmem:[%s20674_s12 + $0x2b8] sm:$0xf0] }
 0xba5   : > { %v12532_v24 = vpop.permute.xlu1 %12531 }
 0xba6   : > { %v12534_v6 = vunpack.i.h.bf16 %v12532_v24  ;;  %v12533_v11 = vunpack.i.l.bf16 %v12532_v24  ;;  %v11664_v24 = vor.u32 %v12389_v33, %v11661_v19  ;;  %v11843_v33 = vld [vmem:[%s20674_s12 + $0x328] sm:$0xf]  ;;  %v12428_v19 = vld [vmem:[%s20674_s12 + $0x334] sm:$0xf0] }
 0xba8   : > { %v8397_v21 = vsel %vm8396_vm15, %v12533_v11, %v12534_v6  ;;  %v11643_v6 = vld [vmem:[%s20674_s12 + $0x1e0] sm:$0xf]  ;;  %v12387_v11 = vld [vmem:[%s20674_s12 + $0x1ec] sm:$0xf0] }
 0xba9   : > { %v8399_v38 = vmax.f32 %v8388_v35, %v8397_v21  ;;  %v11668_v21 = vor.u32 %v12392_v45, %v11667_v54  ;;  %v11644_v61 = vor.u32 %v12387_v11, %v11643_v6  ;;  %v12426_v54 = vld [vmem:[%s20674_s12 + $0x32c] sm:$0xf]  ;;  %v11845_v45 = vld [vmem:[%s20674_s12 + $0x338] sm:$0xf0]  ;;  %v12423_v6 = vld [vmem:[%s20674_s12 + $0x30c] sm:$0xf0]  ;;  %v11844_v11 = vor.u32 %v12428_v19, %v11843_v33 }
 0xbaa   : > { %v12444_v33 = vld [vmem:[%s20676_s14 + $0x38] sm:$0xff] }
 0xbab   : > { %v20137_v35 = vpack.c.bf16 %v8399_v38, %v8399_v38  ;;  %v11672_v38 = vor.u32 %v12390_v49, %v11669_v1  ;;  %v12452_v19 = vld [vmem:[%s20676_s14 + $0x78] sm:$0xff] }
 0xbad   : > { %v20149_v22 = vshrl.u32 %v20137_v35, 16  ;;  %v8881_v49 = vrot.slane %v20137_v35, 1 }
 0xbaf   : > { %11477 = vmatmul.msk.bf16.vlgmr.msrb.gmra.mxu2 %vm8601_vm2, %v20149_v22  ;;  %11478 = vmatmul.msk.bf16.vlgmr.msrb.gmra.mxu3 %vm8601_vm2, %v20149_v22 }
 0xbb0   : > { %11479 = vmatmul.msk.bf16.vlgmr.msrb.gmra.mxu0 %vm8601_vm2, %v20149_v22  ;;  %11480 = vmatmul.msk.bf16.vlgmr.msrb.gmra.mxu1 %vm8601_vm2, %v20149_v22 }
 0xbb1   : > { %9026 = vmatpush.bf16.msrb.mxu2 %v11724_v9  ;;  %9039 = vmatpush.bf16.msrb.mxu3 %v11728_v46  ;;  %v11648_v9 = vor.u32 %v12385_v7, %v11645_v59  ;;  %v12383_v46 = vld [vmem:[%s20674_s12 + $0x1cc] sm:$0xf0]  ;;  %v11827_v7 = vld [vmem:[%s20674_s12 + $0x308] sm:$0xf]  ;;  %v12424_v59 = vld [vmem:[%s20674_s12 + $0x314] sm:$0xf0] }
 0xbb2   : > { %9052 = vmatpush.bf16.msrb.mxu0 %v11732_v40  ;;  %9065 = vmatpush.bf16.msrb.mxu1 %v11736_v48  ;;  %v11652_v40 = vor.u32 %v12388_v0, %v11651_v36  ;;  %v11656_v48 = vor.u32 %v12386_v30, %v11653_v13  ;;  %v11628_v55 = vor.u32 %v12383_v46, %v11627_v26  ;;  %v12422_v36 = vld [vmem:[%s20674_s12 + $0x30c] sm:$0xf]  ;;  %v11829_v0 = vld [vmem:[%s20674_s12 + $0x318] sm:$0xf0]  ;;  %v11803_v26 = vld [vmem:[%s20674_s12 + $0x2e0] sm:$0xf] }
 0xbb3   : > { %v11832_v46 = vor.u32 %v12422_v36, %v11829_v0  ;;  %v12456_v0 = vld [vmem:[%s20676_s14 + $0x98] sm:$0xff] }
 0xbb5   : > { %9027 = vmatpush.bf16.msrb.mxu2 %v11708_v15  ;;  %9040 = vmatpush.bf16.msrb.mxu3 %v11712_v57  ;;  %v12433_v15 = vld [vmem:[%s20674_s12 + $0x364] sm:$0xf]  ;;  %v11869_v57 = vld [vmem:[%s20674_s12 + $0x370] sm:$0xf0] }
 0xbb6   : > { %9053 = vmatpush.bf16.msrb.mxu0 %v11716_v27  ;;  %9066 = vmatpush.bf16.msrb.mxu1 %v11720_v16  ;;  %v11632_v27 = vor.u32 %v12381_v43, %v11629_v17  ;;  %v12436_v16 = vld [vmem:[%s20674_s12 + $0x374] sm:$0xf0]  ;;  %v11872_v47 = vor.u32 %v12433_v15, %v11869_v57  ;;  %v12417_v43 = vld [vmem:[%s20674_s12 + $0x2e4] sm:$0xf]  ;;  %v11805_v17 = vld [vmem:[%s20674_s12 + $0x2f0] sm:$0xf0]  ;;  %v11816_v57 = vor.u32 %v12418_v20, %v11813_v60 }
 0xbb7   : > { %v11876_v28 = vor.u32 %v12436_v16, %v11875_v58  ;;  %v11808_v4 = vor.u32 %v12417_v43, %v11805_v17  ;;  %v12413_v58 = vld [vmem:[%s20674_s12 + $0x2c4] sm:$0xf]  ;;  %v12416_v16 = vld [vmem:[%s20674_s12 + $0x2d4] sm:$0xf0]  ;;  %v12463_v43 = vld [vmem:[%s20676_s14 + $0xd0] sm:$0xff] }
 0xbb9   : > { %9028 = vmatpush.bf16.msrb.mxu2 %v11692_v29  ;;  %9041 = vmatpush.bf16.msrb.mxu3 %v11696_v63  ;;  %v11851_v29 = vld [vmem:[%s20674_s12 + $0x340] sm:$0xf]  ;;  %v12431_v63 = vld [vmem:[%s20674_s12 + $0x34c] sm:$0xf0] }
 0xbba   : > { %9054 = vmatpush.bf16.msrb.mxu0 %v11700_v8  ;;  %9067 = vmatpush.bf16.msrb.mxu1 %v11704_v53  ;;  %v12429_v8 = vld [vmem:[%s20674_s12 + $0x344] sm:$0xf]  ;;  %v11853_v53 = vld [vmem:[%s20674_s12 + $0x350] sm:$0xf0]  ;;  %v11852_v12 = vor.u32 %v12431_v63, %v11851_v29  ;;  %v11800_v63 = vor.u32 %v12414_v5, %v11797_v56  ;;  %v12438_v56 = vld [vmem:[%s20676_s14 + $0x8] sm:$0xff] }
 0xbbb   : > { %v11856_v32 = vor.u32 %v12429_v8, %v11853_v53  ;;  %v11779_v8 = vld [vmem:[%s20674_s12 + $0x2a8] sm:$0xf]  ;;  %v12412_v53 = vld [vmem:[%s20674_s12 + $0x2b4] sm:$0xf0]  ;;  %v12461_v5 = vld [vmem:[%s20676_s14 + $0xc0] sm:$0xff] }
 0xbbd   : > { %9029 = vmatpush.bf16.msrb.mxu2 %v11676_v41  ;;  %9042 = vmatpush.bf16.msrb.mxu3 %v11680_v44  ;;  %v11835_v41 = vld [vmem:[%s20674_s12 + $0x320] sm:$0xf]  ;;  %v12427_v44 = vld [vmem:[%s20674_s12 + $0x32c] sm:$0xf0] }
 0xbbe   : > { %9055 = vmatpush.bf16.msrb.mxu0 %v11684_v18  ;;  %9068 = vmatpush.bf16.msrb.mxu1 %v11688_v3  ;;  %v12425_v18 = vld [vmem:[%s20674_s12 + $0x324] sm:$0xf]  ;;  %v11837_v3 = vld [vmem:[%s20674_s12 + $0x330] sm:$0xf0]  ;;  %v11836_v1 = vor.u32 %v12427_v44, %v11835_v41  ;;  %v9110_v41 = vrot.slane %v20149_v22, 1  ;;  %v12460_v44 = vld [vmem:[%s20676_s14 + $0xb8] sm:$0xff] }
 0xbbf   : > { %11593 = vmatmul.msk.bf16.vlgmr.msra.gmra.mxu2 %vm8601_vm2, %v20137_v35  ;;  %11594 = vmatmul.msk.bf16.vlgmr.msra.gmra.mxu3 %vm8601_vm2, %v20137_v35 }
 0xbc0   : > { %11595 = vmatmul.msk.bf16.vlgmr.msra.gmra.mxu0 %vm8601_vm2, %v20137_v35  ;;  %11596 = vmatmul.msk.bf16.vlgmr.msra.gmra.mxu1 %vm8601_vm2, %v20137_v35  ;;  %v11821_v35 = vld [vmem:[%s20674_s12 + $0x310] sm:$0xf0] }
 0xbc1   : > { %9030 = vmatpush.bf16.msrb.mxu2 %v11660_v2  ;;  %9043 = vmatpush.bf16.msrb.mxu3 %v11664_v24  ;;  %v11840_v2 = vor.u32 %v12425_v18, %v11837_v3  ;;  %v11819_v24 = vld [vmem:[%s20674_s12 + $0x300] sm:$0xf]  ;;  %v12459_v18 = vld [vmem:[%s20676_s14 + $0xb0] sm:$0xff] }
 0xbc2   : > { %9056 = vmatpush.bf16.msrb.mxu0 %v11668_v21  ;;  %9069 = vmatpush.bf16.msrb.mxu1 %v11672_v38  ;;  %v11848_v21 = vor.u32 %v12426_v54, %v11845_v45  ;;  %v12421_v38 = vld [vmem:[%s20674_s12 + $0x304] sm:$0xf]  ;;  %v11820_v30 = vor.u32 %v12423_v6, %v11819_v24  ;;  %v12467_v3 = vld [vmem:[%s20676_s14 + $0xf0] sm:$0xff]  ;;  %v12466_v24 = vld [vmem:[%s20676_s14 + $0xe8] sm:$0xff] }
 0xbc3   : > { %v11824_v13 = vor.u32 %v12421_v38, %v11821_v35  ;;  %v12443_v6 = vld [vmem:[%s20676_s14 + $0x30] sm:$0xff]  ;;  %v12465_v38 = vld [vmem:[%s20676_s14 + $0xe0] sm:$0xff]  ;;  %v12442_v35 = vld [vmem:[%s20676_s14 + $0x28] sm:$0xff] }
 0xbc5   : > { %9031 = vmatpush.bf16.msrb.mxu2 %v11644_v61  ;;  %9044 = vmatpush.bf16.msrb.mxu3 %v11648_v9  ;;  %v12419_v61 = vld [vmem:[%s20674_s12 + $0x2ec] sm:$0xf0]  ;;  %v11828_v9 = vor.u32 %v12424_v59, %v11827_v7  ;;  %v12450_v7 = vld [vmem:[%s20676_s14 + $0x68] sm:$0xff] }
 0xbc6   : > { %9057 = vmatpush.bf16.msrb.mxu0 %v11652_v40  ;;  %9070 = vmatpush.bf16.msrb.mxu1 %v11656_v48  ;;  %v11811_v40 = vld [vmem:[%s20674_s12 + $0x2e8] sm:$0xf]  ;;  %v12420_v48 = vld [vmem:[%s20674_s12 + $0x2f4] sm:$0xf0]  ;;  %v11804_v52 = vor.u32 %v12419_v61, %v11803_v26  ;;  %v12441_v61 = vld [vmem:[%s20676_s14 + $0x20] sm:$0xff] }
 0xbc7   : > { %v11812_v15 = vor.u32 %v12420_v48, %v11811_v40 }
 0xbc9   : > { %9032 = vmatpush.bf16.msrb.mxu2 %v11628_v55  ;;  %9045 = vmatpush.bf16.msrb.mxu3 %v11632_v27  ;;  %v11789_v55 = vld [vmem:[%s20674_s12 + $0x2d0] sm:$0xf0]  ;;  %v11795_v27 = vld [vmem:[%s20674_s12 + $0x2c8] sm:$0xf] }
 0xbca   : > { %9058 = vmatpush.bf16.msrb.mxu0 %v11636_v10  ;;  %9071 = vmatpush.bf16.msrb.mxu1 %v11640_v50  ;;  %v11788_v10 = vor.u32 %v12415_v23, %v11787_v62  ;;  %v11792_v50 = vor.u32 %v12413_v58, %v11789_v55  ;;  %v11796_v29 = vor.u32 %v12416_v16, %v11795_v27  ;;  %v12448_v62 = vld [vmem:[%s20676_s14 + $0x58] sm:$0xff]  ;;  %v12454_v23 = vld [vmem:[%s20676_s14 + $0x88] sm:$0xff]  ;;  %v12447_v58 = vld [vmem:[%s20676_s14 + $0x50] sm:$0xff] }
 0xbcb   : > { %v12453_v16 = vld [vmem:[%s20676_s14 + $0x80] sm:$0xff] }
 0xbcd   : > { %9255 = vmatpush.bf16.msra.mxu2 %v11868_v51  ;;  %9268 = vmatpush.bf16.msra.mxu3 %v11872_v47  ;;  %v11771_v51 = vld [vmem:[%s20674_s12 + $0x2a0] sm:$0xf]  ;;  %v12411_v47 = vld [vmem:[%s20674_s12 + $0x2ac] sm:$0xf0] }
 0xbce   : > { %9281 = vmatpush.bf16.msra.mxu0 %v11876_v28  ;;  %9294 = vmatpush.bf16.msra.mxu1 %v11880_v42  ;;  %v12409_v28 = vld [vmem:[%s20674_s12 + $0x2a4] sm:$0xf]  ;;  %v11773_v42 = vld [vmem:[%s20674_s12 + $0x2b0] sm:$0xf0]  ;;  %v11772_v34 = vor.u32 %v12411_v47, %v11771_v51 }
 0xbcf   : > { %11737 = vmatmul.msk.bf16.vlgmr.msrb.gmra.mxu2 %vm8601_vm2, %v8881_v49  ;;  %11738 = vmatmul.msk.bf16.vlgmr.msrb.gmra.mxu3 %vm8601_vm2, %v8881_v49  ;;  %v11776_v25 = vor.u32 %v12409_v28, %v11773_v42  ;;  %v12437_v47 = vld [vmem:[%s20676_s14] sm:$0xff] }
 0xbd0   : > { %11739 = vmatmul.msk.bf16.vlgmr.msrb.gmra.mxu0 %vm8601_vm2, %v8881_v49  ;;  %11740 = vmatmul.msk.bf16.vlgmr.msrb.gmra.mxu1 %vm8601_vm2, %v8881_v49 }
 0xbd1   : > { %9256 = vmatpush.bf16.msra.mxu2 %v11852_v12  ;;  %9269 = vmatpush.bf16.msra.mxu3 %v11856_v32  ;;  %v11780_v12 = vor.u32 %v12412_v53, %v11779_v8  ;;  %v11784_v32 = vor.u32 %v12410_v31, %v11781_v14  ;;  %v12475_v8 = vld [vmem:[%s20678_s16 + $0x30] sm:$0xff]  ;;  %v9310_v14 = vld [vmem:[%s20675_s13] sm:$0xf] }
 0xbd2   : > { %9282 = vmatpush.bf16.msra.mxu0 %v11860_v37  ;;  %9295 = vmatpush.bf16.msra.mxu1 %v11864_v39  ;;  %v12468_v37 = vld [vmem:[%s20676_s14 + $0xf8] sm:$0xff] }
 0xbd5   : > { %9257 = vmatpush.bf16.msra.mxu2 %v11836_v1  ;;  %9270 = vmatpush.bf16.msra.mxu3 %v11840_v2  ;;  %v12458_v2 = vld [vmem:[%s20676_s14 + $0xa8] sm:$0xff] }
 0xbd6   : > { %9283 = vmatpush.bf16.msra.mxu0 %v11844_v11  ;;  %9296 = vmatpush.bf16.msra.mxu1 %v11848_v21  ;;  %v12451_v11 = vld [vmem:[%s20676_s14 + $0x70] sm:$0xff]  ;;  %v12457_v21 = vld [vmem:[%s20676_s14 + $0xa0] sm:$0xff] }
 0xbd9   : > { %9258 = vmatpush.bf16.msra.mxu2 %v11820_v30  ;;  %9271 = vmatpush.bf16.msra.mxu3 %v11824_v13  ;;  %v12464_v30 = vld [vmem:[%s20676_s14 + $0xd8] sm:$0xff] }
 0xbda   : > { %9284 = vmatpush.bf16.msra.mxu0 %v11828_v9  ;;  %9297 = vmatpush.bf16.msra.mxu1 %v11832_v46  ;;  %v12449_v9 = vld [vmem:[%s20676_s14 + $0x60] sm:$0xff]  ;;  %v12455_v46 = vld [vmem:[%s20676_s14 + $0x90] sm:$0xff] }
 0xbdd   : > { %9259 = vmatpush.bf16.msra.mxu2 %v11804_v52  ;;  %9272 = vmatpush.bf16.msra.mxu3 %v11808_v4  ;;  %v12440_v4 = vld [vmem:[%s20676_s14 + $0x18] sm:$0xff] }
 0xbde   : > { %9285 = vmatpush.bf16.msra.mxu0 %v11812_v15  ;;  %9298 = vmatpush.bf16.msra.mxu1 %v11816_v57  ;;  %v12462_v15 = vld [vmem:[%s20676_s14 + $0xc8] sm:$0xff]  ;;  %v12439_v57 = vld [vmem:[%s20676_s14 + $0x10] sm:$0xff] }
 0xbe1   : > { %9260 = vmatpush.bf16.msra.mxu2 %v11788_v10  ;;  %9273 = vmatpush.bf16.msra.mxu3 %v11792_v50  ;;  %v12446_v10 = vld [vmem:[%s20676_s14 + $0x48] sm:$0xff] }
 0xbe2   : > { %9286 = vmatpush.bf16.msra.mxu0 %v11796_v29  ;;  %9299 = vmatpush.bf16.msra.mxu1 %v11800_v63  ;;  %v12445_v29 = vld [vmem:[%s20676_s14 + $0x40] sm:$0xff]  ;;  %v12476_v63 = vld [vmem:[%s20678_s16 + $0x38] sm:$0xff] }
 0xbe5   : > { %9261 = vmatpush.bf16.msra.mxu2 %v11772_v34  ;;  %9274 = vmatpush.bf16.msra.mxu3 %v11776_v25 }
 0xbe6   : > { %9287 = vmatpush.bf16.msra.mxu0 %v11780_v12  ;;  %9300 = vmatpush.bf16.msra.mxu1 %v11784_v32 }
 0xbe8   : > { %11881 = vmatmul.msk.bf16.vlgmr.msra.gmra.mxu2 %vm8601_vm2, %v9110_v41  ;;  %11882 = vmatmul.msk.bf16.vlgmr.msra.gmra.mxu3 %vm8601_vm2, %v9110_v41 }
 0xbe9   : > { %11883 = vmatmul.msk.bf16.vlgmr.msra.gmra.mxu0 %vm8601_vm2, %v9110_v41  ;;  %11884 = vmatmul.msk.bf16.vlgmr.msra.gmra.mxu1 %vm8601_vm2, %v9110_v41  ;;  %v9314_v41 = vperm.slane %v9310_v14, 2 }
 0xbea   : > { %9615 = vmatpush.bf16.msrb.mxu0 %v12460_v44  ;;  %9628 = vmatpush.bf16.msrb.mxu1 %v12468_v37  ;;  %v9315_v44 = vperm.slane %v9310_v14, 3 }
 0xbeb   : > { %9589 = vmatpush.bf16.msrb.mxu2 %v12444_v33  ;;  %9602 = vmatpush.bf16.msrb.mxu3 %v12452_v19 }
 0xbee   : > { %9616 = vmatpush.bf16.msrb.mxu0 %v12459_v18  ;;  %9629 = vmatpush.bf16.msrb.mxu1 %v12467_v3 }
 0xbef   : > { %9590 = vmatpush.bf16.msrb.mxu2 %v12443_v6  ;;  %9603 = vmatpush.bf16.msrb.mxu3 %v12451_v11  ;;  %v9312_v11 = vperm.slane %v9310_v14, 0 }
 0xbf2   : > { %9617 = vmatpush.bf16.msrb.mxu0 %v12458_v2  ;;  %9630 = vmatpush.bf16.msrb.mxu1 %v12466_v24 }
 0xbf3   : > { %9591 = vmatpush.bf16.msrb.mxu2 %v12442_v35  ;;  %9604 = vmatpush.bf16.msrb.mxu3 %v12450_v7 }
 0xbf6   : > { %9618 = vmatpush.bf16.msrb.mxu0 %v12457_v21  ;;  %9631 = vmatpush.bf16.msrb.mxu1 %v12465_v38 }
 0xbf7   : > { %9592 = vmatpush.bf16.msrb.mxu2 %v12441_v61  ;;  %9605 = vmatpush.bf16.msrb.mxu3 %v12449_v9 }
 0xbfa   : > { %9619 = vmatpush.bf16.msrb.mxu0 %v12456_v0  ;;  %9632 = vmatpush.bf16.msrb.mxu1 %v12464_v30 }
 0xbfb   : > { %9593 = vmatpush.bf16.msrb.mxu2 %v12440_v4  ;;  %9606 = vmatpush.bf16.msrb.mxu3 %v12448_v62  ;;  %v12469_v4 = vld [vmem:[%s20678_s16] sm:$0xff] }
 0xbfe   : > { %9620 = vmatpush.bf16.msrb.mxu0 %v12455_v46  ;;  %9633 = vmatpush.bf16.msrb.mxu1 %v12463_v43 }
 0xbff   : > { %9594 = vmatpush.bf16.msrb.mxu2 %v12439_v57  ;;  %9607 = vmatpush.bf16.msrb.mxu3 %v12447_v58  ;;  %v9396_v58 = vld [vmem:[%s20677_s15] sm:$0x1] }
 0xc02   : > { %9621 = vmatpush.bf16.msrb.mxu0 %v12454_v23  ;;  %9634 = vmatpush.bf16.msrb.mxu1 %v12462_v15 }
 0xc03   : > { %9595 = vmatpush.bf16.msrb.mxu2 %v12438_v56  ;;  %9608 = vmatpush.bf16.msrb.mxu3 %v12446_v10 }
 0xc06   : > { %9622 = vmatpush.bf16.msrb.mxu0 %v12453_v16  ;;  %9635 = vmatpush.bf16.msrb.mxu1 %v12461_v5 }
 0xc07   : > { %9596 = vmatpush.bf16.msrb.mxu2 %v12437_v47  ;;  %9609 = vmatpush.bf16.msrb.mxu3 %v12445_v29 }
 0xc0b   : > { %9708 = vmatpush.bf16.msra.mxu2 %v12476_v63  ;;  %v9659_v63 = vld [vmem:[%s21263_s27] sm:$0x1] }
 0xc0f   : > { %9709 = vmatpush.bf16.msra.mxu2 %v12475_v8 }
 0xc2d   : > { %v20495_v39 = vpop.f32.mrf.mxu0  ;;  %v20497_v22 = vpop.f32.mrf.mxu1 }
 0xc32   : > { %v20511_v54 = vpop.f32.mrf.mxu2  ;;  %v20513_v45 = vpop.f32.mrf.mxu3 }
 0xc35   : > { %v8642_v49 = vpop.f32.mrf.mxu0  ;;  %v8655_v1 = vpop.f32.mrf.mxu1 }
 0xc3a   : > { %v8616_v59 = vpop.f32.mrf.mxu2  ;;  %v8629_v36 = vpop.f32.mrf.mxu3 }
 0xc3d   : > { %v8834_v13 = vpop.f32.mrf.mxu0  ;;  %v8847_v26 = vpop.f32.mrf.mxu1 }
 0xc3e   : > { %v8835_v34 = vadd.f32 %v8834_v13, %v20495_v39  ;;  %v8848_v25 = vadd.f32 %v8847_v26, %v20497_v22  ;;  %v9313_v39 = vperm.slane %v9310_v14, 1 }
 0xc42   : > { %v8808_v17 = vpop.f32.mrf.mxu2  ;;  %v8821_v40 = vpop.f32.mrf.mxu3 }
 0xc43   : > { %v8809_v19 = vadd.f32 %v8808_v17, %v20511_v54  ;;  %v8822_v49 = vadd.f32 %v8821_v40, %v20513_v45  ;;  %v12474_v40 = vld [vmem:[%s20678_s16 + $0x28] sm:$0xff] }
 0xc44   : > { %9710 = vmatpush.bf16.msra.mxu2 %v12474_v40 }
 0xc45   : > { %v8836_v48 = vpop.f32.mrf.mxu0  ;;  %v8849_v20 = vpop.f32.mrf.mxu1 }
 0xc46   : > { %v12473_v48 = vld [vmem:[%s20678_s16 + $0x20] sm:$0xff]  ;;  %v12472_v20 = vld [vmem:[%s20678_s16 + $0x18] sm:$0xff] }
 0xc48   : > { %9711 = vmatpush.bf16.msra.mxu2 %v12473_v48 }
 0xc4a   : > { %v8810_v60 = vpop.f32.mrf.mxu2  ;;  %v8823_v52 = vpop.f32.mrf.mxu3 }
 0xc4b   : > { %v12471_v60 = vld [vmem:[%s20678_s16 + $0x10] sm:$0xff]  ;;  %v12470_v52 = vld [vmem:[%s20678_s16 + $0x8] sm:$0xff] }
 0xc4c   : > { %9712 = vmatpush.bf16.msra.mxu2 %v12472_v20 }
 0xc4d   : > { %v9060_v55 = vpop.f32.mrf.mxu0  ;;  %v9073_v27 = vpop.f32.mrf.mxu1 }
 0xc4e   : > { %v9079_v12 = vadd.f32 %v9060_v55, %v8835_v34  ;;  %v9080_v32 = vadd.f32 %v9073_v27, %v8848_v25 }
 0xc50   : > { %9713 = vmatpush.bf16.msra.mxu2 %v12471_v60 }
 0xc52   : > { %v9034_v50 = vpop.f32.mrf.mxu2  ;;  %v9047_v51 = vpop.f32.mrf.mxu3 }
 0xc53   : > { %v9077_v24 = vadd.f32 %v9034_v50, %v8809_v19  ;;  %v9078_v6 = vadd.f32 %v9047_v51, %v8822_v49 }
 0xc54   : > { %9714 = vmatpush.bf16.msra.mxu2 %v12470_v52 }
 0xc55   : > { %v9062_v28 = vpop.f32.mrf.mxu0  ;;  %v9075_v42 = vpop.f32.mrf.mxu1 }
 0xc58   : > { %9715 = vmatpush.bf16.msra.mxu2 %v12469_v4 }
 0xc5a   : > { %v9036_v53 = vpop.f32.mrf.mxu2  ;;  %v9049_v31 = vpop.f32.mrf.mxu3 }
 0xc66   : > { %v9289_v37 = vpop.f32.mrf.mxu0  ;;  %v9302_v18 = vpop.f32.mrf.mxu1 }
 0xc67   : > { %v9308_v3 = vadd.f32 %v9289_v37, %v9079_v12  ;;  %v9309_v33 = vadd.f32 %v9302_v18, %v9080_v32 }
 0xc69   : > { %v9322_v1 = vadd.f32 %v9314_v41, %v9308_v3  ;;  %v9323_v2 = vadd.f32 %v9315_v44, %v9309_v33 }
 0xc6b   : > { %v9326_v21 = vmax.f32 %v9322_v1, 0.0  ;;  %v9327_v22 = vmax.f32 %v9323_v2, 0.0  ;;  %v9263_v38 = vpop.f32.mrf.mxu2  ;;  %v9276_v35 = vpop.f32.mrf.mxu3 }
 0xc6c   : > { %v9306_v7 = vadd.f32 %v9263_v38, %v9077_v24  ;;  %v9307_v59 = vadd.f32 %v9276_v35, %v9078_v6 }
 0xc6d   : > { %v9330_v36 = vpack.c.bf16 %v9326_v21, %v9326_v21  ;;  %v9331_v0 = vpack.c.bf16 %v9327_v22, %v9327_v22 }
 0xc6e   : > { %v9320_v30 = vadd.f32 %v9312_v11, %v9306_v7  ;;  %v9321_v13 = vadd.f32 %v9313_v39, %v9307_v59  ;;  %v9291_v26 = vpop.f32.mrf.mxu0  ;;  %v9304_v54 = vpop.f32.mrf.mxu1 }
 0xc6f   : > { %9623 = vmatmul.bf16.vlgmr.msrb.gmra.mxu0 %v9330_v36  ;;  %9636 = vmatmul.bf16.vlgmr.msrb.gmra.mxu1 %v9331_v0 }
 0xc70   : > { %v9324_v45 = vmax.f32 %v9320_v30, 0.0  ;;  %v9325_v61 = vmax.f32 %v9321_v13, 0.0 }
 0xc72   : > { %v9328_v9 = vpack.c.bf16 %v9324_v45, %v9324_v45  ;;  %v9329_v46 = vpack.c.bf16 %v9325_v61, %v9325_v61 }
 0xc73   : > { %v9265_v43 = vpop.f32.mrf.mxu2  ;;  %v9278_v17 = vpop.f32.mrf.mxu3 }
 0xc74   : > { %9597 = vmatmul.bf16.vlgmr.msrb.gmra.mxu2 %v9328_v9  ;;  %9610 = vmatmul.bf16.vlgmr.msrb.gmra.mxu3 %v9329_v46 }
 0xcec   : > { %v9624_v62 = vpop.f32.mrf.mxu0  ;;  %v9637_v23 = vpop.f32.mrf.mxu1 }
 0xcf4   : > { %v9626_v15 = vpop.f32.mrf.mxu0  ;;  %v9639_v57 = vpop.f32.mrf.mxu1 }
 0xcf7   : > { %v9598_v55 = vpop.f32.mrf.mxu2  ;;  %v9611_v27 = vpop.f32.mrf.mxu3 }
 0xcf8   : > { %v9599_v16 = vadd.f32 %v9598_v55, %v9396_v58 }
 0xcfa   : > { %v9612_v5 = vadd.f32 %v9611_v27, %v9599_v16 }
 0xcfc   : > { %v9625_v56 = vadd.f32 %v9624_v62, %v9612_v5 }
 0xcfe   : > { %v9638_v10 = vadd.f32 %v9637_v23, %v9625_v56 }
 0xcff   : > { %v9600_v50 = vpop.f32.mrf.mxu2  ;;  %v9613_v51 = vpop.f32.mrf.mxu3 }
 0xd00   : > { %v9641_v47 = vmax.f32 %v9638_v10, 0.0 }
 0xd02   : > { %v9642_v29 = vpack.c.bf16 %v9641_v47, %v9641_v47 }
 0xd04   : > { %9716 = vmatmul.bf16.vlgmr.msra.gmra.mxu2 %v9642_v29 }
 0xd87   : > { %v9717_v28 = vpop.f32.mrf.mxu2 }
 0xd88   : > { %v9718_v42 = vadd.f32 %v9717_v28, %v9659_v63 }
 0xd8a   : > { %9722 = vst.msk [vmem:[%s582_s23] sm:$0x1] %vm9721_vm12, %v9718_v42 }
 0xd8b   : > { %12962 = shalt.err (!%p12959_p3)
}
 0xd8c   : > { %12478 = dma.vmem_to_hbm [thread:$0]  (%p13135_p5), %s9735_s24, 16, %s9737_s25, %s9724_s22  }
 0xd8f   : > { %v9719_v8 = vpop.f32.mrf.mxu2 }
 0xd90 PF: > { %s21265_s21 = sld [smem:[#allocation7_spill]] }
 0xd91   : > { %s21266_s1 = sld [smem:[#allocation5_spill]] }
 0xd96   : > { %p12484_p4 = scmp.ge.s32.totalorder %s21265_s21, 2 }
 0xd97   : > { %s9748_s23 = sand.u32 1, %s21266_s1  }
 0xd98   : > { %p12481_p7 = pnand %p12484_p4, %p13139_p6  ;;  %s9749_s0 = scalar_lea.sflag [#allocation3], %s9748_s23 }
 0xd9a   : > { %p12482_p8 = pneg %p12481_p7 }
 0xd9c   : > { %12980 = dma.done.wait (%p12482_p8), %s9749_s0, 16  }
 0xd9d   : > { %12982 = vsyncadd (%p12482_p8), %s9749_s0, 4294967280  ;;  %s21268_s30 = sld [smem:[#allocation8_spill]]  ;;  %s21271_s27 = smov %s12989_s28 }
 0xd9e   : > { %s21269_s20 = sld [smem:[#allocation6_spill]] }
 0xd9f   : > { %s21270_s29 = sld [smem:[#allocation9_spill]] }
 0xda3   : > { %p28_p9 = scmp.ge.s32.totalorder %s21268_s30, 4  }
 0xda4   : > { %s21272_s28 = smov %s21269_s20 }
 0xda5   :  { %30 = sbr.rel (!%p28_p9) target bundleno = 8 (0x8), region = 139 }
 0xdaa   :  { %9754 = vsyncpa [#allocation3], 1 }
 0xdab   :  { %9756 = vsyncpa [#allocation3 + $0x1], 1 }

</bundles_post_ra>
